<compile_context>
chip_gen: v6e
topology: v6e:2x2x1
jax: 0.10.0
libtpu: 0.0.40
codegen_flags: <defaults>
</compile_context>

<pallas_src>
import math

import numpy as np
import jax
import jax.numpy as jnp
from jax import lax
from jax.experimental import pallas as pl
from jax.experimental.pallas import tpu as pltpu

# ----------------------------------------------------------------------------
# Model constants (shapes from the PyTorch module defaults)
# ----------------------------------------------------------------------------
NUM_HEADS = 4
D_MODEL = 64
HEAD_DIM = D_MODEL // NUM_HEADS     # 16
OBS_LEN = 8
PRED_LEN = 12
N_TCN = 5
OUT_DIMS = 5
N_ASYM = 7
GCN_DIM = 16
N_PED = 5                           # pedestrians in this example

_VMEM = pl.BlockSpec(memory_space=pltpu.MemorySpace.VMEM)
_SMEM = pl.BlockSpec(memory_space=pltpu.MemorySpace.SMEM)
F32 = jnp.float32


def _softmax_last(x):
    m = jnp.max(x, axis=-1, keepdims=True)
    e = jnp.exp(x - m)
    return e / jnp.sum(e, axis=-1, keepdims=True)


def _prelu(x, a):
    return jnp.where(x >= 0.0, x, a * x)


# ----------------------------------------------------------------------------
# Kernel 1: SparseWeightedAdjacency (fused)
# Layouts:  spatial rows = t*N + i, lanes = h*N + j      (40, 20)
#           temporal rows = n*T + t1, lanes = h*T + t2    (40, 32)
# ----------------------------------------------------------------------------
def _adjacency_kernel(
        # data
        sg_ref, tg_ref, dis_ref, beh_ref, ids_ref, idt_ref,
        # spatial attention weights (pre-transposed to (in, out))
        sew_ref, seb_ref, sqw_ref, sqb_ref, skw_ref, skb_ref,
        # temporal attention weights
        tew_ref, teb_ref, tqw_ref, tqb_ref, tkw_ref, tkb_ref,
        # SpatialTemporalFusion 1x1 conv folded to (40,40) + bias column
        fw_ref, fb_ref,
        # asymmetric-conv shift matrices (row direction) and mix matrices (lane direction)
        ads_ref, aus_ref, adt_ref, aut_ref,
        m1s_ref, m2s_ref, b2s_ref, m1t_ref, m2t_ref, b2t_ref,
        # ZeroSoftmax lane-group-sum matrices
        gs_ref, gt_ref,
        # PReLU alphas (SMEM): [fusion, spatial asym x7, temporal asym x7]
        alpha_ref,
        # outputs
        nsa_ref, nta_ref,
        # scratch
        qs_scr, ks_scr, qt_scr, kt_scr, ds_scr, dt_scr):
    scale = 1.0 / math.sqrt(D_MODEL)

    # --- attention projections; the K=2/3 embeddings are VPU broadcast-MACs ---
    sg = sg_ref[...]                                                      # (40, 2)
    emb_s = sg[:, 0:1] * sew_ref[0:1, :] + sg[:, 1:2] * sew_ref[1:2, :] + seb_ref[...]
    qs_scr[...] = jnp.dot(emb_s, sqw_ref[...], preferred_element_type=F32) + sqb_ref[...]
    ks_scr[...] = jnp.dot(emb_s, skw_ref[...], preferred_element_type=F32) + skb_ref[...]

    tg = tg_ref[...]                                                      # (40, 3)
    emb_t = (tg[:, 0:1] * tew_ref[0:1, :] + tg[:, 1:2] * tew_ref[1:2, :]
             + tg[:, 2:3] * tew_ref[2:3, :] + teb_ref[...])
    qt_scr[...] = jnp.dot(emb_t, tqw_ref[...], preferred_element_type=F32) + tqb_ref[...]
    kt_scr[...] = jnp.dot(emb_t, tkw_ref[...], preferred_element_type=F32) + tkb_ref[...]

    beh = _softmax_last(beh_ref[...])                                     # (N, N), head-shared

    # --- spatial attention + distance/behaviour fusion softmaxes, per (t, h) slab ---
    def spa_body(t, carry):
        dis = _softmax_last(dis_ref[t])                                   # (N, N), head-shared
        r0 = t * N_PED
        for h in range(NUM_HEADS):
            q = qs_scr[pl.ds(r0, N_PED), pl.ds(h * HEAD_DIM, HEAD_DIM)]
            k = ks_scr[pl.ds(r0, N_PED), pl.ds(h * HEAD_DIM, HEAD_DIM)]
            s = lax.dot_general(q, k, (((1,), (1,)), ((), ())),
                                preferred_element_type=F32) * scale
            a = _softmax_last(s)
            a = _softmax_last(a * dis)
            a = _softmax_last(a * beh)
            ds_scr[pl.ds(r0, N_PED), pl.ds(h * N_PED, N_PED)] = a
        return carry

    lax.fori_loop(0, OBS_LEN, spa_body, 0)

    # --- temporal attention, per (n, h) slab ---
    def tem_body(n, carry):
        r0 = n * OBS_LEN
        for h in range(NUM_HEADS):
            q = qt_scr[pl.ds(r0, OBS_LEN), pl.ds(h * HEAD_DIM, HEAD_DIM)]
            k = kt_scr[pl.ds(r0, OBS_LEN), pl.ds(h * HEAD_DIM, HEAD_DIM)]
            s = lax.dot_general(q, k, (((1,), (1,)), ((), ())),
                                preferred_element_type=F32) * scale
            dt_scr[pl.ds(r0, OBS_LEN), pl.ds(h * OBS_LEN, OBS_LEN)] = _softmax_last(s)
        return carry

    lax.fori_loop(0, N_PED, tem_body, 0)

    ds = ds_scr[...]                                                      # fused dsi (40, 20)
    dt = dt_scr[...]                                                      # dti       (40, 32)

    # --- SpatialTemporalFusion: 1x1 conv over the T axis + PReLU + residual ---
    st = _prelu(jnp.dot(fw_ref[...], ds, preferred_element_type=F32) + fb_ref[...],
                alpha_ref[0]) + ds

    # --- InteractionMask: 7 asymmetric-conv layers per path as shift/mix matmuls ---
    a_ds = ads_ref[...]
    a_us = aus_ref[...]
    a_dt = adt_ref[...]
    a_ut = aut_ref[...]

    def asym_body(l, carry):
        xs, xt = carry
        y1 = (jnp.dot(jnp.dot(a_ds, xs, preferred_element_type=F32), m1s_ref[3 * l],
                      preferred_element_type=F32)
              + jnp.dot(xs, m1s_ref[3 * l + 1], preferred_element_type=F32)
              + jnp.dot(jnp.dot(a_us, xs, preferred_element_type=F32), m1s_ref[3 * l + 2],
                        preferred_element_type=F32))
        y2 = jnp.dot(xs, m2s_ref[l], preferred_element_type=F32) + b2s_ref[l]
        xs = _prelu(y2 + y1, alpha_ref[1 + l]) + xs

        z1 = (jnp.dot(jnp.dot(a_dt, xt, preferred_element_type=F32), m1t_ref[3 * l],
                      preferred_element_type=F32)
              + jnp.dot(xt, m1t_ref[3 * l + 1], preferred_element_type=F32)
              + jnp.dot(jnp.dot(a_ut, xt, preferred_element_type=F32), m1t_ref[3 * l + 2],
                        preferred_element_type=F32))
        z2 = jnp.dot(xt, m2t_ref[l], preferred_element_type=F32) + b2t_ref[l]
        xt = _prelu(z2 + z1, alpha_ref[1 + N_ASYM + l]) + xt
        return (xs, xt)

    xs, xt = lax.fori_loop(0, N_ASYM, asym_body, (st, dt))

    # --- sigmoid threshold + identity ---
    ms = jax.nn.sigmoid(xs)
    ms = jnp.where(ms > 0.5, ms, 0.0) + ids_ref[...]
    mt = jax.nn.sigmoid(xt)
    mt = jnp.where(mt > 0.5, mt, 0.0) + idt_ref[...]

    # --- ZeroSoftmax along each N (resp. T) lane-group, via block-ones matmul ---
    es = (jnp.exp(ds * ms) - 1.0) ** 2
    nsa_ref[...] = es / (jnp.dot(es, gs_ref[...], preferred_element_type=F32) + 1e-5)
    et = (jnp.exp(dt * mt) - 1.0) ** 2
    nta_ref[...] = et / (jnp.dot(et, gt_ref[...], preferred_element_type=F32) + 1e-5)


def _adjacency_call(p, sg, tg3, dis_base, beh_base, id_s, id_t):
    tn = OBS_LEN * N_PED
    return pl.pallas_call(
        _adjacency_kernel,
        out_shape=(jax.ShapeDtypeStruct((tn, NUM_HEADS * N_PED), jnp.float32),
                   jax.ShapeDtypeStruct((tn, NUM_HEADS * OBS_LEN), jnp.float32)),
        in_specs=[_VMEM] * 32 + [_SMEM],
        out_specs=(_VMEM, _VMEM),
        scratch_shapes=[
            pltpu.VMEM((tn, D_MODEL), jnp.float32),
            pltpu.VMEM((tn, D_MODEL), jnp.float32),
            pltpu.VMEM((tn, D_MODEL), jnp.float32),
            pltpu.VMEM((tn, D_MODEL), jnp.float32),
            pltpu.VMEM((tn, NUM_HEADS * N_PED), jnp.float32),
            pltpu.VMEM((tn, NUM_HEADS * OBS_LEN), jnp.float32),
        ],
    )(sg, tg3, dis_base, beh_base, id_s, id_t,
      p['se_w'], p['se_b'], p['sq_w'], p['sq_b'], p['sk_w'], p['sk_b'],
      p['te_w'], p['te_b'], p['tq_w'], p['tq_b'], p['tk_w'], p['tk_b'],
      p['fuse_w'], p['fuse_b'],
      p['a_ds'], p['a_us'], p['a_dt'], p['a_ut'],
      p['m1s'], p['m2s'], p['b2s'], p['m1t'], p['m2t'], p['b2t'],
      p['gs'], p['gt'],
      p['alphas'])


# ----------------------------------------------------------------------------
# Kernel 2: SparseGraphConvolution + fusion_ (fused)
# Scratch layouts: st0/ts1 rows = t*N + i, ts0 rows = n*T + t, lanes = h*16 + d
# Output R rows = n*T + t, lanes = h*16 + d
# ----------------------------------------------------------------------------
def _gcn_kernel(sg_ref, tg_ref, nsa_ref, nta_ref,
                sel_s_ref, sel_t_ref,
                wst0_ref, wst1_ref, wts0_ref, wts1_ref,
                alpha_ref, fw_ref,
                r_ref,
                st0_scr, ts0_scr, ts1_scr):
    ri = lax.broadcasted_iota(jnp.int32, (N_PED, N_PED), 0)
    ci = lax.broadcasted_iota(jnp.int32, (N_PED, N_PED), 1)
    eye5 = (ri == ci).astype(F32)

    a_st0 = alpha_ref[0]
    a_st1 = alpha_ref[1]
    a_ts0 = alpha_ref[2]
    a_ts1 = alpha_ref[3]
    w_st0 = wst0_ref[...]
    w_st1 = wst1_ref[...]
    w_ts0 = wts0_ref[...]
    w_ts1 = wts1_ref[...]

    # --- ts path stage 0: GraphConvolution(tem_graph, nta) ---
    def ts0_body(n, carry):
        g = tg_ref[pl.ds(n * OBS_LEN, OBS_LEN), :]                        # (8, 2)
        for h in range(NUM_HEADS):
            a = nta_ref[pl.ds(n * OBS_LEN, OBS_LEN), pl.ds(h * OBS_LEN, OBS_LEN)]
            ag = jnp.dot(a, g, preferred_element_type=F32)                # (8, 2)
            emb = ag[:, 0:1] * w_ts0[0:1, :] + ag[:, 1:2] * w_ts0[1:2, :]  # VPU MAC (K=2)
            ts0_scr[pl.ds(n * OBS_LEN, OBS_LEN), pl.ds(h * GCN_DIM, GCN_DIM)] = _prelu(emb, a_ts0)
        return carry

    lax.fori_loop(0, N_PED, ts0_body, 0)

    # --- ts path stage 1: Treedeliver_spatial(., nsa) ---
    def ts1_body(t, carry):
        sel = sel_t_ref[t]                                                # (5, 40) row gather
        for h in range(NUM_HEADS):
            x = jnp.dot(sel, ts0_scr[:, pl.ds(h * GCN_DIM, GCN_DIM)],
                        preferred_element_type=F32)                       # (5, 16)
            a = nsa_ref[pl.ds(t * N_PED, N_PED), pl.ds(h * N_PED, N_PED)]
            base = jnp.dot(a, x, preferred_element_type=F32)
            pp = _prelu(base, a_ts1)
            qq = _prelu(x, a_ts1)
            dg = jnp.sum(a * eye5, axis=-1, keepdims=True)
            feats = jnp.dot(a, pp, preferred_element_type=F32) + dg * (qq - pp)
            out = _prelu(jnp.dot(feats, w_ts1, preferred_element_type=F32), a_ts1)
            ts1_scr[pl.ds(t * N_PED, N_PED), pl.ds(h * GCN_DIM, GCN_DIM)] = out
        return carry

    lax.fori_loop(0, OBS_LEN, ts1_body, 0)

    # --- st path stage 0: Treedeliver_spatial(spa_graph, nsa) ---
    def st0_body(t, carry):
        g = sg_ref[pl.ds(t * N_PED, N_PED), :]                            # (5, 2)
        qq = _prelu(g, a_st0)
        for h in range(NUM_HEADS):
            a = nsa_ref[pl.ds(t * N_PED, N_PED), pl.ds(h * N_PED, N_PED)]
            base = jnp.dot(a, g, preferred_element_type=F32)
            pp = _prelu(base, a_st0)
            dg = jnp.sum(a * eye5, axis=-1, keepdims=True)
            feats = jnp.dot(a, pp, preferred_element_type=F32) + dg * (qq - pp)   # (5, 2)
            emb = feats[:, 0:1] * w_st0[0:1, :] + feats[:, 1:2] * w_st0[1:2, :]   # VPU MAC
            st0_scr[pl.ds(t * N_PED, N_PED), pl.ds(h * GCN_DIM, GCN_DIM)] = _prelu(emb, a_st0)
        return carry

    lax.fori_loop(0, OBS_LEN, st0_body, 0)

    # --- st path stage 1 (GraphConvolution with nta) + fusion_ 1x1 conv + residual ---
    def st1_body(n, carry):
        sel = sel_s_ref[n]                                                # (8, 40) row gather
        f1 = []
        for h in range(NUM_HEADS):
            x = jnp.dot(sel, st0_scr[:, pl.ds(h * GCN_DIM, GCN_DIM)],
                        preferred_element_type=F32)                       # (8, 16)
            a = nta_ref[pl.ds(n * OBS_LEN, OBS_LEN), pl.ds(h * OBS_LEN, OBS_LEN)]
            f1.append(_prelu(jnp.dot(jnp.dot(a, x, preferred_element_type=F32), w_st1,
                                     preferred_element_type=F32), a_st1))
        for co in range(NUM_HEADS):
            rep = (fw_ref[co, 0] * f1[0] + fw_ref[co, 1] * f1[1]
                   + fw_ref[co, 2] * f1[2] + fw_ref[co, 3] * f1[3])
            f2 = jnp.dot(sel, ts1_scr[:, pl.ds(co * GCN_DIM, GCN_DIM)],
                         preferred_element_type=F32)                      # (8, 16)
            r_ref[pl.ds(n * OBS_LEN, OBS_LEN), pl.ds(co * GCN_DIM, GCN_DIM)] = rep + f2
        return carry

    lax.fori_loop(0, N_PED, st1_body, 0)


def _gcn_call(p, sg, tg2, nsa, nta):
    rows = N_PED * OBS_LEN
    return pl.pallas_call(
        _gcn_kernel,
        out_shape=jax.ShapeDtypeStruct((rows, NUM_HEADS * GCN_DIM), jnp.float32),
        in_specs=[_VMEM] * 10 + [_SMEM, _SMEM],
        out_specs=_VMEM,
        scratch_shapes=[
            pltpu.VMEM((rows, NUM_HEADS * GCN_DIM), jnp.float32),
            pltpu.VMEM((rows, NUM_HEADS * GCN_DIM), jnp.float32),
            pltpu.VMEM((rows, NUM_HEADS * GCN_DIM), jnp.float32),
        ],
    )(sg, tg2, nsa, nta, p['sel_s'], p['sel_t'],
      p['w_st0'], p['w_st1'], p['w_ts0'], p['w_ts1'],
      p['alphas'], p['fw'])


# ----------------------------------------------------------------------------
# Kernel 3: TCN (5 layers of 3x3 conv as shift/mix matmuls) + output Linear + head-mean
# Layout: rows = n*4 + head (20), lanes = time_channel*16 + feature (128 -> 192)
# ----------------------------------------------------------------------------
def _tcn_kernel(x_ref, am_ref, ap_ref, m0_ref, b0_ref, mk_ref, bk_ref,
                wout_ref, bout_ref, avg_ref, alpha_ref, out_ref, z_scr):
    am = am_ref[...]
    ap = ap_ref[...]
    x = x_ref[...]                                                        # (20, 128)

    y = (jnp.dot(jnp.dot(am, x, preferred_element_type=F32), m0_ref[0], preferred_element_type=F32)
         + jnp.dot(x, m0_ref[1], preferred_element_type=F32)
         + jnp.dot(jnp.dot(ap, x, preferred_element_type=F32), m0_ref[2], preferred_element_type=F32)
         + b0_ref[...])
    x = _prelu(y, alpha_ref[0])                                           # (20, 192)

    def layer(k, xc):
        yk = (jnp.dot(jnp.dot(am, xc, preferred_element_type=F32), mk_ref[3 * k],
                      preferred_element_type=F32)
              + jnp.dot(xc, mk_ref[3 * k + 1], preferred_element_type=F32)
              + jnp.dot(jnp.dot(ap, xc, preferred_element_type=F32), mk_ref[3 * k + 2],
                        preferred_element_type=F32)
              + bk_ref[k])
        return _prelu(yk, alpha_ref[1 + k]) + xc

    x = lax.fori_loop(0, N_TCN - 1, layer, x)

    # output Linear (block-diag over the 12 predicted steps) + mean over the 4 heads
    z_scr[...] = jnp.dot(avg_ref[...],
                         jnp.dot(x, wout_ref[...], preferred_element_type=F32),
                         preferred_element_type=F32) + bout_ref[...]      # (5, 60)
    for c in range(PRED_LEN):
        out_ref[c] = z_scr[:, pl.ds(c * OUT_DIMS, OUT_DIMS)]


def _tcn_call(p, xin):
    return pl.pallas_call(
        _tcn_kernel,
        out_shape=jax.ShapeDtypeStruct((PRED_LEN, N_PED, OUT_DIMS), jnp.float32),
        in_specs=[_VMEM] * 10 + [_SMEM],
        out_specs=_VMEM,
        scratch_shapes=[pltpu.VMEM((N_PED, PRED_LEN * OUT_DIMS), jnp.float32)],
    )(xin, p['am'], p['ap'], p['m0'], p['b0'], p['mk'], p['bk'],
      p['wout'], p['bout'], p['avg'], p['alphas'])


# ----------------------------------------------------------------------------
# Forward pass (3 pallas_call dispatches; everything else is tiny one-time glue)
# ----------------------------------------------------------------------------
def trajectory_model_forward(params, graph, identity, obs_traj, category):
    g3 = graph[0]                                                         # (T, N, 3)
    sg = g3[:, :, 1:].reshape(OBS_LEN * N_PED, 2)                          # rows t*N+i
    tg3 = jnp.transpose(g3, (1, 0, 2)).reshape(N_PED * OBS_LEN, 3)         # rows n*T+t
    tg2 = jnp.transpose(g3[:, :, 1:], (1, 0, 2)).reshape(N_PED * OBS_LEN, 2)

    # distance weight base (1/dist + I), head-shared; softmaxed in-kernel
    obs = jnp.transpose(obs_traj[0], (2, 0, 1))                            # (T, N, 2)
    diff = obs[:, :, None, :] - obs[:, None, :, :]
    dist = jnp.sqrt(jnp.sum(diff * diff, axis=-1))
    safe = jnp.where(dist > 0.0, dist, 1.0)
    dis_base = jnp.where(dist > 0.0, 1.0 / safe, 0.0) + jnp.eye(N_PED, dtype=jnp.float32)[None]

    # behaviour weight base (category table gather), head/time-shared
    cat = category.reshape(-1).astype(jnp.int32)
    row = jnp.array([5.0, 1.0, 3.0, 6.0], jnp.float32)
    v = jnp.take(row, cat - 1)
    eye_n = jnp.eye(N_PED, dtype=jnp.float32)
    beh_base = jnp.broadcast_to(v[None, :], (N_PED, N_PED)) * (1.0 - eye_n) + 15.0 * eye_n

    # identities rearranged to the in-kernel row layouts
    id_s = jnp.tile(identity[0].reshape(OBS_LEN * N_PED, N_PED), (1, NUM_HEADS))
    id_t = jnp.tile(identity[1].reshape(N_PED * OBS_LEN, OBS_LEN), (1, NUM_HEADS))

    nsa, nta = _adjacency_call(params['k1'], sg, tg3, dis_base, beh_base, id_s, id_t)
    rep = _gcn_call(params['k2'], sg, tg2, nsa, nta)                       # (N*T, H*16)

    # (n,t,h,d) -> rows (n,h), lanes (t,d) for the TCN kernel
    xin = rep.reshape(N_PED, OBS_LEN, NUM_HEADS, GCN_DIM).transpose(0, 2, 1, 3) \
             .reshape(N_PED * NUM_HEADS, OBS_LEN * GCN_DIM)

    return _tcn_call(params['k3'], xin)                                    # (12, N, 5)


# ----------------------------------------------------------------------------
# Parameter init: create torch-layout weights, then fold them once into the
# shift / channel-mix / block-diagonal matrices the kernels consume.
# ----------------------------------------------------------------------------
def init_params(key):
    keys = iter(jax.random.split(key, 256))

    def nrm(shape, s=0.1):
        return np.asarray(s * jax.random.normal(next(keys), shape, dtype=jnp.float32))

    ALPHA = 0.25  # PReLU default init
    T, N, H, C = OBS_LEN, N_PED, NUM_HEADS, GCN_DIM

    def attn(in_dims):
        # torch Linear weights are (out, in); pre-transpose to (in, out)
        return dict(e_w=nrm((D_MODEL, in_dims)).T, e_b=nrm((D_MODEL,))[None, :],
                    q_w=nrm((D_MODEL, D_MODEL)).T, q_b=nrm((D_MODEL,))[None, :],
                    k_w=nrm((D_MODEL, D_MODEL)).T, k_b=nrm((D_MODEL,))[None, :])

    spa, tem = attn(2), attn(3)

    # SpatialTemporalFusion: Conv2d(T, T, 1) + bias, folded to a (T*N, T*N) matrix
    fconv = nrm((T, T, 1, 1))[:, :, 0, 0]
    fbias = nrm((T,))
    fuse_w = np.kron(fconv, np.eye(N, dtype=np.float32))
    fuse_b = np.repeat(fbias, N)[:, None]

    # AsymmetricConvolution stacks -> per-layer mix matrices (channel-major lane blocks)
    def asym_stack(W):
        m1, m2, b2 = [], [], []
        sh = [np.eye(W, k=1, dtype=np.float32), np.eye(W, dtype=np.float32),
              np.eye(W, k=-1, dtype=np.float32)]
        for _ in range(N_ASYM):
            w1 = nrm((H, H, 3, 1))          # (3,1) conv, no bias
            w2 = nrm((H, H, 1, 3))          # (1,3) conv, bias
            bb = nrm((H,))
            for k in range(3):
                m1.append(np.kron(w1[:, :, k, 0].T, np.eye(W, dtype=np.float32)))
            m2.append(sum(np.kron(w2[:, :, 0, d].T, sh[d]) for d in range(3)))
            b2.append(np.repeat(bb, W))
        return np.stack(m1), np.stack(m2), np.stack(b2)[:, None, :]

    m1s, m2s, b2s = asym_stack(N)           # (21,20,20), (7,20,20), (7,1,20)
    m1t, m2t, b2t = asym_stack(T)           # (21,32,32), (7,32,32), (7,1,32)

    k1 = dict(
        se_w=spa['e_w'], se_b=spa['e_b'], sq_w=spa['q_w'], sq_b=spa['q_b'],
        sk_w=spa['k_w'], sk_b=spa['k_b'],
        te_w=tem['e_w'], te_b=tem['e_b'], tq_w=tem['q_w'], tq_b=tem['q_b'],
        tk_w=tem['k_w'], tk_b=tem['k_b'],
        fuse_w=fuse_w, fuse_b=fuse_b,
        a_ds=np.kron(np.eye(T, dtype=np.float32), np.eye(N, k=-1, dtype=np.float32)),
        a_us=np.kron(np.eye(T, dtype=np.float32), np.eye(N, k=1, dtype=np.float32)),
        a_dt=np.kron(np.eye(N, dtype=np.float32), np.eye(T, k=-1, dtype=np.float32)),
        a_ut=np.kron(np.eye(N, dtype=np.float32), np.eye(T, k=1, dtype=np.float32)),
        m1s=m1s, m2s=m2s, b2s=b2s, m1t=m1t, m2t=m2t, b2t=b2t,
        gs=np.kron(np.eye(H, dtype=np.float32), np.ones((N, N), np.float32)),
        gt=np.kron(np.eye(H, dtype=np.float32), np.ones((T, T), np.float32)),
        alphas=np.full((1 + 2 * N_ASYM,), ALPHA, np.float32),
    )

    # SparseGraphConvolution + fusion_ parameters (embeddings are bias-free Linears)
    sel_s = np.zeros((N, T, T * N), np.float32)
    for n in range(N):
        for t in range(T):
            sel_s[n, t, t * N + n] = 1.0
    sel_t = np.zeros((T, N, N * T), np.float32)
    for t in range(T):
        for i in range(N):
            sel_t[t, i, i * T + t] = 1.0
    k2 = dict(
        sel_s=sel_s, sel_t=sel_t,
        w_st0=nrm((C, 2)).T, w_st1=nrm((C, C)).T,
        w_ts0=nrm((C, 2)).T, w_ts1=nrm((C, C)).T,
        alphas=np.full((4,), ALPHA, np.float32),
        fw=nrm((H, H, 1, 1))[:, :, 0, 0],
    )

    # TCN: 3x3 convs folded to (row-shift, channel-mix) matrix pairs
    def tcn_mats(cin):
        w = nrm((PRED_LEN, cin, 3, 3))
        b = nrm((PRED_LEN,))
        sh = [np.eye(C, k=1, dtype=np.float32), np.eye(C, dtype=np.float32),
              np.eye(C, k=-1, dtype=np.float32)]
        m = np.stack([sum(np.kron(w[:, :, k, d].T, sh[d]) for d in range(3))
                      for k in range(3)])
        return m, np.repeat(b, C)[None, :]

    m0, b0 = tcn_mats(T)                         # (3, 128, 192), (1, 192)
    mk_list, bk_list = [], []
    for _ in range(N_TCN - 1):
        m, b = tcn_mats(PRED_LEN)
        mk_list.extend([m[0], m[1], m[2]])
        bk_list.append(b)
    out_w = nrm((OUT_DIMS, C))
    out_b = nrm((OUT_DIMS,))
    k3 = dict(
        am=np.kron(np.eye(N, dtype=np.float32), np.eye(H, k=-1, dtype=np.float32)),
        ap=np.kron(np.eye(N, dtype=np.float32), np.eye(H, k=1, dtype=np.float32)),
        m0=m0, b0=b0,
        mk=np.stack(mk_list),                    # (12, 192, 192)
        bk=np.stack(bk_list),                    # (4, 1, 192)
        wout=np.kron(np.eye(PRED_LEN, dtype=np.float32), out_w.T),   # (192, 60)
        bout=np.tile(out_b, PRED_LEN)[None, :],                      # (1, 60)
        avg=np.kron(np.eye(N, dtype=np.float32),
                    np.full((1, H), 1.0 / H, np.float32)),           # (5, 20)
        alphas=np.full((N_TCN,), ALPHA, np.float32),
    )

    params = dict(k1=k1, k2=k2, k3=k3)
    return jax.tree_util.tree_map(lambda x: jnp.asarray(x, jnp.float32), params)


# ----------------------------------------------------------------------------
# Main
# ----------------------------------------------------------------------------
if __name__ == "__main__":
    key = jax.random.PRNGKey(0)
    kg, ko, kc = jax.random.split(key, 3)
    graph = jax.random.normal(kg, (1, OBS_LEN, N_PED, 3), dtype=jnp.float32)
    obs_traj = jax.random.normal(ko, (1, N_PED, 2, OBS_LEN), dtype=jnp.float32)
    category = jax.random.randint(kc, (1, N_PED), 1, 5).astype(jnp.int32)   # classes 1..4
    identity_spatial = jnp.broadcast_to(jnp.eye(N_PED, dtype=jnp.float32),
                                        (OBS_LEN, N_PED, N_PED))
    identity_temporal = jnp.broadcast_to(jnp.eye(OBS_LEN, dtype=jnp.float32),
                                         (N_PED, OBS_LEN, OBS_LEN))

    params = init_params(jax.random.PRNGKey(1))

    fwd = jax.jit(trajectory_model_forward)
    pred = fwd(params, graph, (identity_spatial, identity_temporal), obs_traj, category)
    pred = jax.block_until_ready(pred)

    assert pred.shape == (PRED_LEN, N_PED, OUT_DIMS), pred.shape
    assert bool(jnp.all(jnp.isfinite(pred)))
    print("KERNEL_OK")
</pallas_src>

<mosaic_0001>
module attributes {stable_mosaic.version = 11 : i64} {
  func.func @_adjacency_kernel(%arg0: memref<40x2xf32, #tpu.memory_space<vmem>>, %arg1: memref<40x3xf32, #tpu.memory_space<vmem>>, %arg2: memref<8x5x5xf32, #tpu.memory_space<vmem>>, %arg3: memref<5x5xf32, #tpu.memory_space<vmem>>, %arg4: memref<40x20xf32, #tpu.memory_space<vmem>>, %arg5: memref<40x32xf32, #tpu.memory_space<vmem>>, %arg6: memref<2x64xf32, #tpu.memory_space<vmem>>, %arg7: memref<1x64xf32, #tpu.memory_space<vmem>>, %arg8: memref<64x64xf32, #tpu.memory_space<vmem>>, %arg9: memref<1x64xf32, #tpu.memory_space<vmem>>, %arg10: memref<64x64xf32, #tpu.memory_space<vmem>>, %arg11: memref<1x64xf32, #tpu.memory_space<vmem>>, %arg12: memref<3x64xf32, #tpu.memory_space<vmem>>, %arg13: memref<1x64xf32, #tpu.memory_space<vmem>>, %arg14: memref<64x64xf32, #tpu.memory_space<vmem>>, %arg15: memref<1x64xf32, #tpu.memory_space<vmem>>, %arg16: memref<64x64xf32, #tpu.memory_space<vmem>>, %arg17: memref<1x64xf32, #tpu.memory_space<vmem>>, %arg18: memref<40x40xf32, #tpu.memory_space<vmem>>, %arg19: memref<40x1xf32, #tpu.memory_space<vmem>>, %arg20: memref<40x40xf32, #tpu.memory_space<vmem>>, %arg21: memref<40x40xf32, #tpu.memory_space<vmem>>, %arg22: memref<40x40xf32, #tpu.memory_space<vmem>>, %arg23: memref<40x40xf32, #tpu.memory_space<vmem>>, %arg24: memref<21x20x20xf32, #tpu.memory_space<vmem>>, %arg25: memref<7x20x20xf32, #tpu.memory_space<vmem>>, %arg26: memref<7x1x20xf32, #tpu.memory_space<vmem>>, %arg27: memref<21x32x32xf32, #tpu.memory_space<vmem>>, %arg28: memref<7x32x32xf32, #tpu.memory_space<vmem>>, %arg29: memref<7x1x32xf32, #tpu.memory_space<vmem>>, %arg30: memref<20x20xf32, #tpu.memory_space<vmem>>, %arg31: memref<32x32xf32, #tpu.memory_space<vmem>>, %arg32: memref<15xf32, #tpu.memory_space<smem>>, %arg33: memref<40x20xf32, #tpu.memory_space<vmem>>, %arg34: memref<40x32xf32, #tpu.memory_space<vmem>>, %arg35: memref<40x64xf32, #tpu.memory_space<vmem>>, %arg36: memref<40x64xf32, #tpu.memory_space<vmem>>, %arg37: memref<40x64xf32, #tpu.memory_space<vmem>>, %arg38: memref<40x64xf32, #tpu.memory_space<vmem>>, %arg39: memref<40x20xf32, #tpu.memory_space<vmem>>, %arg40: memref<40x32xf32, #tpu.memory_space<vmem>>) attributes {dimension_semantics = [], scalar_prefetch = 0 : i64, scratch_operands = 6 : i64, tpu.core_type = #tpu.core_type<tc>} {
    %c0 = arith.constant 0 : index
    %c0_0 = arith.constant 0 : index
    %0 = vector.load %arg0[%c0, %c0_0] : memref<40x2xf32, #tpu.memory_space<vmem>>, vector<40x2xf32>
    %1 = vector.extract_strided_slice %0 {offsets = [0, 0], sizes = [40, 1], strides = [1, 1]} : vector<40x2xf32> to vector<40x1xf32>
    %c0_1 = arith.constant 0 : index
    %c0_2 = arith.constant 0 : index
    %2 = vector.load %arg6[%c0_1, %c0_2] : memref<2x64xf32, #tpu.memory_space<vmem>>, vector<1x64xf32>
    %3 = vector.broadcast %1 : vector<40x1xf32> to vector<40x64xf32>
    %4 = vector.broadcast %2 : vector<1x64xf32> to vector<40x64xf32>
    %5 = arith.mulf %3, %4 : vector<40x64xf32>
    %6 = vector.extract_strided_slice %0 {offsets = [0, 1], sizes = [40, 1], strides = [1, 1]} : vector<40x2xf32> to vector<40x1xf32>
    %c1 = arith.constant 1 : index
    %c0_3 = arith.constant 0 : index
    %7 = vector.load %arg6[%c1, %c0_3] : memref<2x64xf32, #tpu.memory_space<vmem>>, vector<1x64xf32>
    %8 = vector.broadcast %6 : vector<40x1xf32> to vector<40x64xf32>
    %9 = vector.broadcast %7 : vector<1x64xf32> to vector<40x64xf32>
    %10 = arith.mulf %8, %9 : vector<40x64xf32>
    %11 = arith.addf %5, %10 : vector<40x64xf32>
    %c0_4 = arith.constant 0 : index
    %c0_5 = arith.constant 0 : index
    %12 = vector.load %arg7[%c0_4, %c0_5] : memref<1x64xf32, #tpu.memory_space<vmem>>, vector<1x64xf32>
    %13 = vector.broadcast %12 : vector<1x64xf32> to vector<40x64xf32>
    %14 = arith.addf %11, %13 : vector<40x64xf32>
    %c0_6 = arith.constant 0 : index
    %c0_7 = arith.constant 0 : index
    %15 = vector.load %arg8[%c0_6, %c0_7] : memref<64x64xf32, #tpu.memory_space<vmem>>, vector<64x64xf32>
    %cst = arith.constant dense<0.000000e+00> : vector<40x64xf32>
    %16 = tpu.matmul %14, %15, %cst {dimension_numbers = #tpu.dot_dimension_numbers<[1], [0], [0], [1], [0, 0, 1, 1], [], []>} : vector<40x64xf32>, vector<64x64xf32>, vector<40x64xf32> -> vector<40x64xf32>
    %c0_8 = arith.constant 0 : index
    %c0_9 = arith.constant 0 : index
    %17 = vector.load %arg9[%c0_8, %c0_9] : memref<1x64xf32, #tpu.memory_space<vmem>>, vector<1x64xf32>
    %18 = vector.broadcast %17 : vector<1x64xf32> to vector<40x64xf32>
    %19 = arith.addf %16, %18 : vector<40x64xf32>
    %c0_10 = arith.constant 0 : index
    %c0_11 = arith.constant 0 : index
    %20 = vector.load %arg35[%c0_10, %c0_11] : memref<40x64xf32, #tpu.memory_space<vmem>>, vector<40x64xf32>
    tpu.vector_store %arg35[%c0_10, %c0_11], %19 {strides = array<i32>} : memref<40x64xf32, #tpu.memory_space<vmem>>, vector<40x64xf32>,
    %c0_12 = arith.constant 0 : index
    %c0_13 = arith.constant 0 : index
    %21 = vector.load %arg10[%c0_12, %c0_13] : memref<64x64xf32, #tpu.memory_space<vmem>>, vector<64x64xf32>
    %cst_14 = arith.constant dense<0.000000e+00> : vector<40x64xf32>
    %22 = tpu.matmul %14, %21, %cst_14 {dimension_numbers = #tpu.dot_dimension_numbers<[1], [0], [0], [1], [0, 0, 1, 1], [], []>} : vector<40x64xf32>, vector<64x64xf32>, vector<40x64xf32> -> vector<40x64xf32>
    %c0_15 = arith.constant 0 : index
    %c0_16 = arith.constant 0 : index
    %23 = vector.load %arg11[%c0_15, %c0_16] : memref<1x64xf32, #tpu.memory_space<vmem>>, vector<1x64xf32>
    %24 = vector.broadcast %23 : vector<1x64xf32> to vector<40x64xf32>
    %25 = arith.addf %22, %24 : vector<40x64xf32>
    %c0_17 = arith.constant 0 : index
    %c0_18 = arith.constant 0 : index
    %26 = vector.load %arg36[%c0_17, %c0_18] : memref<40x64xf32, #tpu.memory_space<vmem>>, vector<40x64xf32>
    tpu.vector_store %arg36[%c0_17, %c0_18], %25 {strides = array<i32>} : memref<40x64xf32, #tpu.memory_space<vmem>>, vector<40x64xf32>,
    %c0_19 = arith.constant 0 : index
    %c0_20 = arith.constant 0 : index
    %27 = vector.load %arg1[%c0_19, %c0_20] : memref<40x3xf32, #tpu.memory_space<vmem>>, vector<40x3xf32>
    %28 = vector.extract_strided_slice %27 {offsets = [0, 0], sizes = [40, 1], strides = [1, 1]} : vector<40x3xf32> to vector<40x1xf32>
    %c0_21 = arith.constant 0 : index
    %c0_22 = arith.constant 0 : index
    %29 = vector.load %arg12[%c0_21, %c0_22] : memref<3x64xf32, #tpu.memory_space<vmem>>, vector<1x64xf32>
    %30 = vector.broadcast %28 : vector<40x1xf32> to vector<40x64xf32>
    %31 = vector.broadcast %29 : vector<1x64xf32> to vector<40x64xf32>
    %32 = arith.mulf %30, %31 : vector<40x64xf32>
    %33 = vector.extract_strided_slice %27 {offsets = [0, 1], sizes = [40, 1], strides = [1, 1]} : vector<40x3xf32> to vector<40x1xf32>
    %c1_23 = arith.constant 1 : index
    %c0_24 = arith.constant 0 : index
    %34 = vector.load %arg12[%c1_23, %c0_24] : memref<3x64xf32, #tpu.memory_space<vmem>>, vector<1x64xf32>
    %35 = vector.broadcast %33 : vector<40x1xf32> to vector<40x64xf32>
    %36 = vector.broadcast %34 : vector<1x64xf32> to vector<40x64xf32>
    %37 = arith.mulf %35, %36 : vector<40x64xf32>
    %38 = arith.addf %32, %37 : vector<40x64xf32>
    %39 = vector.extract_strided_slice %27 {offsets = [0, 2], sizes = [40, 1], strides = [1, 1]} : vector<40x3xf32> to vector<40x1xf32>
    %c2 = arith.constant 2 : index
    %c0_25 = arith.constant 0 : index
    %40 = vector.load %arg12[%c2, %c0_25] : memref<3x64xf32, #tpu.memory_space<vmem>>, vector<1x64xf32>
    %41 = vector.broadcast %39 : vector<40x1xf32> to vector<40x64xf32>
    %42 = vector.broadcast %40 : vector<1x64xf32> to vector<40x64xf32>
    %43 = arith.mulf %41, %42 : vector<40x64xf32>
    %44 = arith.addf %38, %43 : vector<40x64xf32>
    %c0_26 = arith.constant 0 : index
    %c0_27 = arith.constant 0 : index
    %45 = vector.load %arg13[%c0_26, %c0_27] : memref<1x64xf32, #tpu.memory_space<vmem>>, vector<1x64xf32>
    %46 = vector.broadcast %45 : vector<1x64xf32> to vector<40x64xf32>
    %47 = arith.addf %44, %46 : vector<40x64xf32>
    %c0_28 = arith.constant 0 : index
    %c0_29 = arith.constant 0 : index
    %48 = vector.load %arg14[%c0_28, %c0_29] : memref<64x64xf32, #tpu.memory_space<vmem>>, vector<64x64xf32>
    %cst_30 = arith.constant dense<0.000000e+00> : vector<40x64xf32>
    %49 = tpu.matmul %47, %48, %cst_30 {dimension_numbers = #tpu.dot_dimension_numbers<[1], [0], [0], [1], [0, 0, 1, 1], [], []>} : vector<40x64xf32>, vector<64x64xf32>, vector<40x64xf32> -> vector<40x64xf32>
    %c0_31 = arith.constant 0 : index
    %c0_32 = arith.constant 0 : index
    %50 = vector.load %arg15[%c0_31, %c0_32] : memref<1x64xf32, #tpu.memory_space<vmem>>, vector<1x64xf32>
    %51 = vector.broadcast %50 : vector<1x64xf32> to vector<40x64xf32>
    %52 = arith.addf %49, %51 : vector<40x64xf32>
    %c0_33 = arith.constant 0 : index
    %c0_34 = arith.constant 0 : index
    %53 = vector.load %arg37[%c0_33, %c0_34] : memref<40x64xf32, #tpu.memory_space<vmem>>, vector<40x64xf32>
    tpu.vector_store %arg37[%c0_33, %c0_34], %52 {strides = array<i32>} : memref<40x64xf32, #tpu.memory_space<vmem>>, vector<40x64xf32>,
    %c0_35 = arith.constant 0 : index
    %c0_36 = arith.constant 0 : index
    %54 = vector.load %arg16[%c0_35, %c0_36] : memref<64x64xf32, #tpu.memory_space<vmem>>, vector<64x64xf32>
    %cst_37 = arith.constant dense<0.000000e+00> : vector<40x64xf32>
    %55 = tpu.matmul %47, %54, %cst_37 {dimension_numbers = #tpu.dot_dimension_numbers<[1], [0], [0], [1], [0, 0, 1, 1], [], []>} : vector<40x64xf32>, vector<64x64xf32>, vector<40x64xf32> -> vector<40x64xf32>
    %c0_38 = arith.constant 0 : index
    %c0_39 = arith.constant 0 : index
    %56 = vector.load %arg17[%c0_38, %c0_39] : memref<1x64xf32, #tpu.memory_space<vmem>>, vector<1x64xf32>
    %57 = vector.broadcast %56 : vector<1x64xf32> to vector<40x64xf32>
    %58 = arith.addf %55, %57 : vector<40x64xf32>
    %c0_40 = arith.constant 0 : index
    %c0_41 = arith.constant 0 : index
    %59 = vector.load %arg38[%c0_40, %c0_41] : memref<40x64xf32, #tpu.memory_space<vmem>>, vector<40x64xf32>
    tpu.vector_store %arg38[%c0_40, %c0_41], %58 {strides = array<i32>} : memref<40x64xf32, #tpu.memory_space<vmem>>, vector<40x64xf32>,
    %c0_42 = arith.constant 0 : index
    %c0_43 = arith.constant 0 : index
    %60 = vector.load %arg3[%c0_42, %c0_43] : memref<5x5xf32, #tpu.memory_space<vmem>>, vector<5x5xf32>
    %cst_44 = arith.constant dense<0xFF800000> : vector<5xf32>
    %61 = vector.multi_reduction <maximumf>, %60, %cst_44 [1] : vector<5x5xf32> to vector<5xf32>
    %62 = vector.shape_cast %61 : vector<5xf32> to vector<5x1xf32>
    %63 = vector.broadcast %62 : vector<5x1xf32> to vector<5x5xf32>
    %64 = arith.subf %60, %63 : vector<5x5xf32>
    %65 = math.exp %64 : vector<5x5xf32>
    %cst_45 = arith.constant dense<0.000000e+00> : vector<5xf32>
    %66 = vector.multi_reduction <add>, %65, %cst_45 [1] : vector<5x5xf32> to vector<5xf32>
    %67 = vector.shape_cast %66 : vector<5xf32> to vector<5x1xf32>
    %68 = vector.broadcast %67 : vector<5x1xf32> to vector<5x5xf32>
    %69 = arith.divf %65, %68 : vector<5x5xf32>
    %c0_i32 = arith.constant 0 : i32
    %c8_i32 = arith.constant 8 : i32
    %70 = arith.addi %c0_i32, %c8_i32 : i32
    %c1_i32 = arith.constant 1 : i32
    scf.for %arg41 = %c0_i32 to %70 step %c1_i32  : i32 {
      %136 = arith.index_cast %arg41 : i32 to index
      %c0_96 = arith.constant 0 : index
      %c0_97 = arith.constant 0 : index
      %137 = vector.load %arg2[%136, %c0_96, %c0_97] : memref<8x5x5xf32, #tpu.memory_space<vmem>>, vector<1x5x5xf32>
      %138 = vector.shape_cast %137 : vector<1x5x5xf32> to vector<5x5xf32>
      %cst_98 = arith.constant dense<0xFF800000> : vector<5xf32>
      %139 = vector.multi_reduction <maximumf>, %138, %cst_98 [1] : vector<5x5xf32> to vector<5xf32>
      %140 = vector.shape_cast %139 : vector<5xf32> to vector<5x1xf32>
      %141 = vector.broadcast %140 : vector<5x1xf32> to vector<5x5xf32>
      %142 = arith.subf %138, %141 : vector<5x5xf32>
      %143 = math.exp %142 : vector<5x5xf32>
      %cst_99 = arith.constant dense<0.000000e+00> : vector<5xf32>
      %144 = vector.multi_reduction <add>, %143, %cst_99 [1] : vector<5x5xf32> to vector<5xf32>
      %145 = vector.shape_cast %144 : vector<5xf32> to vector<5x1xf32>
      %146 = vector.broadcast %145 : vector<5x1xf32> to vector<5x5xf32>
      %147 = arith.divf %143, %146 : vector<5x5xf32>
      %c5_i32_100 = arith.constant 5 : i32
      %148 = arith.muli %arg41, %c5_i32_100 : i32
      %149 = arith.index_cast %148 : i32 to index
      %c0_101 = arith.constant 0 : index
      %150 = vector.load %arg35[%149, %c0_101] : memref<40x64xf32, #tpu.memory_space<vmem>>, vector<5x16xf32>
      %151 = arith.index_cast %148 : i32 to index
      %c0_102 = arith.constant 0 : index
      %152 = vector.load %arg36[%151, %c0_102] : memref<40x64xf32, #tpu.memory_space<vmem>>, vector<5x16xf32>
      %cst_103 = arith.constant dense<0.000000e+00> : vector<5x5xf32>
      %153 = tpu.matmul %150, %152, %cst_103 {dimension_numbers = #tpu.dot_dimension_numbers<[1], [1], [0], [0], [0, 0, 1, 0], [], []>} : vector<5x16xf32>, vector<5x16xf32>, vector<5x5xf32> -> vector<5x5xf32>
      %cst_104 = arith.constant 1.250000e-01 : f32
      %154 = vector.broadcast %cst_104 : f32 to vector<5x5xf32>
      %155 = arith.mulf %153, %154 : vector<5x5xf32>
      %cst_105 = arith.constant dense<0xFF800000> : vector<5xf32>
      %156 = vector.multi_reduction <maximumf>, %155, %cst_105 [1] : vector<5x5xf32> to vector<5xf32>
      %157 = vector.shape_cast %156 : vector<5xf32> to vector<5x1xf32>
      %158 = vector.broadcast %157 : vector<5x1xf32> to vector<5x5xf32>
      %159 = arith.subf %155, %158 : vector<5x5xf32>
      %160 = math.exp %159 : vector<5x5xf32>
      %cst_106 = arith.constant dense<0.000000e+00> : vector<5xf32>
      %161 = vector.multi_reduction <add>, %160, %cst_106 [1] : vector<5x5xf32> to vector<5xf32>
      %162 = vector.shape_cast %161 : vector<5xf32> to vector<5x1xf32>
      %163 = vector.broadcast %162 : vector<5x1xf32> to vector<5x5xf32>
      %164 = arith.divf %160, %163 : vector<5x5xf32>
      %165 = arith.mulf %164, %147 : vector<5x5xf32>
      %cst_107 = arith.constant dense<0xFF800000> : vector<5xf32>
      %166 = vector.multi_reduction <maximumf>, %165, %cst_107 [1] : vector<5x5xf32> to vector<5xf32>
      %167 = vector.shape_cast %166 : vector<5xf32> to vector<5x1xf32>
      %168 = vector.broadcast %167 : vector<5x1xf32> to vector<5x5xf32>
      %169 = arith.subf %165, %168 : vector<5x5xf32>
      %170 = math.exp %169 : vector<5x5xf32>
      %cst_108 = arith.constant dense<0.000000e+00> : vector<5xf32>
      %171 = vector.multi_reduction <add>, %170, %cst_108 [1] : vector<5x5xf32> to vector<5xf32>
      %172 = vector.shape_cast %171 : vector<5xf32> to vector<5x1xf32>
      %173 = vector.broadcast %172 : vector<5x1xf32> to vector<5x5xf32>
      %174 = arith.divf %170, %173 : vector<5x5xf32>
      %175 = arith.mulf %174, %69 : vector<5x5xf32>
      %cst_109 = arith.constant dense<0xFF800000> : vector<5xf32>
      %176 = vector.multi_reduction <maximumf>, %175, %cst_109 [1] : vector<5x5xf32> to vector<5xf32>
      %177 = vector.shape_cast %176 : vector<5xf32> to vector<5x1xf32>
      %178 = vector.broadcast %177 : vector<5x1xf32> to vector<5x5xf32>
      %179 = arith.subf %175, %178 : vector<5x5xf32>
      %180 = math.exp %179 : vector<5x5xf32>
      %cst_110 = arith.constant dense<0.000000e+00> : vector<5xf32>
      %181 = vector.multi_reduction <add>, %180, %cst_110 [1] : vector<5x5xf32> to vector<5xf32>
      %182 = vector.shape_cast %181 : vector<5xf32> to vector<5x1xf32>
      %183 = vector.broadcast %182 : vector<5x1xf32> to vector<5x5xf32>
      %184 = arith.divf %180, %183 : vector<5x5xf32>
      %185 = arith.index_cast %148 : i32 to index
      %c0_111 = arith.constant 0 : index
      %186 = vector.load %arg39[%185, %c0_111] : memref<40x20xf32, #tpu.memory_space<vmem>>, vector<5x5xf32>
      tpu.vector_store %arg39[%185, %c0_111], %184 {strides = array<i32>} : memref<40x20xf32, #tpu.memory_space<vmem>>, vector<5x5xf32>,
      %187 = arith.index_cast %148 : i32 to index
      %c16 = arith.constant 16 : index
      %188 = vector.load %arg35[%187, %c16] : memref<40x64xf32, #tpu.memory_space<vmem>>, vector<5x16xf32>
      %189 = arith.index_cast %148 : i32 to index
      %c16_112 = arith.constant 16 : index
      %190 = vector.load %arg36[%189, %c16_112] : memref<40x64xf32, #tpu.memory_space<vmem>>, vector<5x16xf32>
      %cst_113 = arith.constant dense<0.000000e+00> : vector<5x5xf32>
      %191 = tpu.matmul %188, %190, %cst_113 {dimension_numbers = #tpu.dot_dimension_numbers<[1], [1], [0], [0], [0, 0, 1, 0], [], []>} : vector<5x16xf32>, vector<5x16xf32>, vector<5x5xf32> -> vector<5x5xf32>
      %cst_114 = arith.constant 1.250000e-01 : f32
      %192 = vector.broadcast %cst_114 : f32 to vector<5x5xf32>
      %193 = arith.mulf %191, %192 : vector<5x5xf32>
      %cst_115 = arith.constant dense<0xFF800000> : vector<5xf32>
      %194 = vector.multi_reduction <maximumf>, %193, %cst_115 [1] : vector<5x5xf32> to vector<5xf32>
      %195 = vector.shape_cast %194 : vector<5xf32> to vector<5x1xf32>
      %196 = vector.broadcast %195 : vector<5x1xf32> to vector<5x5xf32>
      %197 = arith.subf %193, %196 : vector<5x5xf32>
      %198 = math.exp %197 : vector<5x5xf32>
      %cst_116 = arith.constant dense<0.000000e+00> : vector<5xf32>
      %199 = vector.multi_reduction <add>, %198, %cst_116 [1] : vector<5x5xf32> to vector<5xf32>
      %200 = vector.shape_cast %199 : vector<5xf32> to vector<5x1xf32>
      %201 = vector.broadcast %200 : vector<5x1xf32> to vector<5x5xf32>
      %202 = arith.divf %198, %201 : vector<5x5xf32>
      %203 = arith.mulf %202, %147 : vector<5x5xf32>
      %cst_117 = arith.constant dense<0xFF800000> : vector<5xf32>
      %204 = vector.multi_reduction <maximumf>, %203, %cst_117 [1] : vector<5x5xf32> to vector<5xf32>
      %205 = vector.shape_cast %204 : vector<5xf32> to vector<5x1xf32>
      %206 = vector.broadcast %205 : vector<5x1xf32> to vector<5x5xf32>
      %207 = arith.subf %203, %206 : vector<5x5xf32>
      %208 = math.exp %207 : vector<5x5xf32>
      %cst_118 = arith.constant dense<0.000000e+00> : vector<5xf32>
      %209 = vector.multi_reduction <add>, %208, %cst_118 [1] : vector<5x5xf32> to vector<5xf32>
      %210 = vector.shape_cast %209 : vector<5xf32> to vector<5x1xf32>
      %211 = vector.broadcast %210 : vector<5x1xf32> to vector<5x5xf32>
      %212 = arith.divf %208, %211 : vector<5x5xf32>
      %213 = arith.mulf %212, %69 : vector<5x5xf32>
      %cst_119 = arith.constant dense<0xFF800000> : vector<5xf32>
      %214 = vector.multi_reduction <maximumf>, %213, %cst_119 [1] : vector<5x5xf32> to vector<5xf32>
      %215 = vector.shape_cast %214 : vector<5xf32> to vector<5x1xf32>
      %216 = vector.broadcast %215 : vector<5x1xf32> to vector<5x5xf32>
      %217 = arith.subf %213, %216 : vector<5x5xf32>
      %218 = math.exp %217 : vector<5x5xf32>
      %cst_120 = arith.constant dense<0.000000e+00> : vector<5xf32>
      %219 = vector.multi_reduction <add>, %218, %cst_120 [1] : vector<5x5xf32> to vector<5xf32>
      %220 = vector.shape_cast %219 : vector<5xf32> to vector<5x1xf32>
      %221 = vector.broadcast %220 : vector<5x1xf32> to vector<5x5xf32>
      %222 = arith.divf %218, %221 : vector<5x5xf32>
      %223 = arith.index_cast %148 : i32 to index
      %c5 = arith.constant 5 : index
      %224 = vector.load %arg39[%223, %c5] : memref<40x20xf32, #tpu.memory_space<vmem>>, vector<5x5xf32>
      tpu.vector_store %arg39[%223, %c5], %222 {strides = array<i32>} : memref<40x20xf32, #tpu.memory_space<vmem>>, vector<5x5xf32>,
      %225 = arith.index_cast %148 : i32 to index
      %c32 = arith.constant 32 : index
      %226 = vector.load %arg35[%225, %c32] : memref<40x64xf32, #tpu.memory_space<vmem>>, vector<5x16xf32>
      %227 = arith.index_cast %148 : i32 to index
      %c32_121 = arith.constant 32 : index
      %228 = vector.load %arg36[%227, %c32_121] : memref<40x64xf32, #tpu.memory_space<vmem>>, vector<5x16xf32>
      %cst_122 = arith.constant dense<0.000000e+00> : vector<5x5xf32>
      %229 = tpu.matmul %226, %228, %cst_122 {dimension_numbers = #tpu.dot_dimension_numbers<[1], [1], [0], [0], [0, 0, 1, 0], [], []>} : vector<5x16xf32>, vector<5x16xf32>, vector<5x5xf32> -> vector<5x5xf32>
      %cst_123 = arith.constant 1.250000e-01 : f32
      %230 = vector.broadcast %cst_123 : f32 to vector<5x5xf32>
      %231 = arith.mulf %229, %230 : vector<5x5xf32>
      %cst_124 = arith.constant dense<0xFF800000> : vector<5xf32>
      %232 = vector.multi_reduction <maximumf>, %231, %cst_124 [1] : vector<5x5xf32> to vector<5xf32>
      %233 = vector.shape_cast %232 : vector<5xf32> to vector<5x1xf32>
      %234 = vector.broadcast %233 : vector<5x1xf32> to vector<5x5xf32>
      %235 = arith.subf %231, %234 : vector<5x5xf32>
      %236 = math.exp %235 : vector<5x5xf32>
      %cst_125 = arith.constant dense<0.000000e+00> : vector<5xf32>
      %237 = vector.multi_reduction <add>, %236, %cst_125 [1] : vector<5x5xf32> to vector<5xf32>
      %238 = vector.shape_cast %237 : vector<5xf32> to vector<5x1xf32>
      %239 = vector.broadcast %238 : vector<5x1xf32> to vector<5x5xf32>
      %240 = arith.divf %236, %239 : vector<5x5xf32>
      %241 = arith.mulf %240, %147 : vector<5x5xf32>
      %cst_126 = arith.constant dense<0xFF800000> : vector<5xf32>
      %242 = vector.multi_reduction <maximumf>, %241, %cst_126 [1] : vector<5x5xf32> to vector<5xf32>
      %243 = vector.shape_cast %242 : vector<5xf32> to vector<5x1xf32>
      %244 = vector.broadcast %243 : vector<5x1xf32> to vector<5x5xf32>
      %245 = arith.subf %241, %244 : vector<5x5xf32>
      %246 = math.exp %245 : vector<5x5xf32>
      %cst_127 = arith.constant dense<0.000000e+00> : vector<5xf32>
      %247 = vector.multi_reduction <add>, %246, %cst_127 [1] : vector<5x5xf32> to vector<5xf32>
      %248 = vector.shape_cast %247 : vector<5xf32> to vector<5x1xf32>
      %249 = vector.broadcast %248 : vector<5x1xf32> to vector<5x5xf32>
      %250 = arith.divf %246, %249 : vector<5x5xf32>
      %251 = arith.mulf %250, %69 : vector<5x5xf32>
      %cst_128 = arith.constant dense<0xFF800000> : vector<5xf32>
      %252 = vector.multi_reduction <maximumf>, %251, %cst_128 [1] : vector<5x5xf32> to vector<5xf32>
      %253 = vector.shape_cast %252 : vector<5xf32> to vector<5x1xf32>
      %254 = vector.broadcast %253 : vector<5x1xf32> to vector<5x5xf32>
      %255 = arith.subf %251, %254 : vector<5x5xf32>
      %256 = math.exp %255 : vector<5x5xf32>
      %cst_129 = arith.constant dense<0.000000e+00> : vector<5xf32>
      %257 = vector.multi_reduction <add>, %256, %cst_129 [1] : vector<5x5xf32> to vector<5xf32>
      %258 = vector.shape_cast %257 : vector<5xf32> to vector<5x1xf32>
      %259 = vector.broadcast %258 : vector<5x1xf32> to vector<5x5xf32>
      %260 = arith.divf %256, %259 : vector<5x5xf32>
      %261 = arith.index_cast %148 : i32 to index
      %c10 = arith.constant 10 : index
      %262 = vector.load %arg39[%261, %c10] : memref<40x20xf32, #tpu.memory_space<vmem>>, vector<5x5xf32>
      tpu.vector_store %arg39[%261, %c10], %260 {strides = array<i32>} : memref<40x20xf32, #tpu.memory_space<vmem>>, vector<5x5xf32>,
      %263 = arith.index_cast %148 : i32 to index
      %c48 = arith.constant 48 : index
      %264 = vector.load %arg35[%263, %c48] : memref<40x64xf32, #tpu.memory_space<vmem>>, vector<5x16xf32>
      %265 = arith.index_cast %148 : i32 to index
      %c48_130 = arith.constant 48 : index
      %266 = vector.load %arg36[%265, %c48_130] : memref<40x64xf32, #tpu.memory_space<vmem>>, vector<5x16xf32>
      %cst_131 = arith.constant dense<0.000000e+00> : vector<5x5xf32>
      %267 = tpu.matmul %264, %266, %cst_131 {dimension_numbers = #tpu.dot_dimension_numbers<[1], [1], [0], [0], [0, 0, 1, 0], [], []>} : vector<5x16xf32>, vector<5x16xf32>, vector<5x5xf32> -> vector<5x5xf32>
      %cst_132 = arith.constant 1.250000e-01 : f32
      %268 = vector.broadcast %cst_132 : f32 to vector<5x5xf32>
      %269 = arith.mulf %267, %268 : vector<5x5xf32>
      %cst_133 = arith.constant dense<0xFF800000> : vector<5xf32>
      %270 = vector.multi_reduction <maximumf>, %269, %cst_133 [1] : vector<5x5xf32> to vector<5xf32>
      %271 = vector.shape_cast %270 : vector<5xf32> to vector<5x1xf32>
      %272 = vector.broadcast %271 : vector<5x1xf32> to vector<5x5xf32>
      %273 = arith.subf %269, %272 : vector<5x5xf32>
      %274 = math.exp %273 : vector<5x5xf32>
      %cst_134 = arith.constant dense<0.000000e+00> : vector<5xf32>
      %275 = vector.multi_reduction <add>, %274, %cst_134 [1] : vector<5x5xf32> to vector<5xf32>
      %276 = vector.shape_cast %275 : vector<5xf32> to vector<5x1xf32>
      %277 = vector.broadcast %276 : vector<5x1xf32> to vector<5x5xf32>
      %278 = arith.divf %274, %277 : vector<5x5xf32>
      %279 = arith.mulf %278, %147 : vector<5x5xf32>
      %cst_135 = arith.constant dense<0xFF800000> : vector<5xf32>
      %280 = vector.multi_reduction <maximumf>, %279, %cst_135 [1] : vector<5x5xf32> to vector<5xf32>
      %281 = vector.shape_cast %280 : vector<5xf32> to vector<5x1xf32>
      %282 = vector.broadcast %281 : vector<5x1xf32> to vector<5x5xf32>
      %283 = arith.subf %279, %282 : vector<5x5xf32>
      %284 = math.exp %283 : vector<5x5xf32>
      %cst_136 = arith.constant dense<0.000000e+00> : vector<5xf32>
      %285 = vector.multi_reduction <add>, %284, %cst_136 [1] : vector<5x5xf32> to vector<5xf32>
      %286 = vector.shape_cast %285 : vector<5xf32> to vector<5x1xf32>
      %287 = vector.broadcast %286 : vector<5x1xf32> to vector<5x5xf32>
      %288 = arith.divf %284, %287 : vector<5x5xf32>
      %289 = arith.mulf %288, %69 : vector<5x5xf32>
      %cst_137 = arith.constant dense<0xFF800000> : vector<5xf32>
      %290 = vector.multi_reduction <maximumf>, %289, %cst_137 [1] : vector<5x5xf32> to vector<5xf32>
      %291 = vector.shape_cast %290 : vector<5xf32> to vector<5x1xf32>
      %292 = vector.broadcast %291 : vector<5x1xf32> to vector<5x5xf32>
      %293 = arith.subf %289, %292 : vector<5x5xf32>
      %294 = math.exp %293 : vector<5x5xf32>
      %cst_138 = arith.constant dense<0.000000e+00> : vector<5xf32>
      %295 = vector.multi_reduction <add>, %294, %cst_138 [1] : vector<5x5xf32> to vector<5xf32>
      %296 = vector.shape_cast %295 : vector<5xf32> to vector<5x1xf32>
      %297 = vector.broadcast %296 : vector<5x1xf32> to vector<5x5xf32>
      %298 = arith.divf %294, %297 : vector<5x5xf32>
      %299 = arith.index_cast %148 : i32 to index
      %c15 = arith.constant 15 : index
      %300 = vector.load %arg39[%299, %c15] : memref<40x20xf32, #tpu.memory_space<vmem>>, vector<5x5xf32>
      tpu.vector_store %arg39[%299, %c15], %298 {strides = array<i32>} : memref<40x20xf32, #tpu.memory_space<vmem>>, vector<5x5xf32>,
    }
    %c8_i32_46 = arith.constant 8 : i32
    %c0_i32_47 = arith.constant 0 : i32
    %c5_i32 = arith.constant 5 : i32
    %71 = arith.addi %c0_i32_47, %c5_i32 : i32
    %c1_i32_48 = arith.constant 1 : i32
    scf.for %arg41 = %c0_i32_47 to %71 step %c1_i32_48  : i32 {
      %c8_i32_96 = arith.constant 8 : i32
      %136 = arith.muli %arg41, %c8_i32_96 : i32
      %137 = arith.index_cast %136 : i32 to index
      %c0_97 = arith.constant 0 : index
      %138 = vector.load %arg37[%137, %c0_97] : memref<40x64xf32, #tpu.memory_space<vmem>>, vector<8x16xf32>
      %139 = arith.index_cast %136 : i32 to index
      %c0_98 = arith.constant 0 : index
      %140 = vector.load %arg38[%139, %c0_98] : memref<40x64xf32, #tpu.memory_space<vmem>>, vector<8x16xf32>
      %cst_99 = arith.constant dense<0.000000e+00> : vector<8x8xf32>
      %141 = tpu.matmul %138, %140, %cst_99 {dimension_numbers = #tpu.dot_dimension_numbers<[1], [1], [0], [0], [0, 0, 1, 0], [], []>} : vector<8x16xf32>, vector<8x16xf32>, vector<8x8xf32> -> vector<8x8xf32>
      %cst_100 = arith.constant 1.250000e-01 : f32
      %142 = vector.broadcast %cst_100 : f32 to vector<8x8xf32>
      %143 = arith.mulf %141, %142 : vector<8x8xf32>
      %cst_101 = arith.constant dense<0xFF800000> : vector<8xf32>
      %144 = vector.multi_reduction <maximumf>, %143, %cst_101 [1] : vector<8x8xf32> to vector<8xf32>
      %145 = vector.shape_cast %144 : vector<8xf32> to vector<8x1xf32>
      %146 = vector.broadcast %145 : vector<8x1xf32> to vector<8x8xf32>
      %147 = arith.subf %143, %146 : vector<8x8xf32>
      %148 = math.exp %147 : vector<8x8xf32>
      %cst_102 = arith.constant dense<0.000000e+00> : vector<8xf32>
      %149 = vector.multi_reduction <add>, %148, %cst_102 [1] : vector<8x8xf32> to vector<8xf32>
      %150 = vector.shape_cast %149 : vector<8xf32> to vector<8x1xf32>
      %151 = vector.broadcast %150 : vector<8x1xf32> to vector<8x8xf32>
      %152 = arith.divf %148, %151 : vector<8x8xf32>
      %153 = arith.index_cast %136 : i32 to index
      %c0_103 = arith.constant 0 : index
      %154 = vector.load %arg40[%153, %c0_103] : memref<40x32xf32, #tpu.memory_space<vmem>>, vector<8x8xf32>
      tpu.vector_store %arg40[%153, %c0_103], %152 {strides = array<i32>} : memref<40x32xf32, #tpu.memory_space<vmem>>, vector<8x8xf32>,
      %155 = arith.index_cast %136 : i32 to index
      %c16 = arith.constant 16 : index
      %156 = vector.load %arg37[%155, %c16] : memref<40x64xf32, #tpu.memory_space<vmem>>, vector<8x16xf32>
      %157 = arith.index_cast %136 : i32 to index
      %c16_104 = arith.constant 16 : index
      %158 = vector.load %arg38[%157, %c16_104] : memref<40x64xf32, #tpu.memory_space<vmem>>, vector<8x16xf32>
      %cst_105 = arith.constant dense<0.000000e+00> : vector<8x8xf32>
      %159 = tpu.matmul %156, %158, %cst_105 {dimension_numbers = #tpu.dot_dimension_numbers<[1], [1], [0], [0], [0, 0, 1, 0], [], []>} : vector<8x16xf32>, vector<8x16xf32>, vector<8x8xf32> -> vector<8x8xf32>
      %cst_106 = arith.constant 1.250000e-01 : f32
      %160 = vector.broadcast %cst_106 : f32 to vector<8x8xf32>
      %161 = arith.mulf %159, %160 : vector<8x8xf32>
      %cst_107 = arith.constant dense<0xFF800000> : vector<8xf32>
      %162 = vector.multi_reduction <maximumf>, %161, %cst_107 [1] : vector<8x8xf32> to vector<8xf32>
      %163 = vector.shape_cast %162 : vector<8xf32> to vector<8x1xf32>
      %164 = vector.broadcast %163 : vector<8x1xf32> to vector<8x8xf32>
      %165 = arith.subf %161, %164 : vector<8x8xf32>
      %166 = math.exp %165 : vector<8x8xf32>
      %cst_108 = arith.constant dense<0.000000e+00> : vector<8xf32>
      %167 = vector.multi_reduction <add>, %166, %cst_108 [1] : vector<8x8xf32> to vector<8xf32>
      %168 = vector.shape_cast %167 : vector<8xf32> to vector<8x1xf32>
      %169 = vector.broadcast %168 : vector<8x1xf32> to vector<8x8xf32>
      %170 = arith.divf %166, %169 : vector<8x8xf32>
      %171 = arith.index_cast %136 : i32 to index
      %c8 = arith.constant 8 : index
      %172 = vector.load %arg40[%171, %c8] : memref<40x32xf32, #tpu.memory_space<vmem>>, vector<8x8xf32>
      tpu.vector_store %arg40[%171, %c8], %170 {strides = array<i32>} : memref<40x32xf32, #tpu.memory_space<vmem>>, vector<8x8xf32>,
      %173 = arith.index_cast %136 : i32 to index
      %c32 = arith.constant 32 : index
      %174 = vector.load %arg37[%173, %c32] : memref<40x64xf32, #tpu.memory_space<vmem>>, vector<8x16xf32>
      %175 = arith.index_cast %136 : i32 to index
      %c32_109 = arith.constant 32 : index
      %176 = vector.load %arg38[%175, %c32_109] : memref<40x64xf32, #tpu.memory_space<vmem>>, vector<8x16xf32>
      %cst_110 = arith.constant dense<0.000000e+00> : vector<8x8xf32>
      %177 = tpu.matmul %174, %176, %cst_110 {dimension_numbers = #tpu.dot_dimension_numbers<[1], [1], [0], [0], [0, 0, 1, 0], [], []>} : vector<8x16xf32>, vector<8x16xf32>, vector<8x8xf32> -> vector<8x8xf32>
      %cst_111 = arith.constant 1.250000e-01 : f32
      %178 = vector.broadcast %cst_111 : f32 to vector<8x8xf32>
      %179 = arith.mulf %177, %178 : vector<8x8xf32>
      %cst_112 = arith.constant dense<0xFF800000> : vector<8xf32>
      %180 = vector.multi_reduction <maximumf>, %179, %cst_112 [1] : vector<8x8xf32> to vector<8xf32>
      %181 = vector.shape_cast %180 : vector<8xf32> to vector<8x1xf32>
      %182 = vector.broadcast %181 : vector<8x1xf32> to vector<8x8xf32>
      %183 = arith.subf %179, %182 : vector<8x8xf32>
      %184 = math.exp %183 : vector<8x8xf32>
      %cst_113 = arith.constant dense<0.000000e+00> : vector<8xf32>
      %185 = vector.multi_reduction <add>, %184, %cst_113 [1] : vector<8x8xf32> to vector<8xf32>
      %186 = vector.shape_cast %185 : vector<8xf32> to vector<8x1xf32>
      %187 = vector.broadcast %186 : vector<8x1xf32> to vector<8x8xf32>
      %188 = arith.divf %184, %187 : vector<8x8xf32>
      %189 = arith.index_cast %136 : i32 to index
      %c16_114 = arith.constant 16 : index
      %190 = vector.load %arg40[%189, %c16_114] : memref<40x32xf32, #tpu.memory_space<vmem>>, vector<8x8xf32>
      tpu.vector_store %arg40[%189, %c16_114], %188 {strides = array<i32>} : memref<40x32xf32, #tpu.memory_space<vmem>>, vector<8x8xf32>,
      %191 = arith.index_cast %136 : i32 to index
      %c48 = arith.constant 48 : index
      %192 = vector.load %arg37[%191, %c48] : memref<40x64xf32, #tpu.memory_space<vmem>>, vector<8x16xf32>
      %193 = arith.index_cast %136 : i32 to index
      %c48_115 = arith.constant 48 : index
      %194 = vector.load %arg38[%193, %c48_115] : memref<40x64xf32, #tpu.memory_space<vmem>>, vector<8x16xf32>
      %cst_116 = arith.constant dense<0.000000e+00> : vector<8x8xf32>
      %195 = tpu.matmul %192, %194, %cst_116 {dimension_numbers = #tpu.dot_dimension_numbers<[1], [1], [0], [0], [0, 0, 1, 0], [], []>} : vector<8x16xf32>, vector<8x16xf32>, vector<8x8xf32> -> vector<8x8xf32>
      %cst_117 = arith.constant 1.250000e-01 : f32
      %196 = vector.broadcast %cst_117 : f32 to vector<8x8xf32>
      %197 = arith.mulf %195, %196 : vector<8x8xf32>
      %cst_118 = arith.constant dense<0xFF800000> : vector<8xf32>
      %198 = vector.multi_reduction <maximumf>, %197, %cst_118 [1] : vector<8x8xf32> to vector<8xf32>
      %199 = vector.shape_cast %198 : vector<8xf32> to vector<8x1xf32>
      %200 = vector.broadcast %199 : vector<8x1xf32> to vector<8x8xf32>
      %201 = arith.subf %197, %200 : vector<8x8xf32>
      %202 = math.exp %201 : vector<8x8xf32>
      %cst_119 = arith.constant dense<0.000000e+00> : vector<8xf32>
      %203 = vector.multi_reduction <add>, %202, %cst_119 [1] : vector<8x8xf32> to vector<8xf32>
      %204 = vector.shape_cast %203 : vector<8xf32> to vector<8x1xf32>
      %205 = vector.broadcast %204 : vector<8x1xf32> to vector<8x8xf32>
      %206 = arith.divf %202, %205 : vector<8x8xf32>
      %207 = arith.index_cast %136 : i32 to index
      %c24 = arith.constant 24 : index
      %208 = vector.load %arg40[%207, %c24] : memref<40x32xf32, #tpu.memory_space<vmem>>, vector<8x8xf32>
      tpu.vector_store %arg40[%207, %c24], %206 {strides = array<i32>} : memref<40x32xf32, #tpu.memory_space<vmem>>, vector<8x8xf32>,
    }
    %c5_i32_49 = arith.constant 5 : i32
    %c0_50 = arith.constant 0 : index
    %c0_51 = arith.constant 0 : index
    %72 = vector.load %arg39[%c0_50, %c0_51] : memref<40x20xf32, #tpu.memory_space<vmem>>, vector<40x20xf32>
    %c0_52 = arith.constant 0 : index
    %c0_53 = arith.constant 0 : index
    %73 = vector.load %arg40[%c0_52, %c0_53] : memref<40x32xf32, #tpu.memory_space<vmem>>, vector<40x32xf32>
    %c0_54 = arith.constant 0 : index
    %c0_55 = arith.constant 0 : index
    %74 = vector.load %arg18[%c0_54, %c0_55] : memref<40x40xf32, #tpu.memory_space<vmem>>, vector<40x40xf32>
    %cst_56 = arith.constant dense<0.000000e+00> : vector<40x20xf32>
    %75 = tpu.matmul %74, %72, %cst_56 {dimension_numbers = #tpu.dot_dimension_numbers<[1], [0], [0], [1], [0, 0, 1, 1], [], []>} : vector<40x40xf32>, vector<40x20xf32>, vector<40x20xf32> -> vector<40x20xf32>
    %c0_57 = arith.constant 0 : index
    %c0_58 = arith.constant 0 : index
    %76 = vector.load %arg19[%c0_57, %c0_58] : memref<40x1xf32, #tpu.memory_space<vmem>>, vector<40x1xf32>
    %77 = vector.broadcast %76 : vector<40x1xf32> to vector<40x20xf32>
    %78 = arith.addf %75, %77 : vector<40x20xf32>
    %c0_59 = arith.constant 0 : index
    %79 = memref.load %arg32[%c0_59] : memref<15xf32, #tpu.memory_space<smem>>
    %cst_60 = arith.constant 0.000000e+00 : f32
    %80 = vector.broadcast %cst_60 : f32 to vector<40x20xf32>
    %81 = arith.cmpf oge, %78, %80 : vector<40x20xf32>
    %82 = vector.broadcast %79 : f32 to vector<40x20xf32>
    %83 = arith.mulf %82, %78 : vector<40x20xf32>
    %84 = arith.select %81, %78, %83 : vector<40x20xi1>, vector<40x20xf32>
    %85 = arith.addf %84, %72 : vector<40x20xf32>
    %c0_61 = arith.constant 0 : index
    %c0_62 = arith.constant 0 : index
    %86 = vector.load %arg20[%c0_61, %c0_62] : memref<40x40xf32, #tpu.memory_space<vmem>>, vector<40x40xf32>
    %c0_63 = arith.constant 0 : index
    %c0_64 = arith.constant 0 : index
    %87 = vector.load %arg21[%c0_63, %c0_64] : memref<40x40xf32, #tpu.memory_space<vmem>>, vector<40x40xf32>
    %c0_65 = arith.constant 0 : index
    %c0_66 = arith.constant 0 : index
    %88 = vector.load %arg22[%c0_65, %c0_66] : memref<40x40xf32, #tpu.memory_space<vmem>>, vector<40x40xf32>
    %c0_67 = arith.constant 0 : index
    %c0_68 = arith.constant 0 : index
    %89 = vector.load %arg23[%c0_67, %c0_68] : memref<40x40xf32, #tpu.memory_space<vmem>>, vector<40x40xf32>
    %c0_i32_69 = arith.constant 0 : i32
    %c7_i32 = arith.constant 7 : i32
    %90 = arith.addi %c0_i32_69, %c7_i32 : i32
    %c1_i32_70 = arith.constant 1 : i32
    %91:2 = scf.for %arg41 = %c0_i32_69 to %90 step %c1_i32_70 iter_args(%arg42 = %85, %arg43 = %73) -> (vector<40x20xf32>, vector<40x32xf32>)  : i32 {
      %cst_96 = arith.constant dense<0.000000e+00> : vector<40x20xf32>
      %136 = tpu.matmul %86, %arg42, %cst_96 {dimension_numbers = #tpu.dot_dimension_numbers<[1], [0], [0], [1], [0, 0, 1, 1], [], []>} : vector<40x40xf32>, vector<40x20xf32>, vector<40x20xf32> -> vector<40x20xf32>
      %c3_i32 = arith.constant 3 : i32
      %137 = arith.muli %c3_i32, %arg41 : i32
      %138 = arith.index_cast %137 : i32 to index
      %c0_97 = arith.constant 0 : index
      %c0_98 = arith.constant 0 : index
      %139 = vector.load %arg24[%138, %c0_97, %c0_98] : memref<21x20x20xf32, #tpu.memory_space<vmem>>, vector<1x20x20xf32>
      %140 = vector.shape_cast %139 : vector<1x20x20xf32> to vector<20x20xf32>
      %cst_99 = arith.constant dense<0.000000e+00> : vector<40x20xf32>
      %141 = tpu.matmul %136, %140, %cst_99 {dimension_numbers = #tpu.dot_dimension_numbers<[1], [0], [0], [1], [0, 0, 1, 1], [], []>} : vector<40x20xf32>, vector<20x20xf32>, vector<40x20xf32> -> vector<40x20xf32>
      %c3_i32_100 = arith.constant 3 : i32
      %142 = arith.muli %c3_i32_100, %arg41 : i32
      %c1_i32_101 = arith.constant 1 : i32
      %143 = arith.addi %142, %c1_i32_101 : i32
      %144 = arith.index_cast %143 : i32 to index
      %c0_102 = arith.constant 0 : index
      %c0_103 = arith.constant 0 : index
      %145 = vector.load %arg24[%144, %c0_102, %c0_103] : memref<21x20x20xf32, #tpu.memory_space<vmem>>, vector<1x20x20xf32>
      %146 = vector.shape_cast %145 : vector<1x20x20xf32> to vector<20x20xf32>
      %cst_104 = arith.constant dense<0.000000e+00> : vector<40x20xf32>
      %147 = tpu.matmul %arg42, %146, %cst_104 {dimension_numbers = #tpu.dot_dimension_numbers<[1], [0], [0], [1], [0, 0, 1, 1], [], []>} : vector<40x20xf32>, vector<20x20xf32>, vector<40x20xf32> -> vector<40x20xf32>
      %148 = arith.addf %141, %147 : vector<40x20xf32>
      %cst_105 = arith.constant dense<0.000000e+00> : vector<40x20xf32>
      %149 = tpu.matmul %87, %arg42, %cst_105 {dimension_numbers = #tpu.dot_dimension_numbers<[1], [0], [0], [1], [0, 0, 1, 1], [], []>} : vector<40x40xf32>, vector<40x20xf32>, vector<40x20xf32> -> vector<40x20xf32>
      %c3_i32_106 = arith.constant 3 : i32
      %150 = arith.muli %c3_i32_106, %arg41 : i32
      %c2_i32 = arith.constant 2 : i32
      %151 = arith.addi %150, %c2_i32 : i32
      %152 = arith.index_cast %151 : i32 to index
      %c0_107 = arith.constant 0 : index
      %c0_108 = arith.constant 0 : index
      %153 = vector.load %arg24[%152, %c0_107, %c0_108] : memref<21x20x20xf32, #tpu.memory_space<vmem>>, vector<1x20x20xf32>
      %154 = vector.shape_cast %153 : vector<1x20x20xf32> to vector<20x20xf32>
      %cst_109 = arith.constant dense<0.000000e+00> : vector<40x20xf32>
      %155 = tpu.matmul %149, %154, %cst_109 {dimension_numbers = #tpu.dot_dimension_numbers<[1], [0], [0], [1], [0, 0, 1, 1], [], []>} : vector<40x20xf32>, vector<20x20xf32>, vector<40x20xf32> -> vector<40x20xf32>
      %156 = arith.addf %148, %155 : vector<40x20xf32>
      %157 = arith.index_cast %arg41 : i32 to index
      %c0_110 = arith.constant 0 : index
      %c0_111 = arith.constant 0 : index
      %158 = vector.load %arg25[%157, %c0_110, %c0_111] : memref<7x20x20xf32, #tpu.memory_space<vmem>>, vector<1x20x20xf32>
      %159 = vector.shape_cast %158 : vector<1x20x20xf32> to vector<20x20xf32>
      %cst_112 = arith.constant dense<0.000000e+00> : vector<40x20xf32>
      %160 = tpu.matmul %arg42, %159, %cst_112 {dimension_numbers = #tpu.dot_dimension_numbers<[1], [0], [0], [1], [0, 0, 1, 1], [], []>} : vector<40x20xf32>, vector<20x20xf32>, vector<40x20xf32> -> vector<40x20xf32>
      %161 = arith.index_cast %arg41 : i32 to index
      %c0_113 = arith.constant 0 : index
      %c0_114 = arith.constant 0 : index
      %162 = vector.load %arg26[%161, %c0_113, %c0_114] : memref<7x1x20xf32, #tpu.memory_space<vmem>>, vector<1x1x20xf32>
      %163 = vector.shape_cast %162 : vector<1x1x20xf32> to vector<1x20xf32>
      %164 = vector.broadcast %163 : vector<1x20xf32> to vector<40x20xf32>
      %165 = arith.addf %160, %164 : vector<40x20xf32>
      %166 = arith.addf %165, %156 : vector<40x20xf32>
      %c1_i32_115 = arith.constant 1 : i32
      %167 = arith.addi %c1_i32_115, %arg41 : i32
      %168 = arith.index_cast %167 : i32 to index
      %169 = memref.load %arg32[%168] : memref<15xf32, #tpu.memory_space<smem>>
      %cst_116 = arith.constant 0.000000e+00 : f32
      %170 = vector.broadcast %cst_116 : f32 to vector<40x20xf32>
      %171 = arith.cmpf oge, %166, %170 : vector<40x20xf32>
      %172 = vector.broadcast %169 : f32 to vector<40x20xf32>
      %173 = arith.mulf %172, %166 : vector<40x20xf32>
      %174 = arith.select %171, %166, %173 : vector<40x20xi1>, vector<40x20xf32>
      %175 = arith.addf %174, %arg42 : vector<40x20xf32>
      %cst_117 = arith.constant dense<0.000000e+00> : vector<40x32xf32>
      %176 = tpu.matmul %88, %arg43, %cst_117 {dimension_numbers = #tpu.dot_dimension_numbers<[1], [0], [0], [1], [0, 0, 1, 1], [], []>} : vector<40x40xf32>, vector<40x32xf32>, vector<40x32xf32> -> vector<40x32xf32>
      %c3_i32_118 = arith.constant 3 : i32
      %177 = arith.muli %c3_i32_118, %arg41 : i32
      %178 = arith.index_cast %177 : i32 to index
      %c0_119 = arith.constant 0 : index
      %c0_120 = arith.constant 0 : index
      %179 = vector.load %arg27[%178, %c0_119, %c0_120] : memref<21x32x32xf32, #tpu.memory_space<vmem>>, vector<1x32x32xf32>
      %180 = vector.shape_cast %179 : vector<1x32x32xf32> to vector<32x32xf32>
      %cst_121 = arith.constant dense<0.000000e+00> : vector<40x32xf32>
      %181 = tpu.matmul %176, %180, %cst_121 {dimension_numbers = #tpu.dot_dimension_numbers<[1], [0], [0], [1], [0, 0, 1, 1], [], []>} : vector<40x32xf32>, vector<32x32xf32>, vector<40x32xf32> -> vector<40x32xf32>
      %c3_i32_122 = arith.constant 3 : i32
      %182 = arith.muli %c3_i32_122, %arg41 : i32
      %c1_i32_123 = arith.constant 1 : i32
      %183 = arith.addi %182, %c1_i32_123 : i32
      %184 = arith.index_cast %183 : i32 to index
      %c0_124 = arith.constant 0 : index
      %c0_125 = arith.constant 0 : index
      %185 = vector.load %arg27[%184, %c0_124, %c0_125] : memref<21x32x32xf32, #tpu.memory_space<vmem>>, vector<1x32x32xf32>
      %186 = vector.shape_cast %185 : vector<1x32x32xf32> to vector<32x32xf32>
      %cst_126 = arith.constant dense<0.000000e+00> : vector<40x32xf32>
      %187 = tpu.matmul %arg43, %186, %cst_126 {dimension_numbers = #tpu.dot_dimension_numbers<[1], [0], [0], [1], [0, 0, 1, 1], [], []>} : vector<40x32xf32>, vector<32x32xf32>, vector<40x32xf32> -> vector<40x32xf32>
      %188 = arith.addf %181, %187 : vector<40x32xf32>
      %cst_127 = arith.constant dense<0.000000e+00> : vector<40x32xf32>
      %189 = tpu.matmul %89, %arg43, %cst_127 {dimension_numbers = #tpu.dot_dimension_numbers<[1], [0], [0], [1], [0, 0, 1, 1], [], []>} : vector<40x40xf32>, vector<40x32xf32>, vector<40x32xf32> -> vector<40x32xf32>
      %c3_i32_128 = arith.constant 3 : i32
      %190 = arith.muli %c3_i32_128, %arg41 : i32
      %c2_i32_129 = arith.constant 2 : i32
      %191 = arith.addi %190, %c2_i32_129 : i32
      %192 = arith.index_cast %191 : i32 to index
      %c0_130 = arith.constant 0 : index
      %c0_131 = arith.constant 0 : index
      %193 = vector.load %arg27[%192, %c0_130, %c0_131] : memref<21x32x32xf32, #tpu.memory_space<vmem>>, vector<1x32x32xf32>
      %194 = vector.shape_cast %193 : vector<1x32x32xf32> to vector<32x32xf32>
      %cst_132 = arith.constant dense<0.000000e+00> : vector<40x32xf32>
      %195 = tpu.matmul %189, %194, %cst_132 {dimension_numbers = #tpu.dot_dimension_numbers<[1], [0], [0], [1], [0, 0, 1, 1], [], []>} : vector<40x32xf32>, vector<32x32xf32>, vector<40x32xf32> -> vector<40x32xf32>
      %196 = arith.addf %188, %195 : vector<40x32xf32>
      %197 = arith.index_cast %arg41 : i32 to index
      %c0_133 = arith.constant 0 : index
      %c0_134 = arith.constant 0 : index
      %198 = vector.load %arg28[%197, %c0_133, %c0_134] : memref<7x32x32xf32, #tpu.memory_space<vmem>>, vector<1x32x32xf32>
      %199 = vector.shape_cast %198 : vector<1x32x32xf32> to vector<32x32xf32>
      %cst_135 = arith.constant dense<0.000000e+00> : vector<40x32xf32>
      %200 = tpu.matmul %arg43, %199, %cst_135 {dimension_numbers = #tpu.dot_dimension_numbers<[1], [0], [0], [1], [0, 0, 1, 1], [], []>} : vector<40x32xf32>, vector<32x32xf32>, vector<40x32xf32> -> vector<40x32xf32>
      %201 = arith.index_cast %arg41 : i32 to index
      %c0_136 = arith.constant 0 : index
      %c0_137 = arith.constant 0 : index
      %202 = vector.load %arg29[%201, %c0_136, %c0_137] : memref<7x1x32xf32, #tpu.memory_space<vmem>>, vector<1x1x32xf32>
      %203 = vector.shape_cast %202 : vector<1x1x32xf32> to vector<1x32xf32>
      %204 = vector.broadcast %203 : vector<1x32xf32> to vector<40x32xf32>
      %205 = arith.addf %200, %204 : vector<40x32xf32>
      %206 = arith.addf %205, %196 : vector<40x32xf32>
      %c8_i32_138 = arith.constant 8 : i32
      %207 = arith.addi %c8_i32_138, %arg41 : i32
      %208 = arith.index_cast %207 : i32 to index
      %209 = memref.load %arg32[%208] : memref<15xf32, #tpu.memory_space<smem>>
      %cst_139 = arith.constant 0.000000e+00 : f32
      %210 = vector.broadcast %cst_139 : f32 to vector<40x32xf32>
      %211 = arith.cmpf oge, %206, %210 : vector<40x32xf32>
      %212 = vector.broadcast %209 : f32 to vector<40x32xf32>
      %213 = arith.mulf %212, %206 : vector<40x32xf32>
      %214 = arith.select %211, %206, %213 : vector<40x32xi1>, vector<40x32xf32>
      %215 = arith.addf %214, %arg43 : vector<40x32xf32>
      scf.yield %175, %215 : vector<40x20xf32>, vector<40x32xf32>
    }
    %c7_i32_71 = arith.constant 7 : i32
    %92 = arith.negf %91#0 : vector<40x20xf32>
    %93 = math.exp %92 : vector<40x20xf32>
    %cst_72 = arith.constant 1.000000e+00 : f32
    %94 = vector.broadcast %cst_72 : f32 to vector<40x20xf32>
    %95 = arith.addf %94, %93 : vector<40x20xf32>
    %96 = arith.divf %94, %95 : vector<40x20xf32>
    %cst_73 = arith.constant 5.000000e-01 : f32
    %97 = vector.broadcast %cst_73 : f32 to vector<40x20xf32>
    %98 = arith.cmpf ogt, %96, %97 : vector<40x20xf32>
    %cst_74 = arith.constant 0.000000e+00 : f32
    %99 = vector.broadcast %cst_74 : f32 to vector<40x20xf32>
    %100 = arith.select %98, %96, %99 : vector<40x20xi1>, vector<40x20xf32>
    %c0_75 = arith.constant 0 : index
    %c0_76 = arith.constant 0 : index
    %101 = vector.load %arg4[%c0_75, %c0_76] : memref<40x20xf32, #tpu.memory_space<vmem>>, vector<40x20xf32>
    %102 = arith.addf %100, %101 : vector<40x20xf32>
    %103 = arith.negf %91#1 : vector<40x32xf32>
    %104 = math.exp %103 : vector<40x32xf32>
    %cst_77 = arith.constant 1.000000e+00 : f32
    %105 = vector.broadcast %cst_77 : f32 to vector<40x32xf32>
    %106 = arith.addf %105, %104 : vector<40x32xf32>
    %107 = arith.divf %105, %106 : vector<40x32xf32>
    %cst_78 = arith.constant 5.000000e-01 : f32
    %108 = vector.broadcast %cst_78 : f32 to vector<40x32xf32>
    %109 = arith.cmpf ogt, %107, %108 : vector<40x32xf32>
    %cst_79 = arith.constant 0.000000e+00 : f32
    %110 = vector.broadcast %cst_79 : f32 to vector<40x32xf32>
    %111 = arith.select %109, %107, %110 : vector<40x32xi1>, vector<40x32xf32>
    %c0_80 = arith.constant 0 : index
    %c0_81 = arith.constant 0 : index
    %112 = vector.load %arg5[%c0_80, %c0_81] : memref<40x32xf32, #tpu.memory_space<vmem>>, vector<40x32xf32>
    %113 = arith.addf %111, %112 : vector<40x32xf32>
    %114 = arith.mulf %72, %102 : vector<40x20xf32>
    %115 = math.exp %114 : vector<40x20xf32>
    %cst_82 = arith.constant 1.000000e+00 : f32
    %116 = vector.broadcast %cst_82 : f32 to vector<40x20xf32>
    %117 = arith.subf %115, %116 : vector<40x20xf32>
    %118 = arith.mulf %117, %117 : vector<40x20xf32>
    %c0_83 = arith.constant 0 : index
    %c0_84 = arith.constant 0 : index
    %119 = vector.load %arg30[%c0_83, %c0_84] : memref<20x20xf32, #tpu.memory_space<vmem>>, vector<20x20xf32>
    %cst_85 = arith.constant dense<0.000000e+00> : vector<40x20xf32>
    %120 = tpu.matmul %118, %119, %cst_85 {dimension_numbers = #tpu.dot_dimension_numbers<[1], [0], [0], [1], [0, 0, 1, 1], [], []>} : vector<40x20xf32>, vector<20x20xf32>, vector<40x20xf32> -> vector<40x20xf32>
    %cst_86 = arith.constant 9.99999974E-6 : f32
    %121 = vector.broadcast %cst_86 : f32 to vector<40x20xf32>
    %122 = arith.addf %120, %121 : vector<40x20xf32>
    %123 = arith.divf %118, %122 : vector<40x20xf32>
    %c0_87 = arith.constant 0 : index
    %c0_88 = arith.constant 0 : index
    %124 = vector.load %arg33[%c0_87, %c0_88] : memref<40x20xf32, #tpu.memory_space<vmem>>, vector<40x20xf32>
    tpu.vector_store %arg33[%c0_87, %c0_88], %123 {strides = array<i32>} : memref<40x20xf32, #tpu.memory_space<vmem>>, vector<40x20xf32>,
    %125 = arith.mulf %73, %113 : vector<40x32xf32>
    %126 = math.exp %125 : vector<40x32xf32>
    %cst_89 = arith.constant 1.000000e+00 : f32
    %127 = vector.broadcast %cst_89 : f32 to vector<40x32xf32>
    %128 = arith.subf %126, %127 : vector<40x32xf32>
    %129 = arith.mulf %128, %128 : vector<40x32xf32>
    %c0_90 = arith.constant 0 : index
    %c0_91 = arith.constant 0 : index
    %130 = vector.load %arg31[%c0_90, %c0_91] : memref<32x32xf32, #tpu.memory_space<vmem>>, vector<32x32xf32>
    %cst_92 = arith.constant dense<0.000000e+00> : vector<40x32xf32>
    %131 = tpu.matmul %129, %130, %cst_92 {dimension_numbers = #tpu.dot_dimension_numbers<[1], [0], [0], [1], [0, 0, 1, 1], [], []>} : vector<40x32xf32>, vector<32x32xf32>, vector<40x32xf32> -> vector<40x32xf32>
    %cst_93 = arith.constant 9.99999974E-6 : f32
    %132 = vector.broadcast %cst_93 : f32 to vector<40x32xf32>
    %133 = arith.addf %131, %132 : vector<40x32xf32>
    %134 = arith.divf %129, %133 : vector<40x32xf32>
    %c0_94 = arith.constant 0 : index
    %c0_95 = arith.constant 0 : index
    %135 = vector.load %arg34[%c0_94, %c0_95] : memref<40x32xf32, #tpu.memory_space<vmem>>, vector<40x32xf32>
    tpu.vector_store %arg34[%c0_94, %c0_95], %134 {strides = array<i32>} : memref<40x32xf32, #tpu.memory_space<vmem>>, vector<40x32xf32>,
    return
  }
}

module attributes {stable_mosaic.version = 11 : i64} {
  func.func @_gcn_kernel(%arg0: memref<40x2xf32, #tpu.memory_space<vmem>>, %arg1: memref<40x2xf32, #tpu.memory_space<vmem>>, %arg2: memref<40x20xf32, #tpu.memory_space<vmem>>, %arg3: memref<40x32xf32, #tpu.memory_space<vmem>>, %arg4: memref<5x8x40xf32, #tpu.memory_space<vmem>>, %arg5: memref<8x5x40xf32, #tpu.memory_space<vmem>>, %arg6: memref<2x16xf32, #tpu.memory_space<vmem>>, %arg7: memref<16x16xf32, #tpu.memory_space<vmem>>, %arg8: memref<2x16xf32, #tpu.memory_space<vmem>>, %arg9: memref<16x16xf32, #tpu.memory_space<vmem>>, %arg10: memref<4xf32, #tpu.memory_space<smem>>, %arg11: memref<4x4xf32, #tpu.memory_space<smem>>, %arg12: memref<40x64xf32, #tpu.memory_space<vmem>>, %arg13: memref<40x64xf32, #tpu.memory_space<vmem>>, %arg14: memref<40x64xf32, #tpu.memory_space<vmem>>, %arg15: memref<40x64xf32, #tpu.memory_space<vmem>>) attributes {dimension_semantics = [], scalar_prefetch = 0 : i64, scratch_operands = 3 : i64, tpu.core_type = #tpu.core_type<tc>} {
    %0 = tpu.iota {dimensions = array<i32: 0>} : vector<5x5xi32>
    %1 = tpu.iota {dimensions = array<i32: 1>} : vector<5x5xi32>
    %2 = arith.cmpi eq, %0, %1 : vector<5x5xi32>
    %3 = arith.extui %2 : vector<5x5xi1> to vector<5x5xi32>
    %4 = arith.sitofp %3 : vector<5x5xi32> to vector<5x5xf32>
    %c0 = arith.constant 0 : index
    %5 = memref.load %arg10[%c0] : memref<4xf32, #tpu.memory_space<smem>>
    %c1 = arith.constant 1 : index
    %6 = memref.load %arg10[%c1] : memref<4xf32, #tpu.memory_space<smem>>
    %c2 = arith.constant 2 : index
    %7 = memref.load %arg10[%c2] : memref<4xf32, #tpu.memory_space<smem>>
    %c3 = arith.constant 3 : index
    %8 = memref.load %arg10[%c3] : memref<4xf32, #tpu.memory_space<smem>>
    %c0_0 = arith.constant 0 : index
    %c0_1 = arith.constant 0 : index
    %9 = vector.load %arg6[%c0_0, %c0_1] : memref<2x16xf32, #tpu.memory_space<vmem>>, vector<2x16xf32>
    %c0_2 = arith.constant 0 : index
    %c0_3 = arith.constant 0 : index
    %10 = vector.load %arg7[%c0_2, %c0_3] : memref<16x16xf32, #tpu.memory_space<vmem>>, vector<16x16xf32>
    %c0_4 = arith.constant 0 : index
    %c0_5 = arith.constant 0 : index
    %11 = vector.load %arg8[%c0_4, %c0_5] : memref<2x16xf32, #tpu.memory_space<vmem>>, vector<2x16xf32>
    %c0_6 = arith.constant 0 : index
    %c0_7 = arith.constant 0 : index
    %12 = vector.load %arg9[%c0_6, %c0_7] : memref<16x16xf32, #tpu.memory_space<vmem>>, vector<16x16xf32>
    %c0_i32 = arith.constant 0 : i32
    %c5_i32 = arith.constant 5 : i32
    %13 = arith.addi %c0_i32, %c5_i32 : i32
    %c1_i32 = arith.constant 1 : i32
    scf.for %arg16 = %c0_i32 to %13 step %c1_i32  : i32 {
      %c8_i32_20 = arith.constant 8 : i32
      %17 = arith.muli %arg16, %c8_i32_20 : i32
      %18 = arith.index_cast %17 : i32 to index
      %c0_21 = arith.constant 0 : index
      %19 = vector.load %arg1[%18, %c0_21] : memref<40x2xf32, #tpu.memory_space<vmem>>, vector<8x2xf32>
      %c8_i32_22 = arith.constant 8 : i32
      %20 = arith.muli %arg16, %c8_i32_22 : i32
      %21 = arith.index_cast %20 : i32 to index
      %c0_23 = arith.constant 0 : index
      %22 = vector.load %arg3[%21, %c0_23] : memref<40x32xf32, #tpu.memory_space<vmem>>, vector<8x8xf32>
      %cst = arith.constant dense<0.000000e+00> : vector<8x2xf32>
      %23 = tpu.matmul %22, %19, %cst {dimension_numbers = #tpu.dot_dimension_numbers<[1], [0], [0], [1], [0, 0, 1, 1], [], []>} : vector<8x8xf32>, vector<8x2xf32>, vector<8x2xf32> -> vector<8x2xf32>
      %24 = vector.extract_strided_slice %23 {offsets = [0, 0], sizes = [8, 1], strides = [1, 1]} : vector<8x2xf32> to vector<8x1xf32>
      %25 = vector.extract_strided_slice %11 {offsets = [0, 0], sizes = [1, 16], strides = [1, 1]} : vector<2x16xf32> to vector<1x16xf32>
      %26 = vector.broadcast %24 : vector<8x1xf32> to vector<8x16xf32>
      %27 = vector.broadcast %25 : vector<1x16xf32> to vector<8x16xf32>
      %28 = arith.mulf %26, %27 : vector<8x16xf32>
      %29 = vector.extract_strided_slice %23 {offsets = [0, 1], sizes = [8, 1], strides = [1, 1]} : vector<8x2xf32> to vector<8x1xf32>
      %30 = vector.extract_strided_slice %11 {offsets = [1, 0], sizes = [1, 16], strides = [1, 1]} : vector<2x16xf32> to vector<1x16xf32>
      %31 = vector.broadcast %29 : vector<8x1xf32> to vector<8x16xf32>
      %32 = vector.broadcast %30 : vector<1x16xf32> to vector<8x16xf32>
      %33 = arith.mulf %31, %32 : vector<8x16xf32>
      %34 = arith.addf %28, %33 : vector<8x16xf32>
      %cst_24 = arith.constant 0.000000e+00 : f32
      %35 = vector.broadcast %cst_24 : f32 to vector<8x16xf32>
      %36 = arith.cmpf oge, %34, %35 : vector<8x16xf32>
      %37 = vector.broadcast %7 : f32 to vector<8x16xf32>
      %38 = arith.mulf %37, %34 : vector<8x16xf32>
      %39 = arith.select %36, %34, %38 : vector<8x16xi1>, vector<8x16xf32>
      %c8_i32_25 = arith.constant 8 : i32
      %40 = arith.muli %arg16, %c8_i32_25 : i32
      %41 = arith.index_cast %40 : i32 to index
      %c0_26 = arith.constant 0 : index
      %42 = vector.load %arg14[%41, %c0_26] : memref<40x64xf32, #tpu.memory_space<vmem>>, vector<8x16xf32>
      tpu.vector_store %arg14[%41, %c0_26], %39 {strides = array<i32>} : memref<40x64xf32, #tpu.memory_space<vmem>>, vector<8x16xf32>,
      %c8_i32_27 = arith.constant 8 : i32
      %43 = arith.muli %arg16, %c8_i32_27 : i32
      %44 = arith.index_cast %43 : i32 to index
      %c8 = arith.constant 8 : index
      %45 = vector.load %arg3[%44, %c8] : memref<40x32xf32, #tpu.memory_space<vmem>>, vector<8x8xf32>
      %cst_28 = arith.constant dense<0.000000e+00> : vector<8x2xf32>
      %46 = tpu.matmul %45, %19, %cst_28 {dimension_numbers = #tpu.dot_dimension_numbers<[1], [0], [0], [1], [0, 0, 1, 1], [], []>} : vector<8x8xf32>, vector<8x2xf32>, vector<8x2xf32> -> vector<8x2xf32>
      %47 = vector.extract_strided_slice %46 {offsets = [0, 0], sizes = [8, 1], strides = [1, 1]} : vector<8x2xf32> to vector<8x1xf32>
      %48 = vector.extract_strided_slice %11 {offsets = [0, 0], sizes = [1, 16], strides = [1, 1]} : vector<2x16xf32> to vector<1x16xf32>
      %49 = vector.broadcast %47 : vector<8x1xf32> to vector<8x16xf32>
      %50 = vector.broadcast %48 : vector<1x16xf32> to vector<8x16xf32>
      %51 = arith.mulf %49, %50 : vector<8x16xf32>
      %52 = vector.extract_strided_slice %46 {offsets = [0, 1], sizes = [8, 1], strides = [1, 1]} : vector<8x2xf32> to vector<8x1xf32>
      %53 = vector.extract_strided_slice %11 {offsets = [1, 0], sizes = [1, 16], strides = [1, 1]} : vector<2x16xf32> to vector<1x16xf32>
      %54 = vector.broadcast %52 : vector<8x1xf32> to vector<8x16xf32>
      %55 = vector.broadcast %53 : vector<1x16xf32> to vector<8x16xf32>
      %56 = arith.mulf %54, %55 : vector<8x16xf32>
      %57 = arith.addf %51, %56 : vector<8x16xf32>
      %cst_29 = arith.constant 0.000000e+00 : f32
      %58 = vector.broadcast %cst_29 : f32 to vector<8x16xf32>
      %59 = arith.cmpf oge, %57, %58 : vector<8x16xf32>
      %60 = vector.broadcast %7 : f32 to vector<8x16xf32>
      %61 = arith.mulf %60, %57 : vector<8x16xf32>
      %62 = arith.select %59, %57, %61 : vector<8x16xi1>, vector<8x16xf32>
      %c8_i32_30 = arith.constant 8 : i32
      %63 = arith.muli %arg16, %c8_i32_30 : i32
      %64 = arith.index_cast %63 : i32 to index
      %c16 = arith.constant 16 : index
      %65 = vector.load %arg14[%64, %c16] : memref<40x64xf32, #tpu.memory_space<vmem>>, vector<8x16xf32>
      tpu.vector_store %arg14[%64, %c16], %62 {strides = array<i32>} : memref<40x64xf32, #tpu.memory_space<vmem>>, vector<8x16xf32>,
      %c8_i32_31 = arith.constant 8 : i32
      %66 = arith.muli %arg16, %c8_i32_31 : i32
      %67 = arith.index_cast %66 : i32 to index
      %c16_32 = arith.constant 16 : index
      %68 = vector.load %arg3[%67, %c16_32] : memref<40x32xf32, #tpu.memory_space<vmem>>, vector<8x8xf32>
      %cst_33 = arith.constant dense<0.000000e+00> : vector<8x2xf32>
      %69 = tpu.matmul %68, %19, %cst_33 {dimension_numbers = #tpu.dot_dimension_numbers<[1], [0], [0], [1], [0, 0, 1, 1], [], []>} : vector<8x8xf32>, vector<8x2xf32>, vector<8x2xf32> -> vector<8x2xf32>
      %70 = vector.extract_strided_slice %69 {offsets = [0, 0], sizes = [8, 1], strides = [1, 1]} : vector<8x2xf32> to vector<8x1xf32>
      %71 = vector.extract_strided_slice %11 {offsets = [0, 0], sizes = [1, 16], strides = [1, 1]} : vector<2x16xf32> to vector<1x16xf32>
      %72 = vector.broadcast %70 : vector<8x1xf32> to vector<8x16xf32>
      %73 = vector.broadcast %71 : vector<1x16xf32> to vector<8x16xf32>
      %74 = arith.mulf %72, %73 : vector<8x16xf32>
      %75 = vector.extract_strided_slice %69 {offsets = [0, 1], sizes = [8, 1], strides = [1, 1]} : vector<8x2xf32> to vector<8x1xf32>
      %76 = vector.extract_strided_slice %11 {offsets = [1, 0], sizes = [1, 16], strides = [1, 1]} : vector<2x16xf32> to vector<1x16xf32>
      %77 = vector.broadcast %75 : vector<8x1xf32> to vector<8x16xf32>
      %78 = vector.broadcast %76 : vector<1x16xf32> to vector<8x16xf32>
      %79 = arith.mulf %77, %78 : vector<8x16xf32>
      %80 = arith.addf %74, %79 : vector<8x16xf32>
      %cst_34 = arith.constant 0.000000e+00 : f32
      %81 = vector.broadcast %cst_34 : f32 to vector<8x16xf32>
      %82 = arith.cmpf oge, %80, %81 : vector<8x16xf32>
      %83 = vector.broadcast %7 : f32 to vector<8x16xf32>
      %84 = arith.mulf %83, %80 : vector<8x16xf32>
      %85 = arith.select %82, %80, %84 : vector<8x16xi1>, vector<8x16xf32>
      %c8_i32_35 = arith.constant 8 : i32
      %86 = arith.muli %arg16, %c8_i32_35 : i32
      %87 = arith.index_cast %86 : i32 to index
      %c32 = arith.constant 32 : index
      %88 = vector.load %arg14[%87, %c32] : memref<40x64xf32, #tpu.memory_space<vmem>>, vector<8x16xf32>
      tpu.vector_store %arg14[%87, %c32], %85 {strides = array<i32>} : memref<40x64xf32, #tpu.memory_space<vmem>>, vector<8x16xf32>,
      %c8_i32_36 = arith.constant 8 : i32
      %89 = arith.muli %arg16, %c8_i32_36 : i32
      %90 = arith.index_cast %89 : i32 to index
      %c24 = arith.constant 24 : index
      %91 = vector.load %arg3[%90, %c24] : memref<40x32xf32, #tpu.memory_space<vmem>>, vector<8x8xf32>
      %cst_37 = arith.constant dense<0.000000e+00> : vector<8x2xf32>
      %92 = tpu.matmul %91, %19, %cst_37 {dimension_numbers = #tpu.dot_dimension_numbers<[1], [0], [0], [1], [0, 0, 1, 1], [], []>} : vector<8x8xf32>, vector<8x2xf32>, vector<8x2xf32> -> vector<8x2xf32>
      %93 = vector.extract_strided_slice %92 {offsets = [0, 0], sizes = [8, 1], strides = [1, 1]} : vector<8x2xf32> to vector<8x1xf32>
      %94 = vector.extract_strided_slice %11 {offsets = [0, 0], sizes = [1, 16], strides = [1, 1]} : vector<2x16xf32> to vector<1x16xf32>
      %95 = vector.broadcast %93 : vector<8x1xf32> to vector<8x16xf32>
      %96 = vector.broadcast %94 : vector<1x16xf32> to vector<8x16xf32>
      %97 = arith.mulf %95, %96 : vector<8x16xf32>
      %98 = vector.extract_strided_slice %92 {offsets = [0, 1], sizes = [8, 1], strides = [1, 1]} : vector<8x2xf32> to vector<8x1xf32>
      %99 = vector.extract_strided_slice %11 {offsets = [1, 0], sizes = [1, 16], strides = [1, 1]} : vector<2x16xf32> to vector<1x16xf32>
      %100 = vector.broadcast %98 : vector<8x1xf32> to vector<8x16xf32>
      %101 = vector.broadcast %99 : vector<1x16xf32> to vector<8x16xf32>
      %102 = arith.mulf %100, %101 : vector<8x16xf32>
      %103 = arith.addf %97, %102 : vector<8x16xf32>
      %cst_38 = arith.constant 0.000000e+00 : f32
      %104 = vector.broadcast %cst_38 : f32 to vector<8x16xf32>
      %105 = arith.cmpf oge, %103, %104 : vector<8x16xf32>
      %106 = vector.broadcast %7 : f32 to vector<8x16xf32>
      %107 = arith.mulf %106, %103 : vector<8x16xf32>
      %108 = arith.select %105, %103, %107 : vector<8x16xi1>, vector<8x16xf32>
      %c8_i32_39 = arith.constant 8 : i32
      %109 = arith.muli %arg16, %c8_i32_39 : i32
      %110 = arith.index_cast %109 : i32 to index
      %c48 = arith.constant 48 : index
      %111 = vector.load %arg14[%110, %c48] : memref<40x64xf32, #tpu.memory_space<vmem>>, vector<8x16xf32>
      tpu.vector_store %arg14[%110, %c48], %108 {strides = array<i32>} : memref<40x64xf32, #tpu.memory_space<vmem>>, vector<8x16xf32>,
    }
    %c5_i32_8 = arith.constant 5 : i32
    %c0_i32_9 = arith.constant 0 : i32
    %c8_i32 = arith.constant 8 : i32
    %14 = arith.addi %c0_i32_9, %c8_i32 : i32
    %c1_i32_10 = arith.constant 1 : i32
    scf.for %arg16 = %c0_i32_9 to %14 step %c1_i32_10  : i32 {
      %17 = arith.index_cast %arg16 : i32 to index
      %c0_20 = arith.constant 0 : index
      %c0_21 = arith.constant 0 : index
      %18 = vector.load %arg5[%17, %c0_20, %c0_21] : memref<8x5x40xf32, #tpu.memory_space<vmem>>, vector<1x5x40xf32>
      %19 = vector.shape_cast %18 : vector<1x5x40xf32> to vector<5x40xf32>
      %c0_22 = arith.constant 0 : index
      %c0_23 = arith.constant 0 : index
      %20 = vector.load %arg14[%c0_22, %c0_23] : memref<40x64xf32, #tpu.memory_space<vmem>>, vector<40x16xf32>
      %cst = arith.constant dense<0.000000e+00> : vector<5x16xf32>
      %21 = tpu.matmul %19, %20, %cst {dimension_numbers = #tpu.dot_dimension_numbers<[1], [0], [0], [1], [0, 0, 1, 1], [], []>} : vector<5x40xf32>, vector<40x16xf32>, vector<5x16xf32> -> vector<5x16xf32>
      %c5_i32_24 = arith.constant 5 : i32
      %22 = arith.muli %arg16, %c5_i32_24 : i32
      %23 = arith.index_cast %22 : i32 to index
      %c0_25 = arith.constant 0 : index
      %24 = vector.load %arg2[%23, %c0_25] : memref<40x20xf32, #tpu.memory_space<vmem>>, vector<5x5xf32>
      %cst_26 = arith.constant dense<0.000000e+00> : vector<5x16xf32>
      %25 = tpu.matmul %24, %21, %cst_26 {dimension_numbers = #tpu.dot_dimension_numbers<[1], [0], [0], [1], [0, 0, 1, 1], [], []>} : vector<5x5xf32>, vector<5x16xf32>, vector<5x16xf32> -> vector<5x16xf32>
      %cst_27 = arith.constant 0.000000e+00 : f32
      %26 = vector.broadcast %cst_27 : f32 to vector<5x16xf32>
      %27 = arith.cmpf oge, %25, %26 : vector<5x16xf32>
      %28 = vector.broadcast %8 : f32 to vector<5x16xf32>
      %29 = arith.mulf %28, %25 : vector<5x16xf32>
      %30 = arith.select %27, %25, %29 : vector<5x16xi1>, vector<5x16xf32>
      %cst_28 = arith.constant 0.000000e+00 : f32
      %31 = vector.broadcast %cst_28 : f32 to vector<5x16xf32>
      %32 = arith.cmpf oge, %21, %31 : vector<5x16xf32>
      %33 = vector.broadcast %8 : f32 to vector<5x16xf32>
      %34 = arith.mulf %33, %21 : vector<5x16xf32>
      %35 = arith.select %32, %21, %34 : vector<5x16xi1>, vector<5x16xf32>
      %36 = arith.mulf %24, %4 : vector<5x5xf32>
      %cst_29 = arith.constant dense<0.000000e+00> : vector<5xf32>
      %37 = vector.multi_reduction <add>, %36, %cst_29 [1] : vector<5x5xf32> to vector<5xf32>
      %38 = vector.shape_cast %37 : vector<5xf32> to vector<5x1xf32>
      %cst_30 = arith.constant dense<0.000000e+00> : vector<5x16xf32>
      %39 = tpu.matmul %24, %30, %cst_30 {dimension_numbers = #tpu.dot_dimension_numbers<[1], [0], [0], [1], [0, 0, 1, 1], [], []>} : vector<5x5xf32>, vector<5x16xf32>, vector<5x16xf32> -> vector<5x16xf32>
      %40 = arith.subf %35, %30 : vector<5x16xf32>
      %41 = vector.broadcast %38 : vector<5x1xf32> to vector<5x16xf32>
      %42 = arith.mulf %41, %40 : vector<5x16xf32>
      %43 = arith.addf %39, %42 : vector<5x16xf32>
      %cst_31 = arith.constant dense<0.000000e+00> : vector<5x16xf32>
      %44 = tpu.matmul %43, %12, %cst_31 {dimension_numbers = #tpu.dot_dimension_numbers<[1], [0], [0], [1], [0, 0, 1, 1], [], []>} : vector<5x16xf32>, vector<16x16xf32>, vector<5x16xf32> -> vector<5x16xf32>
      %cst_32 = arith.constant 0.000000e+00 : f32
      %45 = vector.broadcast %cst_32 : f32 to vector<5x16xf32>
      %46 = arith.cmpf oge, %44, %45 : vector<5x16xf32>
      %47 = vector.broadcast %8 : f32 to vector<5x16xf32>
      %48 = arith.mulf %47, %44 : vector<5x16xf32>
      %49 = arith.select %46, %44, %48 : vector<5x16xi1>, vector<5x16xf32>
      %c5_i32_33 = arith.constant 5 : i32
      %50 = arith.muli %arg16, %c5_i32_33 : i32
      %51 = arith.index_cast %50 : i32 to index
      %c0_34 = arith.constant 0 : index
      %52 = vector.load %arg15[%51, %c0_34] : memref<40x64xf32, #tpu.memory_space<vmem>>, vector<5x16xf32>
      tpu.vector_store %arg15[%51, %c0_34], %49 {strides = array<i32>} : memref<40x64xf32, #tpu.memory_space<vmem>>, vector<5x16xf32>,
      %c0_35 = arith.constant 0 : index
      %c16 = arith.constant 16 : index
      %53 = vector.load %arg14[%c0_35, %c16] : memref<40x64xf32, #tpu.memory_space<vmem>>, vector<40x16xf32>
      %cst_36 = arith.constant dense<0.000000e+00> : vector<5x16xf32>
      %54 = tpu.matmul %19, %53, %cst_36 {dimension_numbers = #tpu.dot_dimension_numbers<[1], [0], [0], [1], [0, 0, 1, 1], [], []>} : vector<5x40xf32>, vector<40x16xf32>, vector<5x16xf32> -> vector<5x16xf32>
      %c5_i32_37 = arith.constant 5 : i32
      %55 = arith.muli %arg16, %c5_i32_37 : i32
      %56 = arith.index_cast %55 : i32 to index
      %c5 = arith.constant 5 : index
      %57 = vector.load %arg2[%56, %c5] : memref<40x20xf32, #tpu.memory_space<vmem>>, vector<5x5xf32>
      %cst_38 = arith.constant dense<0.000000e+00> : vector<5x16xf32>
      %58 = tpu.matmul %57, %54, %cst_38 {dimension_numbers = #tpu.dot_dimension_numbers<[1], [0], [0], [1], [0, 0, 1, 1], [], []>} : vector<5x5xf32>, vector<5x16xf32>, vector<5x16xf32> -> vector<5x16xf32>
      %cst_39 = arith.constant 0.000000e+00 : f32
      %59 = vector.broadcast %cst_39 : f32 to vector<5x16xf32>
      %60 = arith.cmpf oge, %58, %59 : vector<5x16xf32>
      %61 = vector.broadcast %8 : f32 to vector<5x16xf32>
      %62 = arith.mulf %61, %58 : vector<5x16xf32>
      %63 = arith.select %60, %58, %62 : vector<5x16xi1>, vector<5x16xf32>
      %cst_40 = arith.constant 0.000000e+00 : f32
      %64 = vector.broadcast %cst_40 : f32 to vector<5x16xf32>
      %65 = arith.cmpf oge, %54, %64 : vector<5x16xf32>
      %66 = vector.broadcast %8 : f32 to vector<5x16xf32>
      %67 = arith.mulf %66, %54 : vector<5x16xf32>
      %68 = arith.select %65, %54, %67 : vector<5x16xi1>, vector<5x16xf32>
      %69 = arith.mulf %57, %4 : vector<5x5xf32>
      %cst_41 = arith.constant dense<0.000000e+00> : vector<5xf32>
      %70 = vector.multi_reduction <add>, %69, %cst_41 [1] : vector<5x5xf32> to vector<5xf32>
      %71 = vector.shape_cast %70 : vector<5xf32> to vector<5x1xf32>
      %cst_42 = arith.constant dense<0.000000e+00> : vector<5x16xf32>
      %72 = tpu.matmul %57, %63, %cst_42 {dimension_numbers = #tpu.dot_dimension_numbers<[1], [0], [0], [1], [0, 0, 1, 1], [], []>} : vector<5x5xf32>, vector<5x16xf32>, vector<5x16xf32> -> vector<5x16xf32>
      %73 = arith.subf %68, %63 : vector<5x16xf32>
      %74 = vector.broadcast %71 : vector<5x1xf32> to vector<5x16xf32>
      %75 = arith.mulf %74, %73 : vector<5x16xf32>
      %76 = arith.addf %72, %75 : vector<5x16xf32>
      %cst_43 = arith.constant dense<0.000000e+00> : vector<5x16xf32>
      %77 = tpu.matmul %76, %12, %cst_43 {dimension_numbers = #tpu.dot_dimension_numbers<[1], [0], [0], [1], [0, 0, 1, 1], [], []>} : vector<5x16xf32>, vector<16x16xf32>, vector<5x16xf32> -> vector<5x16xf32>
      %cst_44 = arith.constant 0.000000e+00 : f32
      %78 = vector.broadcast %cst_44 : f32 to vector<5x16xf32>
      %79 = arith.cmpf oge, %77, %78 : vector<5x16xf32>
      %80 = vector.broadcast %8 : f32 to vector<5x16xf32>
      %81 = arith.mulf %80, %77 : vector<5x16xf32>
      %82 = arith.select %79, %77, %81 : vector<5x16xi1>, vector<5x16xf32>
      %c5_i32_45 = arith.constant 5 : i32
      %83 = arith.muli %arg16, %c5_i32_45 : i32
      %84 = arith.index_cast %83 : i32 to index
      %c16_46 = arith.constant 16 : index
      %85 = vector.load %arg15[%84, %c16_46] : memref<40x64xf32, #tpu.memory_space<vmem>>, vector<5x16xf32>
      tpu.vector_store %arg15[%84, %c16_46], %82 {strides = array<i32>} : memref<40x64xf32, #tpu.memory_space<vmem>>, vector<5x16xf32>,
      %c0_47 = arith.constant 0 : index
      %c32 = arith.constant 32 : index
      %86 = vector.load %arg14[%c0_47, %c32] : memref<40x64xf32, #tpu.memory_space<vmem>>, vector<40x16xf32>
      %cst_48 = arith.constant dense<0.000000e+00> : vector<5x16xf32>
      %87 = tpu.matmul %19, %86, %cst_48 {dimension_numbers = #tpu.dot_dimension_numbers<[1], [0], [0], [1], [0, 0, 1, 1], [], []>} : vector<5x40xf32>, vector<40x16xf32>, vector<5x16xf32> -> vector<5x16xf32>
      %c5_i32_49 = arith.constant 5 : i32
      %88 = arith.muli %arg16, %c5_i32_49 : i32
      %89 = arith.index_cast %88 : i32 to index
      %c10 = arith.constant 10 : index
      %90 = vector.load %arg2[%89, %c10] : memref<40x20xf32, #tpu.memory_space<vmem>>, vector<5x5xf32>
      %cst_50 = arith.constant dense<0.000000e+00> : vector<5x16xf32>
      %91 = tpu.matmul %90, %87, %cst_50 {dimension_numbers = #tpu.dot_dimension_numbers<[1], [0], [0], [1], [0, 0, 1, 1], [], []>} : vector<5x5xf32>, vector<5x16xf32>, vector<5x16xf32> -> vector<5x16xf32>
      %cst_51 = arith.constant 0.000000e+00 : f32
      %92 = vector.broadcast %cst_51 : f32 to vector<5x16xf32>
      %93 = arith.cmpf oge, %91, %92 : vector<5x16xf32>
      %94 = vector.broadcast %8 : f32 to vector<5x16xf32>
      %95 = arith.mulf %94, %91 : vector<5x16xf32>
      %96 = arith.select %93, %91, %95 : vector<5x16xi1>, vector<5x16xf32>
      %cst_52 = arith.constant 0.000000e+00 : f32
      %97 = vector.broadcast %cst_52 : f32 to vector<5x16xf32>
      %98 = arith.cmpf oge, %87, %97 : vector<5x16xf32>
      %99 = vector.broadcast %8 : f32 to vector<5x16xf32>
      %100 = arith.mulf %99, %87 : vector<5x16xf32>
      %101 = arith.select %98, %87, %100 : vector<5x16xi1>, vector<5x16xf32>
      %102 = arith.mulf %90, %4 : vector<5x5xf32>
      %cst_53 = arith.constant dense<0.000000e+00> : vector<5xf32>
      %103 = vector.multi_reduction <add>, %102, %cst_53 [1] : vector<5x5xf32> to vector<5xf32>
      %104 = vector.shape_cast %103 : vector<5xf32> to vector<5x1xf32>
      %cst_54 = arith.constant dense<0.000000e+00> : vector<5x16xf32>
      %105 = tpu.matmul %90, %96, %cst_54 {dimension_numbers = #tpu.dot_dimension_numbers<[1], [0], [0], [1], [0, 0, 1, 1], [], []>} : vector<5x5xf32>, vector<5x16xf32>, vector<5x16xf32> -> vector<5x16xf32>
      %106 = arith.subf %101, %96 : vector<5x16xf32>
      %107 = vector.broadcast %104 : vector<5x1xf32> to vector<5x16xf32>
      %108 = arith.mulf %107, %106 : vector<5x16xf32>
      %109 = arith.addf %105, %108 : vector<5x16xf32>
      %cst_55 = arith.constant dense<0.000000e+00> : vector<5x16xf32>
      %110 = tpu.matmul %109, %12, %cst_55 {dimension_numbers = #tpu.dot_dimension_numbers<[1], [0], [0], [1], [0, 0, 1, 1], [], []>} : vector<5x16xf32>, vector<16x16xf32>, vector<5x16xf32> -> vector<5x16xf32>
      %cst_56 = arith.constant 0.000000e+00 : f32
      %111 = vector.broadcast %cst_56 : f32 to vector<5x16xf32>
      %112 = arith.cmpf oge, %110, %111 : vector<5x16xf32>
      %113 = vector.broadcast %8 : f32 to vector<5x16xf32>
      %114 = arith.mulf %113, %110 : vector<5x16xf32>
      %115 = arith.select %112, %110, %114 : vector<5x16xi1>, vector<5x16xf32>
      %c5_i32_57 = arith.constant 5 : i32
      %116 = arith.muli %arg16, %c5_i32_57 : i32
      %117 = arith.index_cast %116 : i32 to index
      %c32_58 = arith.constant 32 : index
      %118 = vector.load %arg15[%117, %c32_58] : memref<40x64xf32, #tpu.memory_space<vmem>>, vector<5x16xf32>
      tpu.vector_store %arg15[%117, %c32_58], %115 {strides = array<i32>} : memref<40x64xf32, #tpu.memory_space<vmem>>, vector<5x16xf32>,
      %c0_59 = arith.constant 0 : index
      %c48 = arith.constant 48 : index
      %119 = vector.load %arg14[%c0_59, %c48] : memref<40x64xf32, #tpu.memory_space<vmem>>, vector<40x16xf32>
      %cst_60 = arith.constant dense<0.000000e+00> : vector<5x16xf32>
      %120 = tpu.matmul %19, %119, %cst_60 {dimension_numbers = #tpu.dot_dimension_numbers<[1], [0], [0], [1], [0, 0, 1, 1], [], []>} : vector<5x40xf32>, vector<40x16xf32>, vector<5x16xf32> -> vector<5x16xf32>
      %c5_i32_61 = arith.constant 5 : i32
      %121 = arith.muli %arg16, %c5_i32_61 : i32
      %122 = arith.index_cast %121 : i32 to index
      %c15 = arith.constant 15 : index
      %123 = vector.load %arg2[%122, %c15] : memref<40x20xf32, #tpu.memory_space<vmem>>, vector<5x5xf32>
      %cst_62 = arith.constant dense<0.000000e+00> : vector<5x16xf32>
      %124 = tpu.matmul %123, %120, %cst_62 {dimension_numbers = #tpu.dot_dimension_numbers<[1], [0], [0], [1], [0, 0, 1, 1], [], []>} : vector<5x5xf32>, vector<5x16xf32>, vector<5x16xf32> -> vector<5x16xf32>
      %cst_63 = arith.constant 0.000000e+00 : f32
      %125 = vector.broadcast %cst_63 : f32 to vector<5x16xf32>
      %126 = arith.cmpf oge, %124, %125 : vector<5x16xf32>
      %127 = vector.broadcast %8 : f32 to vector<5x16xf32>
      %128 = arith.mulf %127, %124 : vector<5x16xf32>
      %129 = arith.select %126, %124, %128 : vector<5x16xi1>, vector<5x16xf32>
      %cst_64 = arith.constant 0.000000e+00 : f32
      %130 = vector.broadcast %cst_64 : f32 to vector<5x16xf32>
      %131 = arith.cmpf oge, %120, %130 : vector<5x16xf32>
      %132 = vector.broadcast %8 : f32 to vector<5x16xf32>
      %133 = arith.mulf %132, %120 : vector<5x16xf32>
      %134 = arith.select %131, %120, %133 : vector<5x16xi1>, vector<5x16xf32>
      %135 = arith.mulf %123, %4 : vector<5x5xf32>
      %cst_65 = arith.constant dense<0.000000e+00> : vector<5xf32>
      %136 = vector.multi_reduction <add>, %135, %cst_65 [1] : vector<5x5xf32> to vector<5xf32>
      %137 = vector.shape_cast %136 : vector<5xf32> to vector<5x1xf32>
      %cst_66 = arith.constant dense<0.000000e+00> : vector<5x16xf32>
      %138 = tpu.matmul %123, %129, %cst_66 {dimension_numbers = #tpu.dot_dimension_numbers<[1], [0], [0], [1], [0, 0, 1, 1], [], []>} : vector<5x5xf32>, vector<5x16xf32>, vector<5x16xf32> -> vector<5x16xf32>
      %139 = arith.subf %134, %129 : vector<5x16xf32>
      %140 = vector.broadcast %137 : vector<5x1xf32> to vector<5x16xf32>
      %141 = arith.mulf %140, %139 : vector<5x16xf32>
      %142 = arith.addf %138, %141 : vector<5x16xf32>
      %cst_67 = arith.constant dense<0.000000e+00> : vector<5x16xf32>
      %143 = tpu.matmul %142, %12, %cst_67 {dimension_numbers = #tpu.dot_dimension_numbers<[1], [0], [0], [1], [0, 0, 1, 1], [], []>} : vector<5x16xf32>, vector<16x16xf32>, vector<5x16xf32> -> vector<5x16xf32>
      %cst_68 = arith.constant 0.000000e+00 : f32
      %144 = vector.broadcast %cst_68 : f32 to vector<5x16xf32>
      %145 = arith.cmpf oge, %143, %144 : vector<5x16xf32>
      %146 = vector.broadcast %8 : f32 to vector<5x16xf32>
      %147 = arith.mulf %146, %143 : vector<5x16xf32>
      %148 = arith.select %145, %143, %147 : vector<5x16xi1>, vector<5x16xf32>
      %c5_i32_69 = arith.constant 5 : i32
      %149 = arith.muli %arg16, %c5_i32_69 : i32
      %150 = arith.index_cast %149 : i32 to index
      %c48_70 = arith.constant 48 : index
      %151 = vector.load %arg15[%150, %c48_70] : memref<40x64xf32, #tpu.memory_space<vmem>>, vector<5x16xf32>
      tpu.vector_store %arg15[%150, %c48_70], %148 {strides = array<i32>} : memref<40x64xf32, #tpu.memory_space<vmem>>, vector<5x16xf32>,
    }
    %c8_i32_11 = arith.constant 8 : i32
    %c0_i32_12 = arith.constant 0 : i32
    %c8_i32_13 = arith.constant 8 : i32
    %15 = arith.addi %c0_i32_12, %c8_i32_13 : i32
    %c1_i32_14 = arith.constant 1 : i32
    scf.for %arg16 = %c0_i32_12 to %15 step %c1_i32_14  : i32 {
      %c5_i32_20 = arith.constant 5 : i32
      %17 = arith.muli %arg16, %c5_i32_20 : i32
      %18 = arith.index_cast %17 : i32 to index
      %c0_21 = arith.constant 0 : index
      %19 = vector.load %arg0[%18, %c0_21] : memref<40x2xf32, #tpu.memory_space<vmem>>, vector<5x2xf32>
      %cst = arith.constant 0.000000e+00 : f32
      %20 = vector.broadcast %cst : f32 to vector<5x2xf32>
      %21 = arith.cmpf oge, %19, %20 : vector<5x2xf32>
      %22 = vector.broadcast %5 : f32 to vector<5x2xf32>
      %23 = arith.mulf %22, %19 : vector<5x2xf32>
      %24 = arith.select %21, %19, %23 : vector<5x2xi1>, vector<5x2xf32>
      %c5_i32_22 = arith.constant 5 : i32
      %25 = arith.muli %arg16, %c5_i32_22 : i32
      %26 = arith.index_cast %25 : i32 to index
      %c0_23 = arith.constant 0 : index
      %27 = vector.load %arg2[%26, %c0_23] : memref<40x20xf32, #tpu.memory_space<vmem>>, vector<5x5xf32>
      %cst_24 = arith.constant dense<0.000000e+00> : vector<5x2xf32>
      %28 = tpu.matmul %27, %19, %cst_24 {dimension_numbers = #tpu.dot_dimension_numbers<[1], [0], [0], [1], [0, 0, 1, 1], [], []>} : vector<5x5xf32>, vector<5x2xf32>, vector<5x2xf32> -> vector<5x2xf32>
      %cst_25 = arith.constant 0.000000e+00 : f32
      %29 = vector.broadcast %cst_25 : f32 to vector<5x2xf32>
      %30 = arith.cmpf oge, %28, %29 : vector<5x2xf32>
      %31 = vector.broadcast %5 : f32 to vector<5x2xf32>
      %32 = arith.mulf %31, %28 : vector<5x2xf32>
      %33 = arith.select %30, %28, %32 : vector<5x2xi1>, vector<5x2xf32>
      %34 = arith.mulf %27, %4 : vector<5x5xf32>
      %cst_26 = arith.constant dense<0.000000e+00> : vector<5xf32>
      %35 = vector.multi_reduction <add>, %34, %cst_26 [1] : vector<5x5xf32> to vector<5xf32>
      %36 = vector.shape_cast %35 : vector<5xf32> to vector<5x1xf32>
      %cst_27 = arith.constant dense<0.000000e+00> : vector<5x2xf32>
      %37 = tpu.matmul %27, %33, %cst_27 {dimension_numbers = #tpu.dot_dimension_numbers<[1], [0], [0], [1], [0, 0, 1, 1], [], []>} : vector<5x5xf32>, vector<5x2xf32>, vector<5x2xf32> -> vector<5x2xf32>
      %38 = arith.subf %24, %33 : vector<5x2xf32>
      %39 = vector.broadcast %36 : vector<5x1xf32> to vector<5x2xf32>
      %40 = arith.mulf %39, %38 : vector<5x2xf32>
      %41 = arith.addf %37, %40 : vector<5x2xf32>
      %42 = vector.extract_strided_slice %41 {offsets = [0, 0], sizes = [5, 1], strides = [1, 1]} : vector<5x2xf32> to vector<5x1xf32>
      %43 = vector.extract_strided_slice %9 {offsets = [0, 0], sizes = [1, 16], strides = [1, 1]} : vector<2x16xf32> to vector<1x16xf32>
      %44 = vector.broadcast %42 : vector<5x1xf32> to vector<5x16xf32>
      %45 = vector.broadcast %43 : vector<1x16xf32> to vector<5x16xf32>
      %46 = arith.mulf %44, %45 : vector<5x16xf32>
      %47 = vector.extract_strided_slice %41 {offsets = [0, 1], sizes = [5, 1], strides = [1, 1]} : vector<5x2xf32> to vector<5x1xf32>
      %48 = vector.extract_strided_slice %9 {offsets = [1, 0], sizes = [1, 16], strides = [1, 1]} : vector<2x16xf32> to vector<1x16xf32>
      %49 = vector.broadcast %47 : vector<5x1xf32> to vector<5x16xf32>
      %50 = vector.broadcast %48 : vector<1x16xf32> to vector<5x16xf32>
      %51 = arith.mulf %49, %50 : vector<5x16xf32>
      %52 = arith.addf %46, %51 : vector<5x16xf32>
      %cst_28 = arith.constant 0.000000e+00 : f32
      %53 = vector.broadcast %cst_28 : f32 to vector<5x16xf32>
      %54 = arith.cmpf oge, %52, %53 : vector<5x16xf32>
      %55 = vector.broadcast %5 : f32 to vector<5x16xf32>
      %56 = arith.mulf %55, %52 : vector<5x16xf32>
      %57 = arith.select %54, %52, %56 : vector<5x16xi1>, vector<5x16xf32>
      %c5_i32_29 = arith.constant 5 : i32
      %58 = arith.muli %arg16, %c5_i32_29 : i32
      %59 = arith.index_cast %58 : i32 to index
      %c0_30 = arith.constant 0 : index
      %60 = vector.load %arg13[%59, %c0_30] : memref<40x64xf32, #tpu.memory_space<vmem>>, vector<5x16xf32>
      tpu.vector_store %arg13[%59, %c0_30], %57 {strides = array<i32>} : memref<40x64xf32, #tpu.memory_space<vmem>>, vector<5x16xf32>,
      %c5_i32_31 = arith.constant 5 : i32
      %61 = arith.muli %arg16, %c5_i32_31 : i32
      %62 = arith.index_cast %61 : i32 to index
      %c5 = arith.constant 5 : index
      %63 = vector.load %arg2[%62, %c5] : memref<40x20xf32, #tpu.memory_space<vmem>>, vector<5x5xf32>
      %cst_32 = arith.constant dense<0.000000e+00> : vector<5x2xf32>
      %64 = tpu.matmul %63, %19, %cst_32 {dimension_numbers = #tpu.dot_dimension_numbers<[1], [0], [0], [1], [0, 0, 1, 1], [], []>} : vector<5x5xf32>, vector<5x2xf32>, vector<5x2xf32> -> vector<5x2xf32>
      %cst_33 = arith.constant 0.000000e+00 : f32
      %65 = vector.broadcast %cst_33 : f32 to vector<5x2xf32>
      %66 = arith.cmpf oge, %64, %65 : vector<5x2xf32>
      %67 = vector.broadcast %5 : f32 to vector<5x2xf32>
      %68 = arith.mulf %67, %64 : vector<5x2xf32>
      %69 = arith.select %66, %64, %68 : vector<5x2xi1>, vector<5x2xf32>
      %70 = arith.mulf %63, %4 : vector<5x5xf32>
      %cst_34 = arith.constant dense<0.000000e+00> : vector<5xf32>
      %71 = vector.multi_reduction <add>, %70, %cst_34 [1] : vector<5x5xf32> to vector<5xf32>
      %72 = vector.shape_cast %71 : vector<5xf32> to vector<5x1xf32>
      %cst_35 = arith.constant dense<0.000000e+00> : vector<5x2xf32>
      %73 = tpu.matmul %63, %69, %cst_35 {dimension_numbers = #tpu.dot_dimension_numbers<[1], [0], [0], [1], [0, 0, 1, 1], [], []>} : vector<5x5xf32>, vector<5x2xf32>, vector<5x2xf32> -> vector<5x2xf32>
      %74 = arith.subf %24, %69 : vector<5x2xf32>
      %75 = vector.broadcast %72 : vector<5x1xf32> to vector<5x2xf32>
      %76 = arith.mulf %75, %74 : vector<5x2xf32>
      %77 = arith.addf %73, %76 : vector<5x2xf32>
      %78 = vector.extract_strided_slice %77 {offsets = [0, 0], sizes = [5, 1], strides = [1, 1]} : vector<5x2xf32> to vector<5x1xf32>
      %79 = vector.extract_strided_slice %9 {offsets = [0, 0], sizes = [1, 16], strides = [1, 1]} : vector<2x16xf32> to vector<1x16xf32>
      %80 = vector.broadcast %78 : vector<5x1xf32> to vector<5x16xf32>
      %81 = vector.broadcast %79 : vector<1x16xf32> to vector<5x16xf32>
      %82 = arith.mulf %80, %81 : vector<5x16xf32>
      %83 = vector.extract_strided_slice %77 {offsets = [0, 1], sizes = [5, 1], strides = [1, 1]} : vector<5x2xf32> to vector<5x1xf32>
      %84 = vector.extract_strided_slice %9 {offsets = [1, 0], sizes = [1, 16], strides = [1, 1]} : vector<2x16xf32> to vector<1x16xf32>
      %85 = vector.broadcast %83 : vector<5x1xf32> to vector<5x16xf32>
      %86 = vector.broadcast %84 : vector<1x16xf32> to vector<5x16xf32>
      %87 = arith.mulf %85, %86 : vector<5x16xf32>
      %88 = arith.addf %82, %87 : vector<5x16xf32>
      %cst_36 = arith.constant 0.000000e+00 : f32
      %89 = vector.broadcast %cst_36 : f32 to vector<5x16xf32>
      %90 = arith.cmpf oge, %88, %89 : vector<5x16xf32>
      %91 = vector.broadcast %5 : f32 to vector<5x16xf32>
      %92 = arith.mulf %91, %88 : vector<5x16xf32>
      %93 = arith.select %90, %88, %92 : vector<5x16xi1>, vector<5x16xf32>
      %c5_i32_37 = arith.constant 5 : i32
      %94 = arith.muli %arg16, %c5_i32_37 : i32
      %95 = arith.index_cast %94 : i32 to index
      %c16 = arith.constant 16 : index
      %96 = vector.load %arg13[%95, %c16] : memref<40x64xf32, #tpu.memory_space<vmem>>, vector<5x16xf32>
      tpu.vector_store %arg13[%95, %c16], %93 {strides = array<i32>} : memref<40x64xf32, #tpu.memory_space<vmem>>, vector<5x16xf32>,
      %c5_i32_38 = arith.constant 5 : i32
      %97 = arith.muli %arg16, %c5_i32_38 : i32
      %98 = arith.index_cast %97 : i32 to index
      %c10 = arith.constant 10 : index
      %99 = vector.load %arg2[%98, %c10] : memref<40x20xf32, #tpu.memory_space<vmem>>, vector<5x5xf32>
      %cst_39 = arith.constant dense<0.000000e+00> : vector<5x2xf32>
      %100 = tpu.matmul %99, %19, %cst_39 {dimension_numbers = #tpu.dot_dimension_numbers<[1], [0], [0], [1], [0, 0, 1, 1], [], []>} : vector<5x5xf32>, vector<5x2xf32>, vector<5x2xf32> -> vector<5x2xf32>
      %cst_40 = arith.constant 0.000000e+00 : f32
      %101 = vector.broadcast %cst_40 : f32 to vector<5x2xf32>
      %102 = arith.cmpf oge, %100, %101 : vector<5x2xf32>
      %103 = vector.broadcast %5 : f32 to vector<5x2xf32>
      %104 = arith.mulf %103, %100 : vector<5x2xf32>
      %105 = arith.select %102, %100, %104 : vector<5x2xi1>, vector<5x2xf32>
      %106 = arith.mulf %99, %4 : vector<5x5xf32>
      %cst_41 = arith.constant dense<0.000000e+00> : vector<5xf32>
      %107 = vector.multi_reduction <add>, %106, %cst_41 [1] : vector<5x5xf32> to vector<5xf32>
      %108 = vector.shape_cast %107 : vector<5xf32> to vector<5x1xf32>
      %cst_42 = arith.constant dense<0.000000e+00> : vector<5x2xf32>
      %109 = tpu.matmul %99, %105, %cst_42 {dimension_numbers = #tpu.dot_dimension_numbers<[1], [0], [0], [1], [0, 0, 1, 1], [], []>} : vector<5x5xf32>, vector<5x2xf32>, vector<5x2xf32> -> vector<5x2xf32>
      %110 = arith.subf %24, %105 : vector<5x2xf32>
      %111 = vector.broadcast %108 : vector<5x1xf32> to vector<5x2xf32>
      %112 = arith.mulf %111, %110 : vector<5x2xf32>
      %113 = arith.addf %109, %112 : vector<5x2xf32>
      %114 = vector.extract_strided_slice %113 {offsets = [0, 0], sizes = [5, 1], strides = [1, 1]} : vector<5x2xf32> to vector<5x1xf32>
      %115 = vector.extract_strided_slice %9 {offsets = [0, 0], sizes = [1, 16], strides = [1, 1]} : vector<2x16xf32> to vector<1x16xf32>
      %116 = vector.broadcast %114 : vector<5x1xf32> to vector<5x16xf32>
      %117 = vector.broadcast %115 : vector<1x16xf32> to vector<5x16xf32>
      %118 = arith.mulf %116, %117 : vector<5x16xf32>
      %119 = vector.extract_strided_slice %113 {offsets = [0, 1], sizes = [5, 1], strides = [1, 1]} : vector<5x2xf32> to vector<5x1xf32>
      %120 = vector.extract_strided_slice %9 {offsets = [1, 0], sizes = [1, 16], strides = [1, 1]} : vector<2x16xf32> to vector<1x16xf32>
      %121 = vector.broadcast %119 : vector<5x1xf32> to vector<5x16xf32>
      %122 = vector.broadcast %120 : vector<1x16xf32> to vector<5x16xf32>
      %123 = arith.mulf %121, %122 : vector<5x16xf32>
      %124 = arith.addf %118, %123 : vector<5x16xf32>
      %cst_43 = arith.constant 0.000000e+00 : f32
      %125 = vector.broadcast %cst_43 : f32 to vector<5x16xf32>
      %126 = arith.cmpf oge, %124, %125 : vector<5x16xf32>
      %127 = vector.broadcast %5 : f32 to vector<5x16xf32>
      %128 = arith.mulf %127, %124 : vector<5x16xf32>
      %129 = arith.select %126, %124, %128 : vector<5x16xi1>, vector<5x16xf32>
      %c5_i32_44 = arith.constant 5 : i32
      %130 = arith.muli %arg16, %c5_i32_44 : i32
      %131 = arith.index_cast %130 : i32 to index
      %c32 = arith.constant 32 : index
      %132 = vector.load %arg13[%131, %c32] : memref<40x64xf32, #tpu.memory_space<vmem>>, vector<5x16xf32>
      tpu.vector_store %arg13[%131, %c32], %129 {strides = array<i32>} : memref<40x64xf32, #tpu.memory_space<vmem>>, vector<5x16xf32>,
      %c5_i32_45 = arith.constant 5 : i32
      %133 = arith.muli %arg16, %c5_i32_45 : i32
      %134 = arith.index_cast %133 : i32 to index
      %c15 = arith.constant 15 : index
      %135 = vector.load %arg2[%134, %c15] : memref<40x20xf32, #tpu.memory_space<vmem>>, vector<5x5xf32>
      %cst_46 = arith.constant dense<0.000000e+00> : vector<5x2xf32>
      %136 = tpu.matmul %135, %19, %cst_46 {dimension_numbers = #tpu.dot_dimension_numbers<[1], [0], [0], [1], [0, 0, 1, 1], [], []>} : vector<5x5xf32>, vector<5x2xf32>, vector<5x2xf32> -> vector<5x2xf32>
      %cst_47 = arith.constant 0.000000e+00 : f32
      %137 = vector.broadcast %cst_47 : f32 to vector<5x2xf32>
      %138 = arith.cmpf oge, %136, %137 : vector<5x2xf32>
      %139 = vector.broadcast %5 : f32 to vector<5x2xf32>
      %140 = arith.mulf %139, %136 : vector<5x2xf32>
      %141 = arith.select %138, %136, %140 : vector<5x2xi1>, vector<5x2xf32>
      %142 = arith.mulf %135, %4 : vector<5x5xf32>
      %cst_48 = arith.constant dense<0.000000e+00> : vector<5xf32>
      %143 = vector.multi_reduction <add>, %142, %cst_48 [1] : vector<5x5xf32> to vector<5xf32>
      %144 = vector.shape_cast %143 : vector<5xf32> to vector<5x1xf32>
      %cst_49 = arith.constant dense<0.000000e+00> : vector<5x2xf32>
      %145 = tpu.matmul %135, %141, %cst_49 {dimension_numbers = #tpu.dot_dimension_numbers<[1], [0], [0], [1], [0, 0, 1, 1], [], []>} : vector<5x5xf32>, vector<5x2xf32>, vector<5x2xf32> -> vector<5x2xf32>
      %146 = arith.subf %24, %141 : vector<5x2xf32>
      %147 = vector.broadcast %144 : vector<5x1xf32> to vector<5x2xf32>
      %148 = arith.mulf %147, %146 : vector<5x2xf32>
      %149 = arith.addf %145, %148 : vector<5x2xf32>
      %150 = vector.extract_strided_slice %149 {offsets = [0, 0], sizes = [5, 1], strides = [1, 1]} : vector<5x2xf32> to vector<5x1xf32>
      %151 = vector.extract_strided_slice %9 {offsets = [0, 0], sizes = [1, 16], strides = [1, 1]} : vector<2x16xf32> to vector<1x16xf32>
      %152 = vector.broadcast %150 : vector<5x1xf32> to vector<5x16xf32>
      %153 = vector.broadcast %151 : vector<1x16xf32> to vector<5x16xf32>
      %154 = arith.mulf %152, %153 : vector<5x16xf32>
      %155 = vector.extract_strided_slice %149 {offsets = [0, 1], sizes = [5, 1], strides = [1, 1]} : vector<5x2xf32> to vector<5x1xf32>
      %156 = vector.extract_strided_slice %9 {offsets = [1, 0], sizes = [1, 16], strides = [1, 1]} : vector<2x16xf32> to vector<1x16xf32>
      %157 = vector.broadcast %155 : vector<5x1xf32> to vector<5x16xf32>
      %158 = vector.broadcast %156 : vector<1x16xf32> to vector<5x16xf32>
      %159 = arith.mulf %157, %158 : vector<5x16xf32>
      %160 = arith.addf %154, %159 : vector<5x16xf32>
      %cst_50 = arith.constant 0.000000e+00 : f32
      %161 = vector.broadcast %cst_50 : f32 to vector<5x16xf32>
      %162 = arith.cmpf oge, %160, %161 : vector<5x16xf32>
      %163 = vector.broadcast %5 : f32 to vector<5x16xf32>
      %164 = arith.mulf %163, %160 : vector<5x16xf32>
      %165 = arith.select %162, %160, %164 : vector<5x16xi1>, vector<5x16xf32>
      %c5_i32_51 = arith.constant 5 : i32
      %166 = arith.muli %arg16, %c5_i32_51 : i32
      %167 = arith.index_cast %166 : i32 to index
      %c48 = arith.constant 48 : index
      %168 = vector.load %arg13[%167, %c48] : memref<40x64xf32, #tpu.memory_space<vmem>>, vector<5x16xf32>
      tpu.vector_store %arg13[%167, %c48], %165 {strides = array<i32>} : memref<40x64xf32, #tpu.memory_space<vmem>>, vector<5x16xf32>,
    }
    %c8_i32_15 = arith.constant 8 : i32
    %c0_i32_16 = arith.constant 0 : i32
    %c5_i32_17 = arith.constant 5 : i32
    %16 = arith.addi %c0_i32_16, %c5_i32_17 : i32
    %c1_i32_18 = arith.constant 1 : i32
    scf.for %arg16 = %c0_i32_16 to %16 step %c1_i32_18  : i32 {
      %17 = arith.index_cast %arg16 : i32 to index
      %c0_20 = arith.constant 0 : index
      %c0_21 = arith.constant 0 : index
      %18 = vector.load %arg4[%17, %c0_20, %c0_21] : memref<5x8x40xf32, #tpu.memory_space<vmem>>, vector<1x8x40xf32>
      %19 = vector.shape_cast %18 : vector<1x8x40xf32> to vector<8x40xf32>
      %c0_22 = arith.constant 0 : index
      %c0_23 = arith.constant 0 : index
      %20 = vector.load %arg13[%c0_22, %c0_23] : memref<40x64xf32, #tpu.memory_space<vmem>>, vector<40x16xf32>
      %cst = arith.constant dense<0.000000e+00> : vector<8x16xf32>
      %21 = tpu.matmul %19, %20, %cst {dimension_numbers = #tpu.dot_dimension_numbers<[1], [0], [0], [1], [0, 0, 1, 1], [], []>} : vector<8x40xf32>, vector<40x16xf32>, vector<8x16xf32> -> vector<8x16xf32>
      %c8_i32_24 = arith.constant 8 : i32
      %22 = arith.muli %arg16, %c8_i32_24 : i32
      %23 = arith.index_cast %22 : i32 to index
      %c0_25 = arith.constant 0 : index
      %24 = vector.load %arg3[%23, %c0_25] : memref<40x32xf32, #tpu.memory_space<vmem>>, vector<8x8xf32>
      %cst_26 = arith.constant dense<0.000000e+00> : vector<8x16xf32>
      %25 = tpu.matmul %24, %21, %cst_26 {dimension_numbers = #tpu.dot_dimension_numbers<[1], [0], [0], [1], [0, 0, 1, 1], [], []>} : vector<8x8xf32>, vector<8x16xf32>, vector<8x16xf32> -> vector<8x16xf32>
      %cst_27 = arith.constant dense<0.000000e+00> : vector<8x16xf32>
      %26 = tpu.matmul %25, %10, %cst_27 {dimension_numbers = #tpu.dot_dimension_numbers<[1], [0], [0], [1], [0, 0, 1, 1], [], []>} : vector<8x16xf32>, vector<16x16xf32>, vector<8x16xf32> -> vector<8x16xf32>
      %cst_28 = arith.constant 0.000000e+00 : f32
      %27 = vector.broadcast %cst_28 : f32 to vector<8x16xf32>
      %28 = arith.cmpf oge, %26, %27 : vector<8x16xf32>
      %29 = vector.broadcast %6 : f32 to vector<8x16xf32>
      %30 = arith.mulf %29, %26 : vector<8x16xf32>
      %31 = arith.select %28, %26, %30 : vector<8x16xi1>, vector<8x16xf32>
      %c0_29 = arith.constant 0 : index
      %c16 = arith.constant 16 : index
      %32 = vector.load %arg13[%c0_29, %c16] : memref<40x64xf32, #tpu.memory_space<vmem>>, vector<40x16xf32>
      %cst_30 = arith.constant dense<0.000000e+00> : vector<8x16xf32>
      %33 = tpu.matmul %19, %32, %cst_30 {dimension_numbers = #tpu.dot_dimension_numbers<[1], [0], [0], [1], [0, 0, 1, 1], [], []>} : vector<8x40xf32>, vector<40x16xf32>, vector<8x16xf32> -> vector<8x16xf32>
      %c8_i32_31 = arith.constant 8 : i32
      %34 = arith.muli %arg16, %c8_i32_31 : i32
      %35 = arith.index_cast %34 : i32 to index
      %c8 = arith.constant 8 : index
      %36 = vector.load %arg3[%35, %c8] : memref<40x32xf32, #tpu.memory_space<vmem>>, vector<8x8xf32>
      %cst_32 = arith.constant dense<0.000000e+00> : vector<8x16xf32>
      %37 = tpu.matmul %36, %33, %cst_32 {dimension_numbers = #tpu.dot_dimension_numbers<[1], [0], [0], [1], [0, 0, 1, 1], [], []>} : vector<8x8xf32>, vector<8x16xf32>, vector<8x16xf32> -> vector<8x16xf32>
      %cst_33 = arith.constant dense<0.000000e+00> : vector<8x16xf32>
      %38 = tpu.matmul %37, %10, %cst_33 {dimension_numbers = #tpu.dot_dimension_numbers<[1], [0], [0], [1], [0, 0, 1, 1], [], []>} : vector<8x16xf32>, vector<16x16xf32>, vector<8x16xf32> -> vector<8x16xf32>
      %cst_34 = arith.constant 0.000000e+00 : f32
      %39 = vector.broadcast %cst_34 : f32 to vector<8x16xf32>
      %40 = arith.cmpf oge, %38, %39 : vector<8x16xf32>
      %41 = vector.broadcast %6 : f32 to vector<8x16xf32>
      %42 = arith.mulf %41, %38 : vector<8x16xf32>
      %43 = arith.select %40, %38, %42 : vector<8x16xi1>, vector<8x16xf32>
      %c0_35 = arith.constant 0 : index
      %c32 = arith.constant 32 : index
      %44 = vector.load %arg13[%c0_35, %c32] : memref<40x64xf32, #tpu.memory_space<vmem>>, vector<40x16xf32>
      %cst_36 = arith.constant dense<0.000000e+00> : vector<8x16xf32>
      %45 = tpu.matmul %19, %44, %cst_36 {dimension_numbers = #tpu.dot_dimension_numbers<[1], [0], [0], [1], [0, 0, 1, 1], [], []>} : vector<8x40xf32>, vector<40x16xf32>, vector<8x16xf32> -> vector<8x16xf32>
      %c8_i32_37 = arith.constant 8 : i32
      %46 = arith.muli %arg16, %c8_i32_37 : i32
      %47 = arith.index_cast %46 : i32 to index
      %c16_38 = arith.constant 16 : index
      %48 = vector.load %arg3[%47, %c16_38] : memref<40x32xf32, #tpu.memory_space<vmem>>, vector<8x8xf32>
      %cst_39 = arith.constant dense<0.000000e+00> : vector<8x16xf32>
      %49 = tpu.matmul %48, %45, %cst_39 {dimension_numbers = #tpu.dot_dimension_numbers<[1], [0], [0], [1], [0, 0, 1, 1], [], []>} : vector<8x8xf32>, vector<8x16xf32>, vector<8x16xf32> -> vector<8x16xf32>
      %cst_40 = arith.constant dense<0.000000e+00> : vector<8x16xf32>
      %50 = tpu.matmul %49, %10, %cst_40 {dimension_numbers = #tpu.dot_dimension_numbers<[1], [0], [0], [1], [0, 0, 1, 1], [], []>} : vector<8x16xf32>, vector<16x16xf32>, vector<8x16xf32> -> vector<8x16xf32>
      %cst_41 = arith.constant 0.000000e+00 : f32
      %51 = vector.broadcast %cst_41 : f32 to vector<8x16xf32>
      %52 = arith.cmpf oge, %50, %51 : vector<8x16xf32>
      %53 = vector.broadcast %6 : f32 to vector<8x16xf32>
      %54 = arith.mulf %53, %50 : vector<8x16xf32>
      %55 = arith.select %52, %50, %54 : vector<8x16xi1>, vector<8x16xf32>
      %c0_42 = arith.constant 0 : index
      %c48 = arith.constant 48 : index
      %56 = vector.load %arg13[%c0_42, %c48] : memref<40x64xf32, #tpu.memory_space<vmem>>, vector<40x16xf32>
      %cst_43 = arith.constant dense<0.000000e+00> : vector<8x16xf32>
      %57 = tpu.matmul %19, %56, %cst_43 {dimension_numbers = #tpu.dot_dimension_numbers<[1], [0], [0], [1], [0, 0, 1, 1], [], []>} : vector<8x40xf32>, vector<40x16xf32>, vector<8x16xf32> -> vector<8x16xf32>
      %c8_i32_44 = arith.constant 8 : i32
      %58 = arith.muli %arg16, %c8_i32_44 : i32
      %59 = arith.index_cast %58 : i32 to index
      %c24 = arith.constant 24 : index
      %60 = vector.load %arg3[%59, %c24] : memref<40x32xf32, #tpu.memory_space<vmem>>, vector<8x8xf32>
      %cst_45 = arith.constant dense<0.000000e+00> : vector<8x16xf32>
      %61 = tpu.matmul %60, %57, %cst_45 {dimension_numbers = #tpu.dot_dimension_numbers<[1], [0], [0], [1], [0, 0, 1, 1], [], []>} : vector<8x8xf32>, vector<8x16xf32>, vector<8x16xf32> -> vector<8x16xf32>
      %cst_46 = arith.constant dense<0.000000e+00> : vector<8x16xf32>
      %62 = tpu.matmul %61, %10, %cst_46 {dimension_numbers = #tpu.dot_dimension_numbers<[1], [0], [0], [1], [0, 0, 1, 1], [], []>} : vector<8x16xf32>, vector<16x16xf32>, vector<8x16xf32> -> vector<8x16xf32>
      %cst_47 = arith.constant 0.000000e+00 : f32
      %63 = vector.broadcast %cst_47 : f32 to vector<8x16xf32>
      %64 = arith.cmpf oge, %62, %63 : vector<8x16xf32>
      %65 = vector.broadcast %6 : f32 to vector<8x16xf32>
      %66 = arith.mulf %65, %62 : vector<8x16xf32>
      %67 = arith.select %64, %62, %66 : vector<8x16xi1>, vector<8x16xf32>
      %c0_48 = arith.constant 0 : index
      %c0_49 = arith.constant 0 : index
      %68 = memref.load %arg11[%c0_48, %c0_49] : memref<4x4xf32, #tpu.memory_space<smem>>
      %69 = vector.broadcast %68 : f32 to vector<8x16xf32>
      %70 = arith.mulf %69, %31 : vector<8x16xf32>
      %c0_50 = arith.constant 0 : index
      %c1_51 = arith.constant 1 : index
      %71 = memref.load %arg11[%c0_50, %c1_51] : memref<4x4xf32, #tpu.memory_space<smem>>
      %72 = vector.broadcast %71 : f32 to vector<8x16xf32>
      %73 = arith.mulf %72, %43 : vector<8x16xf32>
      %74 = arith.addf %70, %73 : vector<8x16xf32>
      %c0_52 = arith.constant 0 : index
      %c2_53 = arith.constant 2 : index
      %75 = memref.load %arg11[%c0_52, %c2_53] : memref<4x4xf32, #tpu.memory_space<smem>>
      %76 = vector.broadcast %75 : f32 to vector<8x16xf32>
      %77 = arith.mulf %76, %55 : vector<8x16xf32>
      %78 = arith.addf %74, %77 : vector<8x16xf32>
      %c0_54 = arith.constant 0 : index
      %c3_55 = arith.constant 3 : index
      %79 = memref.load %arg11[%c0_54, %c3_55] : memref<4x4xf32, #tpu.memory_space<smem>>
      %80 = vector.broadcast %79 : f32 to vector<8x16xf32>
      %81 = arith.mulf %80, %67 : vector<8x16xf32>
      %82 = arith.addf %78, %81 : vector<8x16xf32>
      %c0_56 = arith.constant 0 : index
      %c0_57 = arith.constant 0 : index
      %83 = vector.load %arg15[%c0_56, %c0_57] : memref<40x64xf32, #tpu.memory_space<vmem>>, vector<40x16xf32>
      %cst_58 = arith.constant dense<0.000000e+00> : vector<8x16xf32>
      %84 = tpu.matmul %19, %83, %cst_58 {dimension_numbers = #tpu.dot_dimension_numbers<[1], [0], [0], [1], [0, 0, 1, 1], [], []>} : vector<8x40xf32>, vector<40x16xf32>, vector<8x16xf32> -> vector<8x16xf32>
      %85 = arith.addf %82, %84 : vector<8x16xf32>
      %c8_i32_59 = arith.constant 8 : i32
      %86 = arith.muli %arg16, %c8_i32_59 : i32
      %87 = arith.index_cast %86 : i32 to index
      %c0_60 = arith.constant 0 : index
      %88 = vector.load %arg12[%87, %c0_60] : memref<40x64xf32, #tpu.memory_space<vmem>>, vector<8x16xf32>
      tpu.vector_store %arg12[%87, %c0_60], %85 {strides = array<i32>} : memref<40x64xf32, #tpu.memory_space<vmem>>, vector<8x16xf32>,
      %c1_61 = arith.constant 1 : index
      %c0_62 = arith.constant 0 : index
      %89 = memref.load %arg11[%c1_61, %c0_62] : memref<4x4xf32, #tpu.memory_space<smem>>
      %90 = vector.broadcast %89 : f32 to vector<8x16xf32>
      %91 = arith.mulf %90, %31 : vector<8x16xf32>
      %c1_63 = arith.constant 1 : index
      %c1_64 = arith.constant 1 : index
      %92 = memref.load %arg11[%c1_63, %c1_64] : memref<4x4xf32, #tpu.memory_space<smem>>
      %93 = vector.broadcast %92 : f32 to vector<8x16xf32>
      %94 = arith.mulf %93, %43 : vector<8x16xf32>
      %95 = arith.addf %91, %94 : vector<8x16xf32>
      %c1_65 = arith.constant 1 : index
      %c2_66 = arith.constant 2 : index
      %96 = memref.load %arg11[%c1_65, %c2_66] : memref<4x4xf32, #tpu.memory_space<smem>>
      %97 = vector.broadcast %96 : f32 to vector<8x16xf32>
      %98 = arith.mulf %97, %55 : vector<8x16xf32>
      %99 = arith.addf %95, %98 : vector<8x16xf32>
      %c1_67 = arith.constant 1 : index
      %c3_68 = arith.constant 3 : index
      %100 = memref.load %arg11[%c1_67, %c3_68] : memref<4x4xf32, #tpu.memory_space<smem>>
      %101 = vector.broadcast %100 : f32 to vector<8x16xf32>
      %102 = arith.mulf %101, %67 : vector<8x16xf32>
      %103 = arith.addf %99, %102 : vector<8x16xf32>
      %c0_69 = arith.constant 0 : index
      %c16_70 = arith.constant 16 : index
      %104 = vector.load %arg15[%c0_69, %c16_70] : memref<40x64xf32, #tpu.memory_space<vmem>>, vector<40x16xf32>
      %cst_71 = arith.constant dense<0.000000e+00> : vector<8x16xf32>
      %105 = tpu.matmul %19, %104, %cst_71 {dimension_numbers = #tpu.dot_dimension_numbers<[1], [0], [0], [1], [0, 0, 1, 1], [], []>} : vector<8x40xf32>, vector<40x16xf32>, vector<8x16xf32> -> vector<8x16xf32>
      %106 = arith.addf %103, %105 : vector<8x16xf32>
      %c8_i32_72 = arith.constant 8 : i32
      %107 = arith.muli %arg16, %c8_i32_72 : i32
      %108 = arith.index_cast %107 : i32 to index
      %c16_73 = arith.constant 16 : index
      %109 = vector.load %arg12[%108, %c16_73] : memref<40x64xf32, #tpu.memory_space<vmem>>, vector<8x16xf32>
      tpu.vector_store %arg12[%108, %c16_73], %106 {strides = array<i32>} : memref<40x64xf32, #tpu.memory_space<vmem>>, vector<8x16xf32>,
      %c2_74 = arith.constant 2 : index
      %c0_75 = arith.constant 0 : index
      %110 = memref.load %arg11[%c2_74, %c0_75] : memref<4x4xf32, #tpu.memory_space<smem>>
      %111 = vector.broadcast %110 : f32 to vector<8x16xf32>
      %112 = arith.mulf %111, %31 : vector<8x16xf32>
      %c2_76 = arith.constant 2 : index
      %c1_77 = arith.constant 1 : index
      %113 = memref.load %arg11[%c2_76, %c1_77] : memref<4x4xf32, #tpu.memory_space<smem>>
      %114 = vector.broadcast %113 : f32 to vector<8x16xf32>
      %115 = arith.mulf %114, %43 : vector<8x16xf32>
      %116 = arith.addf %112, %115 : vector<8x16xf32>
      %c2_78 = arith.constant 2 : index
      %c2_79 = arith.constant 2 : index
      %117 = memref.load %arg11[%c2_78, %c2_79] : memref<4x4xf32, #tpu.memory_space<smem>>
      %118 = vector.broadcast %117 : f32 to vector<8x16xf32>
      %119 = arith.mulf %118, %55 : vector<8x16xf32>
      %120 = arith.addf %116, %119 : vector<8x16xf32>
      %c2_80 = arith.constant 2 : index
      %c3_81 = arith.constant 3 : index
      %121 = memref.load %arg11[%c2_80, %c3_81] : memref<4x4xf32, #tpu.memory_space<smem>>
      %122 = vector.broadcast %121 : f32 to vector<8x16xf32>
      %123 = arith.mulf %122, %67 : vector<8x16xf32>
      %124 = arith.addf %120, %123 : vector<8x16xf32>
      %c0_82 = arith.constant 0 : index
      %c32_83 = arith.constant 32 : index
      %125 = vector.load %arg15[%c0_82, %c32_83] : memref<40x64xf32, #tpu.memory_space<vmem>>, vector<40x16xf32>
      %cst_84 = arith.constant dense<0.000000e+00> : vector<8x16xf32>
      %126 = tpu.matmul %19, %125, %cst_84 {dimension_numbers = #tpu.dot_dimension_numbers<[1], [0], [0], [1], [0, 0, 1, 1], [], []>} : vector<8x40xf32>, vector<40x16xf32>, vector<8x16xf32> -> vector<8x16xf32>
      %127 = arith.addf %124, %126 : vector<8x16xf32>
      %c8_i32_85 = arith.constant 8 : i32
      %128 = arith.muli %arg16, %c8_i32_85 : i32
      %129 = arith.index_cast %128 : i32 to index
      %c32_86 = arith.constant 32 : index
      %130 = vector.load %arg12[%129, %c32_86] : memref<40x64xf32, #tpu.memory_space<vmem>>, vector<8x16xf32>
      tpu.vector_store %arg12[%129, %c32_86], %127 {strides = array<i32>} : memref<40x64xf32, #tpu.memory_space<vmem>>, vector<8x16xf32>,
      %c3_87 = arith.constant 3 : index
      %c0_88 = arith.constant 0 : index
      %131 = memref.load %arg11[%c3_87, %c0_88] : memref<4x4xf32, #tpu.memory_space<smem>>
      %132 = vector.broadcast %131 : f32 to vector<8x16xf32>
      %133 = arith.mulf %132, %31 : vector<8x16xf32>
      %c3_89 = arith.constant 3 : index
      %c1_90 = arith.constant 1 : index
      %134 = memref.load %arg11[%c3_89, %c1_90] : memref<4x4xf32, #tpu.memory_space<smem>>
      %135 = vector.broadcast %134 : f32 to vector<8x16xf32>
      %136 = arith.mulf %135, %43 : vector<8x16xf32>
      %137 = arith.addf %133, %136 : vector<8x16xf32>
      %c3_91 = arith.constant 3 : index
      %c2_92 = arith.constant 2 : index
      %138 = memref.load %arg11[%c3_91, %c2_92] : memref<4x4xf32, #tpu.memory_space<smem>>
      %139 = vector.broadcast %138 : f32 to vector<8x16xf32>
      %140 = arith.mulf %139, %55 : vector<8x16xf32>
      %141 = arith.addf %137, %140 : vector<8x16xf32>
      %c3_93 = arith.constant 3 : index
      %c3_94 = arith.constant 3 : index
      %142 = memref.load %arg11[%c3_93, %c3_94] : memref<4x4xf32, #tpu.memory_space<smem>>
      %143 = vector.broadcast %142 : f32 to vector<8x16xf32>
      %144 = arith.mulf %143, %67 : vector<8x16xf32>
      %145 = arith.addf %141, %144 : vector<8x16xf32>
      %c0_95 = arith.constant 0 : index
      %c48_96 = arith.constant 48 : index
      %146 = vector.load %arg15[%c0_95, %c48_96] : memref<40x64xf32, #tpu.memory_space<vmem>>, vector<40x16xf32>
      %cst_97 = arith.constant dense<0.000000e+00> : vector<8x16xf32>
      %147 = tpu.matmul %19, %146, %cst_97 {dimension_numbers = #tpu.dot_dimension_numbers<[1], [0], [0], [1], [0, 0, 1, 1], [], []>} : vector<8x40xf32>, vector<40x16xf32>, vector<8x16xf32> -> vector<8x16xf32>
      %148 = arith.addf %145, %147 : vector<8x16xf32>
      %c8_i32_98 = arith.constant 8 : i32
      %149 = arith.muli %arg16, %c8_i32_98 : i32
      %150 = arith.index_cast %149 : i32 to index
      %c48_99 = arith.constant 48 : index
      %151 = vector.load %arg12[%150, %c48_99] : memref<40x64xf32, #tpu.memory_space<vmem>>, vector<8x16xf32>
      tpu.vector_store %arg12[%150, %c48_99], %148 {strides = array<i32>} : memref<40x64xf32, #tpu.memory_space<vmem>>, vector<8x16xf32>,
    }
    %c5_i32_19 = arith.constant 5 : i32
    return
  }
}

module attributes {stable_mosaic.version = 11 : i64} {
  func.func @_tcn_kernel(%arg0: memref<20x128xf32, #tpu.memory_space<vmem>>, %arg1: memref<20x20xf32, #tpu.memory_space<vmem>>, %arg2: memref<20x20xf32, #tpu.memory_space<vmem>>, %arg3: memref<3x128x192xf32, #tpu.memory_space<vmem>>, %arg4: memref<1x192xf32, #tpu.memory_space<vmem>>, %arg5: memref<12x192x192xf32, #tpu.memory_space<vmem>>, %arg6: memref<4x1x192xf32, #tpu.memory_space<vmem>>, %arg7: memref<192x60xf32, #tpu.memory_space<vmem>>, %arg8: memref<1x60xf32, #tpu.memory_space<vmem>>, %arg9: memref<5x20xf32, #tpu.memory_space<vmem>>, %arg10: memref<5xf32, #tpu.memory_space<smem>>, %arg11: memref<12x5x5xf32, #tpu.memory_space<vmem>>, %arg12: memref<5x60xf32, #tpu.memory_space<vmem>>) attributes {dimension_semantics = [], scalar_prefetch = 0 : i64, scratch_operands = 1 : i64, tpu.core_type = #tpu.core_type<tc>} {
    %c0 = arith.constant 0 : index
    %c0_0 = arith.constant 0 : index
    %0 = vector.load %arg1[%c0, %c0_0] : memref<20x20xf32, #tpu.memory_space<vmem>>, vector<20x20xf32>
    %c0_1 = arith.constant 0 : index
    %c0_2 = arith.constant 0 : index
    %1 = vector.load %arg2[%c0_1, %c0_2] : memref<20x20xf32, #tpu.memory_space<vmem>>, vector<20x20xf32>
    %c0_3 = arith.constant 0 : index
    %c0_4 = arith.constant 0 : index
    %2 = vector.load %arg0[%c0_3, %c0_4] : memref<20x128xf32, #tpu.memory_space<vmem>>, vector<20x128xf32>
    %cst = arith.constant dense<0.000000e+00> : vector<20x128xf32>
    %3 = tpu.matmul %0, %2, %cst {dimension_numbers = #tpu.dot_dimension_numbers<[1], [0], [0], [1], [0, 0, 1, 1], [], []>} : vector<20x20xf32>, vector<20x128xf32>, vector<20x128xf32> -> vector<20x128xf32>
    %c0_5 = arith.constant 0 : index
    %c0_6 = arith.constant 0 : index
    %c0_7 = arith.constant 0 : index
    %4 = vector.load %arg3[%c0_5, %c0_6, %c0_7] : memref<3x128x192xf32, #tpu.memory_space<vmem>>, vector<1x128x192xf32>
    %5 = vector.shape_cast %4 : vector<1x128x192xf32> to vector<128x192xf32>
    %cst_8 = arith.constant dense<0.000000e+00> : vector<20x192xf32>
    %6 = tpu.matmul %3, %5, %cst_8 {dimension_numbers = #tpu.dot_dimension_numbers<[1], [0], [0], [1], [0, 0, 1, 1], [], []>} : vector<20x128xf32>, vector<128x192xf32>, vector<20x192xf32> -> vector<20x192xf32>
    %c1 = arith.constant 1 : index
    %c0_9 = arith.constant 0 : index
    %c0_10 = arith.constant 0 : index
    %7 = vector.load %arg3[%c1, %c0_9, %c0_10] : memref<3x128x192xf32, #tpu.memory_space<vmem>>, vector<1x128x192xf32>
    %8 = vector.shape_cast %7 : vector<1x128x192xf32> to vector<128x192xf32>
    %cst_11 = arith.constant dense<0.000000e+00> : vector<20x192xf32>
    %9 = tpu.matmul %2, %8, %cst_11 {dimension_numbers = #tpu.dot_dimension_numbers<[1], [0], [0], [1], [0, 0, 1, 1], [], []>} : vector<20x128xf32>, vector<128x192xf32>, vector<20x192xf32> -> vector<20x192xf32>
    %10 = arith.addf %6, %9 : vector<20x192xf32>
    %cst_12 = arith.constant dense<0.000000e+00> : vector<20x128xf32>
    %11 = tpu.matmul %1, %2, %cst_12 {dimension_numbers = #tpu.dot_dimension_numbers<[1], [0], [0], [1], [0, 0, 1, 1], [], []>} : vector<20x20xf32>, vector<20x128xf32>, vector<20x128xf32> -> vector<20x128xf32>
    %c2 = arith.constant 2 : index
    %c0_13 = arith.constant 0 : index
    %c0_14 = arith.constant 0 : index
    %12 = vector.load %arg3[%c2, %c0_13, %c0_14] : memref<3x128x192xf32, #tpu.memory_space<vmem>>, vector<1x128x192xf32>
    %13 = vector.shape_cast %12 : vector<1x128x192xf32> to vector<128x192xf32>
    %cst_15 = arith.constant dense<0.000000e+00> : vector<20x192xf32>
    %14 = tpu.matmul %11, %13, %cst_15 {dimension_numbers = #tpu.dot_dimension_numbers<[1], [0], [0], [1], [0, 0, 1, 1], [], []>} : vector<20x128xf32>, vector<128x192xf32>, vector<20x192xf32> -> vector<20x192xf32>
    %15 = arith.addf %10, %14 : vector<20x192xf32>
    %c0_16 = arith.constant 0 : index
    %c0_17 = arith.constant 0 : index
    %16 = vector.load %arg4[%c0_16, %c0_17] : memref<1x192xf32, #tpu.memory_space<vmem>>, vector<1x192xf32>
    %17 = vector.broadcast %16 : vector<1x192xf32> to vector<20x192xf32>
    %18 = arith.addf %15, %17 : vector<20x192xf32>
    %c0_18 = arith.constant 0 : index
    %19 = memref.load %arg10[%c0_18] : memref<5xf32, #tpu.memory_space<smem>>
    %cst_19 = arith.constant 0.000000e+00 : f32
    %20 = vector.broadcast %cst_19 : f32 to vector<20x192xf32>
    %21 = arith.cmpf oge, %18, %20 : vector<20x192xf32>
    %22 = vector.broadcast %19 : f32 to vector<20x192xf32>
    %23 = arith.mulf %22, %18 : vector<20x192xf32>
    %24 = arith.select %21, %18, %23 : vector<20x192xi1>, vector<20x192xf32>
    %c0_i32 = arith.constant 0 : i32
    %c4_i32 = arith.constant 4 : i32
    %25 = arith.addi %c0_i32, %c4_i32 : i32
    %c1_i32 = arith.constant 1 : i32
    %26 = scf.for %arg13 = %c0_i32 to %25 step %c1_i32 iter_args(%arg14 = %24) -> (vector<20x192xf32>)  : i32 {
      %cst_73 = arith.constant dense<0.000000e+00> : vector<20x192xf32>
      %83 = tpu.matmul %0, %arg14, %cst_73 {dimension_numbers = #tpu.dot_dimension_numbers<[1], [0], [0], [1], [0, 0, 1, 1], [], []>} : vector<20x20xf32>, vector<20x192xf32>, vector<20x192xf32> -> vector<20x192xf32>
      %c3_i32 = arith.constant 3 : i32
      %84 = arith.muli %c3_i32, %arg13 : i32
      %85 = arith.index_cast %84 : i32 to index
      %c0_74 = arith.constant 0 : index
      %c0_75 = arith.constant 0 : index
      %86 = vector.load %arg5[%85, %c0_74, %c0_75] : memref<12x192x192xf32, #tpu.memory_space<vmem>>, vector<1x192x192xf32>
      %87 = vector.shape_cast %86 : vector<1x192x192xf32> to vector<192x192xf32>
      %cst_76 = arith.constant dense<0.000000e+00> : vector<20x192xf32>
      %88 = tpu.matmul %83, %87, %cst_76 {dimension_numbers = #tpu.dot_dimension_numbers<[1], [0], [0], [1], [0, 0, 1, 1], [], []>} : vector<20x192xf32>, vector<192x192xf32>, vector<20x192xf32> -> vector<20x192xf32>
      %c3_i32_77 = arith.constant 3 : i32
      %89 = arith.muli %c3_i32_77, %arg13 : i32
      %c1_i32_78 = arith.constant 1 : i32
      %90 = arith.addi %89, %c1_i32_78 : i32
      %91 = arith.index_cast %90 : i32 to index
      %c0_79 = arith.constant 0 : index
      %c0_80 = arith.constant 0 : index
      %92 = vector.load %arg5[%91, %c0_79, %c0_80] : memref<12x192x192xf32, #tpu.memory_space<vmem>>, vector<1x192x192xf32>
      %93 = vector.shape_cast %92 : vector<1x192x192xf32> to vector<192x192xf32>
      %cst_81 = arith.constant dense<0.000000e+00> : vector<20x192xf32>
      %94 = tpu.matmul %arg14, %93, %cst_81 {dimension_numbers = #tpu.dot_dimension_numbers<[1], [0], [0], [1], [0, 0, 1, 1], [], []>} : vector<20x192xf32>, vector<192x192xf32>, vector<20x192xf32> -> vector<20x192xf32>
      %95 = arith.addf %88, %94 : vector<20x192xf32>
      %cst_82 = arith.constant dense<0.000000e+00> : vector<20x192xf32>
      %96 = tpu.matmul %1, %arg14, %cst_82 {dimension_numbers = #tpu.dot_dimension_numbers<[1], [0], [0], [1], [0, 0, 1, 1], [], []>} : vector<20x20xf32>, vector<20x192xf32>, vector<20x192xf32> -> vector<20x192xf32>
      %c3_i32_83 = arith.constant 3 : i32
      %97 = arith.muli %c3_i32_83, %arg13 : i32
      %c2_i32 = arith.constant 2 : i32
      %98 = arith.addi %97, %c2_i32 : i32
      %99 = arith.index_cast %98 : i32 to index
      %c0_84 = arith.constant 0 : index
      %c0_85 = arith.constant 0 : index
      %100 = vector.load %arg5[%99, %c0_84, %c0_85] : memref<12x192x192xf32, #tpu.memory_space<vmem>>, vector<1x192x192xf32>
      %101 = vector.shape_cast %100 : vector<1x192x192xf32> to vector<192x192xf32>
      %cst_86 = arith.constant dense<0.000000e+00> : vector<20x192xf32>
      %102 = tpu.matmul %96, %101, %cst_86 {dimension_numbers = #tpu.dot_dimension_numbers<[1], [0], [0], [1], [0, 0, 1, 1], [], []>} : vector<20x192xf32>, vector<192x192xf32>, vector<20x192xf32> -> vector<20x192xf32>
      %103 = arith.addf %95, %102 : vector<20x192xf32>
      %104 = arith.index_cast %arg13 : i32 to index
      %c0_87 = arith.constant 0 : index
      %c0_88 = arith.constant 0 : index
      %105 = vector.load %arg6[%104, %c0_87, %c0_88] : memref<4x1x192xf32, #tpu.memory_space<vmem>>, vector<1x1x192xf32>
      %106 = vector.shape_cast %105 : vector<1x1x192xf32> to vector<1x192xf32>
      %107 = vector.broadcast %106 : vector<1x192xf32> to vector<20x192xf32>
      %108 = arith.addf %103, %107 : vector<20x192xf32>
      %c1_i32_89 = arith.constant 1 : i32
      %109 = arith.addi %c1_i32_89, %arg13 : i32
      %110 = arith.index_cast %109 : i32 to index
      %111 = memref.load %arg10[%110] : memref<5xf32, #tpu.memory_space<smem>>
      %cst_90 = arith.constant 0.000000e+00 : f32
      %112 = vector.broadcast %cst_90 : f32 to vector<20x192xf32>
      %113 = arith.cmpf oge, %108, %112 : vector<20x192xf32>
      %114 = vector.broadcast %111 : f32 to vector<20x192xf32>
      %115 = arith.mulf %114, %108 : vector<20x192xf32>
      %116 = arith.select %113, %108, %115 : vector<20x192xi1>, vector<20x192xf32>
      %117 = arith.addf %116, %arg14 : vector<20x192xf32>
      scf.yield %117 : vector<20x192xf32>
    }
    %c4_i32_20 = arith.constant 4 : i32
    %c0_21 = arith.constant 0 : index
    %c0_22 = arith.constant 0 : index
    %27 = vector.load %arg9[%c0_21, %c0_22] : memref<5x20xf32, #tpu.memory_space<vmem>>, vector<5x20xf32>
    %c0_23 = arith.constant 0 : index
    %c0_24 = arith.constant 0 : index
    %28 = vector.load %arg7[%c0_23, %c0_24] : memref<192x60xf32, #tpu.memory_space<vmem>>, vector<192x60xf32>
    %cst_25 = arith.constant dense<0.000000e+00> : vector<20x60xf32>
    %29 = tpu.matmul %26, %28, %cst_25 {dimension_numbers = #tpu.dot_dimension_numbers<[1], [0], [0], [1], [0, 0, 1, 1], [], []>} : vector<20x192xf32>, vector<192x60xf32>, vector<20x60xf32> -> vector<20x60xf32>
    %cst_26 = arith.constant dense<0.000000e+00> : vector<5x60xf32>
    %30 = tpu.matmul %27, %29, %cst_26 {dimension_numbers = #tpu.dot_dimension_numbers<[1], [0], [0], [1], [0, 0, 1, 1], [], []>} : vector<5x20xf32>, vector<20x60xf32>, vector<5x60xf32> -> vector<5x60xf32>
    %c0_27 = arith.constant 0 : index
    %c0_28 = arith.constant 0 : index
    %31 = vector.load %arg8[%c0_27, %c0_28] : memref<1x60xf32, #tpu.memory_space<vmem>>, vector<1x60xf32>
    %32 = vector.broadcast %31 : vector<1x60xf32> to vector<5x60xf32>
    %33 = arith.addf %30, %32 : vector<5x60xf32>
    %c0_29 = arith.constant 0 : index
    %c0_30 = arith.constant 0 : index
    %34 = vector.load %arg12[%c0_29, %c0_30] : memref<5x60xf32, #tpu.memory_space<vmem>>, vector<5x60xf32>
    tpu.vector_store %arg12[%c0_29, %c0_30], %33 {strides = array<i32>} : memref<5x60xf32, #tpu.memory_space<vmem>>, vector<5x60xf32>,
    %c0_31 = arith.constant 0 : index
    %c0_32 = arith.constant 0 : index
    %35 = vector.load %arg12[%c0_31, %c0_32] : memref<5x60xf32, #tpu.memory_space<vmem>>, vector<5x5xf32>
    %c0_33 = arith.constant 0 : index
    %c0_34 = arith.constant 0 : index
    %c0_35 = arith.constant 0 : index
    %36 = vector.load %arg11[%c0_33, %c0_34, %c0_35] : memref<12x5x5xf32, #tpu.memory_space<vmem>>, vector<1x5x5xf32>
    %37 = vector.shape_cast %36 : vector<1x5x5xf32> to vector<5x5xf32>
    %38 = vector.shape_cast %35 : vector<5x5xf32> to vector<1x5x5xf32>
    tpu.vector_store %arg11[%c0_33, %c0_34, %c0_35], %38 {strides = array<i32>} : memref<12x5x5xf32, #tpu.memory_space<vmem>>, vector<1x5x5xf32>,
    %c0_36 = arith.constant 0 : index
    %c5 = arith.constant 5 : index
    %39 = vector.load %arg12[%c0_36, %c5] : memref<5x60xf32, #tpu.memory_space<vmem>>, vector<5x5xf32>
    %c1_37 = arith.constant 1 : index
    %c0_38 = arith.constant 0 : index
    %c0_39 = arith.constant 0 : index
    %40 = vector.load %arg11[%c1_37, %c0_38, %c0_39] : memref<12x5x5xf32, #tpu.memory_space<vmem>>, vector<1x5x5xf32>
    %41 = vector.shape_cast %40 : vector<1x5x5xf32> to vector<5x5xf32>
    %42 = vector.shape_cast %39 : vector<5x5xf32> to vector<1x5x5xf32>
    tpu.vector_store %arg11[%c1_37, %c0_38, %c0_39], %42 {strides = array<i32>} : memref<12x5x5xf32, #tpu.memory_space<vmem>>, vector<1x5x5xf32>,
    %c0_40 = arith.constant 0 : index
    %c10 = arith.constant 10 : index
    %43 = vector.load %arg12[%c0_40, %c10] : memref<5x60xf32, #tpu.memory_space<vmem>>, vector<5x5xf32>
    %c2_41 = arith.constant 2 : index
    %c0_42 = arith.constant 0 : index
    %c0_43 = arith.constant 0 : index
    %44 = vector.load %arg11[%c2_41, %c0_42, %c0_43] : memref<12x5x5xf32, #tpu.memory_space<vmem>>, vector<1x5x5xf32>
    %45 = vector.shape_cast %44 : vector<1x5x5xf32> to vector<5x5xf32>
    %46 = vector.shape_cast %43 : vector<5x5xf32> to vector<1x5x5xf32>
    tpu.vector_store %arg11[%c2_41, %c0_42, %c0_43], %46 {strides = array<i32>} : memref<12x5x5xf32, #tpu.memory_space<vmem>>, vector<1x5x5xf32>,
    %c0_44 = arith.constant 0 : index
    %c15 = arith.constant 15 : index
    %47 = vector.load %arg12[%c0_44, %c15] : memref<5x60xf32, #tpu.memory_space<vmem>>, vector<5x5xf32>
    %c3 = arith.constant 3 : index
    %c0_45 = arith.constant 0 : index
    %c0_46 = arith.constant 0 : index
    %48 = vector.load %arg11[%c3, %c0_45, %c0_46] : memref<12x5x5xf32, #tpu.memory_space<vmem>>, vector<1x5x5xf32>
    %49 = vector.shape_cast %48 : vector<1x5x5xf32> to vector<5x5xf32>
    %50 = vector.shape_cast %47 : vector<5x5xf32> to vector<1x5x5xf32>
    tpu.vector_store %arg11[%c3, %c0_45, %c0_46], %50 {strides = array<i32>} : memref<12x5x5xf32, #tpu.memory_space<vmem>>, vector<1x5x5xf32>,
    %c0_47 = arith.constant 0 : index
    %c20 = arith.constant 20 : index
    %51 = vector.load %arg12[%c0_47, %c20] : memref<5x60xf32, #tpu.memory_space<vmem>>, vector<5x5xf32>
    %c4 = arith.constant 4 : index
    %c0_48 = arith.constant 0 : index
    %c0_49 = arith.constant 0 : index
    %52 = vector.load %arg11[%c4, %c0_48, %c0_49] : memref<12x5x5xf32, #tpu.memory_space<vmem>>, vector<1x5x5xf32>
    %53 = vector.shape_cast %52 : vector<1x5x5xf32> to vector<5x5xf32>
    %54 = vector.shape_cast %51 : vector<5x5xf32> to vector<1x5x5xf32>
    tpu.vector_store %arg11[%c4, %c0_48, %c0_49], %54 {strides = array<i32>} : memref<12x5x5xf32, #tpu.memory_space<vmem>>, vector<1x5x5xf32>,
    %c0_50 = arith.constant 0 : index
    %c25 = arith.constant 25 : index
    %55 = vector.load %arg12[%c0_50, %c25] : memref<5x60xf32, #tpu.memory_space<vmem>>, vector<5x5xf32>
    %c5_51 = arith.constant 5 : index
    %c0_52 = arith.constant 0 : index
    %c0_53 = arith.constant 0 : index
    %56 = vector.load %arg11[%c5_51, %c0_52, %c0_53] : memref<12x5x5xf32, #tpu.memory_space<vmem>>, vector<1x5x5xf32>
    %57 = vector.shape_cast %56 : vector<1x5x5xf32> to vector<5x5xf32>
    %58 = vector.shape_cast %55 : vector<5x5xf32> to vector<1x5x5xf32>
    tpu.vector_store %arg11[%c5_51, %c0_52, %c0_53], %58 {strides = array<i32>} : memref<12x5x5xf32, #tpu.memory_space<vmem>>, vector<1x5x5xf32>,
    %c0_54 = arith.constant 0 : index
    %c30 = arith.constant 30 : index
    %59 = vector.load %arg12[%c0_54, %c30] : memref<5x60xf32, #tpu.memory_space<vmem>>, vector<5x5xf32>
    %c6 = arith.constant 6 : index
    %c0_55 = arith.constant 0 : index
    %c0_56 = arith.constant 0 : index
    %60 = vector.load %arg11[%c6, %c0_55, %c0_56] : memref<12x5x5xf32, #tpu.memory_space<vmem>>, vector<1x5x5xf32>
    %61 = vector.shape_cast %60 : vector<1x5x5xf32> to vector<5x5xf32>
    %62 = vector.shape_cast %59 : vector<5x5xf32> to vector<1x5x5xf32>
    tpu.vector_store %arg11[%c6, %c0_55, %c0_56], %62 {strides = array<i32>} : memref<12x5x5xf32, #tpu.memory_space<vmem>>, vector<1x5x5xf32>,
    %c0_57 = arith.constant 0 : index
    %c35 = arith.constant 35 : index
    %63 = vector.load %arg12[%c0_57, %c35] : memref<5x60xf32, #tpu.memory_space<vmem>>, vector<5x5xf32>
    %c7 = arith.constant 7 : index
    %c0_58 = arith.constant 0 : index
    %c0_59 = arith.constant 0 : index
    %64 = vector.load %arg11[%c7, %c0_58, %c0_59] : memref<12x5x5xf32, #tpu.memory_space<vmem>>, vector<1x5x5xf32>
    %65 = vector.shape_cast %64 : vector<1x5x5xf32> to vector<5x5xf32>
    %66 = vector.shape_cast %63 : vector<5x5xf32> to vector<1x5x5xf32>
    tpu.vector_store %arg11[%c7, %c0_58, %c0_59], %66 {strides = array<i32>} : memref<12x5x5xf32, #tpu.memory_space<vmem>>, vector<1x5x5xf32>,
    %c0_60 = arith.constant 0 : index
    %c40 = arith.constant 40 : index
    %67 = vector.load %arg12[%c0_60, %c40] : memref<5x60xf32, #tpu.memory_space<vmem>>, vector<5x5xf32>
    %c8 = arith.constant 8 : index
    %c0_61 = arith.constant 0 : index
    %c0_62 = arith.constant 0 : index
    %68 = vector.load %arg11[%c8, %c0_61, %c0_62] : memref<12x5x5xf32, #tpu.memory_space<vmem>>, vector<1x5x5xf32>
    %69 = vector.shape_cast %68 : vector<1x5x5xf32> to vector<5x5xf32>
    %70 = vector.shape_cast %67 : vector<5x5xf32> to vector<1x5x5xf32>
    tpu.vector_store %arg11[%c8, %c0_61, %c0_62], %70 {strides = array<i32>} : memref<12x5x5xf32, #tpu.memory_space<vmem>>, vector<1x5x5xf32>,
    %c0_63 = arith.constant 0 : index
    %c45 = arith.constant 45 : index
    %71 = vector.load %arg12[%c0_63, %c45] : memref<5x60xf32, #tpu.memory_space<vmem>>, vector<5x5xf32>
    %c9 = arith.constant 9 : index
    %c0_64 = arith.constant 0 : index
    %c0_65 = arith.constant 0 : index
    %72 = vector.load %arg11[%c9, %c0_64, %c0_65] : memref<12x5x5xf32, #tpu.memory_space<vmem>>, vector<1x5x5xf32>
    %73 = vector.shape_cast %72 : vector<1x5x5xf32> to vector<5x5xf32>
    %74 = vector.shape_cast %71 : vector<5x5xf32> to vector<1x5x5xf32>
    tpu.vector_store %arg11[%c9, %c0_64, %c0_65], %74 {strides = array<i32>} : memref<12x5x5xf32, #tpu.memory_space<vmem>>, vector<1x5x5xf32>,
    %c0_66 = arith.constant 0 : index
    %c50 = arith.constant 50 : index
    %75 = vector.load %arg12[%c0_66, %c50] : memref<5x60xf32, #tpu.memory_space<vmem>>, vector<5x5xf32>
    %c10_67 = arith.constant 10 : index
    %c0_68 = arith.constant 0 : index
    %c0_69 = arith.constant 0 : index
    %76 = vector.load %arg11[%c10_67, %c0_68, %c0_69] : memref<12x5x5xf32, #tpu.memory_space<vmem>>, vector<1x5x5xf32>
    %77 = vector.shape_cast %76 : vector<1x5x5xf32> to vector<5x5xf32>
    %78 = vector.shape_cast %75 : vector<5x5xf32> to vector<1x5x5xf32>
    tpu.vector_store %arg11[%c10_67, %c0_68, %c0_69], %78 {strides = array<i32>} : memref<12x5x5xf32, #tpu.memory_space<vmem>>, vector<1x5x5xf32>,
    %c0_70 = arith.constant 0 : index
    %c55 = arith.constant 55 : index
    %79 = vector.load %arg12[%c0_70, %c55] : memref<5x60xf32, #tpu.memory_space<vmem>>, vector<5x5xf32>
    %c11 = arith.constant 11 : index
    %c0_71 = arith.constant 0 : index
    %c0_72 = arith.constant 0 : index
    %80 = vector.load %arg11[%c11, %c0_71, %c0_72] : memref<12x5x5xf32, #tpu.memory_space<vmem>>, vector<1x5x5xf32>
    %81 = vector.shape_cast %80 : vector<1x5x5xf32> to vector<5x5xf32>
    %82 = vector.shape_cast %79 : vector<5x5xf32> to vector<1x5x5xf32>
    tpu.vector_store %arg11[%c11, %c0_71, %c0_72], %82 {strides = array<i32>} : memref<12x5x5xf32, #tpu.memory_space<vmem>>, vector<1x5x5xf32>,
    return
  }
}

</mosaic_0001>

<bundles_post_ra>
// kernel: tile.11
= control target key start
LH: loop header
LB: loop body
LE: loop exit
PB: predicated region body
PF: predicated region fallthrough
CT: control target
= control target key end

     0   :  { %vm3_vm0 = vcmask 326656   ;;  %s60_s0 = inlined_call_operand.vmem [shape: f32[40,4,5], index: 0, kind: input, shape index: {}]   ;;  %s61_s1 = inlined_call_operand.vmem [shape: f32[40,20], index: 1, kind: output, shape index: {}]  }
   0x1   :  { %v2_v0 = vld [vmem:[%s60_s0] sm:$0x1f]   ;;  %v20_v1 = vld [vmem:[%s60_s0 + $0x8] sm:$0x1f]   ;;  %v22_v2 = vld [vmem:[%s60_s0 + $0x10] sm:$0x1f]  }
   0x2   :  { %4 = vst.msk [vmem:[%s61_s1] sm:$0x1f] %vm3_vm0, %v2_v0   ;;  %21 = vst.msk [vmem:[%s61_s1 + $0x5] sm:$0x1f] %vm3_vm0, %v20_v1   ;;  %v24_v3 = vld [vmem:[%s60_s0 + $0x18] sm:$0x1f]  }
   0x3   :  { %23 = vst.msk [vmem:[%s61_s1 + $0xa] sm:$0x1f] %vm3_vm0, %v22_v2   ;;  %25 = vst.msk [vmem:[%s61_s1 + $0xf] sm:$0x1f] %vm3_vm0, %v24_v3  }

// kernel: trajectory_model_forward.5
= control target key start
LH: loop header
LB: loop body
LE: loop exit
PB: predicated region body
PF: predicated region fallthrough
CT: control target
= control target key end

     0   :  { %16 = vsyncpa [#allocation4], 0  ;;  %s2949_s0 = inlined_call_operand.vmem [shape: f32[20,128], index: 0, kind: input, shape index: {}]   ;;  %s2950_s1 = inlined_call_operand.vmem [shape: f32[20,20], index: 1, kind: input, shape index: {}]   ;;  %s2951_s2 = inlined_call_operand.vmem [shape: f32[20,20], index: 2, kind: input, shape index: {}]   ;;  %s2952_s3 = inlined_call_operand.vmem [shape: f32[3,128,192], index: 3, kind: input, shape index: {}]   ;;  %s2953_s4 = inlined_call_operand.vmem [shape: f32[1,192], index: 4, kind: input, shape index: {}]   ;;  %s2954_s5 = inlined_call_operand.vmem [shape: f32[12,192,192], index: 5, kind: input, shape index: {}]   ;;  %s2955_s6 = inlined_call_operand.vmem [shape: f32[4,1,192], index: 6, kind: input, shape index: {}]   ;;  %s2956_s7 = inlined_call_operand.vmem [shape: f32[192,60], index: 7, kind: input, shape index: {}]   ;;  %s2957_s8 = inlined_call_operand.vmem [shape: f32[1,60], index: 8, kind: input, shape index: {}]   ;;  %s2958_s9 = inlined_call_operand.vmem [shape: f32[5,20], index: 9, kind: input, shape index: {}]   ;;  %s2959_s10 = inlined_call_operand.vmem [shape: f32[5], index: 10, kind: input, shape index: {}]   ;;  %s2960_s11 = inlined_call_operand.vmem [shape: f32[12,5,5], index: 11, kind: output, shape index: {}]  }
   0x1   :  { %s43_s19 = sshll.u32 %s2959_s10, 4  ;;  %s44_s19 = int_to_ptr.vmem [resolvable:$true] %s43_s19 }
   0x2   :  { %s1959_s20 = scalar_lea.vmem %s44_s19, 16  ;;  %p1964_p1 = scmp.lt.s32.totalorder %s44_s19, %s44_s19 }
   0x3   :  { %p1960_p0 = scmp.ne.s32.totalorder %s44_s19, %s1959_s20  ;;  %p1965_p2 = scmp.lt.s32.totalorder %s1959_s20, %s1959_s20 }
   0x5   :  { %p1966_p3 = por %p1965_p2, %p1964_p1 }
   0x7   :  { %p1967_p4 = pnand %p1966_p3, %p1960_p0 }
   0x9   :  { %1970 = shalt.err (!%p1967_p4)
}
   0xa   :  { %s2029_s21 = smov [#allocation3]  }
   0xb   :  { %46 = dma.vmem_to_smem %s44_s19, 16, %s2029_s21, [#allocation4]  }
   0xc   :  { %1999 = dma.done.wait [#allocation4], 16  }
   0xd   :  { %2000 = vsyncadd [#allocation4], 4294967280 }
   0xe   :  { %50 = sfence }
   0xf   :  { %v2110_v0 = vld [vmem:[%s2949_s0 + $0x10] sm:$0xf]  ;;  %vm70_vm0 = vcmask 1043456   ;;  %v2030_v1 = vmov 0.0   ;;  %v2116_v2 = vld [vmem:[%s2949_s0 + $0x8] sm:$0xff]  ;;  %vm2031_vm1 = vmmov 0  }
  0x10   :  { %1849 = vmatprep.subr.mxu1 %v2030_v1  ;;  %366 = vmatprep.mubr.f32.mxu0 %v2030_v1  ;;  %v2127_v3 = vld [vmem:[%s2949_s0] sm:$0xff]  ;;  %vm60_vm2 = vcmask 162816   ;;  %v1658_v5 = vld [vmem:[%s2952_s3 + $0x1f8] sm:$0xff]  ;;  %v1657_v6 = vld [vmem:[%s2952_s3 + $0x1f0] sm:$0xff] }
  0x11   :  { %1850 = vmatpush3.msk.msra.mxu1 %vm70_vm0, %v2110_v0  ;;  %1855 = vmatprep.mubr.msk.f32.mxu1 %vm2031_vm1, %v2030_v1  ;;  %v2133_v4 = vld [vmem:[%s2950_s1] sm:$0xff]  ;;  %v1656_v7 = vld [vmem:[%s2952_s3 + $0x1e8] sm:$0xff]  ;;  %v1654_v10 = vld [vmem:[%s2952_s3 + $0x1d8] sm:$0xff] }
  0x12   :  { %1851 = vmatprep.subr.mxu1 %v2030_v1  ;;  %v1655_v8 = vld [vmem:[%s2952_s3 + $0x1e0] sm:$0xff]  ;;  %v2156_v9 = vld [vmem:[%s2950_s1 + $0x8] sm:$0xff]  ;;  %v1653_v11 = vld [vmem:[%s2952_s3 + $0x1d0] sm:$0xff] }
  0x13   :  { %1852 = vmatpush3.msra.mxu1 %v2116_v2  ;;  %v1652_v12 = vld [vmem:[%s2952_s3 + $0x1c8] sm:$0xff]  ;;  %v1651_v13 = vld [vmem:[%s2952_s3 + $0x1c0] sm:$0xff]  ;;  %v2177_v14 = vld [vmem:[%s2950_s1 + $0x10] sm:$0xf] }
  0x14   :  { %1853 = vmatprep.subr.mxu1 %v2030_v1  ;;  %v1650_v15 = vld [vmem:[%s2952_s3 + $0x1b8] sm:$0xff]  ;;  %v1649_v16 = vld [vmem:[%s2952_s3 + $0x1b0] sm:$0xff]  ;;  %v1648_v18 = vld [vmem:[%s2952_s3 + $0x1a8] sm:$0xff] }
  0x15   :  { %1854 = vmatpush3.msra.mxu1 %v2127_v3  ;;  %v185_v17 = vld [vmem:[%s2952_s3 + $0xf8] sm:$0xff]  ;;  %v184_v19 = vld [vmem:[%s2952_s3 + $0xf0] sm:$0xff]  ;;  %v1647_v20 = vld [vmem:[%s2952_s3 + $0x1a0] sm:$0xff] }
  0x16   :  { %1856 = vmatmul.mubr.msk.f32.vlgmr.msra.gmra.mxu1 %vm60_vm2, %v2133_v4  ;;  %219 = vmatprep.subr.mxu1 %v1658_v5  ;;  %v183_v21 = vld [vmem:[%s2952_s3 + $0xe8] sm:$0xff]  ;;  %v1646_v22 = vld [vmem:[%s2952_s3 + $0x198] sm:$0xff]  ;;  %v182_v23 = vld [vmem:[%s2952_s3 + $0xe0] sm:$0xff] }
  0x17   :  { %220 = vmatpush1.msra.mxu1 %v1657_v6  ;;  %1858 = vmatprep.mubr.msk.f32.mxu1 %vm2031_vm1, %v2030_v1  ;;  %v1645_v24 = vld [vmem:[%s2952_s3 + $0x190] sm:$0xff]  ;;  %v181_v25 = vld [vmem:[%s2952_s3 + $0xd8] sm:$0xff]  ;;  %v1644_v26 = vld [vmem:[%s2952_s3 + $0x188] sm:$0xff] }
  0x18   :  { %221 = vmatprep.subr.mxu1 %v1656_v7  ;;  %302 = vmatprep.subr.mxu0 %v185_v17  ;;  %v180_v27 = vld [vmem:[%s2952_s3 + $0xd0] sm:$0xff]  ;;  %v1643_v28 = vld [vmem:[%s2952_s3 + $0x180] sm:$0xff]  ;;  %v179_v29 = vld [vmem:[%s2952_s3 + $0xc8] sm:$0xff] }
  0x19   :  { %222 = vmatpush1.msra.mxu1 %v1655_v8  ;;  %303 = vmatpush1.msra.mxu0 %v184_v19  ;;  %v1642_v30 = vld [vmem:[%s2952_s3 + $0x178] sm:$0xff]  ;;  %v178_v31 = vld [vmem:[%s2952_s3 + $0xc0] sm:$0xff]  ;;  %v1641_v32 = vld [vmem:[%s2952_s3 + $0x170] sm:$0xff] }
  0x1a   :  { %1859 = vmatmul.mubr.msk.f32.gmra.mxu1 %vm60_vm2, %v2156_v9  ;;  %223 = vmatprep.subr.mxu1 %v1654_v10  ;;  %v177_v33 = vld [vmem:[%s2952_s3 + $0xb8] sm:$0xff]  ;;  %v1640_v34 = vld [vmem:[%s2952_s3 + $0x168] sm:$0xff]  ;;  %v176_v35 = vld [vmem:[%s2952_s3 + $0xb0] sm:$0xff] }
  0x1b   :  { %224 = vmatpush1.msra.mxu1 %v1653_v11  ;;  %1861 = vmatprep.mubr.msk.f32.mxu1 %vm2031_vm1, %v2030_v1  ;;  %v1639_v36 = vld [vmem:[%s2952_s3 + $0x160] sm:$0xff]  ;;  %v175_v37 = vld [vmem:[%s2952_s3 + $0xa8] sm:$0xff]  ;;  %v1638_v38 = vld [vmem:[%s2952_s3 + $0x158] sm:$0xff] }
  0x1c   :  { %225 = vmatprep.subr.mxu1 %v1652_v12  ;;  %304 = vmatprep.subr.mxu0 %v183_v21  ;;  %v174_v39 = vld [vmem:[%s2952_s3 + $0xa0] sm:$0xff]  ;;  %v1637_v40 = vld [vmem:[%s2952_s3 + $0x150] sm:$0xff]  ;;  %v173_v41 = vld [vmem:[%s2952_s3 + $0x98] sm:$0xff] }
  0x1d   :  { %226 = vmatpush1.msra.mxu1 %v1651_v13  ;;  %305 = vmatpush1.msra.mxu0 %v182_v23  ;;  %v1636_v42 = vld [vmem:[%s2952_s3 + $0x148] sm:$0xff]  ;;  %v172_v43 = vld [vmem:[%s2952_s3 + $0x90] sm:$0xff]  ;;  %v1635_v44 = vld [vmem:[%s2952_s3 + $0x140] sm:$0xff] }
  0x1e   :  { %1862 = vmatmul.mubr.msk.f32.gmra.mxu1 %vm60_vm2, %v2177_v14  ;;  %227 = vmatprep.subr.mxu1 %v1650_v15  ;;  %v171_v45 = vld [vmem:[%s2952_s3 + $0x88] sm:$0xff]  ;;  %v1634_v46 = vld [vmem:[%s2952_s3 + $0x138] sm:$0xff]  ;;  %v170_v47 = vld [vmem:[%s2952_s3 + $0x80] sm:$0xff] }
  0x1f   :  { %228 = vmatpush1.msra.mxu1 %v1649_v16  ;;  %283 = vmatprep.mubr.f32.mxu1 %v2030_v1  ;;  %v1633_v48 = vld [vmem:[%s2952_s3 + $0x130] sm:$0xff]  ;;  %v169_v49 = vld [vmem:[%s2952_s3 + $0x78] sm:$0xff]  ;;  %v1632_v50 = vld [vmem:[%s2952_s3 + $0x128] sm:$0xff] }
  0x20   :  { %229 = vmatprep.subr.mxu1 %v1648_v18  ;;  %306 = vmatprep.subr.mxu0 %v181_v25  ;;  %v168_v51 = vld [vmem:[%s2952_s3 + $0x70] sm:$0xff]  ;;  %v1631_v52 = vld [vmem:[%s2952_s3 + $0x120] sm:$0xff]  ;;  %v167_v53 = vld [vmem:[%s2952_s3 + $0x68] sm:$0xff] }
  0x21   :  { %230 = vmatpush1.msra.mxu1 %v1647_v20  ;;  %307 = vmatpush1.msra.mxu0 %v180_v27  ;;  %v1630_v54 = vld [vmem:[%s2952_s3 + $0x118] sm:$0xff]  ;;  %v166_v55 = vld [vmem:[%s2952_s3 + $0x60] sm:$0xff]  ;;  %v1629_v56 = vld [vmem:[%s2952_s3 + $0x110] sm:$0xff] }
  0x22   :  { %231 = vmatprep.subr.mxu1 %v1646_v22  ;;  %308 = vmatprep.subr.mxu0 %v179_v29  ;;  %v165_v57 = vld [vmem:[%s2952_s3 + $0x58] sm:$0xff]  ;;  %v1628_v58 = vld [vmem:[%s2952_s3 + $0x108] sm:$0xff]  ;;  %v164_v59 = vld [vmem:[%s2952_s3 + $0x50] sm:$0xff] }
  0x23   :  { %232 = vmatpush1.msra.mxu1 %v1645_v24  ;;  %309 = vmatpush1.msra.mxu0 %v178_v31  ;;  %v1627_v60 = vld [vmem:[%s2952_s3 + $0x100] sm:$0xff]  ;;  %v163_v61 = vld [vmem:[%s2952_s3 + $0x48] sm:$0xff]  ;;  %v161_v63 = vld [vmem:[%s2952_s3 + $0x38] sm:$0xff] }
  0x24   :  { %233 = vmatprep.subr.mxu1 %v1644_v26  ;;  %310 = vmatprep.subr.mxu0 %v177_v33  ;;  %v162_v62 = vld [vmem:[%s2952_s3 + $0x40] sm:$0xff]  ;;  %v160_v5 = vld [vmem:[%s2952_s3 + $0x30] sm:$0xff]  ;;  %v159_v6 = vld [vmem:[%s2952_s3 + $0x28] sm:$0xff] }
  0x25   :  { %234 = vmatpush1.msra.mxu1 %v1643_v28  ;;  %311 = vmatpush1.msra.mxu0 %v176_v35  ;;  %v158_v7 = vld [vmem:[%s2952_s3 + $0x20] sm:$0xff]  ;;  %v157_v8 = vld [vmem:[%s2952_s3 + $0x18] sm:$0xff]  ;;  %v2382_v11 = vld [vmem:[%s2951_s2 + $0x10] sm:$0xf] }
  0x26   :  { %235 = vmatprep.subr.mxu1 %v1642_v30  ;;  %312 = vmatprep.subr.mxu0 %v175_v37  ;;  %v2364_v10 = vld [vmem:[%s2951_s2] sm:$0xff]  ;;  %v1694_v13 = vld [vmem:[%s2952_s3 + $0x2f8] sm:$0xff]  ;;  %v1693_v15 = vld [vmem:[%s2952_s3 + $0x2f0] sm:$0xff] }
  0x27   :  { %236 = vmatpush1.msra.mxu1 %v1641_v32  ;;  %313 = vmatpush1.msra.mxu0 %v174_v39  ;;  %v154_v12 = vld [vmem:[%s2952_s3] sm:$0xff]  ;;  %v1692_v17 = vld [vmem:[%s2952_s3 + $0x2e8] sm:$0xff]  ;;  %v1690_v20 = vld [vmem:[%s2952_s3 + $0x2d8] sm:$0xff] }
  0x28   :  { %237 = vmatprep.subr.mxu1 %v1640_v34  ;;  %314 = vmatprep.subr.mxu0 %v173_v41  ;;  %v1691_v18 = vld [vmem:[%s2952_s3 + $0x2e0] sm:$0xff]  ;;  %v1689_v21 = vld [vmem:[%s2952_s3 + $0x2d0] sm:$0xff]  ;;  %v1688_v23 = vld [vmem:[%s2952_s3 + $0x2c8] sm:$0xff] }
  0x29   :  { %238 = vmatpush1.msra.mxu1 %v1639_v36  ;;  %315 = vmatpush1.msra.mxu0 %v172_v43  ;;  %v1687_v24 = vld [vmem:[%s2952_s3 + $0x2c0] sm:$0xff]  ;;  %v1686_v26 = vld [vmem:[%s2952_s3 + $0x2b8] sm:$0xff]  ;;  %v1685_v27 = vld [vmem:[%s2952_s3 + $0x2b0] sm:$0xff] }
  0x2a   :  { %239 = vmatprep.subr.mxu1 %v1638_v38  ;;  %316 = vmatprep.subr.mxu0 %v171_v45  ;;  %v1684_v29 = vld [vmem:[%s2952_s3 + $0x2a8] sm:$0xff]  ;;  %v1683_v30 = vld [vmem:[%s2952_s3 + $0x2a0] sm:$0xff]  ;;  %v1682_v31 = vld [vmem:[%s2952_s3 + $0x298] sm:$0xff] }
  0x2b   :  { %240 = vmatpush1.msra.mxu1 %v1637_v40  ;;  %317 = vmatpush1.msra.mxu0 %v170_v47  ;;  %v1681_v33 = vld [vmem:[%s2952_s3 + $0x290] sm:$0xff]  ;;  %v1680_v34 = vld [vmem:[%s2952_s3 + $0x288] sm:$0xff]  ;;  %v1679_v35 = vld [vmem:[%s2952_s3 + $0x280] sm:$0xff] }
  0x2c   :  { %241 = vmatprep.subr.mxu1 %v1636_v42  ;;  %318 = vmatprep.subr.mxu0 %v169_v49  ;;  %v1678_v36 = vld [vmem:[%s2952_s3 + $0x278] sm:$0xff]  ;;  %v1677_v37 = vld [vmem:[%s2952_s3 + $0x270] sm:$0xff]  ;;  %v1676_v38 = vld [vmem:[%s2952_s3 + $0x268] sm:$0xff] }
  0x2d   :  { %242 = vmatpush1.msra.mxu1 %v1635_v44  ;;  %319 = vmatpush1.msra.mxu0 %v168_v51  ;;  %v1675_v39 = vld [vmem:[%s2952_s3 + $0x260] sm:$0xff]  ;;  %v1674_v40 = vld [vmem:[%s2952_s3 + $0x258] sm:$0xff]  ;;  %v1673_v41 = vld [vmem:[%s2952_s3 + $0x250] sm:$0xff] }
  0x2e   :  { %243 = vmatprep.subr.mxu1 %v1634_v46  ;;  %320 = vmatprep.subr.mxu0 %v167_v53  ;;  %v1672_v42 = vld [vmem:[%s2952_s3 + $0x248] sm:$0xff]  ;;  %v1671_v43 = vld [vmem:[%s2952_s3 + $0x240] sm:$0xff]  ;;  %v1670_v44 = vld [vmem:[%s2952_s3 + $0x238] sm:$0xff] }
  0x2f   :  { %244 = vmatpush1.msra.mxu1 %v1633_v48  ;;  %321 = vmatpush1.msra.mxu0 %v166_v55  ;;  %v1669_v45 = vld [vmem:[%s2952_s3 + $0x230] sm:$0xff]  ;;  %v1668_v46 = vld [vmem:[%s2952_s3 + $0x228] sm:$0xff]  ;;  %v1667_v47 = vld [vmem:[%s2952_s3 + $0x220] sm:$0xff] }
  0x30   :  { %245 = vmatprep.subr.mxu1 %v1632_v50  ;;  %322 = vmatprep.subr.mxu0 %v165_v57  ;;  %v1666_v48 = vld [vmem:[%s2952_s3 + $0x218] sm:$0xff]  ;;  %v1665_v49 = vld [vmem:[%s2952_s3 + $0x210] sm:$0xff]  ;;  %v1664_v50 = vld [vmem:[%s2952_s3 + $0x208] sm:$0xff] }
  0x31   :  { %246 = vmatpush1.msra.mxu1 %v1631_v52  ;;  %323 = vmatpush1.msra.mxu0 %v164_v59  ;;  %v1663_v51 = vld [vmem:[%s2952_s3 + $0x200] sm:$0xff] }
  0x32   :  { %247 = vmatprep.subr.mxu1 %v1630_v54  ;;  %324 = vmatprep.subr.mxu0 %v163_v61 }
  0x33   :  { %248 = vmatpush1.msra.mxu1 %v1629_v56  ;;  %325 = vmatpush1.msra.mxu0 %v162_v62 }
  0x34   :  { %249 = vmatprep.subr.mxu1 %v1628_v58  ;;  %326 = vmatprep.subr.mxu0 %v161_v63 }
  0x35   :  { %250 = vmatpush1.msra.mxu1 %v1627_v60  ;;  %327 = vmatpush1.msra.mxu0 %v160_v5 }
  0x36   :  { %284 = vmatmul.mubr.f32.vlgmr.msra.gmra.mxu1 %v2127_v3  ;;  %1864 = vmatprep.subr.mxu1 %v2030_v1 }
  0x37   :  { %1865 = vmatpush3.msk.msra.mxu1 %vm70_vm0, %v2110_v0  ;;  %289 = vmatprep.mubr.f32.mxu1 %v2030_v1 }
  0x38   :  { %1866 = vmatprep.subr.mxu1 %v2030_v1  ;;  %328 = vmatprep.subr.mxu0 %v159_v6 }
  0x39   :  { %1867 = vmatpush3.msra.mxu1 %v2116_v2  ;;  %329 = vmatpush1.msra.mxu0 %v158_v7 }
  0x3a   :  { %290 = vmatmul.mubr.f32.gmra.mxu1 %v2116_v2  ;;  %1868 = vmatprep.subr.mxu1 %v2030_v1  ;;  %v156_v2 = vld [vmem:[%s2952_s3 + $0x10] sm:$0xff] }
  0x3b   :  { %295 = vmatprep.mubr.f32.mxu1 %v2030_v1  ;;  %1869 = vmatpush3.msra.mxu1 %v2127_v3  ;;  %v155_v3 = vld [vmem:[%s2952_s3 + $0x8] sm:$0xff]  ;;  %s614_s3 = sld [smem:[#allocation3]] }
  0x3c   :  { %330 = vmatprep.subr.mxu0 %v157_v8  ;;  %v598_v8 = vlaneseq }
  0x3d   :  { %331 = vmatpush1.msra.mxu0 %v156_v2 }
  0x3e   :  { %296 = vmatmul.mubr.f32.gmra.mxu1 %v2110_v0  ;;  %332 = vmatprep.subr.mxu0 %v155_v3  ;;  %v2373_v0 = vld [vmem:[%s2951_s2 + $0x8] sm:$0xff]  ;;  %v2490_v3 = vshrl.u32 %v598_v8, 7 }
  0x3f   :  { %1870 = vmatprep.mubr.msk.f32.mxu1 %vm2031_vm1, %v2030_v1  ;;  %333 = vmatpush1.msra.mxu0 %v154_v12 }
  0x40   :  { %507 = vmatprep.subr.mxu0 %v1694_v13  ;;  %v600_v13 = vsub.s32 0, %v2490_v3 }
  0x42   :  { %1871 = vmatmul.mubr.msk.f32.vlgmr.msra.gmra.mxu1 %vm60_vm2, %v2364_v10 }
  0x43   :  { %1873 = vmatprep.mubr.msk.f32.mxu1 %vm2031_vm1, %v2030_v1 }
  0x46   :  { %1874 = vmatmul.mubr.msk.f32.gmra.mxu1 %vm60_vm2, %v2373_v0 }
  0x47   :  { %1876 = vmatprep.mubr.msk.f32.mxu1 %vm2031_vm1, %v2030_v1 }
  0x4a   :  { %1877 = vmatmul.mubr.msk.f32.gmra.mxu1 %vm60_vm2, %v2382_v11 }
  0xd6   :  { %v140_v16 = vpop.f32.mrf.mxu1 }
  0xd7   :  { %367 = vmatmul.mubr.f32.vlgmr.msra.gmra.mxu0 %v140_v16  ;;  %v604_v16 = vsub.s32 1, %v2490_v3 }
  0xd8   :  { %v1857_v19 = vpop.f32.mrf.mxu1  ;;  %372 = vmatprep.mubr.f32.mxu0 %v2030_v1  ;;  %508 = vmatpush1.msra.mxu0 %v1693_v15  ;;  %v596_v15 = vld [vmem:[%s2953_s4] sm:$0x3]  ;;  %s2513_s4 = smov 0  }
  0xd9   :  { %509 = vmatprep.subr.mxu0 %v1692_v17  ;;  %v601_v19 = vrot.slane %v596_v15, %v600_v13 }
  0xda   :  { %v145_v22 = vpop.f32.mrf.mxu1  ;;  %510 = vmatpush1.msra.mxu0 %v1691_v18 }
  0xdb   :  { %373 = vmatmul.mubr.f32.gmra.mxu0 %v145_v22  ;;  %511 = vmatprep.subr.mxu0 %v1690_v20 }
  0xdc   :  { %v1860_v25 = vpop.f32.mrf.mxu1  ;;  %378 = vmatprep.mubr.f32.mxu0 %v2030_v1  ;;  %512 = vmatpush1.msra.mxu0 %v1689_v21 }
  0xdd   :  { %513 = vmatprep.subr.mxu0 %v1688_v23  ;;  %v605_v23 = vrot.slane %v596_v15, %v604_v16 }
  0xde   :  { %v150_v28 = vpop.f32.mrf.mxu1  ;;  %514 = vmatpush1.msra.mxu0 %v1687_v24  ;;  %v621_v24 = vstv %s614_s3 }
  0xdf   :  { %379 = vmatmul.mubr.f32.gmra.mxu0 %v150_v28  ;;  %515 = vmatprep.subr.mxu0 %v1686_v26 }
  0xe0   :  { %516 = vmatpush1.msra.mxu0 %v1685_v27  ;;  %v1863_v32 = vpop.f32.mrf.mxu1  ;;  %571 = vmatprep.mubr.f32.mxu0 %v2030_v1 }
  0xe1   :  { %517 = vmatprep.subr.mxu0 %v1684_v29 }
  0xe2   :  { %518 = vmatpush1.msra.mxu0 %v1683_v30 }
  0xe3   :  { %519 = vmatprep.subr.mxu0 %v1682_v31 }
  0xe4   :  { %520 = vmatpush1.msra.mxu0 %v1681_v33 }
  0xe5   :  { %521 = vmatprep.subr.mxu0 %v1680_v34 }
  0xe6   :  { %522 = vmatpush1.msra.mxu0 %v1679_v35 }
  0xe7   :  { %523 = vmatprep.subr.mxu0 %v1678_v36 }
  0xe8   :  { %524 = vmatpush1.msra.mxu0 %v1677_v37 }
  0xe9   :  { %525 = vmatprep.subr.mxu0 %v1676_v38 }
  0xea   :  { %526 = vmatpush1.msra.mxu0 %v1675_v39 }
  0xeb   :  { %527 = vmatprep.subr.mxu0 %v1674_v40 }
  0xec   :  { %528 = vmatpush1.msra.mxu0 %v1673_v41 }
  0xed   :  { %529 = vmatprep.subr.mxu0 %v1672_v42 }
  0xee   :  { %530 = vmatpush1.msra.mxu0 %v1671_v43 }
  0xef   :  { %531 = vmatprep.subr.mxu0 %v1670_v44 }
  0xf0   :  { %532 = vmatpush1.msra.mxu0 %v1669_v45 }
  0xf1   :  { %533 = vmatprep.subr.mxu0 %v1668_v46 }
  0xf2   :  { %534 = vmatpush1.msra.mxu0 %v1667_v47 }
  0xf3   :  { %535 = vmatprep.subr.mxu0 %v1666_v48 }
  0xf4   :  { %536 = vmatpush1.msra.mxu0 %v1665_v49 }
  0xf5   :  { %537 = vmatprep.subr.mxu0 %v1664_v50 }
  0xf6   :  { %v285_v52 = vpop.f32.mrf.mxu1  ;;  %538 = vmatpush1.msra.mxu0 %v1663_v51 }
  0xf8   :  { %v287_v53 = vpop.f32.mrf.mxu1 }
  0xfa   :  { %v291_v54 = vpop.f32.mrf.mxu1 }
  0xfc   :  { %v293_v55 = vpop.f32.mrf.mxu1 }
  0xfe   :  { %v297_v56 = vpop.f32.mrf.mxu1 }
 0x100   :  { %v299_v57 = vpop.f32.mrf.mxu1 }
 0x102   :  { %v460_v58 = vpop.f32.mrf.mxu1 }
 0x103   :  { %572 = vmatmul.mubr.f32.vlgmr.msra.gmra.mxu0 %v460_v58 }
 0x104   :  { %v1872_v59 = vpop.f32.mrf.mxu1  ;;  %577 = vmatprep.mubr.f32.mxu0 %v2030_v1 }
 0x106   :  { %v465_v60 = vpop.f32.mrf.mxu1 }
 0x107   :  { %578 = vmatmul.mubr.f32.gmra.mxu0 %v465_v60 }
 0x108   :  { %v1875_v61 = vpop.f32.mrf.mxu1  ;;  %583 = vmatprep.mubr.f32.mxu0 %v2030_v1 }
 0x10a   :  { %v470_v62 = vpop.f32.mrf.mxu1 }
 0x10b   :  { %584 = vmatmul.mubr.f32.gmra.mxu0 %v470_v62 }
 0x10c   :  { %v1878_v63 = vpop.f32.mrf.mxu1 }
 0x197   :  { %v368_v5 = vpop.f32.mrf.mxu0 }
 0x198   :  { %v369_v18 = vadd.f32 %v368_v5, %v285_v52 }
 0x199   :  { %v370_v6 = vpop.f32.mrf.mxu0 }
 0x19a   :  { %v371_v21 = vadd.f32 %v370_v6, %v287_v53 }
 0x19b   :  { %v374_v7 = vpop.f32.mrf.mxu0 }
 0x19c   :  { %v375_v26 = vadd.f32 %v374_v7, %v291_v54 }
 0x19d   :  { %v376_v2 = vpop.f32.mrf.mxu0 }
 0x19e   :  { %v377_v33 = vadd.f32 %v376_v2, %v293_v55 }
 0x19f   :  { %v380_v12 = vpop.f32.mrf.mxu0 }
 0x1a0   :  { %v381_v34 = vadd.f32 %v380_v12, %v297_v56 }
 0x1a1   :  { %v382_v17 = vpop.f32.mrf.mxu0 }
 0x1a2   :  { %v383_v39 = vadd.f32 %v382_v17, %v299_v57 }
 0x1c3   :  { %v573_v20 = vpop.f32.mrf.mxu0 }
 0x1c4   :  { %v590_v22 = vadd.f32 %v573_v20, %v369_v18 }
 0x1c5   :  { %v575_v25 = vpop.f32.mrf.mxu0 }
 0x1c6   :  { %v608_v27 = vadd.f32 %v601_v19, %v590_v22  ;;  %v591_v28 = vadd.f32 %v575_v25, %v371_v21 }
 0x1c7   :  { %v579_v29 = vpop.f32.mrf.mxu0 }
 0x1c8   :  { %vm615_vm3 = vcmp.ge.f32.partialorder %v608_v27, 0.0  ;;  %v622_v30 = vmul.f32 %v621_v24, %v608_v27  ;;  %v609_v31 = vadd.f32 %v605_v23, %v591_v28  ;;  %v592_v32 = vadd.f32 %v579_v29, %v375_v26 }
 0x1c9   :  { %v581_v35 = vpop.f32.mrf.mxu0 }
 0x1ca   :  { %v628_v36 = vsel %vm615_vm3, %v608_v27, %v622_v30   ;;  %vm616_vm4 = vcmp.ge.f32.partialorder %v609_v31, 0.0  ;;  %v623_v37 = vmul.f32 %v621_v24, %v609_v31  ;;  %v610_v38 = vadd.f32 %v601_v19, %v592_v32 }
 0x1cb   :  { %v593_v40 = vadd.f32 %v581_v35, %v377_v33  ;;  %v585_v41 = vpop.f32.mrf.mxu0 }
 0x1cc   :  { %v629_v42 = vsel %vm616_vm4, %v609_v31, %v623_v37   ;;  %vm617_vm5 = vcmp.ge.f32.partialorder %v610_v38, 0.0  ;;  %v624_v43 = vmul.f32 %v621_v24, %v610_v38  ;;  %v594_v44 = vadd.f32 %v585_v41, %v381_v34 }
 0x1cd   :  { %v611_v45 = vadd.f32 %v605_v23, %v593_v40  ;;  %v587_v46 = vpop.f32.mrf.mxu0 }
 0x1ce   :  { %v630_v47 = vsel %vm617_vm5, %v610_v38, %v624_v43   ;;  %v612_v48 = vadd.f32 %v601_v19, %v594_v44  ;;  %v595_v49 = vadd.f32 %v587_v46, %v383_v39 }
 0x1cf   :  { %vm618_vm6 = vcmp.ge.f32.partialorder %v611_v45, 0.0  ;;  %v625_v50 = vmul.f32 %v621_v24, %v611_v45 }
 0x1d0   :  { %vm619_vm7 = vcmp.ge.f32.partialorder %v612_v48, 0.0  ;;  %v626_v51 = vmul.f32 %v621_v24, %v612_v48  ;;  %v613_v52 = vadd.f32 %v605_v23, %v595_v49 }
 0x1d1   :  { %v631_v53 = vsel %vm618_vm6, %v611_v45, %v625_v50  }
 0x1d2   :  { %v632_v54 = vsel %vm619_vm7, %v612_v48, %v626_v51   ;;  %vm620_vm8 = vcmp.ge.f32.partialorder %v613_v52, 0.0  ;;  %v627_v55 = vmul.f32 %v621_v24, %v613_v52 }
 0x1d4   :  { %v633_v56 = vsel %vm620_vm8, %v613_v52, %v627_v55  }
 0x1d5 LB: > { %1695 = vmatprep.subr.msk.mxu1 %vm70_vm0, %v2003_v56  ;;  %s1832_s0 = smul.u32 1152, %s2027_s4  ;;  %v2032_v57 = vmov 0.0   ;;  %vm839_vm9 = vcmask 523264   ;;  %s1814_s16 = sshll.u32 %s2027_s4, 1  ;;  %s2027_s4 = sphi %s2513_s4, %s2737_s4   ;;  %v2023_v36 = vphi %v628_v36, %v2971_v36   ;;  %v2019_v42 = vphi %v629_v42, %v2970_v42   ;;  %v2015_v47 = vphi %v630_v47, %v2969_v47   ;;  %v2011_v53 = vphi %v631_v53, %v2968_v53   ;;  %v2007_v54 = vphi %v632_v54, %v2967_v54   ;;  %v2003_v56 = vphi %v633_v56, %v2966_v56  }
 0x1d6   : > { %1696 = vmatpush1.msk.msra.mxu1 %vm70_vm0, %v2007_v54  ;;  %716 = vmatprep.mubr.f32.mxu1 %v2032_v57  ;;  %s2737_s4 = sadd.s32 1, %s2027_s4   ;;  %s1257_s2 = scalar_lea.vmem %s2955_s6, %s1814_s16 }
 0x1d7   : > { %680 = vmatprep.subr.mxu1 %v2011_v53  ;;  %s2546_s1 = scalar_lea.vmem %s2954_s5, %s1832_s0  ;;  %s1277_s19 = sld [smem:[#allocation3 + %s2737_s4]] }
 0x1d8   : > { %681 = vmatpush1.msra.mxu1 %v2015_v47  ;;  %v1734_v58 = vld [vmem:[%s2546_s1 + $0x278] sm:$0xff]  ;;  %v1733_v59 = vld [vmem:[%s2546_s1 + $0x270] sm:$0xff]  ;;  %v1732_v60 = vld [vmem:[%s2546_s1 + $0x268] sm:$0xff]  ;;  %p636_p5 = scmp.ge.s32.totalorder %s2737_s4, 4  }
 0x1d9   : > { %682 = vmatprep.subr.mxu1 %v2019_v42  ;;  %v1731_v61 = vld [vmem:[%s2546_s1 + $0x260] sm:$0xff]  ;;  %v1730_v62 = vld [vmem:[%s2546_s1 + $0x258] sm:$0xff]  ;;  %v1729_v63 = vld [vmem:[%s2546_s1 + $0x250] sm:$0xff]  ;;  %s2036_s20 = smov (%p636_p5), 118   ;;  %s2037_s21 = smov (%p636_p5), 98  }
 0x1da   : > { %683 = vmatpush1.msra.mxu1 %v2023_v36  ;;  %v1728_v5 = vld [vmem:[%s2546_s1 + $0x248] sm:$0xff]  ;;  %v1727_v6 = vld [vmem:[%s2546_s1 + $0x240] sm:$0xff]  ;;  %v1726_v7 = vld [vmem:[%s2546_s1 + $0x238] sm:$0xff]  ;;  %s2038_s22 = smov (%p636_p5), 103   ;;  %s2039_s23 = smov (%p636_p5), 88  }
 0x1db   : > { %1697 = vmatmul.mubr.msk.f32.vlgmr.msra.gmra.mxu1 %vm60_vm2, %v2133_v4  ;;  %848 = vmatprep.subr.mxu1 %v1734_v58  ;;  %v1725_v8 = vld [vmem:[%s2546_s1 + $0x230] sm:$0xff]  ;;  %v1724_v2 = vld [vmem:[%s2546_s1 + $0x228] sm:$0xff]  ;;  %v1723_v12 = vld [vmem:[%s2546_s1 + $0x220] sm:$0xff]  ;;  %s2040_s10 = smov (%p636_p5), 93   ;;  %s2041_s24 = smov (%p636_p5), 78  }
 0x1dc   : > { %849 = vmatpush1.msra.mxu1 %v1733_v59  ;;  %722 = vmatprep.mubr.f32.mxu1 %v2032_v57  ;;  %v1722_v15 = vld [vmem:[%s2546_s1 + $0x218] sm:$0xff]  ;;  %v1721_v17 = vld [vmem:[%s2546_s1 + $0x210] sm:$0xff]  ;;  %v1720_v18 = vld [vmem:[%s2546_s1 + $0x208] sm:$0xff]  ;;  %s2042_s5 = smov (%p636_p5), 83   ;;  %s2043_s6 = smov (%p636_p5), 73  }
 0x1dd   : > { %850 = vmatprep.subr.mxu1 %v1732_v60  ;;  %v1719_v19 = vld [vmem:[%s2546_s1 + $0x200] sm:$0xff]  ;;  %v1718_v20 = vld [vmem:[%s2546_s1 + $0x1f8] sm:$0xff]  ;;  %v769_v22 = vld [vmem:[%s2546_s1 + $0xf0] sm:$0xff] }
 0x1de   : > { %851 = vmatpush1.msra.mxu1 %v1731_v61  ;;  %v770_v21 = vld [vmem:[%s2546_s1 + $0xf8] sm:$0xff]  ;;  %v768_v23 = vld [vmem:[%s2546_s1 + $0xe8] sm:$0xff]  ;;  %v1717_v24 = vld [vmem:[%s2546_s1 + $0x1f0] sm:$0xff] }
 0x1df   : > { %1698 = vmatmul.mubr.msk.f32.gmra.mxu1 %vm60_vm2, %v2156_v9  ;;  %852 = vmatprep.subr.mxu1 %v1730_v62  ;;  %v767_v25 = vld [vmem:[%s2546_s1 + $0xe0] sm:$0xff]  ;;  %v1716_v26 = vld [vmem:[%s2546_s1 + $0x1e8] sm:$0xff]  ;;  %v766_v27 = vld [vmem:[%s2546_s1 + $0xd8] sm:$0xff] }
 0x1e0   : > { %853 = vmatpush1.msra.mxu1 %v1729_v63  ;;  %728 = vmatprep.mubr.f32.mxu1 %v2032_v57  ;;  %v1715_v28 = vld [vmem:[%s2546_s1 + $0x1e0] sm:$0xff]  ;;  %v765_v29 = vld [vmem:[%s2546_s1 + $0xd0] sm:$0xff]  ;;  %v1714_v30 = vld [vmem:[%s2546_s1 + $0x1d8] sm:$0xff] }
 0x1e1   : > { %854 = vmatprep.subr.mxu1 %v1728_v5  ;;  %940 = vmatprep.subr.mxu0 %v770_v21  ;;  %v764_v31 = vld [vmem:[%s2546_s1 + $0xc8] sm:$0xff]  ;;  %v1713_v32 = vld [vmem:[%s2546_s1 + $0x1d0] sm:$0xff]  ;;  %v763_v33 = vld [vmem:[%s2546_s1 + $0xc0] sm:$0xff] }
 0x1e2   : > { %855 = vmatpush1.msra.mxu1 %v1727_v6  ;;  %941 = vmatpush1.msra.mxu0 %v769_v22  ;;  %v1712_v34 = vld [vmem:[%s2546_s1 + $0x1c8] sm:$0xff]  ;;  %v762_v35 = vld [vmem:[%s2546_s1 + $0xb8] sm:$0xff]  ;;  %v1711_v37 = vld [vmem:[%s2546_s1 + $0x1c0] sm:$0xff] }
 0x1e3   : > { %1699 = vmatmul.mubr.msk.f32.gmra.mxu1 %vm60_vm2, %v2177_v14  ;;  %856 = vmatprep.subr.mxu1 %v1726_v7  ;;  %v761_v38 = vld [vmem:[%s2546_s1 + $0xb0] sm:$0xff]  ;;  %v1710_v39 = vld [vmem:[%s2546_s1 + $0x1b8] sm:$0xff]  ;;  %v760_v40 = vld [vmem:[%s2546_s1 + $0xa8] sm:$0xff] }
 0x1e4   : > { %857 = vmatpush1.msra.mxu1 %v1725_v8  ;;  %1751 = vmatprep.mubr.msk.f32.mxu1 %vm839_vm9, %v2019_v42  ;;  %v1709_v41 = vld [vmem:[%s2546_s1 + $0x1b0] sm:$0xff]  ;;  %v759_v43 = vld [vmem:[%s2546_s1 + $0xa0] sm:$0xff]  ;;  %v1708_v44 = vld [vmem:[%s2546_s1 + $0x1a8] sm:$0xff] }
 0x1e5   : > { %858 = vmatprep.subr.mxu1 %v1724_v2  ;;  %942 = vmatprep.subr.mxu0 %v768_v23  ;;  %v758_v45 = vld [vmem:[%s2546_s1 + $0x98] sm:$0xff]  ;;  %v1707_v46 = vld [vmem:[%s2546_s1 + $0x1a0] sm:$0xff]  ;;  %v757_v48 = vld [vmem:[%s2546_s1 + $0x90] sm:$0xff] }
 0x1e6   : > { %859 = vmatpush1.msra.mxu1 %v1723_v12  ;;  %943 = vmatpush1.msra.mxu0 %v767_v25  ;;  %v1706_v49 = vld [vmem:[%s2546_s1 + $0x198] sm:$0xff]  ;;  %v756_v50 = vld [vmem:[%s2546_s1 + $0x88] sm:$0xff]  ;;  %v1705_v51 = vld [vmem:[%s2546_s1 + $0x190] sm:$0xff] }
 0x1e7   : > { %860 = vmatprep.subr.mxu1 %v1722_v15  ;;  %944 = vmatprep.subr.mxu0 %v766_v27  ;;  %v755_v52 = vld [vmem:[%s2546_s1 + $0x80] sm:$0xff]  ;;  %v1704_v55 = vld [vmem:[%s2546_s1 + $0x188] sm:$0xff]  ;;  %v754_v58 = vld [vmem:[%s2546_s1 + $0x78] sm:$0xff] }
 0x1e8   : > { %861 = vmatpush1.msra.mxu1 %v1721_v17  ;;  %945 = vmatpush1.msra.mxu0 %v765_v29  ;;  %v1703_v59 = vld [vmem:[%s2546_s1 + $0x180] sm:$0xff]  ;;  %v753_v60 = vld [vmem:[%s2546_s1 + $0x70] sm:$0xff]  ;;  %v1750_v61 = vld [vmem:[%s2546_s1 + $0x2f8] sm:$0xff] }
 0x1e9   : > { %862 = vmatprep.subr.mxu1 %v1720_v18  ;;  %946 = vmatprep.subr.mxu0 %v764_v31  ;;  %v752_v62 = vld [vmem:[%s2546_s1 + $0x68] sm:$0xff]  ;;  %v1749_v63 = vld [vmem:[%s2546_s1 + $0x2f0] sm:$0xff]  ;;  %v751_v5 = vld [vmem:[%s2546_s1 + $0x60] sm:$0xff] }
 0x1ea   : > { %863 = vmatpush1.msra.mxu1 %v1719_v19  ;;  %947 = vmatpush1.msra.mxu0 %v763_v33  ;;  %v1748_v6 = vld [vmem:[%s2546_s1 + $0x2e8] sm:$0xff]  ;;  %v750_v7 = vld [vmem:[%s2546_s1 + $0x58] sm:$0xff]  ;;  %v1747_v8 = vld [vmem:[%s2546_s1 + $0x2e0] sm:$0xff] }
 0x1eb   : > { %864 = vmatprep.subr.mxu1 %v1718_v20  ;;  %948 = vmatprep.subr.mxu0 %v762_v35  ;;  %v749_v2 = vld [vmem:[%s2546_s1 + $0x50] sm:$0xff]  ;;  %v1746_v12 = vld [vmem:[%s2546_s1 + $0x2d8] sm:$0xff]  ;;  %v748_v15 = vld [vmem:[%s2546_s1 + $0x48] sm:$0xff] }
 0x1ec   : > { %865 = vmatpush1.msra.mxu1 %v1717_v24  ;;  %949 = vmatpush1.msra.mxu0 %v761_v38  ;;  %v1745_v17 = vld [vmem:[%s2546_s1 + $0x2d0] sm:$0xff]  ;;  %v747_v18 = vld [vmem:[%s2546_s1 + $0x40] sm:$0xff]  ;;  %v1744_v19 = vld [vmem:[%s2546_s1 + $0x2c8] sm:$0xff] }
 0x1ed   : > { %866 = vmatprep.subr.mxu1 %v1716_v26  ;;  %950 = vmatprep.subr.mxu0 %v760_v40  ;;  %v746_v20 = vld [vmem:[%s2546_s1 + $0x38] sm:$0xff]  ;;  %v1743_v21 = vld [vmem:[%s2546_s1 + $0x2c0] sm:$0xff]  ;;  %v745_v22 = vld [vmem:[%s2546_s1 + $0x30] sm:$0xff] }
 0x1ee   : > { %867 = vmatpush1.msra.mxu1 %v1715_v28  ;;  %951 = vmatpush1.msra.mxu0 %v759_v43  ;;  %v1742_v23 = vld [vmem:[%s2546_s1 + $0x2b8] sm:$0xff]  ;;  %v744_v24 = vld [vmem:[%s2546_s1 + $0x28] sm:$0xff]  ;;  %v1741_v25 = vld [vmem:[%s2546_s1 + $0x2b0] sm:$0xff] }
 0x1ef   : > { %868 = vmatprep.subr.mxu1 %v1714_v30  ;;  %952 = vmatprep.subr.mxu0 %v758_v45  ;;  %v743_v26 = vld [vmem:[%s2546_s1 + $0x20] sm:$0xff]  ;;  %v1740_v27 = vld [vmem:[%s2546_s1 + $0x2a8] sm:$0xff]  ;;  %v742_v28 = vld [vmem:[%s2546_s1 + $0x18] sm:$0xff] }
 0x1f0   : > { %869 = vmatpush1.msra.mxu1 %v1713_v32  ;;  %953 = vmatpush1.msra.mxu0 %v757_v48  ;;  %v1739_v29 = vld [vmem:[%s2546_s1 + $0x2a0] sm:$0xff]  ;;  %v741_v30 = vld [vmem:[%s2546_s1 + $0x10] sm:$0xff]  ;;  %v1738_v31 = vld [vmem:[%s2546_s1 + $0x298] sm:$0xff] }
 0x1f1   : > { %870 = vmatprep.subr.mxu1 %v1712_v34  ;;  %954 = vmatprep.subr.mxu0 %v756_v50  ;;  %v740_v32 = vld [vmem:[%s2546_s1 + $0x8] sm:$0xff]  ;;  %v1737_v33 = vld [vmem:[%s2546_s1 + $0x290] sm:$0xff]  ;;  %v739_v34 = vld [vmem:[%s2546_s1] sm:$0xff] }
 0x1f2   : > { %871 = vmatpush1.msra.mxu1 %v1711_v37  ;;  %955 = vmatpush1.msra.mxu0 %v755_v52  ;;  %v1736_v35 = vld [vmem:[%s2546_s1 + $0x288] sm:$0xff]  ;;  %v786_v37 = vld [vmem:[%s2546_s1 + $0x178] sm:$0xff]  ;;  %v1735_v38 = vld [vmem:[%s2546_s1 + $0x280] sm:$0xff] }
 0x1f3   : > { %872 = vmatprep.subr.mxu1 %v1710_v39  ;;  %956 = vmatprep.subr.mxu0 %v754_v58  ;;  %v785_v39 = vld [vmem:[%s2546_s1 + $0x170] sm:$0xff]  ;;  %v784_v40 = vld [vmem:[%s2546_s1 + $0x168] sm:$0xff]  ;;  %v782_v43 = vld [vmem:[%s2546_s1 + $0x158] sm:$0xff] }
 0x1f4   : > { %873 = vmatpush1.msra.mxu1 %v1709_v41  ;;  %957 = vmatpush1.msra.mxu0 %v753_v60  ;;  %v783_v41 = vld [vmem:[%s2546_s1 + $0x160] sm:$0xff]  ;;  %v780_v45 = vld [vmem:[%s2546_s1 + $0x148] sm:$0xff]  ;;  %v778_v48 = vld [vmem:[%s2546_s1 + $0x138] sm:$0xff] }
 0x1f5   : > { %874 = vmatprep.subr.mxu1 %v1708_v44  ;;  %958 = vmatprep.subr.mxu0 %v752_v62  ;;  %v781_v44 = vld [vmem:[%s2546_s1 + $0x150] sm:$0xff]  ;;  %v776_v50 = vld [vmem:[%s2546_s1 + $0x128] sm:$0xff]  ;;  %v774_v52 = vld [vmem:[%s2546_s1 + $0x118] sm:$0xff] }
 0x1f6   : > { %875 = vmatpush1.msra.mxu1 %v1707_v46  ;;  %959 = vmatpush1.msra.mxu0 %v751_v5  ;;  %v779_v46 = vld [vmem:[%s2546_s1 + $0x140] sm:$0xff]  ;;  %v772_v58 = vld [vmem:[%s2546_s1 + $0x108] sm:$0xff]  ;;  %v1794_v60 = vld [vmem:[%s2546_s1 + $0x3f8] sm:$0xff] }
 0x1f7   : > { %876 = vmatprep.subr.mxu1 %v1706_v49  ;;  %960 = vmatprep.subr.mxu0 %v750_v7  ;;  %v777_v49 = vld [vmem:[%s2546_s1 + $0x130] sm:$0xff]  ;;  %v1790_v7 = vld [vmem:[%s2546_s1 + $0x3d8] sm:$0xff]  ;;  %v1317_v4 = vld [vmem:[%s2956_s7 + $0x68] sm:$0xff] (%p636_p5) }
 0x1f8   : > { %877 = vmatpush1.msra.mxu1 %v1705_v51  ;;  %961 = vmatpush1.msra.mxu0 %v749_v2  ;;  %v775_v51 = vld [vmem:[%s2546_s1 + $0x120] sm:$0xff]  ;;  %v1789_v2 = vld [vmem:[%s2546_s1 + $0x3d0] sm:$0xff]  ;;  %v1315_v14 = vld [vmem:[%s2956_s7 + $0x58] sm:$0xff] (%p636_p5) }
 0x1f9   : > { %878 = vmatprep.subr.mxu1 %v1704_v55  ;;  %962 = vmatprep.subr.mxu0 %v748_v15  ;;  %v773_v55 = vld [vmem:[%s2546_s1 + $0x110] sm:$0xff]  ;;  %v1316_v9 = vld [vmem:[%s2956_s7 + $0x60] sm:$0xff] (%p636_p5)  ;;  %v1311_v3 = vld [vmem:[%s2956_s7 + $0x38] sm:$0xff] (%p636_p5) }
 0x1fa   : > { %879 = vmatpush1.msra.mxu1 %v1703_v59  ;;  %963 = vmatpush1.msra.mxu0 %v747_v18  ;;  %v771_v59 = vld [vmem:[%s2546_s1 + $0x100] sm:$0xff]  ;;  %v1786_v18 = vld [vmem:[%s2546_s1 + $0x3b8] sm:$0xff] }
 0x1fb   : > { %896 = vmatprep.subr.mxu1 %v1750_v61  ;;  %964 = vmatprep.subr.mxu0 %v746_v20  ;;  %v1785_v20 = vld [vmem:[%s2546_s1 + $0x3b0] sm:$0xff] }
 0x1fc   : > { %897 = vmatpush2.msra.mxu1 %v1749_v63  ;;  %965 = vmatpush1.msra.mxu0 %v745_v22  ;;  %v1793_v63 = vld [vmem:[%s2546_s1 + $0x3f0] sm:$0xff]  ;;  %v1783_v22 = vld [vmem:[%s2546_s1 + $0x3a0] sm:$0xff] }
 0x1fd   : > { %898 = vmatprep.subr.mxu1 %v1748_v6  ;;  %966 = vmatprep.subr.mxu0 %v744_v24  ;;  %v1791_v6 = vld [vmem:[%s2546_s1 + $0x3e0] sm:$0xff]  ;;  %v1781_v24 = vld [vmem:[%s2546_s1 + $0x390] sm:$0xff] }
 0x1fe   : > { %899 = vmatpush2.msra.mxu1 %v1747_v8  ;;  %967 = vmatpush1.msra.mxu0 %v743_v26  ;;  %v1779_v26 = vld [vmem:[%s2546_s1 + $0x380] sm:$0xff] }
 0x1ff   : > { %900 = vmatprep.subr.mxu1 %v1746_v12  ;;  %968 = vmatprep.subr.mxu0 %v742_v28  ;;  %v1788_v12 = vld [vmem:[%s2546_s1 + $0x3c8] sm:$0xff]  ;;  %v1777_v28 = vld [vmem:[%s2546_s1 + $0x370] sm:$0xff] }
 0x200   : > { %901 = vmatpush2.msra.mxu1 %v1745_v17  ;;  %969 = vmatpush1.msra.mxu0 %v741_v30  ;;  %v1787_v17 = vld [vmem:[%s2546_s1 + $0x3c0] sm:$0xff] }
 0x201   : > { %902 = vmatprep.subr.mxu1 %v1744_v19  ;;  %970 = vmatprep.subr.mxu0 %v740_v32  ;;  %v1775_v30 = vld [vmem:[%s2546_s1 + $0x360] sm:$0xff]  ;;  %v1773_v32 = vld [vmem:[%s2546_s1 + $0x350] sm:$0xff] }
 0x202   : > { %903 = vmatpush2.msra.mxu1 %v1743_v21  ;;  %971 = vmatpush1.msra.mxu0 %v739_v34  ;;  %v1784_v21 = vld [vmem:[%s2546_s1 + $0x3a8] sm:$0xff]  ;;  %v1771_v34 = vld [vmem:[%s2546_s1 + $0x340] sm:$0xff] }
 0x203   : > { %904 = vmatprep.subr.mxu1 %v1742_v23  ;;  %988 = vmatprep.subr.mxu0 %v786_v37  ;;  %v1782_v23 = vld [vmem:[%s2546_s1 + $0x398] sm:$0xff]  ;;  %v1769_v37 = vld [vmem:[%s2546_s1 + $0x330] sm:$0xff] }
 0x204   : > { %905 = vmatpush2.msra.mxu1 %v1741_v25  ;;  %989 = vmatpush2.msra.mxu0 %v785_v39  ;;  %v1780_v25 = vld [vmem:[%s2546_s1 + $0x388] sm:$0xff]  ;;  %v1767_v39 = vld [vmem:[%s2546_s1 + $0x320] sm:$0xff] }
 0x205   : > { %906 = vmatprep.subr.mxu1 %v1740_v27  ;;  %990 = vmatprep.subr.mxu0 %v784_v40  ;;  %v1778_v27 = vld [vmem:[%s2546_s1 + $0x378] sm:$0xff] }
 0x206   : > { %907 = vmatpush2.msra.mxu1 %v1739_v29  ;;  %991 = vmatpush2.msra.mxu0 %v783_v41  ;;  %v1776_v29 = vld [vmem:[%s2546_s1 + $0x368] sm:$0xff]  ;;  %v1766_v40 = vld [vmem:[%s2546_s1 + $0x318] sm:$0xff]  ;;  %v1765_v41 = vld [vmem:[%s2546_s1 + $0x310] sm:$0xff] }
 0x207   : > { %908 = vmatprep.subr.mxu1 %v1738_v31  ;;  %992 = vmatprep.subr.mxu0 %v782_v43  ;;  %v1774_v31 = vld [vmem:[%s2546_s1 + $0x358] sm:$0xff]  ;;  %v1764_v43 = vld [vmem:[%s2546_s1 + $0x308] sm:$0xff] }
 0x208   : > { %909 = vmatpush2.msra.mxu1 %v1737_v33  ;;  %993 = vmatpush2.msra.mxu0 %v781_v44  ;;  %v1772_v33 = vld [vmem:[%s2546_s1 + $0x348] sm:$0xff]  ;;  %v1763_v44 = vld [vmem:[%s2546_s1 + $0x300] sm:$0xff] }
 0x209   : > { %910 = vmatprep.subr.mxu1 %v1736_v35  ;;  %994 = vmatprep.subr.mxu0 %v780_v45  ;;  %v1770_v35 = vld [vmem:[%s2546_s1 + $0x338] sm:$0xff] }
 0x20a   : > { %911 = vmatpush2.msra.mxu1 %v1735_v38  ;;  %995 = vmatpush2.msra.mxu0 %v779_v46  ;;  %v1768_v38 = vld [vmem:[%s2546_s1 + $0x328] sm:$0xff]  ;;  %v1810_v45 = vld [vmem:[%s2546_s1 + $0x478] sm:$0xff]  ;;  %v1809_v46 = vld [vmem:[%s2546_s1 + $0x470] sm:$0xff] }
 0x20b   : > { %913 = vmatmul.mubr.f32.vlgmr.msra.gmra.mxu1 %v2023_v36  ;;  %1757 = vmatprep.subr.msk.mxu1 %vm70_vm0, %v2003_v56 }
 0x20c   : > { %1758 = vmatpush1.msk.msra.mxu1 %vm70_vm0, %v2007_v54  ;;  %1752 = vmatprep.mubr.msk.f32.mxu1 %vm839_vm9, %v2011_v53 }
 0x20d   : > { %1051 = vmatprep.subr.mxu1 %v2011_v53  ;;  %996 = vmatprep.subr.mxu0 %v778_v48  ;;  %v1808_v48 = vld [vmem:[%s2546_s1 + $0x468] sm:$0xff] }
 0x20e   : > { %1052 = vmatpush1.msra.mxu1 %v2015_v47  ;;  %997 = vmatpush2.msra.mxu0 %v777_v49  ;;  %v1807_v49 = vld [vmem:[%s2546_s1 + $0x460] sm:$0xff] }
 0x20f   : > { %919 = vmatmul.mubr.f32.gmra.mxu1 %v2015_v47  ;;  %1053 = vmatprep.subr.mxu1 %v2019_v42 }
 0x210   : > { %1753 = vmatprep.mubr.msk.f32.mxu1 %vm839_vm9, %v2003_v56  ;;  %1054 = vmatpush1.msra.mxu1 %v2023_v36 }
 0x211   : > { %998 = vmatprep.subr.mxu0 %v776_v50  ;;  %v1806_v50 = vld [vmem:[%s2546_s1 + $0x458] sm:$0xff]  ;;  %1879 = vmatprep.subr.mxu1 (%p636_p5), %v2030_v1 }
 0x212   : > { %999 = vmatpush2.msra.mxu0 %v775_v51  ;;  %v1805_v51 = vld [vmem:[%s2546_s1 + $0x450] sm:$0xff] }
 0x213   : > { %925 = vmatmul.mubr.f32.gmra.mxu1 %v2007_v54  ;;  %1000 = vmatprep.subr.mxu0 %v774_v52  ;;  %v1804_v52 = vld [vmem:[%s2546_s1 + $0x448] sm:$0xff] }
 0x214   : > { %1087 = vmatprep.mubr.f32.mxu1 %v2032_v57  ;;  %1001 = vmatpush2.msra.mxu0 %v773_v55  ;;  %v1803_v55 = vld [vmem:[%s2546_s1 + $0x440] sm:$0xff] }
 0x215   : > { %1002 = vmatprep.subr.mxu0 %v772_v58  ;;  %v1802_v58 = vld [vmem:[%s2546_s1 + $0x438] sm:$0xff] }
 0x216   : > { %1003 = vmatpush2.msra.mxu0 %v771_v59  ;;  %v1801_v59 = vld [vmem:[%s2546_s1 + $0x430] sm:$0xff] }
 0x217   : > { %1759 = vmatmul.mubr.msk.f32.vlgmr.msra.gmra.mxu1 %vm60_vm2, %v2364_v10  ;;  %1167 = vmatprep.subr.mxu0 %v1794_v60  ;;  %v1800_v60 = vld [vmem:[%s2546_s1 + $0x428] sm:$0xff]  ;;  %v1314_v10 = vld [vmem:[%s2956_s7 + $0x50] sm:$0xff] (%p636_p5) }
 0x218   : > { %1093 = vmatprep.mubr.f32.mxu1 %v2032_v57 }
 0x21b   : > { %1760 = vmatmul.mubr.msk.f32.gmra.mxu1 %vm60_vm2, %v2373_v0  ;;  %v1313_v0 = vld [vmem:[%s2956_s7 + $0x48] sm:$0xff] (%p636_p5) }
 0x21c   : > { %1099 = vmatprep.mubr.f32.mxu1 %v2032_v57  ;;  %v1792_v57 = vld [vmem:[%s2546_s1 + $0x3e8] sm:$0xff] }
 0x21f   : > { %1761 = vmatmul.mubr.msk.f32.gmra.mxu1 %vm60_vm2, %v2382_v11  ;;  %v1312_v11 = vld [vmem:[%s2956_s7 + $0x40] sm:$0xff] (%p636_p5) }
 0x220   :  { %1885 = vmatprep.mubr.msk.f32.mxu1 (%p636_p5), %vm2031_vm1, %v2030_v1  ;;  %vm1501_vm1 = vcmask (%p636_p5), 487424  }
 0x29b   : > { %v718_v61 = vpop.f32.mrf.mxu1 }
 0x29d   : > { %v720_v62 = vpop.f32.mrf.mxu1 }
 0x29e   : > { %1754 = vmatprep.mubr.msk.f32.mxu0 %vm839_vm9, %v720_v62  ;;  %v1798_v62 = vld [vmem:[%s2546_s1 + $0x418] sm:$0xff] }
 0x29f   : > { %v724_v5 = vpop.f32.mrf.mxu1  ;;  %1005 = vmatmul.mubr.f32.vlgmr.msra.gmra.mxu0 %v718_v61  ;;  %v1799_v61 = vld [vmem:[%s2546_s1 + $0x420] sm:$0xff] }
 0x2a0   : > { %1168 = vmatpush1.msra.mxu0 %v1793_v63  ;;  %v1797_v63 = vld [vmem:[%s2546_s1 + $0x410] sm:$0xff] }
 0x2a1   : > { %v726_v8 = vpop.f32.mrf.mxu1  ;;  %1169 = vmatprep.subr.mxu0 %v1792_v57  ;;  %v1796_v57 = vld [vmem:[%s2546_s1 + $0x408] sm:$0xff] }
 0x2a2   : > { %1755 = vmatprep.mubr.msk.f32.mxu0 %vm839_vm9, %v726_v8  ;;  %1170 = vmatpush1.msra.mxu0 %v1791_v6  ;;  %v1795_v6 = vld [vmem:[%s2546_s1 + $0x400] sm:$0xff] }
 0x2a3   : > { %v730_v15 = vpop.f32.mrf.mxu1  ;;  %1011 = vmatmul.mubr.f32.gmra.mxu0 %v724_v5  ;;  %1171 = vmatprep.subr.mxu0 %v1790_v7 }
 0x2a4   : > { %1172 = vmatpush1.msra.mxu0 %v1789_v2 }
 0x2a5   : > { %v732_v19 = vpop.f32.mrf.mxu1  ;;  %1173 = vmatprep.subr.mxu0 %v1788_v12 }
 0x2a6   : > { %1756 = vmatprep.mubr.msk.f32.mxu0 %vm839_vm9, %v732_v19  ;;  %1174 = vmatpush1.msra.mxu0 %v1787_v17 }
 0x2a7   : > { %1017 = vmatmul.mubr.f32.gmra.mxu0 %v730_v15  ;;  %1175 = vmatprep.subr.mxu0 %v1786_v18 }
 0x2a8   : > { %1176 = vmatpush1.msra.mxu0 %v1785_v20 }
 0x2a9   : > { %1177 = vmatprep.subr.mxu0 %v1784_v21 }
 0x2aa   : > { %1178 = vmatpush1.msra.mxu0 %v1783_v22 }
 0x2ab   : > { %1179 = vmatprep.subr.mxu0 %v1782_v23 }
 0x2ac   : > { %1180 = vmatpush1.msra.mxu0 %v1781_v24 }
 0x2ad   : > { %1181 = vmatprep.subr.mxu0 %v1780_v25 }
 0x2ae   : > { %1182 = vmatpush1.msra.mxu0 %v1779_v26 }
 0x2af   : > { %1183 = vmatprep.subr.mxu0 %v1778_v27 }
 0x2b0   : > { %1184 = vmatpush1.msra.mxu0 %v1777_v28  ;;  %v1258_v28 = vld [vmem:[%s1257_s2] sm:$0x3]  ;;  %s2033_s2 = smov (%p636_p5), 113  }
 0x2b1   : > { %1185 = vmatprep.subr.mxu0 %v1776_v29 }
 0x2b2   : > { %1186 = vmatpush1.msra.mxu0 %v1775_v30 }
 0x2b3   : > { %1187 = vmatprep.subr.mxu0 %v1774_v31  ;;  %v1263_v31 = vrot.slane %v1258_v28, %v600_v13  ;;  %v1310_v13 = vld [vmem:[%s2956_s7 + $0x30] sm:$0xff] (%p636_p5) }
 0x2b4   : > { %1188 = vmatpush1.msra.mxu0 %v1773_v32 }
 0x2b5   : > { %1189 = vmatprep.subr.mxu0 %v1772_v33 }
 0x2b6   : > { %1190 = vmatpush1.msra.mxu0 %v1771_v34 }
 0x2b7   : > { %1191 = vmatprep.subr.mxu0 %v1770_v35  ;;  %v1267_v35 = vrot.slane %v1258_v28, %v604_v16  ;;  %v1309_v16 = vld [vmem:[%s2956_s7 + $0x28] sm:$0xff] (%p636_p5)  ;;  %v1327_v28 = vld [vmem:[%s2956_s7 + $0xb8] sm:$0xff] (%p636_p5) }
 0x2b8   : > { %1192 = vmatpush1.msra.mxu0 %v1769_v37  ;;  %v1284_v37 = vstv %s1277_s19  ;;  %s2034_s19 = smov (%p636_p5), 123  }
 0x2b9   : > { %1193 = vmatprep.subr.mxu0 %v1768_v38 }
 0x2ba   : > { %1194 = vmatpush1.msra.mxu0 %v1767_v39 }
 0x2bb   : > { %1195 = vmatprep.subr.mxu0 %v1766_v40 }
 0x2bc   : > { %1196 = vmatpush1.msra.mxu0 %v1765_v41 }
 0x2bd   : > { %1197 = vmatprep.subr.mxu0 %v1764_v43 }
 0x2be   : > { %1198 = vmatpush1.msra.mxu0 %v1763_v44 }
 0x2bf   : > { %1215 = vmatprep.subr.mxu0 %v1810_v45 }
 0x2c0   : > { %1216 = vmatpush2.msra.mxu0 %v1809_v46 }
 0x2c1   : > { %1217 = vmatprep.subr.mxu0 %v1808_v48 }
 0x2c2   : > { %1218 = vmatpush2.msra.mxu0 %v1807_v49 }
 0x2c3   : > { %1219 = vmatprep.subr.mxu0 %v1806_v50 }
 0x2c4   : > { %1220 = vmatpush2.msra.mxu0 %v1805_v51 }
 0x2c5   : > { %1221 = vmatprep.subr.mxu0 %v1804_v52 }
 0x2c6   : > { %1222 = vmatpush2.msra.mxu0 %v1803_v55 }
 0x2c7   : > { %1223 = vmatprep.subr.mxu0 %v1802_v58 }
 0x2c8   : > { %1224 = vmatpush2.msra.mxu0 %v1801_v59 }
 0x2c9   : > { %1225 = vmatprep.subr.mxu0 %v1800_v60 }
 0x2ca   : > { %1226 = vmatpush2.msra.mxu0 %v1799_v61 }
 0x2cb   : > { %v914_v5 = vpop.f32.mrf.mxu1  ;;  %1227 = vmatprep.subr.mxu0 %v1798_v62 }
 0x2cc   : > { %1228 = vmatpush2.msra.mxu0 %v1797_v63 }
 0x2cd   : > { %v916_v7 = vpop.f32.mrf.mxu1  ;;  %1229 = vmatprep.subr.mxu0 %v1796_v57 }
 0x2ce   : > { %1230 = vmatpush2.msra.mxu0 %v1795_v6 }
 0x2cf   : > { %v920_v8 = vpop.f32.mrf.mxu1  ;;  %1338 = vmatprep.subr.mxu0 (%p636_p5), %v2030_v1 }
 0x2d1   : > { %v922_v2 = vpop.f32.mrf.mxu1 }
 0x2d3   : > { %v926_v12 = vpop.f32.mrf.mxu1 }
 0x2d5   : > { %v928_v15 = vpop.f32.mrf.mxu1 }
 0x2d7   : > { %v1089_v17 = vpop.f32.mrf.mxu1 }
 0x2d9   : > { %v1091_v18 = vpop.f32.mrf.mxu1 }
 0x2da   : > { %1811 = vmatprep.mubr.msk.f32.mxu0 %vm839_vm9, %v1091_v18 }
 0x2db   : > { %v1095_v19 = vpop.f32.mrf.mxu1  ;;  %1232 = vmatmul.mubr.f32.vlgmr.msra.gmra.mxu0 %v1089_v17 }
 0x2dd   : > { %v1097_v20 = vpop.f32.mrf.mxu1 }
 0x2de   : > { %1812 = vmatprep.mubr.msk.f32.mxu0 %vm839_vm9, %v1097_v20 }
 0x2df   : > { %v1101_v21 = vpop.f32.mrf.mxu1  ;;  %1238 = vmatmul.mubr.f32.gmra.mxu0 %v1095_v19 }
 0x2e1   : > { %v1103_v22 = vpop.f32.mrf.mxu1 }
 0x2e2   : > { %1813 = vmatprep.mubr.msk.f32.mxu0 %vm839_vm9, %v1103_v22 }
 0x2e3   : > { %1244 = vmatmul.mubr.f32.gmra.mxu0 %v1101_v21 }
 0x35f   : > { %v1006_v23 = vpop.f32.mrf.mxu0 }
 0x360   : > { %v1007_v30 = vadd.f32 %v1006_v23, %v914_v5 }
 0x361   : > { %v1008_v24 = vpop.f32.mrf.mxu0 }
 0x362   : > { %v1009_v33 = vadd.f32 %v1008_v24, %v916_v7 }
 0x363   : > { %v1012_v25 = vpop.f32.mrf.mxu0 }
 0x364   : > { %v1013_v39 = vadd.f32 %v1012_v25, %v920_v8  ;;  %v1319_v25 = vld [vmem:[%s2956_s7 + $0x78] sm:$0xff] (%p636_p5) }
 0x365   : > { %v1014_v26 = vpop.f32.mrf.mxu0  ;;  %1339 = vmatpush1.msra.mxu0 (%p636_p5), %v1319_v25 }
 0x366   : > { %v1015_v48 = vadd.f32 %v1014_v26, %v922_v2  ;;  %v1318_v26 = vld [vmem:[%s2956_s7 + $0x70] sm:$0xff] (%p636_p5)  ;;  %1340 = vmatprep.subr.mxu0 (%p636_p5), %v2030_v1 }
 0x367   : > { %v1018_v27 = vpop.f32.mrf.mxu0  ;;  %1341 = vmatpush1.msra.mxu0 (%p636_p5), %v1318_v26 }
 0x368   : > { %v1019_v49 = vadd.f32 %v1018_v27, %v926_v12  ;;  %1342 = vmatprep.subr.mxu0 (%p636_p5), %v2030_v1  ;;  %v1304_v27 = vld [vmem:[%s2956_s7] sm:$0xff] (%p636_p5) }
 0x369   : > { %v1020_v29 = vpop.f32.mrf.mxu0  ;;  %1343 = vmatpush1.msra.mxu0 (%p636_p5), %v1317_v4 }
 0x36a   : > { %v1021_v58 = vadd.f32 %v1020_v29, %v928_v15  ;;  %1344 = vmatprep.subr.mxu0 (%p636_p5), %v2030_v1  ;;  %v1326_v29 = vld [vmem:[%s2956_s7 + $0xb0] sm:$0xff] (%p636_p5) }
 0x36b   :  { %1345 = vmatpush1.msra.mxu0 (%p636_p5), %v1316_v9 }
 0x36c   :  { %1346 = vmatprep.subr.mxu0 (%p636_p5), %v2030_v1 }
 0x36d   :  { %1347 = vmatpush1.msra.mxu0 (%p636_p5), %v1315_v14 }
 0x36e   :  { %1348 = vmatprep.subr.mxu0 (%p636_p5), %v2030_v1 }
 0x36f   :  { %1349 = vmatpush1.msra.mxu0 (%p636_p5), %v1314_v10 }
 0x370   :  { %1350 = vmatprep.subr.mxu0 (%p636_p5), %v2030_v1 }
 0x371   :  { %1351 = vmatpush1.msra.mxu0 (%p636_p5), %v1313_v0 }
 0x372   :  { %1352 = vmatprep.subr.mxu0 (%p636_p5), %v2030_v1 }
 0x373   :  { %1353 = vmatpush1.msra.mxu0 (%p636_p5), %v1312_v11 }
 0x374   :  { %1354 = vmatprep.subr.mxu0 (%p636_p5), %v2030_v1 }
 0x375   :  { %1355 = vmatpush1.msra.mxu0 (%p636_p5), %v1311_v3 }
 0x376   :  { %1356 = vmatprep.subr.mxu0 (%p636_p5), %v2030_v1 }
 0x377   :  { %1357 = vmatpush1.msra.mxu0 (%p636_p5), %v1310_v13 }
 0x378   :  { %1358 = vmatprep.subr.mxu0 (%p636_p5), %v2030_v1 }
 0x379   :  { %1359 = vmatpush1.msra.mxu0 (%p636_p5), %v1309_v16 }
 0x37a   :  { %1360 = vmatprep.subr.mxu0 (%p636_p5), %v2030_v1 }
 0x39b   : > { %v1233_v32 = vpop.f32.mrf.mxu0 }
 0x39c   : > { %v1250_v34 = vadd.f32 %v1233_v32, %v1007_v30  ;;  %v1325_v30 = vld [vmem:[%s2956_s7 + $0xa8] sm:$0xff] (%p636_p5)  ;;  %v1323_v32 = vld [vmem:[%s2956_s7 + $0x98] sm:$0xff] (%p636_p5) }
 0x39d   : > { %v1235_v38 = vpop.f32.mrf.mxu0 }
 0x39e   : > { %v1270_v40 = vadd.f32 %v1263_v31, %v1250_v34  ;;  %v1251_v41 = vadd.f32 %v1235_v38, %v1009_v33  ;;  %v1322_v33 = vld [vmem:[%s2956_s7 + $0x90] sm:$0xff] (%p636_p5)  ;;  %v1321_v34 = vld [vmem:[%s2956_s7 + $0x88] sm:$0xff] (%p636_p5) }
 0x39f   : > { %v1239_v43 = vpop.f32.mrf.mxu0 }
 0x3a0   : > { %vm1278_vm10 = vcmp.ge.f32.partialorder %v1270_v40, 0.0  ;;  %v1285_v44 = vmul.f32 %v1284_v37, %v1270_v40  ;;  %v1271_v45 = vadd.f32 %v1267_v35, %v1251_v41  ;;  %v1252_v46 = vadd.f32 %v1239_v43, %v1013_v39 }
 0x3a1   : > { %v1241_v50 = vpop.f32.mrf.mxu0 }
 0x3a2   : > { %v1291_v51 = vsel %vm1278_vm10, %v1270_v40, %v1285_v44  ;;  %vm1279_vm11 = vcmp.ge.f32.partialorder %v1271_v45, 0.0  ;;  %v1286_v52 = vmul.f32 %v1284_v37, %v1271_v45  ;;  %v1272_v55 = vadd.f32 %v1263_v31, %v1252_v46  ;;  %v1303_v44 = vld [vmem:[%s2958_s9] sm:$0x1f] (%p636_p5) }
 0x3a3   : > { %v2748_v36 = vadd.f32 %v2023_v36, %v1291_v51   ;;  %v1253_v60 = vadd.f32 %v1241_v50, %v1015_v48  ;;  %v1245_v61 = vpop.f32.mrf.mxu0 }
 0x3a4   : > { %v1292_v62 = vsel %vm1279_vm11, %v1271_v45, %v1286_v52  ;;  %vm1280_vm12 = vcmp.ge.f32.partialorder %v1272_v55, 0.0  ;;  %v1287_v63 = vmul.f32 %v1284_v37, %v1272_v55  ;;  %v1254_v57 = vadd.f32 %v1245_v61, %v1019_v49  ;;  %v1818_v45 = vld [vmem:[%s2957_s8] ss:$0 sm:$0xff] (%p636_p5)  ;;  %s2035_s8 = smov (%p636_p5), 108  }
 0x3a5   : > { %v2961_v59 = vmov %v2748_v36  ;;  %v1298_v5 = vadd.f32 %v2019_v42, %v1292_v62   ;;  %v1273_v6 = vadd.f32 %v1267_v35, %v1253_v60  ;;  %v1247_v7 = vpop.f32.mrf.mxu0 }
 0x3a6   : > { %v1293_v8 = vsel %vm1280_vm12, %v1272_v55, %v1287_v63  ;;  %v1274_v2 = vadd.f32 %v1263_v31, %v1254_v57  ;;  %v1255_v12 = vadd.f32 %v1247_v7, %v1021_v58  ;;  %v1324_v31 = vld [vmem:[%s2956_s7 + $0xa0] sm:$0xff] (%p636_p5) }
 0x3a7   : > { %v2752_v47 = vadd.f32 %v2015_v47, %v1293_v8   ;;  %vm1281_vm13 = vcmp.ge.f32.partialorder %v1273_v6, 0.0  ;;  %v1288_v15 = vmul.f32 %v1284_v37, %v1273_v6  ;;  %1815 = vmatprep.mubr.msk.f32.mxu0 (%p636_p5), %vm839_vm9, %v1298_v5 }
 0x3a8   : > { %vm1282_vm14 = vcmp.ge.f32.partialorder %v1274_v2, 0.0  ;;  %v1289_v36 = vmul.f32 %v1284_v37, %v1274_v2  ;;  %v1275_v18 = vadd.f32 %v1267_v35, %v1255_v12  ;;  %v1320_v35 = vld [vmem:[%s2956_s7 + $0x80] sm:$0xff] (%p636_p5) }
 0x3a9   : > { %v2962_v17 = vmov %v2752_v47  ;;  %v1294_v19 = vsel %vm1281_vm13, %v1273_v6, %v1288_v15 }
 0x3aa   : > { %v2755_v53 = vadd.f32 %v2011_v53, %v1294_v19   ;;  %v1295_v21 = vsel %vm1282_vm14, %v1274_v2, %v1289_v36  ;;  %vm1283_vm15 = vcmp.ge.f32.partialorder %v1275_v18, 0.0  ;;  %v1290_v42 = vmul.f32 %v1284_v37, %v1275_v18 }
 0x3ab   : > { %v2758_v54 = vadd.f32 %v2007_v54, %v1295_v21   ;;  %v2969_v47 = vmov %v2962_v17  ;;  %v2971_v36 = vmov %v2961_v59 }
 0x3ac   : > { %v2963_v20 = vmov %v2755_v53  ;;  %v1296_v23 = vsel %vm1283_vm15, %v1275_v18, %v1290_v42  ;;  %v2970_v42 = vmov %v1298_v5  ;;  %638 = sbr.rel (!%p636_p5) target bundleno = 469 (0x1d5), region = 92  ;;  %v1308_v47 = vld [vmem:[%s2956_s7 + $0x20] sm:$0xff] (%p636_p5) }
 0x3ad   : > { %v2964_v22 = vmov %v2758_v54  ;;  %v2761_v56 = vadd.f32 %v2003_v56, %v1296_v23   ;;  %v2968_v53 = vmov %v2963_v20  ;;  %1361 = vmatpush1.msra.mxu0 (%p636_p5), %v1308_v47 }
 0x3ae   : > { %v2967_v54 = vmov %v2964_v22  ;;  %v1307_v53 = vld [vmem:[%s2956_s7 + $0x18] sm:$0xff] (%p636_p5)  ;;  %1362 = vmatprep.subr.mxu0 (%p636_p5), %v2030_v1 }
 0x3af   : > { %v2965_v24 = vmov %v2761_v56  ;;  %v1306_v54 = vld [vmem:[%s2956_s7 + $0x10] sm:$0xff] (%p636_p5)  ;;  %1363 = vmatpush1.msra.mxu0 (%p636_p5), %v1307_v53 }
 0x3b0   : > { %v2966_v56 = vmov %v2965_v24  ;;  %1364 = vmatprep.subr.mxu0 (%p636_p5), %v2030_v1 }
 0x3b1   :  { %v1305_v56 = vld [vmem:[%s2956_s7 + $0x8] sm:$0xff]  ;;  %1365 = vmatpush1.msra.mxu0 %v1306_v54 }
 0x3b2   :  { %1366 = vmatprep.subr.mxu0 %v2030_v1 }
 0x3b3   :  { %1367 = vmatpush1.msra.mxu0 %v1305_v56 }
 0x3b4   :  { %1368 = vmatprep.subr.mxu0 %v2030_v1 }
 0x3b5   :  { %1369 = vmatpush1.msra.mxu0 %v1304_v27 }
 0x3b6   :  { %1386 = vmatprep.subr.mxu0 %v2030_v1 }
 0x3b7   :  { %1387 = vmatpush2.msra.mxu0 %v1327_v28 }
 0x3b8   :  { %1388 = vmatprep.subr.mxu0 %v2030_v1 }
 0x3b9   :  { %1389 = vmatpush2.msra.mxu0 %v1326_v29 }
 0x3ba   :  { %1390 = vmatprep.subr.mxu0 %v2030_v1 }
 0x3bb   :  { %1391 = vmatpush2.msra.mxu0 %v1325_v30 }
 0x3bc   :  { %1392 = vmatprep.subr.mxu0 %v2030_v1 }
 0x3bd   :  { %1393 = vmatpush2.msra.mxu0 %v1324_v31 }
 0x3be   :  { %1394 = vmatprep.subr.mxu0 %v2030_v1 }
 0x3bf   :  { %1395 = vmatpush2.msra.mxu0 %v1323_v32 }
 0x3c0   :  { %1396 = vmatprep.subr.mxu0 %v2030_v1 }
 0x3c1   :  { %1397 = vmatpush2.msra.mxu0 %v1322_v33 }
 0x3c2   :  { %1398 = vmatprep.subr.mxu0 %v2030_v1 }
 0x3c3   :  { %1399 = vmatpush2.msra.mxu0 %v1321_v34 }
 0x3c4   :  { %1400 = vmatprep.subr.mxu0 %v2030_v1 }
 0x3c5   :  { %1401 = vmatpush2.msra.mxu0 %v1320_v35 }
 0x3c6   :  { %1403 = vmatmul.mubr.f32.vlgmr.msra.gmra.mxu0 %v2961_v59 }
 0x3c7   :  { %1816 = vmatprep.mubr.msk.f32.mxu0 %vm839_vm9, %v2963_v20 }
 0x3ca   :  { %1408 = vmatmul.mubr.f32.gmra.mxu0 %v2962_v17 }
 0x3cb   :  { %1817 = vmatprep.mubr.msk.f32.mxu0 %vm839_vm9, %v2965_v24 }
 0x3ce   :  { %1413 = vmatmul.mubr.f32.gmra.mxu0 %v2964_v22 }
 0x486   :  { %v1404_v37 = vpop.f32.mrf.mxu0 }
 0x488   :  { %v1406_v38 = vpop.f32.mrf.mxu0 }
 0x48a   :  { %v1409_v39 = vpop.f32.mrf.mxu0 }
 0x48c   :  { %v1411_v40 = vpop.f32.mrf.mxu0 }
 0x48e   :  { %v1414_v41 = vpop.f32.mrf.mxu0 }
 0x48f   :  { %1880 = vmatpush3.msk.msra.mxu1 %vm70_vm0, %v1414_v41  ;;  %vm1504_vm0 = vcmask 36864  }
 0x490   :  { %v1416_v43 = vpop.f32.mrf.mxu0  ;;  %1881 = vmatprep.subr.mxu1 %v2030_v1 }
 0x491   :  { %1882 = vmatpush3.msra.mxu1 %v1409_v39 }
 0x492   :  { %1883 = vmatprep.subr.mxu1 %v2030_v1 }
 0x493   :  { %1884 = vmatpush3.msra.mxu1 %v1404_v37 }
 0x494   :  { %1886 = vmatmul.mubr.msk.f32.vlgmr.msra.gmra.mxu1 %vm60_vm2, %v1303_v44 }
 0x554   :  { %v1497_v46 = vpop.f32.mrf.mxu1 }
 0x555   :  { %v1498_v48 = vadd.f32 %v1818_v45, %v1497_v46 }
 0x556   :  { %v1887_v49 = vpop.f32.mrf.mxu1 }
 0x557   :  { %1502 = vst.msk [vmem:[#allocation2] sm:$0x1f] %vm1501_vm1, %v1498_v48 }
 0x55e   :  { %v1503_v50 = vld [vmem:[#allocation2] sm:$0x1f] }
 0x55f   :  { %v1520_v51 = vld [vmem:[#allocation2] sm:$0x1f]  ;;  %1505 = vst.msk [vmem:[%s2960_s11] sm:$0x1f] %vm1504_vm0, %v1503_v50 }
 0x560   :  { %v1506_v52 = vld [vmem:[#allocation2] sm:$0x1f]  ;;  %1522 = vrot.lane.b32.xlu1 %v1520_v51, %s2033_s2 }
 0x561   :  { %1508 = vrot.lane.b32.xlu0 %v1506_v52, %s2034_s19  ;;  %v1527_v1 = vld [vmem:[#allocation2] sm:$0x1f] }
 0x562   :  { %v1513_v55 = vld [vmem:[#allocation2] sm:$0x1f] }
 0x563   :  { %v1541_v58 = vld [vmem:[#allocation2] sm:$0x1f] }
 0x564   :  { %1529 = vrot.lane.b32.xlu1 %v1527_v1, %s2035_s8  ;;  %v1534_v59 = vld [vmem:[#allocation2] sm:$0x1f] }
 0x565   :  { %1515 = vrot.lane.b32.xlu0 %v1513_v55, %s2036_s20  ;;  %v1555_v60 = vld [vmem:[#allocation2] sm:$0x1f] }
 0x566   :  { %v1548_v61 = vld [vmem:[#allocation2] sm:$0x1f] }
 0x567   :  { %v1569_v62 = vld [vmem:[#allocation2] sm:$0x1f] }
 0x568   :  { %1543 = vrot.lane.b32.xlu1 %v1541_v58, %s2037_s21  ;;  %v1562_v63 = vld [vmem:[#allocation2] sm:$0x1f] }
 0x569   :  { %1536 = vrot.lane.b32.xlu0 %v1534_v59, %s2038_s22  ;;  %v1576_v57 = vld [vmem:[#allocation2] sm:$0x1f] }
 0x56c   :  { %1557 = vrot.lane.b32.xlu1 %v1555_v60, %s2039_s23 }
 0x56d   :  { %1550 = vrot.lane.b32.xlu0 %v1548_v61, %s2040_s10 }
 0x570   :  { %1571 = vrot.lane.b32.xlu1 %v1569_v62, %s2041_s24 }
 0x571   :  { %1564 = vrot.lane.b32.xlu0 %v1562_v63, %s2042_s5 }
 0x575   :  { %1578 = vrot.lane.b32.xlu0 %v1576_v57, %s2043_s6 }
 0x5d2   :  { %v1523_v5 = vpop.permute.xlu1 %1522 }
 0x5d3   :  { %v1509_v6 = vpop.permute.xlu0 %1508  ;;  %1823 = vst.msk [vmem:[%s2960_s11 + $0x18] sm:$0x1f] %vm1504_vm0, %v1523_v5 }
 0x5d4   :  { %1821 = vst.msk [vmem:[%s2960_s11 + $0x8] sm:$0x1f] %vm1504_vm0, %v1509_v6 }
 0x5d6   :  { %v1530_v7 = vpop.permute.xlu1 %1529 }
 0x5d7   :  { %v1516_v8 = vpop.permute.xlu0 %1515  ;;  %1824 = vst.msk [vmem:[%s2960_s11 + $0x20] sm:$0x1f] %vm1504_vm0, %v1530_v7 }
 0x5d8   :  { %1822 = vst.msk [vmem:[%s2960_s11 + $0x10] sm:$0x1f] %vm1504_vm0, %v1516_v8 }
 0x5da   :  { %v1544_v2 = vpop.permute.xlu1 %1543 }
 0x5db   :  { %v1537_v12 = vpop.permute.xlu0 %1536  ;;  %1826 = vst.msk [vmem:[%s2960_s11 + $0x30] sm:$0x1f] %vm1504_vm0, %v1544_v2 }
 0x5dc   :  { %1825 = vst.msk [vmem:[%s2960_s11 + $0x28] sm:$0x1f] %vm1504_vm0, %v1537_v12 }
 0x5de   :  { %v1558_v17 = vpop.permute.xlu1 %1557 }
 0x5df   :  { %v1551_v15 = vpop.permute.xlu0 %1550  ;;  %1828 = vst.msk [vmem:[%s2960_s11 + $0x40] sm:$0x1f] %vm1504_vm0, %v1558_v17 }
 0x5e0   :  { %1827 = vst.msk [vmem:[%s2960_s11 + $0x38] sm:$0x1f] %vm1504_vm0, %v1551_v15 }
 0x5e2   :  { %v1572_v36 = vpop.permute.xlu1 %1571 }
 0x5e3   :  { %v1565_v18 = vpop.permute.xlu0 %1564  ;;  %1830 = vst.msk [vmem:[%s2960_s11 + $0x50] sm:$0x1f] %vm1504_vm0, %v1572_v36 }
 0x5e4   :  { %1829 = vst.msk [vmem:[%s2960_s11 + $0x48] sm:$0x1f] %vm1504_vm0, %v1565_v18 }
 0x5e7   :  { %v1579_v19 = vpop.permute.xlu0 %1578 }
 0x5e8   :  { %1831 = vst.msk [vmem:[%s2960_s11 + $0x58] sm:$0x1f] %vm1504_vm0, %v1579_v19 }
 0x5e9   :  { %1587 = vsyncpa [#allocation4], 1 }

// kernel: trajectory_model_forward.3
= control target key start
LH: loop header
LB: loop body
LE: loop exit
PB: predicated region body
PF: predicated region fallthrough
CT: control target
= control target key end

     0   :  { %s6033_s6 = smov 1   ;;  %s6034_s10 = smov 2   ;;  %s7372_s0 = inlined_call_operand.smem [shape: u32[35], index: -1, kind: input, shape index: {}] }
   0x1   :  { %s6126_s5 = sld [smem:[%s7372_s0]]   ;;  %s6035_s14 = smov 3  }
   0x2   :  { %s6131_s9 = sld [smem:[%s7372_s0 + %s6033_s6]]   ;;  %s6036_s18 = smov 4  }
   0x3   :  { %s6136_s13 = sld [smem:[%s7372_s0 + %s6034_s10]]   ;;  %s6037_s22 = smov 5  }
   0x4   :  { %s6141_s17 = sld [smem:[%s7372_s0 + %s6035_s14]]   ;;  %s6038_s26 = smov 6  }
   0x5   :  { %s6146_s21 = sld [smem:[%s7372_s0 + %s6036_s18]]   ;;  %s6039_s30 = smov 7  }
   0x6   :  { %s6151_s25 = sld [smem:[%s7372_s0 + %s6037_s22]]   ;;  %s6040_s4 = smov 8  }
   0x7   :  { %7382 = sst [smem:[#allocation58_spill]] %s6126_s5  ;;  %s6041_s10 = smov 9  }
   0x8   :  { %7383 = sst [smem:[#allocation59_spill]] %s6131_s9  ;;  %s6042_s15 = smov 10  }
   0x9   :  { %7384 = sst [smem:[#allocation60_spill]] %s6136_s13  ;;  %s6043_s20 = smov 11  }
   0xa   :  { %7385 = sst [smem:[#allocation61_spill]] %s6141_s17  ;;  %s6045_s1 = smov 13  }
   0xb   :  { %7386 = sst [smem:[#allocation62_spill]] %s6146_s21  ;;  %s6046_s7 = smov 14  }
   0xc   :  { %7387 = sst [smem:[#allocation63_spill]] %s6151_s25  ;;  %s6048_s22 = smov 16  }
   0xd   :  { %s6156_s29 = sld [smem:[%s7372_s0 + %s6038_s26]]   ;;  %s6044_s26 = smov 12  }
   0xe   :  { %s6161_s3 = sld [smem:[%s7372_s0 + %s6039_s30]]   ;;  %s6049_s28 = smov 17  }
   0xf   :  { %s6166_s8 = sld [smem:[%s7372_s0 + %s6040_s4]]  }
  0x10   :  { %s6171_s14 = sld [smem:[%s7372_s0 + %s6041_s10]]  }
  0x11   :  { %s6176_s19 = sld [smem:[%s7372_s0 + %s6042_s15]]   ;;  %s6047_s15 = smov 15  }
  0x12   :  { %s6181_s24 = sld [smem:[%s7372_s0 + %s6043_s20]]  }
  0x13   :  { %s6186_s30 = sld [smem:[%s7372_s0 + %s6044_s26]]  }
  0x14   :  { %s6191_s6 = sld [smem:[%s7372_s0 + %s6045_s1]]  }
  0x15   :  { %s6196_s12 = sld [smem:[%s7372_s0 + %s6046_s7]]   ;;  %s6050_s7 = smov 18  }
  0x16   :  { %s6201_s20 = sld [smem:[%s7372_s0 + %s6047_s15]]   ;;  %s6051_s15 = smov 19  }
  0x17   :  { %s6206_s27 = sld [smem:[%s7372_s0 + %s6048_s22]]   ;;  %s6052_s22 = smov 20  }
  0x18   :  { %s6211_s4 = sld [smem:[%s7372_s0 + %s6049_s28]]   ;;  %s6053_s28 = smov 21  }
  0x19   :  { %7388 = sst [smem:[#allocation64_spill]] %s6186_s30 }
  0x1a   :  { %s6216_s25 = sld [smem:[%s7372_s0 + %s6050_s7]]   ;;  %s6054_s7 = smov 22  }
  0x1b   :  { %7389 = sst [smem:[#allocation65_spill]] %s6196_s12 }
  0x1c   :  { %s6221_s21 = sld [smem:[%s7372_s0 + %s6051_s15]]   ;;  %s6055_s15 = smov 23  }
  0x1d   :  { %7390 = sst [smem:[#allocation66_spill]] %s6206_s27 }
  0x1e   :  { %s6226_s13 = sld [smem:[%s7372_s0 + %s6052_s22]]   ;;  %s6056_s22 = smov 24  }
  0x1f   :  { %s6231_s17 = sld [smem:[%s7372_s0 + %s6053_s28]]   ;;  %s6057_s28 = smov 25  }
  0x20   :  { %7391 = sst [smem:[#allocation67_spill]] %s6216_s25 }
  0x21   :  { %s6236_s9 = sld [smem:[%s7372_s0 + %s6054_s7]]   ;;  %s6058_s7 = smov 26  }
  0x22   :  { %7392 = sst [smem:[#allocation68_spill]] %s6221_s21 }
  0x23   :  { %s6241_s21 = sld [smem:[%s7372_s0 + %s6055_s15]]   ;;  %s6059_s15 = smov 27  }
  0x24   :  { %s6246_s5 = sld [smem:[%s7372_s0 + %s6056_s22]]   ;;  %s6060_s22 = smov 28  }
  0x25   :  { %7393 = sst [smem:[#allocation69_spill]] %s6231_s17 }
  0x26   :  { %s6251_s17 = sld [smem:[%s7372_s0 + %s6057_s28]]   ;;  %s6061_s28 = smov 29  }
  0x27   :  { %s6256_s25 = sld [smem:[%s7372_s0 + %s6058_s7]]   ;;  %s6062_s7 = smov 30  }
  0x28   :  { %s6276_s27 = sld [smem:[%s7372_s0 + %s6062_s7]]   ;;  %s6066_s7 = smov 34  }
  0x29   :  { %7394 = sst [smem:[#allocation70_spill]] %s6241_s21 }
  0x2a   :  { %7395 = sst [smem:[#allocation71_spill]] %s6246_s5 }
  0x2b   :  { %s6261_s21 = sld [smem:[%s7372_s0 + %s6059_s15]]   ;;  %s6063_s15 = smov 31  }
  0x2c   :  { %7396 = sst [smem:[#allocation72_spill]] %s6251_s17 }
  0x2d   :  { %s6266_s5 = sld [smem:[%s7372_s0 + %s6060_s22]]   ;;  %s6064_s22 = smov 32  }
  0x2e   :  { %s6271_s17 = sld [smem:[%s7372_s0 + %s6061_s28]]   ;;  %s6065_s28 = smov 33  }
  0x2f   :  { %s6286_s12 = sld [smem:[%s7372_s0 + %s6064_s22]]  }
  0x30   :  { %s6296_s30 = sld [smem:[%s7372_s0 + %s6066_s7]]  }
  0x31   :  { %7397 = sst [smem:[#allocation73_spill]] %s6261_s21 }
  0x32   :  { %s6281_s21 = sld [smem:[%s7372_s0 + %s6063_s15]]  }
  0x34   :  { %7398 = sst [smem:[#allocation74_spill]] %s6271_s17 }
  0x35   :  { %s6291_s17 = sld [smem:[%s7372_s0 + %s6065_s28]]  }
  0x36   :  { %75 = vsyncpa [#allocation9], 0 }
  0x37   :  { %76 = vsyncpa [#allocation12], 0 }
  0x38   :  { %77 = vsyncpa [#allocation15], 0 }
  0x39   :  { %78 = vsyncpa [#allocation18], 0 }
  0x3a   :  { %79 = vsyncpa [#allocation21], 0 }
  0x3b   :  { %80 = vsyncpa [#allocation24], 0 }
  0x3c   :  { %81 = vsyncpa [#allocation27], 0 }
  0x3d   :  { %82 = vsyncpa [#allocation30], 0 }
  0x3e   :  { %83 = vsyncpa [#allocation33], 0 }
  0x3f   :  { %84 = vsyncpa [#allocation36], 0 }
  0x40   :  { %85 = vsyncpa [#allocation39], 0 }
  0x41   :  { %86 = vsyncpa [#allocation42], 0 }
  0x42   :  { %87 = vsyncpa [#allocation10], 0  ;;  %s6067_s15 = smov [#allocation11]   ;;  %s6068_s18 = smov [#allocation14]  }
  0x43   :  { %s116_s16 = sshll.u32 %s6067_s15, 4  ;;  %s138_s22 = sshll.u32 %s6068_s18, 4  ;;  %s117_s16 = int_to_ptr.vmem [resolvable:$true] %s116_s16  ;;  %s139_s22 = int_to_ptr.vmem [resolvable:$true] %s138_s22 }
  0x44   :  { %s5443_s0 = scalar_lea.vmem %s117_s16, 16  ;;  %s5447_s23 = scalar_lea.vmem %s117_s16, 32 }
  0x45   :  { %p5444_p0 = scmp.ne.s32.totalorder %s117_s16, %s5443_s0  ;;  %p5448_p1 = scmp.lt.s32.totalorder %s117_s16, %s117_s16 }
  0x46   :  { %p5449_p2 = scmp.lt.s32.totalorder %s5447_s23, %s5443_s0 }
  0x48   :  { %p5450_p3 = por %p5449_p2, %p5448_p1 }
  0x4a   :  { %p5451_p4 = pnand %p5450_p3, %p5444_p0 }
  0x4c   :  { %5454 = shalt.err (!%p5451_p4)
}
  0x4d   :  { %119 = dma.hbm_to_vmem [thread:$0]  %s6161_s3, 16, %s117_s16, [#allocation12]  }
  0x4e   :  { %s5463_s26 = scalar_lea.vmem %s139_s22, 16  ;;  %s5467_s28 = scalar_lea.vmem %s139_s22, 32 }
  0x4f   :  { %p5464_p5 = scmp.ne.s32.totalorder %s139_s22, %s5463_s26  ;;  %p5468_p6 = scmp.lt.s32.totalorder %s139_s22, %s139_s22 }
  0x50   :  { %p5469_p7 = scmp.lt.s32.totalorder %s5467_s28, %s5463_s26 }
  0x52   :  { %p5470_p8 = por %p5469_p7, %p5468_p6 }
  0x54   :  { %p5471_p9 = pnand %p5470_p8, %p5464_p5 }
  0x56   :  { %5474 = shalt.err (!%p5471_p9)
}
  0x57   :  { %141 = dma.hbm_to_vmem [thread:$0]  %s6171_s14, 16, %s139_s22, [#allocation15]  }
  0x58   :  { %s6069_s1 = smov [#allocation17]   ;;  %s6070_s7 = smov [#allocation20]  }
  0x59   :  { %s160_s2 = sshll.u32 %s6069_s1, 4  ;;  %s180_s10 = sshll.u32 %s6070_s7, 4  ;;  %s161_s2 = int_to_ptr.vmem [resolvable:$true] %s160_s2  ;;  %s181_s10 = int_to_ptr.vmem [resolvable:$true] %s180_s10 }
  0x5a   :  { %s5483_s11 = scalar_lea.vmem %s161_s2, 16  ;;  %s5487_s15 = scalar_lea.vmem %s161_s2, 32 }
  0x5b   :  { %p5484_p10 = scmp.ne.s32.totalorder %s161_s2, %s5483_s11  ;;  %p5488_p11 = scmp.lt.s32.totalorder %s161_s2, %s161_s2 }
  0x5c   :  { %p5489_p12 = scmp.lt.s32.totalorder %s5487_s15, %s5483_s11 }
  0x5e   :  { %p5490_p13 = por %p5489_p12, %p5488_p11 }
  0x60   :  { %p5491_p0 = pnand %p5490_p13, %p5484_p10 }
  0x62   :  { %5494 = shalt.err (!%p5491_p0)
}
  0x63   :  { %163 = dma.hbm_to_vmem [thread:$0]  %s6181_s24, 16, %s161_s2, [#allocation18]  }
  0x64   :  { %s5503_s3 = scalar_lea.vmem %s181_s10, 16  ;;  %s5507_s16 = scalar_lea.vmem %s181_s10, 32 }
  0x65   :  { %p5504_p1 = scmp.ne.s32.totalorder %s181_s10, %s5503_s3  ;;  %p5508_p2 = scmp.lt.s32.totalorder %s181_s10, %s181_s10 }
  0x66   :  { %p5509_p3 = scmp.lt.s32.totalorder %s5507_s16, %s5503_s3 }
  0x68   :  { %p5510_p4 = por %p5509_p3, %p5508_p2 }
  0x6a   :  { %p5511_p5 = pnand %p5510_p4, %p5504_p1 }
  0x6c   :  { %5514 = shalt.err (!%p5511_p5)
}
  0x6d   :  { %183 = dma.hbm_to_vmem [thread:$0]  %s6191_s6, 16, %s181_s10, [#allocation21]  }
  0x6e   :  { %s6071_s14 = smov [#allocation23]   ;;  %s6072_s22 = smov [#allocation26]  }
  0x6f   :  { %s202_s18 = sshll.u32 %s6071_s14, 4  ;;  %s224_s0 = sshll.u32 %s6072_s22, 4  ;;  %s203_s18 = int_to_ptr.vmem [resolvable:$true] %s202_s18  ;;  %s225_s0 = int_to_ptr.vmem [resolvable:$true] %s224_s0 }
  0x70   :  { %s5523_s23 = scalar_lea.vmem %s203_s18, 16  ;;  %s5527_s26 = scalar_lea.vmem %s203_s18, 32 }
  0x71   :  { %p5524_p6 = scmp.ne.s32.totalorder %s203_s18, %s5523_s23  ;;  %p5528_p7 = scmp.lt.s32.totalorder %s203_s18, %s203_s18 }
  0x72   :  { %p5529_p8 = scmp.lt.s32.totalorder %s5527_s26, %s5523_s23 }
  0x74   :  { %p5530_p9 = por %p5529_p8, %p5528_p7 }
  0x76   :  { %p5531_p10 = pnand %p5530_p9, %p5524_p6 }
  0x78   :  { %5534 = shalt.err (!%p5531_p10)
}
  0x79   :  { %205 = dma.hbm_to_vmem [thread:$0]  %s6201_s20, 16, %s203_s18, [#allocation24]  }
  0x7a   :  { %s5543_s24 = scalar_lea.vmem %s225_s0, 16  ;;  %s5547_s28 = scalar_lea.vmem %s225_s0, 32 }
  0x7b   :  { %p5544_p11 = scmp.ne.s32.totalorder %s225_s0, %s5543_s24  ;;  %p5548_p12 = scmp.lt.s32.totalorder %s225_s0, %s225_s0 }
  0x7c   :  { %p5549_p13 = scmp.lt.s32.totalorder %s5547_s28, %s5543_s24 }
  0x7e   :  { %p5550_p0 = por %p5549_p13, %p5548_p12 }
  0x80   :  { %p5551_p1 = pnand %p5550_p0, %p5544_p11 }
  0x82   :  { %5554 = shalt.err (!%p5551_p1)
}
  0x83   :  { %227 = dma.hbm_to_vmem [thread:$0]  %s6211_s4, 16, %s225_s0, [#allocation27]  }
  0x84   :  { %s6073_s6 = smov [#allocation29]   ;;  %s6074_s2 = smov [#allocation32]  }
  0x85   :  { %s247_s1 = sshll.u32 %s6073_s6, 4  ;;  %s271_s7 = sshll.u32 %s6074_s2, 4  ;;  %s248_s1 = int_to_ptr.vmem [resolvable:$true] %s247_s1  ;;  %s272_s7 = int_to_ptr.vmem [resolvable:$true] %s271_s7 }
  0x86   :  { %s5563_s10 = scalar_lea.vmem %s248_s1, 640  ;;  %p5568_p3 = scmp.lt.s32.totalorder %s248_s1, %s248_s1 }
  0x87   :  { %p5564_p2 = scmp.ne.s32.totalorder %s248_s1, %s5563_s10  ;;  %p5569_p4 = scmp.lt.s32.totalorder %s5563_s10, %s5563_s10 }
  0x89   :  { %p5570_p5 = por %p5569_p4, %p5568_p3 }
  0x8b   :  { %p5571_p6 = pnand %p5570_p5, %p5564_p2 }
  0x8d   :  { %5574 = shalt.err (!%p5571_p6)
}
  0x8e   :  { %s6075_s20 = smov 128   ;;  %s6076_s11 = smov 8  }
  0x8f   :  { %253 = dma.hbm_to_vmem [thread:$0]  %s6226_s13, 640, %s248_s1, [#allocation30], %s6075_s20, %s6075_s20, %s6076_s11  }
  0x90   :  { %s5583_s4 = scalar_lea.vmem %s272_s7, 640  ;;  %p5588_p8 = scmp.lt.s32.totalorder %s272_s7, %s272_s7 }
  0x91   :  { %p5584_p7 = scmp.ne.s32.totalorder %s272_s7, %s5583_s4  ;;  %p5589_p9 = scmp.lt.s32.totalorder %s5583_s4, %s5583_s4 }
  0x93   :  { %p5590_p10 = por %p5589_p9, %p5588_p8 }
  0x95   :  { %p5591_p11 = pnand %p5590_p10, %p5584_p7 }
  0x97   :  { %5594 = shalt.err (!%p5591_p11)
}
  0x98   :  { %277 = dma.hbm_to_vmem [thread:$0]  %s6236_s9, 640, %s272_s7, [#allocation33], %s6075_s20, %s6075_s20, %s6076_s11  }
  0x99   :  { %s6077_s15 = smov [#allocation35]  }
  0x9a   :  { %s299_s3 = sshll.u32 %s6077_s15, 4  ;;  %s300_s3 = int_to_ptr.vmem [resolvable:$true] %s299_s3 }
  0x9b   :  { %s5603_s16 = scalar_lea.vmem %s300_s3, 112  ;;  %s5607_s14 = scalar_lea.vmem %s300_s3, 128 }
  0x9c   :  { %p5604_p12 = scmp.ne.s32.totalorder %s300_s3, %s5603_s16  ;;  %p5608_p13 = scmp.lt.s32.totalorder %s300_s3, %s300_s3 }
  0x9d   :  { %p5609_p0 = scmp.lt.s32.totalorder %s5607_s14, %s5603_s16 }
  0x9f   :  { %p5610_p1 = por %p5609_p0, %p5608_p13 }
  0xa1   :  { %p5611_p2 = pnand %p5610_p1, %p5604_p12 }
  0xa3   :  { %5614 = shalt.err (!%p5611_p2)
}
  0xa4   :  { %s6078_s13 = smov 16   ;;  %s6079_s18 = smov 1  }
  0xa5   :  { %305 = dma.hbm_to_vmem [thread:$0]  %s6256_s25, 112, %s300_s3, [#allocation36], %s6078_s13, %s6078_s13, %s6079_s18  }
  0xa6   :  { %s6080_s22 = smov [#allocation38]   ;;  %s6081_s0 = smov [#allocation41]  }
  0xa7   :  { %s323_s9 = sshll.u32 %s6080_s22, 4  ;;  %s347_s23 = sshll.u32 %s6081_s0, 4  ;;  %s324_s9 = int_to_ptr.vmem [resolvable:$true] %s323_s9  ;;  %s348_s23 = int_to_ptr.vmem [resolvable:$true] %s347_s23 }
  0xa8   :  { %s5623_s26 = scalar_lea.vmem %s324_s9, 3584  ;;  %p5628_p4 = scmp.lt.s32.totalorder %s324_s9, %s324_s9 }
  0xa9   :  { %p5624_p3 = scmp.ne.s32.totalorder %s324_s9, %s5623_s26  ;;  %p5629_p5 = scmp.lt.s32.totalorder %s5623_s26, %s5623_s26 }
  0xab   :  { %p5630_p6 = por %p5629_p5, %p5628_p4 }
  0xad   :  { %p5631_p7 = pnand %p5630_p6, %p5624_p3 }
  0xaf   :  { %5634 = shalt.err (!%p5631_p7)
}
  0xb0   :  { %329 = dma.hbm_to_vmem [thread:$0]  %s6266_s5, 3584, %s324_s9, [#allocation39], %s6075_s20, %s6075_s20, %s6076_s11  }
  0xb1   :  { %s5643_s24 = scalar_lea.vmem %s348_s23, 384  ;;  %p5648_p9 = scmp.lt.s32.totalorder %s348_s23, %s348_s23 }
  0xb2   :  { %p5644_p8 = scmp.ne.s32.totalorder %s348_s23, %s5643_s24  ;;  %p5649_p10 = scmp.lt.s32.totalorder %s5643_s24, %s5643_s24 }
  0xb4   :  { %p5650_p11 = por %p5649_p10, %p5648_p9 }
  0xb6   :  { %p5651_p12 = pnand %p5650_p11, %p5644_p8 }
  0xb8   :  { %5654 = shalt.err (!%p5651_p12)
}
  0xb9   :  { %353 = dma.hbm_to_vmem [thread:$0]  %s6276_s27, 384, %s348_s23, [#allocation42], %s6075_s20, %s6075_s20, %s6076_s11  }
  0xba   :  { %s6082_s25 = smov [#allocation8]   ;;  %s6083_s6 = smov [#allocation13]  }
  0xbb   :  { %s106_s28 = sshll.u32 %s6082_s25, 4  ;;  %s125_s1 = sshll.u32 %s6083_s6, 4  ;;  %s107_s28 = int_to_ptr.vmem [resolvable:$true] %s106_s28  ;;  %s126_s1 = int_to_ptr.vmem [resolvable:$true] %s125_s1 }
  0xbc   :  { %s5663_s2 = scalar_lea.vmem %s107_s28, 32  ;;  %p5668_p0 = scmp.lt.s32.totalorder %s107_s28, %s107_s28 }
  0xbd   :  { %p5664_p13 = scmp.ne.s32.totalorder %s107_s28, %s5663_s2  ;;  %p5669_p1 = scmp.lt.s32.totalorder %s5663_s2, %s5663_s2 }
  0xbf   :  { %p5670_p2 = por %p5669_p1, %p5668_p0 }
  0xc1   :  { %p5671_p3 = pnand %p5670_p2, %p5664_p13 }
  0xc3   :  { %5674 = shalt.err (!%p5671_p3)
}
  0xc4   :  { %109 = dma.hbm_to_vmem [thread:$0]  %s6156_s29, 32, %s107_s28, [#allocation9]  }
  0xc5   :  { %s5683_s5 = scalar_lea.vmem %s126_s1, 1024  ;;  %p5688_p5 = scmp.lt.s32.totalorder %s126_s1, %s126_s1 }
  0xc6   :  { %p5684_p4 = scmp.ne.s32.totalorder %s126_s1, %s5683_s5  ;;  %p5689_p6 = scmp.lt.s32.totalorder %s5683_s5, %s5683_s5 }
  0xc8   :  { %p5690_p7 = por %p5689_p6, %p5688_p5 }
  0xca   :  { %p5691_p8 = pnand %p5690_p7, %p5684_p4 }
  0xcc   :  { %5694 = shalt.err (!%p5691_p8)
}
  0xcd   :  { %131 = dma.hbm_to_vmem [thread:$0]  %s6166_s8, 1024, %s126_s1, [#allocation12], %s6075_s20, %s6075_s20, %s6076_s11  }
  0xce   :  { %s6084_s27 = smov [#allocation16]   ;;  %s6085_s10 = smov [#allocation19]  }
  0xcf   :  { %s147_s7 = sshll.u32 %s6084_s27, 4  ;;  %s170_s4 = sshll.u32 %s6085_s10, 4  ;;  %s148_s7 = int_to_ptr.vmem [resolvable:$true] %s147_s7  ;;  %s171_s4 = int_to_ptr.vmem [resolvable:$true] %s170_s4 }
  0xd0   :  { %s5703_s15 = scalar_lea.vmem %s148_s7, 1024  ;;  %p5708_p10 = scmp.lt.s32.totalorder %s148_s7, %s148_s7 }
  0xd1   :  { %p5704_p9 = scmp.ne.s32.totalorder %s148_s7, %s5703_s15  ;;  %p5709_p11 = scmp.lt.s32.totalorder %s5703_s15, %s5703_s15 }
  0xd3   :  { %p5710_p12 = por %p5709_p11, %p5708_p10 }
  0xd5   :  { %p5711_p13 = pnand %p5710_p12, %p5704_p9 }
  0xd7   :  { %5714 = shalt.err (!%p5711_p13)
}
  0xd8   :  { %153 = dma.hbm_to_vmem [thread:$0]  %s6176_s19, 1024, %s148_s7, [#allocation15], %s6075_s20, %s6075_s20, %s6076_s11  }
  0xd9   :  { %s5723_s29 = scalar_lea.vmem %s171_s4, 64  ;;  %p5728_p1 = scmp.lt.s32.totalorder %s171_s4, %s171_s4 }
  0xda   :  { %p5724_p0 = scmp.ne.s32.totalorder %s171_s4, %s5723_s29  ;;  %p5729_p2 = scmp.lt.s32.totalorder %s5723_s29, %s5723_s29 }
  0xdc   :  { %p5730_p3 = por %p5729_p2, %p5728_p1 }
  0xde   :  { %p5731_p4 = pnand %p5730_p3, %p5724_p0 }
  0xe0   :  { %5734 = shalt.err (!%p5731_p4)
}
  0xe1   :  { %s7399_s8 = sld [smem:[#allocation64_spill]]  ;;  %s6086_s3 = smov [#allocation22]  }
  0xe2   :  { %s189_s16 = sshll.u32 %s6086_s3, 4  ;;  %s6087_s14 = smov [#allocation25]   ;;  %s190_s16 = int_to_ptr.vmem [resolvable:$true] %s189_s16 }
  0xe3   :  { %s211_s22 = sshll.u32 %s6087_s14, 4  ;;  %s5743_s9 = scalar_lea.vmem %s190_s16, 1024  ;;  %s212_s22 = int_to_ptr.vmem [resolvable:$true] %s211_s22 }
  0xe4   :  { %p5744_p5 = scmp.ne.s32.totalorder %s190_s16, %s5743_s9  ;;  %p5748_p6 = scmp.lt.s32.totalorder %s190_s16, %s190_s16 }
  0xe5   :  { %p5749_p7 = scmp.lt.s32.totalorder %s5743_s9, %s5743_s9 }
  0xe7   :  { %173 = dma.hbm_to_vmem [thread:$0]  %s7399_s8, 64, %s171_s4, [#allocation18]  }
  0xe8   :  { %p5750_p8 = por %p5749_p7, %p5748_p6 }
  0xea   :  { %p5751_p9 = pnand %p5750_p8, %p5744_p5 }
  0xec   :  { %5754 = shalt.err (!%p5751_p9)
}
  0xed   :  { %s7400_s19 = sld [smem:[#allocation65_spill]]  ;;  %s5763_s0 = scalar_lea.vmem %s212_s22, 1024 }
  0xee   :  { %p5764_p10 = scmp.ne.s32.totalorder %s212_s22, %s5763_s0  ;;  %p5768_p11 = scmp.lt.s32.totalorder %s212_s22, %s212_s22 }
  0xef   :  { %p5769_p12 = scmp.lt.s32.totalorder %s5763_s0, %s5763_s0 }
  0xf1   :  { %p5770_p13 = por %p5769_p12, %p5768_p11 }
  0xf3   :  { %195 = dma.hbm_to_vmem [thread:$0]  %s7400_s19, 1024, %s190_s16, [#allocation21], %s6075_s20, %s6075_s20, %s6076_s11  }
  0xf4   :  { %p5771_p0 = pnand %p5770_p13, %p5764_p10 }
  0xf6   :  { %5774 = shalt.err (!%p5771_p0)
}
  0xf7   :  { %s7401_s23 = sld [smem:[#allocation66_spill]]  ;;  %s6088_s26 = smov [#allocation28]  }
  0xf8   :  { %s233_s24 = sshll.u32 %s6088_s26, 4  ;;  %s6089_s25 = smov [#allocation31]   ;;  %s234_s24 = int_to_ptr.vmem [resolvable:$true] %s233_s24 }
  0xf9   :  { %s259_s28 = sshll.u32 %s6089_s25, 4  ;;  %s5783_s6 = scalar_lea.vmem %s234_s24, 640  ;;  %s260_s28 = int_to_ptr.vmem [resolvable:$true] %s259_s28 }
  0xfa   :  { %p5784_p1 = scmp.ne.s32.totalorder %s234_s24, %s5783_s6  ;;  %p5788_p2 = scmp.lt.s32.totalorder %s234_s24, %s234_s24 }
  0xfb   :  { %p5789_p3 = scmp.lt.s32.totalorder %s5783_s6, %s5783_s6 }
  0xfd   :  { %217 = dma.hbm_to_vmem [thread:$0]  %s7401_s23, 1024, %s212_s22, [#allocation24], %s6075_s20, %s6075_s20, %s6076_s11  }
  0xfe   :  { %p5790_p4 = por %p5789_p3, %p5788_p2 }
 0x100   :  { %p5791_p5 = pnand %p5790_p4, %p5784_p1 }
 0x102   :  { %5794 = shalt.err (!%p5791_p5)
}
 0x103   :  { %s7402_s1 = sld [smem:[#allocation67_spill]]  ;;  %s5803_s2 = scalar_lea.vmem %s260_s28, 640 }
 0x104   :  { %p5804_p6 = scmp.ne.s32.totalorder %s260_s28, %s5803_s2  ;;  %p5808_p7 = scmp.lt.s32.totalorder %s260_s28, %s260_s28 }
 0x105   :  { %p5809_p8 = scmp.lt.s32.totalorder %s5803_s2, %s5803_s2 }
 0x107   :  { %p5810_p9 = por %p5809_p8, %p5808_p7 }
 0x109   :  { %239 = dma.hbm_to_vmem [thread:$0]  %s7402_s1, 640, %s234_s24, [#allocation27], %s6075_s20, %s6075_s20, %s6076_s11  }
 0x10a   :  { %p5811_p10 = pnand %p5810_p9, %p5804_p6 }
 0x10c   :  { %5814 = shalt.err (!%p5811_p10)
}
 0x10d   :  { %s7403_s5 = sld [smem:[#allocation69_spill]]  ;;  %s6090_s27 = smov [#allocation34]  }
 0x10e   :  { %s283_s7 = sshll.u32 %s6090_s27, 4  ;;  %s6091_s10 = smov [#allocation37]   ;;  %s284_s7 = int_to_ptr.vmem [resolvable:$true] %s283_s7 }
 0x10f   :  { %s311_s4 = sshll.u32 %s6091_s10, 4  ;;  %s5823_s15 = scalar_lea.vmem %s284_s7, 640  ;;  %s312_s4 = int_to_ptr.vmem [resolvable:$true] %s311_s4 }
 0x110   :  { %p5824_p11 = scmp.ne.s32.totalorder %s284_s7, %s5823_s15  ;;  %p5828_p12 = scmp.lt.s32.totalorder %s284_s7, %s284_s7 }
 0x111   :  { %p5829_p13 = scmp.lt.s32.totalorder %s5823_s15, %s5823_s15 }
 0x113   :  { %265 = dma.hbm_to_vmem [thread:$0]  %s7403_s5, 640, %s260_s28, [#allocation30], %s6075_s20, %s6075_s20, %s6076_s11  }
 0x114   :  { %p5830_p0 = por %p5829_p13, %p5828_p12 }
 0x116   :  { %p5831_p1 = pnand %p5830_p0, %p5824_p11 }
 0x118   :  { %5834 = shalt.err (!%p5831_p1)
}
 0x119   :  { %s7404_s29 = sld [smem:[#allocation70_spill]]  ;;  %s5843_s8 = scalar_lea.vmem %s312_s4, 10752 }
 0x11a   :  { %p5844_p2 = scmp.ne.s32.totalorder %s312_s4, %s5843_s8  ;;  %p5848_p3 = scmp.lt.s32.totalorder %s312_s4, %s312_s4 }
 0x11b   :  { %p5849_p4 = scmp.lt.s32.totalorder %s5843_s8, %s5843_s8 }
 0x11d   :  { %p5850_p5 = por %p5849_p4, %p5848_p3 }
 0x11f   :  { %289 = dma.hbm_to_vmem [thread:$0]  %s7404_s29, 640, %s284_s7, [#allocation33], %s6075_s20, %s6075_s20, %s6076_s11  }
 0x120   :  { %p5851_p6 = pnand %p5850_p5, %p5844_p2 }
 0x122   :  { %5854 = shalt.err (!%p5851_p6)
}
 0x123   :  { %s7405_s3 = sld [smem:[#allocation73_spill]]  ;;  %s6092_s16 = smov [#allocation40]  }
 0x124   :  { %s335_s14 = sshll.u32 %s6092_s16, 4  ;;  %s6093_s22 = smov [#allocation43]   ;;  %s336_s14 = int_to_ptr.vmem [resolvable:$true] %s335_s14 }
 0x125   :  { %s359_s9 = sshll.u32 %s6093_s22, 4  ;;  %s5863_s19 = scalar_lea.vmem %s336_s14, 112  ;;  %s360_s9 = int_to_ptr.vmem [resolvable:$true] %s359_s9 }
 0x126   :  { %p5864_p7 = scmp.ne.s32.totalorder %s336_s14, %s5863_s19  ;;  %s5867_s0 = scalar_lea.vmem %s336_s14, 128 }
 0x127   :  { %p5868_p8 = scmp.lt.s32.totalorder %s336_s14, %s336_s14  ;;  %p5869_p9 = scmp.lt.s32.totalorder %s5867_s0, %s5863_s19 }
 0x129   :  { %317 = dma.hbm_to_vmem [thread:$0]  %s7405_s3, 10752, %s312_s4, [#allocation36], %s6075_s20, %s6075_s20, %s6076_s11  }
 0x12a   :  { %p5870_p10 = por %p5869_p9, %p5868_p8 }
 0x12c   :  { %p5871_p11 = pnand %p5870_p10, %p5864_p7 }
 0x12e   :  { %5874 = shalt.err (!%p5871_p11)
}
 0x12f   :  { %s7406_s23 = sld [smem:[#allocation74_spill]]  ;;  %s5883_s26 = scalar_lea.vmem %s360_s9, 512 }
 0x130   :  { %p5884_p12 = scmp.ne.s32.totalorder %s360_s9, %s5883_s26  ;;  %p5888_p13 = scmp.lt.s32.totalorder %s360_s9, %s360_s9 }
 0x131   :  { %p5889_p0 = scmp.lt.s32.totalorder %s5883_s26, %s5883_s26 }
 0x133   :  { %p5890_p1 = por %p5889_p0, %p5888_p13 }
 0x135   :  { %341 = dma.hbm_to_vmem [thread:$0]  %s7406_s23, 112, %s336_s14, [#allocation39], %s6078_s13, %s6078_s13, %s6079_s18  }
 0x136   :  { %p5891_p2 = pnand %p5890_p1, %p5884_p12 }
 0x138   :  { %5894 = shalt.err (!%p5891_p2)
}
 0x139   :  { %365 = dma.hbm_to_vmem [thread:$0]  %s6281_s21, 512, %s360_s9, [#allocation42], %s6075_s20, %s6075_s20, %s6076_s11  }
 0x13a   :  { %s6094_s24 = smov [#allocation44]  }
 0x13b   :  { %373 = dma.hbm_to_smem %s6286_s12, 16, %s6094_s24, [#allocation10]  }
 0x13c   :  { %5955 = dma.done.wait [#allocation9], 32  }
 0x13d   :  { %5956 = vsyncadd [#allocation9], 4294967264 }
 0x13e   :  { %5957 = dma.done.wait [#allocation12], 1040  }
 0x13f   :  { %5958 = vsyncadd [#allocation12], 4294966256 }
 0x140   :  { %5959 = dma.done.wait [#allocation15], 1040  }
 0x141   :  { %5960 = vsyncadd [#allocation15], 4294966256 }
 0x142   :  { %5961 = dma.done.wait [#allocation18], 80  }
 0x143   :  { %5962 = vsyncadd [#allocation18], 4294967216 }
 0x144   :  { %5963 = dma.done.wait [#allocation21], 1040  }
 0x145   :  { %5964 = vsyncadd [#allocation21], 4294966256 }
 0x146   :  { %5965 = dma.done.wait [#allocation24], 1040  }
 0x147   :  { %5966 = vsyncadd [#allocation24], 4294966256 }
 0x148   :  { %5967 = dma.done.wait [#allocation27], 656  }
 0x149   :  { %5968 = vsyncadd [#allocation27], 4294966640 }
 0x14a   :  { %5969 = dma.done.wait [#allocation30], 1280  }
 0x14b   :  { %5970 = vsyncadd [#allocation30], 4294966016 }
 0x14c   :  { %5971 = dma.done.wait [#allocation33], 1280  }
 0x14d   :  { %5972 = vsyncadd [#allocation33], 4294966016 }
 0x14e   :  { %5973 = dma.done.wait [#allocation36], 10864  }
 0x14f   :  { %5974 = vsyncadd [#allocation36], 4294956432 }
 0x150   :  { %5975 = dma.done.wait [#allocation39], 3696  }
 0x151   :  { %5976 = vsyncadd [#allocation39], 4294963600 }
 0x152   :  { %5977 = dma.done.wait [#allocation42], 896  }
 0x153   :  { %5978 = vsyncadd [#allocation42], 4294966400 }
 0x154   :  { %5979 = dma.done.wait [#allocation10], 16  }
 0x155   :  { %5980 = vsyncadd [#allocation10], 4294967280 }
 0x156   :  { %446 = sfence }
 0x157   :  { %s7407_s21 = sld [smem:[#allocation58_spill]]  ;;  %v6095_v2 = vmov 0   ;;  %v7378_v3 = vmov 0.0   ;;  %v541_v4 = vld [vmem:[#allocation13 + $0x38] sm:$0xff]  ;;  %v540_v6 = vld [vmem:[#allocation13 + $0x30] sm:$0xff]  ;;  %v6097_v7 = vmov 1  }
 0x158   :  { %5266 = vset.pattern.permute.xlu1 %v6095_v2  ;;  %5264 = vset.pattern.permute.xlu0 %v6095_v2  ;;  %v667_v5 = vld [vmem:[#allocation16 + $0x38] sm:$0xff]  ;;  %v666_v8 = vld [vmem:[#allocation16 + $0x30] sm:$0xff]  ;;  %v539_v9 = vld [vmem:[#allocation13 + $0x28] sm:$0xff]  ;;  %s7408_s12 = sld [smem:[#allocation59_spill]]  ;;  %vm6098_vm0 = vmmov 0   ;;  %v6099_v26 = vmov 2  }
 0x159   :  { %4556 = vmatprep.subr.mxu0 %v7378_v3  ;;  %4587 = vmatprep.subr.mxu1 %v7378_v3  ;;  %v665_v11 = vld [vmem:[#allocation16 + $0x28] sm:$0xff]  ;;  %v538_v12 = vld [vmem:[#allocation13 + $0x20] sm:$0xff]  ;;  %v537_v15 = vld [vmem:[#allocation13 + $0x18] sm:$0xff]  ;;  %s7409_s20 = sld [smem:[#allocation61_spill]]  ;;  %vm1128_vm1 = vcmask 36864   ;;  %vm549_vm2 = vcmask 523264  }
 0x15a   :  { %4557 = vmatpush3.msra.mxu0 %v541_v4  ;;  %4588 = vmatpush3.msra.mxu1 %v667_v5  ;;  %v664_v13 = vld [vmem:[#allocation16 + $0x20] sm:$0xff]  ;;  %v663_v16 = vld [vmem:[#allocation16 + $0x18] sm:$0xff]  ;;  %v536_v18 = vld [vmem:[#allocation13 + $0x10] sm:$0xff]  ;;  %s6549_s11 = smov 0  }
 0x15b   :  { %4558 = vmatprep.subr.mxu0 %v7378_v3  ;;  %4589 = vmatprep.subr.mxu1 %v7378_v3  ;;  %v662_v19 = vld [vmem:[#allocation16 + $0x10] sm:$0xff]  ;;  %v535_v20 = vld [vmem:[#allocation13 + $0x8] sm:$0xff]  ;;  %v534_v23 = vld [vmem:[#allocation13] sm:$0xff] }
 0x15c   :  { %4559 = vmatpush3.msra.mxu0 %v540_v6  ;;  %4590 = vmatpush3.msra.mxu1 %v666_v8  ;;  %v661_v21 = vld [vmem:[#allocation16 + $0x8] sm:$0xff]  ;;  %v660_v24 = vld [vmem:[#allocation16] sm:$0xff]  ;;  %v4181_v34 = vld [vmem:[#allocation8] ss:$0 sm:$0xff] }
 0x15d   :  { %v448_v0 = vld [vmem:[%s7407_s21 + $0x8] sm:$0xff]  ;;  %v447_v1 = vld [vmem:[%s7407_s21] sm:$0xff]  ;;  %v449_v10 = vld [vmem:[%s7407_s21 + $0x10] sm:$0xff]  ;;  %4560 = vmatprep.subr.mxu0 %v7378_v3  ;;  %4591 = vmatprep.subr.mxu1 %v7378_v3 }
 0x15e   :  { %460 = vperm.xlu1 %5266, %v448_v0   ;;  %455 = vperm.xlu0 %5264, %v447_v1   ;;  %v450_v14 = vld [vmem:[%s7407_s21 + $0x18] sm:$0xff]  ;;  %v451_v17 = vld [vmem:[%s7407_s21 + $0x20] sm:$0xff]  ;;  %v771_v25 = vld [vmem:[%s7408_s12 + $0x8] sm:$0xff] }
 0x15f   :  { %4561 = vmatpush3.msra.mxu0 %v539_v9  ;;  %4592 = vmatpush3.msra.mxu1 %v665_v11  ;;  %v770_v22 = vld [vmem:[%s7408_s12] sm:$0xff]  ;;  %v772_v27 = vld [vmem:[%s7408_s12 + $0x10] sm:$0xff]  ;;  %v773_v28 = vld [vmem:[%s7408_s12 + $0x18] sm:$0xff] }
 0x160   :  { %4562 = vmatprep.subr.mxu0 %v7378_v3  ;;  %4593 = vmatprep.subr.mxu1 %v7378_v3  ;;  %v774_v29 = vld [vmem:[%s7408_s12 + $0x20] sm:$0xff]  ;;  %v4182_v35 = vld [vmem:[#allocation8 + $0x1] ss:$0 sm:$0xff]  ;;  %v6416_v41 = vld [vmem:[#allocation11] ss:$0 sm:$0xff] }
 0x161   :  { %4563 = vmatpush3.msra.mxu0 %v538_v12  ;;  %4594 = vmatpush3.msra.mxu1 %v664_v13  ;;  %v6412_v30 = vld [vmem:[%s7409_s20] sm:$0x1f]  ;;  %v899_v50 = vld [vmem:[#allocation22 + $0x38] sm:$0xff]  ;;  %v898_v58 = vld [vmem:[#allocation22 + $0x30] sm:$0xff] }
 0x162   :  { %5267 = vset.pattern.permute.xlu1 %v6097_v7  ;;  %5265 = vset.pattern.permute.xlu0 %v6097_v7  ;;  %v1129_v31 = vsel %vm1128_vm1, %v6412_v30, -inf  ;;  %v1024_v51 = vld [vmem:[#allocation25 + $0x38] sm:$0xff]  ;;  %v1023_v59 = vld [vmem:[#allocation25 + $0x30] sm:$0xff]  ;;  %v897_v4 = vld [vmem:[#allocation22 + $0x28] sm:$0xff] }
 0x163   :  { %493 = vperm.xlu1 %5267, %v448_v0   ;;  %489 = vperm.xlu0 %5265, %v447_v1   ;;  %v1022_v5 = vld [vmem:[#allocation25 + $0x28] sm:$0xff]  ;;  %v6439_v6 = vld [vmem:[#allocation19] ss:$0 sm:$0xff]  ;;  %v896_v11 = vld [vmem:[#allocation22 + $0x20] sm:$0xff] }
 0x164   :  { %4564 = vmatprep.subr.mxu0 %v7378_v3  ;;  %4595 = vmatprep.subr.mxu1 %v7378_v3  ;;  %v1021_v12 = vld [vmem:[#allocation25 + $0x20] sm:$0xff] }
 0x165   :  { %4565 = vmatpush3.msra.mxu0 %v537_v15  ;;  %4596 = vmatpush3.msra.mxu1 %v663_v16  ;;  %v6454_v16 = vld [vmem:[#allocation19 + $0x2] ss:$0 sm:$0xff] }
 0x166   :  { %4566 = vmatprep.subr.mxu0 %v7378_v3  ;;  %4597 = vmatprep.subr.mxu1 %v7378_v3 }
 0x167   :  { %5268 = vset.pattern.permute.xlu1 %v6095_v2  ;;  %497 = vperm.xlu0 %5265, %v449_v10  }
 0x168   :  { %465 = vperm.xlu1 %5268, %v449_v10   ;;  %4567 = vmatpush3.msra.mxu0 %v536_v18  ;;  %v1020_v18 = vld [vmem:[#allocation25 + $0x18] sm:$0xff] }
 0x169   :  { %4598 = vmatpush3.msra.mxu1 %v662_v19  ;;  %4568 = vmatprep.subr.mxu0 %v7378_v3 }
 0x16a   :  { %4599 = vmatprep.subr.mxu1 %v7378_v3  ;;  %4569 = vmatpush3.msra.mxu0 %v535_v20 }
 0x16b   :  { %501 = vperm.xlu0 %5265, %v450_v14   ;;  %4600 = vmatpush3.msra.mxu1 %v661_v21 }
 0x16c   :  { %470 = vperm.xlu1 %5268, %v450_v14   ;;  %4570 = vmatprep.subr.mxu0 %v7378_v3 }
 0x16d   :  { %4601 = vmatprep.subr.mxu1 %v7378_v3  ;;  %4571 = vmatpush3.msra.mxu0 %v534_v23  ;;  %v894_v23 = vld [vmem:[#allocation22 + $0x10] sm:$0xff] }
 0x16e   :  { %4572 = vmatprep.mubr.msk.f32.mxu0 %vm6098_vm0, %v7378_v3  ;;  %4602 = vmatpush3.msra.mxu1 %v660_v24  ;;  %v1019_v24 = vld [vmem:[#allocation25 + $0x10] sm:$0xff] }
 0x16f   :  { %505 = vperm.xlu0 %5265, %v451_v17   ;;  %4603 = vmatprep.mubr.msk.f32.mxu1 %vm6098_vm0, %v7378_v3 }
 0x170   :  { %475 = vperm.xlu1 %5268, %v451_v17   ;;  %4618 = vmatprep.subr.mxu0 %v7378_v3  ;;  %v895_v17 = vld [vmem:[#allocation22 + $0x18] sm:$0xff] }
 0x171   :  { %4649 = vmatprep.subr.mxu1 %v7378_v3 }
 0x173   :  { %812 = vperm.xlu0 %5265, %v770_v22  }
 0x174   :  { %778 = vperm.xlu1 %5268, %v770_v22  }
 0x177   :  { %5270 = vset.pattern.permute.xlu0 %v6095_v2 }
 0x178   :  { %5269 = vset.pattern.permute.xlu1 %v6099_v26  ;;  %783 = vperm.xlu0 %5270, %v771_v25  }
 0x179   :  { %847 = vperm.xlu1 %5269, %v770_v22  }
 0x17c   :  { %788 = vperm.xlu0 %5270, %v772_v27  }
 0x17d   :  { %5271 = vset.pattern.permute.xlu1 %v6097_v7 }
 0x17e   :  { %816 = vperm.xlu1 %5271, %v771_v25  }
 0x180   :  { %5274 = vset.pattern.permute.xlu0 %v6099_v26 }
 0x181   :  { %855 = vperm.xlu0 %5274, %v772_v27  }
 0x182   :  { %5272 = vset.pattern.permute.xlu1 %v6099_v26 }
 0x183   :  { %851 = vperm.xlu1 %5272, %v771_v25   ;;  %v6466_v25 = vld [vmem:[#allocation20] ss:$0 sm:$0xff] }
 0x185   :  { %859 = vperm.xlu0 %5274, %v773_v28  }
 0x187   :  { %5273 = vset.pattern.permute.xlu1 %v6097_v7 }
 0x188   :  { %820 = vperm.xlu1 %5273, %v772_v27   ;;  %v893_v27 = vld [vmem:[#allocation22 + $0x8] sm:$0xff] }
 0x189   :  { %5278 = vset.pattern.permute.xlu0 %v6097_v7 }
 0x18a   :  { %828 = vperm.xlu0 %5278, %v774_v29  }
 0x18c   :  { %5275 = vset.pattern.permute.xlu1 %v6095_v2 }
 0x18d   :  { %793 = vperm.xlu1 %5275, %v773_v28  }
 0x18e   :  { %5280 = vset.pattern.permute.xlu0 %v6099_v26 }
 0x191   :  { %5276 = vset.pattern.permute.xlu1 %v6097_v7  ;;  %v6441_v7 = vld [vmem:[#allocation19 + $0x1] ss:$0 sm:$0xff] }
 0x192   :  { %824 = vperm.xlu1 %5276, %v773_v28   ;;  %v1018_v28 = vld [vmem:[#allocation25 + $0x8] sm:$0xff] }
 0x196   :  { %5277 = vset.pattern.permute.xlu1 %v6095_v2 }
 0x197   :  { %798 = vperm.xlu1 %5277, %v774_v29  }
 0x19b   :  { %5279 = vset.pattern.permute.xlu1 %v6099_v26 }
 0x19c   :  { %863 = vperm.xlu1 %5279, %v774_v29  }
 0x1c0   :  { %1130 = vmax.xlane.f32.xlu1 %v1129_v31 }
 0x1d9   :  { %v461_v32 = vpop.permute.xlu1 %460  ;;  %v456_v33 = vpop.permute.xlu0 %455 }
 0x1da   :  { %v482_v36 = vmul.f32 %v4181_v34, %v456_v33  ;;  %v483_v42 = vmul.f32 %v4181_v34, %v461_v32  ;;  %v892_v32 = vld [vmem:[#allocation22] sm:$0xff] }
 0x1de   :  { %v494_v37 = vpop.permute.xlu1 %493  ;;  %v490_v38 = vpop.permute.xlu0 %489 }
 0x1df   :  { %v513_v39 = vmul.f32 %v4182_v35, %v494_v37  ;;  %v512_v40 = vmul.f32 %v4182_v35, %v490_v38 }
 0x1e1   :  { %v517_v43 = vadd.f32 %v512_v40, %v482_v36  ;;  %v518_v45 = vadd.f32 %v513_v39, %v483_v42 }
 0x1e2   :  { %v498_v44 = vpop.permute.xlu0 %497 }
 0x1e3   :  { %v529_v46 = vadd.f32 %v6416_v41, %v517_v43  ;;  %v466_v47 = vpop.permute.xlu1 %465  ;;  %v514_v48 = vmul.f32 %v4182_v35, %v498_v44  ;;  %v530_v53 = vadd.f32 %v6416_v41, %v518_v45 }
 0x1e4   :  { %v484_v49 = vmul.f32 %v4181_v34, %v466_v47 }
 0x1e5   :  { %4573 = vmatmul.mubr.msk.f32.vlgmr.msra.gmra.mxu0 %vm549_vm2, %v529_v46  ;;  %4604 = vmatmul.mubr.msk.f32.vlgmr.msra.gmra.mxu1 %vm549_vm2, %v529_v46 }
 0x1e6   :  { %v502_v52 = vpop.permute.xlu0 %501  ;;  %4575 = vmatprep.mubr.msk.f32.mxu0 %vm6098_vm0, %v7378_v3  ;;  %4606 = vmatprep.mubr.msk.f32.mxu1 %vm6098_vm0, %v7378_v3  ;;  %v519_v54 = vadd.f32 %v514_v48, %v484_v49 }
 0x1e7   :  { %v471_v55 = vpop.permute.xlu1 %470  ;;  %v515_v56 = vmul.f32 %v4182_v35, %v502_v52  ;;  %4619 = vmatpush3.msra.mxu0 %v899_v50  ;;  %4650 = vmatpush3.msra.mxu1 %v1024_v51 }
 0x1e8   :  { %v485_v57 = vmul.f32 %v4181_v34, %v471_v55  ;;  %4620 = vmatprep.subr.mxu0 %v7378_v3  ;;  %4651 = vmatprep.subr.mxu1 %v7378_v3  ;;  %v531_v61 = vadd.f32 %v6416_v41, %v519_v54 }
 0x1e9   :  { %4576 = vmatmul.mubr.msk.f32.gmra.mxu0 %vm549_vm2, %v530_v53  ;;  %4607 = vmatmul.mubr.msk.f32.gmra.mxu1 %vm549_vm2, %v530_v53 }
 0x1ea   :  { %v506_v60 = vpop.permute.xlu0 %505  ;;  %4578 = vmatprep.mubr.msk.f32.mxu0 %vm6098_vm0, %v7378_v3  ;;  %4609 = vmatprep.mubr.msk.f32.mxu1 %vm6098_vm0, %v7378_v3  ;;  %v520_v62 = vadd.f32 %v515_v56, %v485_v57 }
 0x1eb   :  { %v476_v63 = vpop.permute.xlu1 %475  ;;  %4621 = vmatpush3.msra.mxu0 %v898_v58  ;;  %4652 = vmatpush3.msra.mxu1 %v1023_v59  ;;  %v516_v1 = vmul.f32 %v4182_v35, %v506_v60 }
 0x1ec   :  { %v486_v0 = vmul.f32 %v4181_v34, %v476_v63  ;;  %4622 = vmatprep.subr.mxu0 %v7378_v3  ;;  %4653 = vmatprep.subr.mxu1 %v7378_v3  ;;  %v532_v9 = vadd.f32 %v6416_v41, %v520_v62  ;;  %v1017_v34 = vld [vmem:[#allocation25] sm:$0xff] }
 0x1ed   :  { %4579 = vmatmul.mubr.msk.f32.gmra.mxu0 %vm549_vm2, %v531_v61  ;;  %4610 = vmatmul.mubr.msk.f32.gmra.mxu1 %vm549_vm2, %v531_v61 }
 0x1ee   :  { %v813_v8 = vpop.permute.xlu0 %812  ;;  %4581 = vmatprep.mubr.msk.f32.mxu0 %vm6098_vm0, %v7378_v3  ;;  %4612 = vmatprep.mubr.msk.f32.mxu1 %vm6098_vm0, %v7378_v3  ;;  %v521_v13 = vadd.f32 %v516_v1, %v486_v0 }
 0x1ef   :  { %v779_v10 = vpop.permute.xlu1 %778  ;;  %4623 = vmatpush3.msra.mxu0 %v897_v4  ;;  %4654 = vmatpush3.msra.mxu1 %v1022_v5  ;;  %v835_v15 = vmul.f32 %v6441_v7, %v813_v8 }
 0x1f0   :  { %4624 = vmatprep.subr.mxu0 %v7378_v3  ;;  %4655 = vmatprep.subr.mxu1 %v7378_v3  ;;  %v805_v14 = vmul.f32 %v6439_v6, %v779_v10  ;;  %v533_v19 = vadd.f32 %v6416_v41, %v521_v13 }
 0x1f1   :  { %4582 = vmatmul.mubr.msk.f32.gmra.mxu0 %vm549_vm2, %v532_v9  ;;  %4613 = vmatmul.mubr.msk.f32.gmra.mxu1 %vm549_vm2, %v532_v9 }
 0x1f2   :  { %4625 = vmatpush3.msra.mxu0 %v896_v11  ;;  %4656 = vmatpush3.msra.mxu1 %v1021_v12  ;;  %v840_v21 = vadd.f32 %v835_v15, %v805_v14  ;;  %v4184_v12 = vld [vmem:[#allocation14] ss:$0 sm:$0xff]  ;;  %v4190_v14 = vld [vmem:[#allocation17] ss:$0 sm:$0xff] }
 0x1f3   :  { %4626 = vmatprep.subr.mxu0 %v7378_v3  ;;  %4657 = vmatprep.subr.mxu1 %v7378_v3  ;;  %v784_v29 = vpop.permute.xlu0 %783 }
 0x1f4   :  { %v848_v20 = vpop.permute.xlu1 %847  ;;  %4584 = vmatprep.mubr.msk.f32.mxu0 %vm6098_vm0, %v7378_v3  ;;  %4615 = vmatprep.mubr.msk.f32.mxu1 %vm6098_vm0, %v7378_v3  ;;  %v806_v36 = vmul.f32 %v6439_v6, %v784_v29 }
 0x1f5   :  { %v870_v22 = vmul.f32 %v6454_v16, %v848_v20  ;;  %4627 = vmatpush3.msra.mxu0 %v895_v17  ;;  %4658 = vmatpush3.msra.mxu1 %v1020_v18 }
 0x1f6   :  { %4585 = vmatmul.mubr.msk.f32.gmra.mxu0 %vm549_vm2, %v533_v19  ;;  %4616 = vmatmul.mubr.msk.f32.gmra.mxu1 %vm549_vm2, %v533_v19 }
 0x1f7   :  { %v875_v26 = vadd.f32 %v870_v22, %v840_v21  ;;  %4628 = vmatprep.subr.mxu0 %v7378_v3  ;;  %4659 = vmatprep.subr.mxu1 %v7378_v3  ;;  %v789_v37 = vpop.permute.xlu0 %788 }
 0x1f8   :  { %4629 = vmatpush3.msra.mxu0 %v894_v23  ;;  %4660 = vmatpush3.msra.mxu1 %v1019_v24  ;;  %v807_v43 = vmul.f32 %v6439_v6, %v789_v37 }
 0x1f9   :  { %4630 = vmatprep.subr.mxu0 %v7378_v3  ;;  %4661 = vmatprep.subr.mxu1 %v7378_v3  ;;  %v817_v31 = vpop.permute.xlu1 %816  ;;  %v887_v33 = vadd.f32 %v6466_v25, %v875_v26 }
 0x1fa   :  { %4631 = vmatpush3.msra.mxu0 %v893_v27  ;;  %4662 = vmatpush3.msra.mxu1 %v1018_v28  ;;  %v836_v35 = vmul.f32 %v6441_v7, %v817_v31 }
 0x1fb   :  { %4632 = vmatprep.subr.mxu0 %v7378_v3  ;;  %4663 = vmatprep.subr.mxu1 %v7378_v3 }
 0x1fc   :  { %4633 = vmatpush3.msra.mxu0 %v892_v32  ;;  %4634 = vmatprep.mubr.msk.f32.mxu0 %vm6098_vm0, %v7378_v3  ;;  %v841_v39 = vadd.f32 %v836_v35, %v806_v36  ;;  %v856_v42 = vpop.permute.xlu0 %855 }
 0x1fd   :  { %4664 = vmatpush3.msra.mxu1 %v1017_v34  ;;  %4665 = vmatprep.mubr.msk.f32.mxu1 %vm6098_vm0, %v7378_v3  ;;  %v872_v47 = vmul.f32 %v6454_v16, %v856_v42 }
 0x1fe   :  { %4635 = vmatmul.mubr.msk.f32.vlgmr.msra.gmra.mxu0 %vm549_vm2, %v887_v33  ;;  %4666 = vmatmul.mubr.msk.f32.vlgmr.msra.gmra.mxu1 %vm549_vm2, %v887_v33  ;;  %v852_v38 = vpop.permute.xlu1 %851 }
 0x1ff   :  { %v871_v40 = vmul.f32 %v6454_v16, %v852_v38  ;;  %4637 = vmatprep.mubr.msk.f32.mxu0 %vm6098_vm0, %v7378_v3  ;;  %4668 = vmatprep.mubr.msk.f32.mxu1 %vm6098_vm0, %v7378_v3 }
 0x200   :  { %v860_v52 = vpop.permute.xlu0 %859 }
 0x201   :  { %v876_v41 = vadd.f32 %v871_v40, %v841_v39  ;;  %v873_v56 = vmul.f32 %v6454_v16, %v860_v52 }
 0x203   :  { %v888_v44 = vadd.f32 %v6466_v25, %v876_v41  ;;  %v821_v45 = vpop.permute.xlu1 %820 }
 0x204   :  { %v837_v46 = vmul.f32 %v6441_v7, %v821_v45  ;;  %v4206_v45 = vld [vmem:[#allocation26] ss:$0 sm:$0xff] }
 0x205   :  { %4638 = vmatmul.mubr.msk.f32.gmra.mxu0 %vm549_vm2, %v888_v44  ;;  %4669 = vmatmul.mubr.msk.f32.gmra.mxu1 %vm549_vm2, %v888_v44  ;;  %v829_v58 = vpop.permute.xlu0 %828  ;;  %v4200_v44 = vld [vmem:[#allocation23] ss:$0 sm:$0xff] }
 0x206   :  { %v842_v48 = vadd.f32 %v837_v46, %v807_v43  ;;  %4640 = vmatprep.mubr.msk.f32.mxu0 %vm6098_vm0, %v7378_v3  ;;  %4671 = vmatprep.mubr.msk.f32.mxu1 %vm6098_vm0, %v7378_v3  ;;  %v839_v63 = vmul.f32 %v6441_v7, %v829_v58 }
 0x208   :  { %v877_v49 = vadd.f32 %v872_v47, %v842_v48  ;;  %v794_v50 = vpop.permute.xlu1 %793 }
 0x209   :  { %v808_v54 = vmul.f32 %v6439_v6, %v794_v50 }
 0x20a   :  { %v889_v51 = vadd.f32 %v6466_v25, %v877_v49 }
 0x20c   :  { %4641 = vmatmul.mubr.msk.f32.gmra.mxu0 %vm549_vm2, %v889_v51  ;;  %4672 = vmatmul.mubr.msk.f32.gmra.mxu1 %vm549_vm2, %v889_v51 }
 0x20d   :  { %v825_v53 = vpop.permute.xlu1 %824  ;;  %4643 = vmatprep.mubr.msk.f32.mxu0 %vm6098_vm0, %v7378_v3  ;;  %4674 = vmatprep.mubr.msk.f32.mxu1 %vm6098_vm0, %v7378_v3 }
 0x20e   :  { %v838_v55 = vmul.f32 %v6441_v7, %v825_v53 }
 0x210   :  { %v843_v57 = vadd.f32 %v838_v55, %v808_v54 }
 0x212   :  { %v878_v59 = vadd.f32 %v873_v56, %v843_v57  ;;  %v799_v60 = vpop.permute.xlu1 %798 }
 0x213   :  { %v809_v62 = vmul.f32 %v6439_v6, %v799_v60 }
 0x214   :  { %v890_v61 = vadd.f32 %v6466_v25, %v878_v59 }
 0x215   :  { %v844_v1 = vadd.f32 %v839_v63, %v809_v62 }
 0x216   :  { %4644 = vmatmul.mubr.msk.f32.gmra.mxu0 %vm549_vm2, %v890_v61  ;;  %4675 = vmatmul.mubr.msk.f32.gmra.mxu1 %vm549_vm2, %v890_v61 }
 0x217   :  { %v864_v0 = vpop.permute.xlu1 %863  ;;  %4646 = vmatprep.mubr.msk.f32.mxu0 %vm6098_vm0, %v7378_v3  ;;  %4677 = vmatprep.mubr.msk.f32.mxu1 %vm6098_vm0, %v7378_v3 }
 0x218   :  { %v874_v4 = vmul.f32 %v6454_v16, %v864_v0 }
 0x21a   :  { %v879_v5 = vadd.f32 %v874_v4, %v844_v1 }
 0x21c   :  { %v891_v8 = vadd.f32 %v6466_v25, %v879_v5 }
 0x21e   :  { %4647 = vmatmul.mubr.msk.f32.gmra.mxu0 %vm549_vm2, %v891_v8  ;;  %4678 = vmatmul.mubr.msk.f32.gmra.mxu1 %vm549_vm2, %v891_v8 }
 0x249   :  { %v1131_v6 = vpop.xlane.xlu1 %1130 }
 0x24a   :  { %v1132_v7 = vsub.f32 %v6412_v30, %v1131_v6 }
 0x24c   :  { %v1133_v9 = vmul.f32 1.442695, %v1132_v7 }
 0x24e   :  { %5281 = vpow2.f32 %v1133_v9 }
 0x25b   :  { %v6522_v10 = vpop.eup %5281 }
 0x25c   :  { %v1135_v11 = vsel %vm1128_vm1, %v6522_v10, 0.0 }
 0x25d   :  { %1136 = vadd.xlane.f32.xlu0 %v1135_v11 }
 0x2a5   :  { %v631_v13 = vpop.f32.mrf.mxu0  ;;  %v741_v15 = vpop.f32.mrf.mxu1 }
 0x2a6   :  { %v632_v16 = vadd.f32 %v4184_v12, %v631_v13  ;;  %v742_v17 = vadd.f32 %v4190_v14, %v741_v15 }
 0x2a7   :  { %v4574_v18 = vpop.f32.mrf.mxu0  ;;  %v4605_v19 = vpop.f32.mrf.mxu1 }
 0x2a8   :  { %655 = vst.msk [vmem:[#allocation2] sm:$0xff] %vm549_vm2, %v632_v16  ;;  %765 = vst.msk [vmem:[#allocation3] sm:$0xff] %vm549_vm2, %v742_v17 }
 0x2a9   :  { %v636_v30 = vpop.f32.mrf.mxu0  ;;  %v746_v20 = vpop.f32.mrf.mxu1 }
 0x2aa   :  { %v637_v21 = vadd.f32 %v4184_v12, %v636_v30  ;;  %v747_v22 = vadd.f32 %v4190_v14, %v746_v20 }
 0x2ab   :  { %v4577_v23 = vpop.f32.mrf.mxu0  ;;  %v4608_v24 = vpop.f32.mrf.mxu1 }
 0x2ac   :  { %656 = vst.msk [vmem:[#allocation2 + $0x8] sm:$0xff] %vm549_vm2, %v637_v21  ;;  %766 = vst.msk [vmem:[#allocation3 + $0x8] sm:$0xff] %vm549_vm2, %v747_v22 }
 0x2ad   :  { %v641_v25 = vpop.f32.mrf.mxu0  ;;  %v751_v26 = vpop.f32.mrf.mxu1 }
 0x2ae   :  { %v642_v27 = vadd.f32 %v4184_v12, %v641_v25  ;;  %v752_v28 = vadd.f32 %v4190_v14, %v751_v26 }
 0x2af   :  { %v4580_v29 = vpop.f32.mrf.mxu0  ;;  %v4611_v31 = vpop.f32.mrf.mxu1 }
 0x2b0   :  { %657 = vst.msk [vmem:[#allocation2 + $0x10] sm:$0xff] %vm549_vm2, %v642_v27  ;;  %767 = vst.msk [vmem:[#allocation3 + $0x10] sm:$0xff] %vm549_vm2, %v752_v28 }
 0x2b1   :  { %v646_v32 = vpop.f32.mrf.mxu0  ;;  %v756_v33 = vpop.f32.mrf.mxu1 }
 0x2b2   :  { %v647_v34 = vadd.f32 %v4184_v12, %v646_v32  ;;  %v757_v35 = vadd.f32 %v4190_v14, %v756_v33 }
 0x2b3   :  { %v4583_v36 = vpop.f32.mrf.mxu0  ;;  %v4614_v37 = vpop.f32.mrf.mxu1 }
 0x2b4   :  { %658 = vst.msk [vmem:[#allocation2 + $0x18] sm:$0xff] %vm549_vm2, %v647_v34  ;;  %768 = vst.msk [vmem:[#allocation3 + $0x18] sm:$0xff] %vm549_vm2, %v757_v35 }
 0x2b6   :  { %v651_v38 = vpop.f32.mrf.mxu0  ;;  %v761_v39 = vpop.f32.mrf.mxu1 }
 0x2b7   :  { %v652_v40 = vadd.f32 %v4184_v12, %v651_v38  ;;  %v762_v41 = vadd.f32 %v4190_v14, %v761_v39 }
 0x2b8   :  { %v4586_v42 = vpop.f32.mrf.mxu0  ;;  %v4617_v43 = vpop.f32.mrf.mxu1 }
 0x2b9   :  { %659 = vst.msk [vmem:[#allocation2 + $0x20] sm:$0xff] %vm549_vm2, %v652_v40  ;;  %769 = vst.msk [vmem:[#allocation3 + $0x20] sm:$0xff] %vm549_vm2, %v762_v41 }
 0x2be   :  { %v988_v46 = vpop.f32.mrf.mxu0  ;;  %v1098_v47 = vpop.f32.mrf.mxu1 }
 0x2bf   :  { %v989_v48 = vadd.f32 %v4200_v44, %v988_v46  ;;  %v1099_v49 = vadd.f32 %v4206_v45, %v1098_v47 }
 0x2c0   :  { %v4636_v50 = vpop.f32.mrf.mxu0  ;;  %v4667_v51 = vpop.f32.mrf.mxu1 }
 0x2c1   :  { %1012 = vst.msk [vmem:[#allocation4] sm:$0xff] %vm549_vm2, %v989_v48  ;;  %1122 = vst.msk [vmem:[#allocation5] sm:$0xff] %vm549_vm2, %v1099_v49 }
 0x2c5   :  { %v993_v52 = vpop.f32.mrf.mxu0  ;;  %v1103_v53 = vpop.f32.mrf.mxu1 }
 0x2c6   :  { %v994_v54 = vadd.f32 %v4200_v44, %v993_v52  ;;  %v1104_v55 = vadd.f32 %v4206_v45, %v1103_v53 }
 0x2c7   :  { %v4639_v56 = vpop.f32.mrf.mxu0  ;;  %v4670_v57 = vpop.f32.mrf.mxu1 }
 0x2c8   :  { %1013 = vst.msk [vmem:[#allocation4 + $0x8] sm:$0xff] %vm549_vm2, %v994_v54  ;;  %1123 = vst.msk [vmem:[#allocation5 + $0x8] sm:$0xff] %vm549_vm2, %v1104_v55 }
 0x2cc   :  { %v998_v58 = vpop.f32.mrf.mxu0  ;;  %v1108_v59 = vpop.f32.mrf.mxu1 }
 0x2cd   :  { %v999_v60 = vadd.f32 %v4200_v44, %v998_v58  ;;  %v1109_v61 = vadd.f32 %v4206_v45, %v1108_v59 }
 0x2ce   :  { %v4642_v62 = vpop.f32.mrf.mxu0  ;;  %v4673_v63 = vpop.f32.mrf.mxu1 }
 0x2cf   :  { %1014 = vst.msk [vmem:[#allocation4 + $0x10] sm:$0xff] %vm549_vm2, %v999_v60  ;;  %1124 = vst.msk [vmem:[#allocation5 + $0x10] sm:$0xff] %vm549_vm2, %v1109_v61 }
 0x2d6   :  { %v1003_v0 = vpop.f32.mrf.mxu0  ;;  %v1113_v1 = vpop.f32.mrf.mxu1 }
 0x2d7   :  { %v1004_v4 = vadd.f32 %v4200_v44, %v1003_v0  ;;  %v1114_v5 = vadd.f32 %v4206_v45, %v1113_v1 }
 0x2d8   :  { %v4645_v8 = vpop.f32.mrf.mxu0  ;;  %v4676_v6 = vpop.f32.mrf.mxu1 }
 0x2d9   :  { %1015 = vst.msk [vmem:[#allocation4 + $0x18] sm:$0xff] %vm549_vm2, %v1004_v4  ;;  %1125 = vst.msk [vmem:[#allocation5 + $0x18] sm:$0xff] %vm549_vm2, %v1114_v5 }
 0x2de   :  { %v1008_v7 = vpop.f32.mrf.mxu0  ;;  %v1118_v9 = vpop.f32.mrf.mxu1 }
 0x2df   :  { %v1009_v11 = vadd.f32 %v4200_v44, %v1008_v7  ;;  %v1119_v12 = vadd.f32 %v4206_v45, %v1118_v9 }
 0x2e0   :  { %v4648_v13 = vpop.f32.mrf.mxu0  ;;  %v4679_v14 = vpop.f32.mrf.mxu1 }
 0x2e1   :  { %1016 = vst.msk [vmem:[#allocation4 + $0x20] sm:$0xff] %vm549_vm2, %v1009_v11  ;;  %1126 = vst.msk [vmem:[#allocation5 + $0x20] sm:$0xff] %vm549_vm2, %v1119_v12 }
 0x2e6   :  { %v1137_v15 = vpop.xlane.xlu0 %1136 }
 0x2e7   :  { %5283 = vrcp.f32 %v1137_v15 }
 0x2f4   :  { %v5284_v16 = vpop.eup %5283 }
 0x2f5   :  { %v6547_v17 = vmul.f32 %v5284_v16, %v6522_v10 }
 0x2f6 LB: > { %v6100_v18 = vmov 0.0   ;;  %s6555_s13 = smul.u32 5, %s5983_s11  ;;  %vm6101_vm3 = vmmov 0   ;;  %vm1165_vm4 = vcmask 130048   ;;  %s6102_s25 = smov 112   ;;  %vm1402_vm5 = vcmask 77864   ;;  %s5983_s11 = sphi %s6549_s11, %s1145_s11  }
 0x2f7   : > { %4680 = vmatprep.subr.mxu0 %v6100_v18  ;;  %4685 = vmatprep.subr.mxu1 %v6100_v18  ;;  %s6103_s28 = smov 96   ;;  %s7410_s1 = sld [smem:[#allocation60_spill]]  ;;  %vm1526_vm6 = vcmask 118864   ;;  %vm1650_vm7 = vcmask 159864  }
 0x2f8   : > { %4682 = vmatprep.mubr.msk.f32.mxu0 %vm6101_vm3, %v6100_v18  ;;  %4687 = vmatprep.mubr.msk.f32.mxu1 %vm6101_vm3, %v6100_v18  ;;  %s1163_s18 = scalar_lea.vmem [#allocation3], %s6555_s13  ;;  %s1161_s6 = scalar_lea.vmem [#allocation2], %s6555_s13 }
 0x2f9   : > { %v1281_v10 = vld [vmem:[%s1163_s18] sm:$0x1f]  ;;  %s6104_s2 = smov 80   ;;  %s4212_s5 = sshll.u32 %s5983_s11, 3 }
 0x2fa   : > { %v1405_v19 = vld [vmem:[%s1163_s18] sm:$0x1f]  ;;  %1286 = vrot.lane.b32.xlu0 %v1281_v10, %s6102_s25  ;;  %s6105_s7 = smov 5   ;;  %s6106_s10 = smov 10  }
 0x2fb   : > { %1410 = vrot.lane.b32.xlu1 %v1405_v19, %s6103_s28  ;;  %v1280_v30 = vld [vmem:[%s1161_s6] sm:$0x1f]  ;;  %s6107_s4 = smov 15   ;;  %s1278_s15 = scalar_lea.vmem [#allocation6], %s6555_s13 }
 0x2fc   : > { %v1529_v20 = vld [vmem:[%s1163_s18] sm:$0x1f]  ;;  %s1145_s11 = sadd.s32 1, %s5983_s11  }
 0x2fd   : > { %v1164_v21 = vld [vmem:[%s1163_s18] sm:$0x1f]  ;;  %s1147_s27 = scalar_lea.vmem %s7410_s1, %s4212_s5  ;;  %p1142_p3 = scmp.ge.s32.totalorder %s1145_s11, 8  }
 0x2fe   : > { %4681 = vmatpush3.xpose.msk.msra.mxu0 %vm1165_vm4, %v1164_v21  ;;  %v1162_v22 = vld [vmem:[%s1161_s6] sm:$0x1f]  ;;  %1283 = vrot.lane.b32.xlu0 %v1280_v30, %s6102_s25  ;;  %s6608_s29 = smov (%p1142_p3), 0  }
 0x2ff   : > { %4690 = vmatprep.subr.mxu0 %v6100_v18  ;;  %1534 = vrot.lane.b32.xlu1 %v1529_v20, %s6104_s2  ;;  %v1404_v23 = vld [vmem:[%s1161_s6] sm:$0x1f] }
 0x300   : > { %v1528_v24 = vld [vmem:[%s1161_s6] sm:$0x1f] }
 0x301   : > { %4683 = vmatmul.mubr.msk.f32.vlgmr.msra.gmra.mxu0 %vm1165_vm4, %v1162_v22  ;;  %v1148_v25 = vld [vmem:[%s1147_s27] sm:$0x1f] }
 0x302   : > { %4692 = vmatprep.mubr.msk.f32.mxu0 %vm6101_vm3, %v6100_v18  ;;  %1407 = vrot.lane.b32.xlu0 %v1404_v23, %s6103_s28  ;;  %v1149_v26 = vsel %vm1128_vm1, %v1148_v25, -inf }
 0x303   : > { %1531 = vrot.lane.b32.xlu1 %v1528_v24, %s6104_s2 }
 0x321   : > { %1150 = vmax.xlane.f32.xlu0 %v1149_v26 }
 0x36c   : > { %v1287_v27 = vpop.permute.xlu0 %1286 }
 0x36d   : > { %v1411_v28 = vpop.permute.xlu1 %1410  ;;  %4686 = vmatpush3.xpose.msk.msra.mxu1 %vm1165_vm4, %v1287_v27 }
 0x36e   : > { %4691 = vmatpush3.xpose.msk.msra.mxu0 %vm1165_vm4, %v1411_v28  ;;  %4695 = vmatprep.subr.mxu1 %v6100_v18 }
 0x370   : > { %v1284_v29 = vpop.permute.xlu0 %1283 }
 0x371   : > { %v1535_v31 = vpop.permute.xlu1 %1534  ;;  %4688 = vmatmul.mubr.msk.f32.vlgmr.msra.gmra.mxu1 %vm1165_vm4, %v1284_v29 }
 0x372   : > { %4696 = vmatpush3.xpose.msk.msra.mxu1 %vm1165_vm4, %v1535_v31  ;;  %4697 = vmatprep.mubr.msk.f32.mxu1 %vm6101_vm3, %v6100_v18 }
 0x374   : > { %v1408_v32 = vpop.permute.xlu0 %1407 }
 0x375   : > { %v1532_v33 = vpop.permute.xlu1 %1531  ;;  %4693 = vmatmul.mubr.msk.f32.vlgmr.msra.gmra.mxu0 %vm1165_vm4, %v1408_v32 }
 0x376   : > { %4698 = vmatmul.mubr.msk.f32.vlgmr.msra.gmra.mxu1 %vm1165_vm4, %v1532_v33 }
 0x3aa   : > { %v1151_v36 = vpop.xlane.xlu0 %1150 }
 0x3ab   : > { %v1152_v37 = vsub.f32 %v1148_v25, %v1151_v36 }
 0x3ad   : > { %v1153_v38 = vmul.f32 1.442695, %v1152_v37 }
 0x3af   : > { %5285 = vpow2.f32 %v1153_v38 }
 0x3bc   : > { %v5286_v53 = vpop.eup %5285 }
 0x3bd   : > { %v1155_v54 = vsel %vm1128_vm1, %v5286_v53, 0.0 }
 0x3c1   : > { %v1238_v34 = vpop.f32.mrf.mxu0 }
 0x3c2   : > { %v1242_v42 = vmul.f32 0.125, %v1238_v34 }
 0x3c3   : > { %v4684_v35 = vpop.f32.mrf.mxu0 }
 0x3c4   : > { %v1243_v50 = vsel %vm1128_vm1, %v1242_v42, -inf }
 0x431   : > { %v1358_v39 = vpop.f32.mrf.mxu1 }
 0x432   : > { %v1362_v40 = vmul.f32 0.125, %v1358_v39 }
 0x433   : > { %v4689_v41 = vpop.f32.mrf.mxu1 }
 0x434   : > { %v1363_v43 = vsel %vm1128_vm1, %v1362_v40, -inf }
 0x435   : > { %1364 = vmax.xlane.f32.xlu1 %v1363_v43  ;;  %v1482_v44 = vpop.f32.mrf.mxu0 }
 0x436   : > { %v1606_v45 = vpop.f32.mrf.mxu1  ;;  %v1486_v46 = vmul.f32 0.125, %v1482_v44 }
 0x437   : > { %v1610_v47 = vmul.f32 0.125, %v1606_v45  ;;  %v4694_v48 = vpop.f32.mrf.mxu0 }
 0x438   : > { %v4699_v49 = vpop.f32.mrf.mxu1  ;;  %v1487_v51 = vsel %vm1128_vm1, %v1486_v46, -inf }
 0x439   : > { %1244 = vmax.xlane.f32.xlu1 %v1243_v50  ;;  %1488 = vmax.xlane.f32.xlu0 %v1487_v51  ;;  %v1611_v52 = vsel %vm1128_vm1, %v1610_v47, -inf }
 0x43d   : > { %1612 = vmax.xlane.f32.xlu0 %v1611_v52 }
 0x441   : > { %1156 = vadd.xlane.f32.xlu0 %v1155_v54 }
 0x4be   : > { %v1365_v55 = vpop.xlane.xlu1 %1364 }
 0x4bf   : > { %v1366_v56 = vsub.f32 %v1362_v40, %v1365_v55 }
 0x4c1   : > { %v1367_v57 = vmul.f32 1.442695, %v1366_v56 }
 0x4c2   : > { %v1245_v58 = vpop.xlane.xlu1 %1244  ;;  %v1489_v59 = vpop.xlane.xlu0 %1488 }
 0x4c3   : > { %5287 = vpow2.f32 %v1367_v57  ;;  %v1246_v60 = vsub.f32 %v1242_v42, %v1245_v58  ;;  %v1490_v61 = vsub.f32 %v1486_v46, %v1489_v59 }
 0x4c5   : > { %v1491_v62 = vmul.f32 1.442695, %v1490_v61  ;;  %v1247_v63 = vmul.f32 1.442695, %v1246_v60 }
 0x4c6   : > { %v1613_v0 = vpop.xlane.xlu0 %1612 }
 0x4c7   : > { %v1614_v1 = vsub.f32 %v1610_v47, %v1613_v0  ;;  %5289 = vpow2.f32 %v1491_v62 }
 0x4c8   : > { %5291 = vpow2.f32 %v1247_v63 }
 0x4c9   : > { %v1615_v4 = vmul.f32 1.442695, %v1614_v1 }
 0x4ca   : > { %v1157_v14 = vpop.xlane.xlu0 %1156 }
 0x4cb   : > { %5293 = vpow2.f32 %v1615_v4 }
 0x4cc   : > { %5295 = vrcp.f32 %v1157_v14 }
 0x4d0   : > { %v5288_v5 = vpop.eup %5287 }
 0x4d1   : > { %v1369_v8 = vsel %vm1128_vm1, %v5288_v5, 0.0 }
 0x4d2   : > { %1370 = vadd.xlane.f32.xlu1 %v1369_v8 }
 0x4d4   : > { %v5290_v6 = vpop.eup %5289 }
 0x4d5   : > { %v1493_v7 = vsel %vm1128_vm1, %v5290_v6, 0.0  ;;  %v5292_v9 = vpop.eup %5291 }
 0x4d6   : > { %1494 = vadd.xlane.f32.xlu0 %v1493_v7  ;;  %v1249_v13 = vsel %vm1128_vm1, %v5292_v9, 0.0 }
 0x4d8   : > { %v5294_v11 = vpop.eup %5293 }
 0x4d9   : > { %v1617_v12 = vsel %vm1128_vm1, %v5294_v11, 0.0  ;;  %v5296_v19 = vpop.eup %5295 }
 0x4da   : > { %1618 = vadd.xlane.f32.xlu1 %v1617_v12  ;;  %1250 = vadd.xlane.f32.xlu0 %v1249_v13  ;;  %v1159_v20 = vmul.f32 %v5296_v19, %v5286_v53 }
 0x55b   : > { %v1371_v15 = vpop.xlane.xlu1 %1370 }
 0x55c   : > { %5297 = vrcp.f32 %v1371_v15 }
 0x55f   : > { %v1495_v16 = vpop.xlane.xlu0 %1494 }
 0x560   : > { %5299 = vrcp.f32 %v1495_v16 }
 0x563   : > { %v1619_v18 = vpop.xlane.xlu1 %1618  ;;  %v1251_v10 = vpop.xlane.xlu0 %1250 }
 0x564   : > { %5301 = vrcp.f32 %v1619_v18 }
 0x565   : > { %5303 = vrcp.f32 %v1251_v10 }
 0x569   : > { %v5298_v30 = vpop.eup %5297 }
 0x56a   : > { %v1373_v21 = vmul.f32 %v5298_v30, %v5288_v5 }
 0x56c   : > { %v1374_v22 = vmul.f32 %v1373_v21, %v1159_v20 }
 0x56d   : > { %v5300_v23 = vpop.eup %5299 }
 0x56e   : > { %v1375_v24 = vsel %vm1128_vm1, %v1374_v22, -inf  ;;  %v1497_v25 = vmul.f32 %v5300_v23, %v5290_v6 }
 0x56f   : > { %1376 = vmax.xlane.f32.xlu1 %v1375_v24 }
 0x570   : > { %v1498_v27 = vmul.f32 %v1497_v25, %v1159_v20 }
 0x571   : > { %v5302_v26 = vpop.eup %5301 }
 0x572   : > { %v5304_v28 = vpop.eup %5303  ;;  %v1621_v29 = vmul.f32 %v5302_v26, %v5294_v11  ;;  %v1499_v31 = vsel %vm1128_vm1, %v1498_v27, -inf }
 0x573   : > { %v1253_v32 = vmul.f32 %v5304_v28, %v5292_v9  ;;  %1500 = vmax.xlane.f32.xlu0 %v1499_v31 }
 0x574   : > { %v1622_v33 = vmul.f32 %v1621_v29, %v1159_v20 }
 0x575   : > { %v1254_v34 = vmul.f32 %v1253_v32, %v1159_v20 }
 0x576   : > { %v1623_v35 = vsel %vm1128_vm1, %v1622_v33, -inf }
 0x577   : > { %1624 = vmax.xlane.f32.xlu1 %v1623_v35  ;;  %v1255_v36 = vsel %vm1128_vm1, %v1254_v34, -inf }
 0x578   : > { %1256 = vmax.xlane.f32.xlu0 %v1255_v36 }
 0x5f8   : > { %v1377_v37 = vpop.xlane.xlu1 %1376 }
 0x5f9   : > { %v1378_v38 = vsub.f32 %v1374_v22, %v1377_v37 }
 0x5fb   : > { %v1379_v39 = vmul.f32 1.442695, %v1378_v38 }
 0x5fc   : > { %v1501_v40 = vpop.xlane.xlu0 %1500 }
 0x5fd   : > { %5305 = vpow2.f32 %v1379_v39  ;;  %v1502_v41 = vsub.f32 %v1498_v27, %v1501_v40 }
 0x5ff   : > { %v1503_v42 = vmul.f32 1.442695, %v1502_v41 }
 0x600   : > { %v1625_v43 = vpop.xlane.xlu1 %1624 }
 0x601   : > { %v1626_v44 = vsub.f32 %v1622_v33, %v1625_v43  ;;  %v1257_v45 = vpop.xlane.xlu0 %1256  ;;  %5307 = vpow2.f32 %v1503_v42 }
 0x602   : > { %v1258_v46 = vsub.f32 %v1254_v34, %v1257_v45 }
 0x603   : > { %v1627_v47 = vmul.f32 1.442695, %v1626_v44 }
 0x604   : > { %v1259_v48 = vmul.f32 1.442695, %v1258_v46 }
 0x605   : > { %5309 = vpow2.f32 %v1627_v47 }
 0x606   : > { %5311 = vpow2.f32 %v1259_v48 }
 0x60a   : > { %v5306_v49 = vpop.eup %5305 }
 0x60b   : > { %v1381_v50 = vsel %vm1128_vm1, %v5306_v49, 0.0 }
 0x60c   : > { %1382 = vadd.xlane.f32.xlu1 %v1381_v50 }
 0x60e   : > { %v5308_v51 = vpop.eup %5307 }
 0x60f   : > { %v1505_v52 = vsel %vm1128_vm1, %v5308_v51, 0.0 }
 0x610   : > { %1506 = vadd.xlane.f32.xlu0 %v1505_v52 }
 0x612   : > { %v5310_v53 = vpop.eup %5309 }
 0x613   : > { %v5312_v54 = vpop.eup %5311  ;;  %v1629_v55 = vsel %vm1128_vm1, %v5310_v53, 0.0 }
 0x614   : > { %1630 = vadd.xlane.f32.xlu1 %v1629_v55  ;;  %v1261_v56 = vsel %vm1128_vm1, %v5312_v54, 0.0 }
 0x615   : > { %1262 = vadd.xlane.f32.xlu0 %v1261_v56 }
 0x695   : > { %v1383_v57 = vpop.xlane.xlu1 %1382 }
 0x696   : > { %5313 = vrcp.f32 %v1383_v57 }
 0x699   : > { %v1507_v58 = vpop.xlane.xlu0 %1506 }
 0x69a   : > { %5315 = vrcp.f32 %v1507_v58 }
 0x69d   : > { %v1631_v59 = vpop.xlane.xlu1 %1630 }
 0x69e   : > { %5317 = vrcp.f32 %v1631_v59  ;;  %v1263_v60 = vpop.xlane.xlu0 %1262 }
 0x69f   : > { %5319 = vrcp.f32 %v1263_v60 }
 0x6a3   : > { %v5314_v61 = vpop.eup %5313 }
 0x6a4   : > { %v1385_v62 = vmul.f32 %v5314_v61, %v5306_v49 }
 0x6a6   : > { %v1386_v63 = vmul.f32 %v1385_v62, %v6547_v17 }
 0x6a7   : > { %v5316_v0 = vpop.eup %5315 }
 0x6a8   : > { %v1387_v1 = vsel %vm1128_vm1, %v1386_v63, -inf  ;;  %v1509_v4 = vmul.f32 %v5316_v0, %v5308_v51 }
 0x6a9   : > { %1388 = vmax.xlane.f32.xlu1 %v1387_v1 }
 0x6aa   : > { %v1510_v8 = vmul.f32 %v1509_v4, %v6547_v17 }
 0x6ab   : > { %v5318_v5 = vpop.eup %5317 }
 0x6ac   : > { %v5320_v6 = vpop.eup %5319  ;;  %v1633_v7 = vmul.f32 %v5318_v5, %v5310_v53  ;;  %v1511_v9 = vsel %vm1128_vm1, %v1510_v8, -inf }
 0x6ad   : > { %v1265_v11 = vmul.f32 %v5320_v6, %v5312_v54  ;;  %1512 = vmax.xlane.f32.xlu0 %v1511_v9 }
 0x6ae   : > { %v1634_v12 = vmul.f32 %v1633_v7, %v6547_v17 }
 0x6af   : > { %v1266_v13 = vmul.f32 %v1265_v11, %v6547_v17 }
 0x6b0   : > { %v1635_v14 = vsel %vm1128_vm1, %v1634_v12, -inf }
 0x6b1   : > { %1636 = vmax.xlane.f32.xlu1 %v1635_v14  ;;  %v1267_v15 = vsel %vm1128_vm1, %v1266_v13, -inf }
 0x6b2   : > { %1268 = vmax.xlane.f32.xlu0 %v1267_v15 }
 0x732   : > { %v1389_v16 = vpop.xlane.xlu1 %1388 }
 0x733   : > { %v1390_v18 = vsub.f32 %v1386_v63, %v1389_v16 }
 0x735   : > { %v1391_v10 = vmul.f32 1.442695, %v1390_v18 }
 0x736   : > { %v1513_v19 = vpop.xlane.xlu0 %1512 }
 0x737   : > { %5321 = vpow2.f32 %v1391_v10  ;;  %v1514_v30 = vsub.f32 %v1510_v8, %v1513_v19 }
 0x739   : > { %v1515_v20 = vmul.f32 1.442695, %v1514_v30 }
 0x73a   : > { %v1637_v21 = vpop.xlane.xlu1 %1636 }
 0x73b   : > { %v1638_v22 = vsub.f32 %v1634_v12, %v1637_v21  ;;  %v1269_v23 = vpop.xlane.xlu0 %1268  ;;  %5323 = vpow2.f32 %v1515_v20 }
 0x73c   : > { %v1270_v24 = vsub.f32 %v1266_v13, %v1269_v23 }
 0x73d   : > { %v1639_v25 = vmul.f32 1.442695, %v1638_v22 }
 0x73e   : > { %v1271_v26 = vmul.f32 1.442695, %v1270_v24 }
 0x73f   : > { %5325 = vpow2.f32 %v1639_v25 }
 0x740   : > { %5327 = vpow2.f32 %v1271_v26 }
 0x744   : > { %v5322_v27 = vpop.eup %5321 }
 0x745   : > { %v1393_v28 = vsel %vm1128_vm1, %v5322_v27, 0.0 }
 0x746   : > { %1394 = vadd.xlane.f32.xlu1 %v1393_v28 }
 0x748   : > { %v5324_v29 = vpop.eup %5323 }
 0x749   : > { %v1517_v31 = vsel %vm1128_vm1, %v5324_v29, 0.0 }
 0x74a   : > { %1518 = vadd.xlane.f32.xlu0 %v1517_v31 }
 0x74c   : > { %v5326_v32 = vpop.eup %5325 }
 0x74d   : > { %v5328_v33 = vpop.eup %5327  ;;  %v1641_v34 = vsel %vm1128_vm1, %v5326_v32, 0.0 }
 0x74e   : > { %1642 = vadd.xlane.f32.xlu1 %v1641_v34  ;;  %v1273_v35 = vsel %vm1128_vm1, %v5328_v33, 0.0 }
 0x74f   : > { %1274 = vadd.xlane.f32.xlu0 %v1273_v35 }
 0x7cf   : > { %v1395_v36 = vpop.xlane.xlu1 %1394 }
 0x7d0   : > { %5329 = vrcp.f32 %v1395_v36 }
 0x7d3   : > { %v1519_v37 = vpop.xlane.xlu0 %1518 }
 0x7d4   : > { %5331 = vrcp.f32 %v1519_v37 }
 0x7d7   : > { %v1643_v38 = vpop.xlane.xlu1 %1642 }
 0x7d8   : > { %5333 = vrcp.f32 %v1643_v38  ;;  %v1275_v39 = vpop.xlane.xlu0 %1274 }
 0x7d9   : > { %5335 = vrcp.f32 %v1275_v39 }
 0x7dd   : > { %v5330_v40 = vpop.eup %5329 }
 0x7de   : > { %v1397_v41 = vmul.f32 %v5330_v40, %v5322_v27 }
 0x7e0   : > { %1399 = vrot.lane.b32.xlu1 %v1397_v41, %s6105_s7 }
 0x7e1   : > { %v5332_v42 = vpop.eup %5331 }
 0x7e2   : > { %v1521_v43 = vmul.f32 %v5332_v42, %v5324_v29 }
 0x7e4   : > { %1523 = vrot.lane.b32.xlu0 %v1521_v43, %s6106_s10 }
 0x7e5   : > { %v5334_v44 = vpop.eup %5333 }
 0x7e6   : > { %v5336_v45 = vpop.eup %5335  ;;  %v1645_v46 = vmul.f32 %v5334_v44, %v5326_v32 }
 0x7e7   : > { %v1277_v47 = vmul.f32 %v5336_v45, %v5328_v33 }
 0x7e8   : > { %1647 = vrot.lane.b32.xlu1 %v1645_v46, %s6107_s4 }
 0x7e9   : > { %1279 = vst.msk [vmem:[%s1278_s15] sm:$0x1f] %vm1128_vm1, %v1277_v47 }
 0x852   : > { %v1400_v48 = vpop.permute.xlu1 %1399 }
 0x853   : > { %1403 = vst.msk [vmem:[%s1278_s15] sm:$0x1f] %vm1402_vm5, %v1400_v48 }
 0x856   : > { %v1524_v49 = vpop.permute.xlu0 %1523 }
 0x857   : > { %1527 = vst.msk [vmem:[%s1278_s15] sm:$0x1f] %vm1526_vm6, %v1524_v49  ;;  %1144 = sbr.rel (!%p1142_p3) target bundleno = 758 (0x2f6), region = 328 }
 0x85a   : > { %v1648_v50 = vpop.permute.xlu1 %1647 }
 0x85b   : > { %1651 = vst.msk [vmem:[%s1278_s15] sm:$0x1f] %vm1650_vm7, %v1648_v50 }
 0x85c LB: > { %v6108_v51 = vmov 0.0   ;;  %s6614_s8 = sshll.u32 %s5987_s29, 3  ;;  %vm6109_vm8 = vmmov 0   ;;  %s6110_s16 = smov 96   ;;  %vm1741_vm9 = vcmask 64512   ;;  %vm1853_vm10 = vcmask 130112   ;;  %s5987_s29 = sphi %s6608_s29, %s1657_s29  }
 0x85d   : > { %4700 = vmatprep.subr.mxu0 %v6108_v51  ;;  %4705 = vmatprep.subr.mxu1 %v6108_v51  ;;  %s1661_s3 = scalar_lea.vmem [#allocation5], %s6614_s8  ;;  %s6111_s14 = smov 112   ;;  %vm1953_vm11 = vcmask 195712   ;;  %vm2053_vm12 = vcmask 261312  }
 0x85e   : > { %4702 = vmatprep.mubr.msk.f32.mxu0 %vm6109_vm8, %v6108_v51  ;;  %4707 = vmatprep.mubr.msk.f32.mxu1 %vm6109_vm8, %v6108_v51  ;;  %v1856_v17 = vld [vmem:[%s1661_s3] sm:$0xff]  ;;  %s1659_s22 = scalar_lea.vmem [#allocation4], %s6614_s8  ;;  %s6112_s9 = smov 80  }
 0x85f   : > { %1861 = vrot.lane.b32.xlu1 %v1856_v17, %s6110_s16  ;;  %1761 = vrot.lane.b32.xlu0 %v1856_v17, %s6111_s14  ;;  %v1755_v52 = vld [vmem:[%s1659_s22] sm:$0xff]  ;;  %s6113_s19 = smov 8   ;;  %s6114_s0 = smov 24  }
 0x860   : > { %4701 = vmatpush3.xpose.msk.msra.mxu0 %vm1165_vm4, %v1856_v17  ;;  %s6115_s23 = smov 16   ;;  %s1753_s26 = scalar_lea.vmem [#allocation7], %s6614_s8 }
 0x861   : > { %4710 = vmatprep.subr.mxu0 %v6108_v51  ;;  %s1657_s29 = sadd.s32 1, %s5987_s29  }
 0x862   : > { %p1654_p4 = scmp.ge.s32.totalorder %s1657_s29, 5  }
 0x863   : > { %1961 = vrot.lane.b32.xlu1 %v1856_v17, %s6112_s9  ;;  %1758 = vrot.lane.b32.xlu0 %v1755_v52, %s6111_s14  ;;  %s7411_s24 = sld [smem:[#allocation68_spill]] (%p1654_p4)  ;;  %vm2100_vm13 = vcmask (%p1654_p4), 326656   ;;  %s6775_s12 = smov (%p1654_p4), 0  }
 0x864   : > { %4703 = vmatmul.mubr.msk.f32.vlgmr.msra.gmra.mxu0 %vm1165_vm4, %v1755_v52  ;;  %5353 = vset.pattern.permute.xlu0 (%p1654_p4), %v6095_v2  ;;  %s2206_s21 = sld [smem:[#allocation44]] (%p1654_p4) }
 0x865   : > { %4712 = vmatprep.mubr.msk.f32.mxu0 %vm6109_vm8, %v6108_v51  ;;  %5354 = vset.pattern.permute.xlu1 (%p1654_p4), %v6095_v2  ;;  %v6707_v2 = vld [vmem:[#allocation29 + $0x8] sm:$0xff] (%p1654_p4) }
 0x866   :  { %7413 = vst [vmem:[#allocation76_spill] sm:$0xff] (%p1654_p4), %v6707_v2 }
 0x867   : > { %1958 = vrot.lane.b32.xlu1 %v1755_v52, %s6112_s9  ;;  %1858 = vrot.lane.b32.xlu0 %v1755_v52, %s6110_s16 }
 0x8d1   : > { %v1862_v53 = vpop.permute.xlu1 %1861  ;;  %v1762_v54 = vpop.permute.xlu0 %1761 }
 0x8d2   : > { %4706 = vmatpush3.xpose.msk.msra.mxu1 %vm1165_vm4, %v1762_v54  ;;  %4711 = vmatpush3.xpose.msk.msra.mxu0 %vm1165_vm4, %v1862_v53  ;;  %v6655_v53 = vld [vmem:[#allocation6 + $0x20] sm:$0xff] (%p1654_p4)  ;;  %v6663_v54 = vld [vmem:[#allocation6 + $0x18] sm:$0xff] (%p1654_p4) }
 0x8d3   : > { %4715 = vmatprep.subr.mxu1 %v6108_v51  ;;  %4720 = vmatprep.subr.mxu0 (%p1654_p4), %v7378_v3 }
 0x8d5   : > { %v1962_v55 = vpop.permute.xlu1 %1961  ;;  %v1759_v56 = vpop.permute.xlu0 %1758 }
 0x8d6   : > { %4708 = vmatmul.mubr.msk.f32.vlgmr.msra.gmra.mxu1 %vm1165_vm4, %v1759_v56  ;;  %v6673_v56 = vld [vmem:[#allocation6 + $0x8] sm:$0xff] (%p1654_p4) }
 0x8d7   : > { %4716 = vmatpush3.xpose.msk.msra.mxu1 %vm1165_vm4, %v1962_v55  ;;  %4717 = vmatprep.mubr.msk.f32.mxu1 %vm6109_vm8, %v6108_v51  ;;  %v6667_v55 = vld [vmem:[#allocation6 + $0x10] sm:$0xff] (%p1654_p4) }
 0x8d8   :  { %5065 = vmatprep.subr.mxu1 (%p1654_p4), %v7378_v3 }
 0x8d9   : > { %v1959_v57 = vpop.permute.xlu1 %1958  ;;  %v1859_v58 = vpop.permute.xlu0 %1858 }
 0x8da   : > { %4713 = vmatmul.mubr.msk.f32.vlgmr.msra.gmra.mxu0 %vm1165_vm4, %v1859_v58  ;;  %4718 = vmatmul.mubr.msk.f32.vlgmr.msra.gmra.mxu1 %vm1165_vm4, %v1959_v57  ;;  %v6679_v57 = vld [vmem:[#allocation6] sm:$0xff] (%p1654_p4) }
 0x8db   :  { %4730 = vmatprep.mubr.msk.f32.mxu0 (%p1654_p4), %vm6098_vm0, %v7378_v3  ;;  %4739 = vmatprep.mubr.msk.f32.mxu1 (%p1654_p4), %vm6098_vm0, %v7378_v3  ;;  %v2065_v58 = vld [vmem:[#allocation28] sm:$0xff] (%p1654_p4) }
 0x8dc   :  { %4721 = vmatpush3.msra.mxu0 (%p1654_p4), %v6655_v53  ;;  %5070 = vmatpush3.msra.mxu1 (%p1654_p4), %v6655_v53 }
 0x8dd   :  { %4722 = vmatprep.subr.mxu0 (%p1654_p4), %v7378_v3  ;;  %5066 = vmatprep.subr.mxu1 (%p1654_p4), %v7378_v3 }
 0x8de   :  { %4723 = vmatpush3.msra.mxu0 (%p1654_p4), %v6663_v54  ;;  %5071 = vmatpush3.msra.mxu1 (%p1654_p4), %v6663_v54 }
 0x8df   :  { %4724 = vmatprep.subr.mxu0 (%p1654_p4), %v7378_v3  ;;  %5067 = vmatprep.subr.mxu1 (%p1654_p4), %v7378_v3 }
 0x8e0   :  { %4725 = vmatpush3.msra.mxu0 (%p1654_p4), %v6667_v55  ;;  %5072 = vmatpush3.msra.mxu1 (%p1654_p4), %v6667_v55 }
 0x8e1   :  { %4726 = vmatprep.subr.mxu0 (%p1654_p4), %v7378_v3  ;;  %5068 = vmatprep.subr.mxu1 (%p1654_p4), %v7378_v3 }
 0x8e2   :  { %4727 = vmatpush3.msra.mxu0 (%p1654_p4), %v6673_v56  ;;  %5073 = vmatpush3.msra.mxu1 (%p1654_p4), %v6673_v56 }
 0x8e3   :  { %4728 = vmatprep.subr.mxu0 (%p1654_p4), %v7378_v3  ;;  %5069 = vmatprep.subr.mxu1 (%p1654_p4), %v7378_v3 }
 0x8e4   :  { %4729 = vmatpush3.msra.mxu0 (%p1654_p4), %v6679_v57  ;;  %5074 = vmatpush3.msra.mxu1 (%p1654_p4), %v6679_v57 }
 0x8e5   :  { %4731 = vmatmul.mubr.msk.f32.vlgmr.msra.gmra.mxu0 (%p1654_p4), %vm2100_vm13, %v2065_v58 }
 0x8e6   :  { %4733 = vmatprep.mubr.msk.f32.mxu0 (%p1654_p4), %vm6098_vm0, %v7378_v3 }
 0x924   : > { %v1736_v59 = vpop.f32.mrf.mxu0 }
 0x925   : > { %v1740_v9 = vmul.f32 0.125, %v1736_v59  ;;  %v2068_v59 = vld [vmem:[#allocation28 + $0x18] sm:$0xff] (%p1654_p4) }
 0x926   : > { %v4704_v60 = vpop.f32.mrf.mxu0  ;;  %4740 = vmatmul.mubr.msk.f32.vlgmr.msra.gmra.mxu1 (%p1654_p4), %vm2100_vm13, %v2068_v59 }
 0x927   : > { %v1742_v13 = vsel %vm1741_vm9, %v1740_v9, -inf  ;;  %v2070_v60 = vld [vmem:[%s7411_s24] sm:$0xff] (%p1654_p4)  ;;  %4742 = vmatprep.mubr.msk.f32.mxu1 (%p1654_p4), %vm6098_vm0, %v7378_v3 }
 0x996   : > { %v1833_v61 = vpop.f32.mrf.mxu1 }
 0x997   : > { %v1837_v62 = vmul.f32 0.125, %v1833_v61  ;;  %v2072_v61 = vld [vmem:[%s7411_s24 + $0x10] sm:$0xff] (%p1654_p4) }
 0x998   : > { %v4709_v63 = vpop.f32.mrf.mxu1 }
 0x999   : > { %v1838_v0 = vsel %vm1741_vm9, %v1837_v62, -inf  ;;  %v2069_v63 = vld [vmem:[#allocation28 + $0x20] sm:$0xff] (%p1654_p4) }
 0x99a   : > { %1839 = vmax.xlane.f32.xlu0 %v1838_v0  ;;  %v1933_v1 = vpop.f32.mrf.mxu0  ;;  %v2033_v4 = vpop.f32.mrf.mxu1  ;;  %4743 = vmatmul.mubr.msk.f32.gmra.mxu1 (%p1654_p4), %vm2100_vm13, %v2069_v63  ;;  %v2071_v0 = vld [vmem:[%s7411_s24 + $0x8] sm:$0xff] (%p1654_p4) }
 0x99b   : > { %v1937_v5 = vmul.f32 0.125, %v1933_v1  ;;  %v2037_v8 = vmul.f32 0.125, %v2033_v4  ;;  %v2073_v1 = vld [vmem:[%s7411_s24 + $0x18] sm:$0xff] (%p1654_p4) }
 0x99c   : > { %v4714_v6 = vpop.f32.mrf.mxu0  ;;  %v4719_v7 = vpop.f32.mrf.mxu1  ;;  %v2067_v4 = vld [vmem:[#allocation28 + $0x10] sm:$0xff] (%p1654_p4) }
 0x99d   : > { %v2038_v11 = vsel %vm1741_vm9, %v2037_v8, -inf  ;;  %v1938_v12 = vsel %vm1741_vm9, %v1937_v5, -inf  ;;  %v6709_v6 = vld [vmem:[#allocation29 + $0x10] sm:$0xff] (%p1654_p4)  ;;  %v6711_v7 = vld [vmem:[#allocation29 + $0x18] sm:$0xff] (%p1654_p4) }
 0x99e   : > { %2039 = vmax.xlane.f32.xlu0 %v2038_v11  ;;  %1939 = vmax.xlane.f32.xlu1 %v1938_v12  ;;  %7414 = vst [vmem:[#allocation77_spill] sm:$0xff] (%p1654_p4), %v6709_v6  ;;  %7415 = vst [vmem:[#allocation78_spill] sm:$0xff] (%p1654_p4), %v6711_v7  ;;  %v6715_v11 = vld [vmem:[#allocation31] sm:$0xff] (%p1654_p4)  ;;  %v6717_v12 = vld [vmem:[#allocation31 + $0x8] sm:$0xff] (%p1654_p4) }
 0x99f   :  { %7417 = vst [vmem:[#allocation80_spill] sm:$0xff] (%p1654_p4), %v6715_v11  ;;  %7418 = vst [vmem:[#allocation81_spill] sm:$0xff] (%p1654_p4), %v6717_v12 }
 0x9a2   : > { %1743 = vmax.xlane.f32.xlu0 %v1742_v13  ;;  %v6719_v13 = vld [vmem:[#allocation31 + $0x10] sm:$0xff] (%p1654_p4) }
 0x9a3   :  { %7419 = vst [vmem:[#allocation82_spill] sm:$0xff] (%p1654_p4), %v6719_v13 }
 0xa23   : > { %v1840_v14 = vpop.xlane.xlu0 %1839 }
 0xa24   : > { %v1841_v15 = vsub.f32 %v1837_v62, %v1840_v14  ;;  %v2066_v62 = vld [vmem:[#allocation28 + $0x8] sm:$0xff] (%p1654_p4) }
 0xa25   :  { %4734 = vmatmul.mubr.msk.f32.gmra.mxu0 (%p1654_p4), %vm2100_vm13, %v2066_v62  ;;  %v6721_v14 = vld [vmem:[#allocation31 + $0x18] sm:$0xff] (%p1654_p4) }
 0xa26   : > { %v1842_v16 = vmul.f32 1.442695, %v1841_v15  ;;  %4736 = vmatprep.mubr.msk.f32.mxu0 (%p1654_p4), %vm6098_vm0, %v7378_v3  ;;  %7420 = vst [vmem:[#allocation83_spill] sm:$0xff] (%p1654_p4), %v6721_v14  ;;  %v6723_v15 = vld [vmem:[#allocation31 + $0x20] sm:$0xff] (%p1654_p4) }
 0xa27   : > { %v2040_v18 = vpop.xlane.xlu0 %2039  ;;  %v1940_v10 = vpop.xlane.xlu1 %1939  ;;  %7421 = vst [vmem:[#allocation84_spill] sm:$0xff] (%p1654_p4), %v6723_v15 }
 0xa28   : > { %5337 = vpow2.f32 %v1842_v16  ;;  %v2041_v19 = vsub.f32 %v2037_v8, %v2040_v18  ;;  %v1941_v30 = vsub.f32 %v1937_v5, %v1940_v10  ;;  %v2074_v5 = vld [vmem:[%s7411_s24 + $0x20] sm:$0xff] (%p1654_p4)  ;;  %v6705_v8 = vld [vmem:[#allocation29] sm:$0xff] (%p1654_p4) }
 0xa29   :  { %4737 = vmatmul.mubr.msk.f32.gmra.mxu0 (%p1654_p4), %vm2100_vm13, %v2067_v4  ;;  %7412 = vst [vmem:[#allocation75_spill] sm:$0xff] (%p1654_p4), %v6705_v8  ;;  %v6725_v16 = vld [vmem:[#allocation32] sm:$0xff] (%p1654_p4)  ;;  %v6727_v18 = vld [vmem:[#allocation32 + $0x8] sm:$0xff] (%p1654_p4)  ;;  %v6729_v10 = vld [vmem:[#allocation32 + $0x10] sm:$0xff] (%p1654_p4) }
 0xa2a   : > { %v2042_v20 = vmul.f32 1.442695, %v2041_v19  ;;  %v1942_v21 = vmul.f32 1.442695, %v1941_v30  ;;  %7422 = vst [vmem:[#allocation85_spill] sm:$0xff] (%p1654_p4), %v6725_v16  ;;  %7423 = vst [vmem:[#allocation86_spill] sm:$0xff] (%p1654_p4), %v6727_v18 }
 0xa2b   : > { %v1744_v22 = vpop.xlane.xlu0 %1743  ;;  %7424 = vst [vmem:[#allocation87_spill] sm:$0xff] (%p1654_p4), %v6729_v10  ;;  %v6731_v19 = vld [vmem:[#allocation32 + $0x18] sm:$0xff] (%p1654_p4)  ;;  %v6733_v30 = vld [vmem:[#allocation32 + $0x20] sm:$0xff] (%p1654_p4) }
 0xa2c   : > { %5339 = vpow2.f32 %v2042_v20  ;;  %v1745_v23 = vsub.f32 %v1740_v9, %v1744_v22  ;;  %v6713_v9 = vld [vmem:[#allocation29 + $0x20] sm:$0xff] (%p1654_p4)  ;;  %7425 = vst [vmem:[#allocation88_spill] sm:$0xff] (%p1654_p4), %v6731_v19  ;;  %v6735_v20 = vld [vmem:[#allocation34] sm:$0xff] (%p1654_p4)  ;;  %v6739_v22 = vld [vmem:[#allocation34 + $0x10] sm:$0xff] (%p1654_p4) }
 0xa2d   : > { %5341 = vpow2.f32 %v1942_v21  ;;  %7416 = vst [vmem:[#allocation79_spill] sm:$0xff] (%p1654_p4), %v6713_v9  ;;  %7426 = vst [vmem:[#allocation89_spill] sm:$0xff] (%p1654_p4), %v6735_v20  ;;  %v6737_v21 = vld [vmem:[#allocation34 + $0x8] sm:$0xff] (%p1654_p4) }
 0xa2e   : > { %v1746_v24 = vmul.f32 1.442695, %v1745_v23  ;;  %7427 = vst [vmem:[#allocation90_spill] sm:$0xff] (%p1654_p4), %v6737_v21  ;;  %7428 = vst [vmem:[#allocation91_spill] sm:$0xff] (%p1654_p4), %v6739_v22  ;;  %v6741_v23 = vld [vmem:[#allocation34 + $0x18] sm:$0xff] (%p1654_p4) }
 0xa30   : > { %5343 = vpow2.f32 %v1746_v24  ;;  %v6743_v24 = vld [vmem:[#allocation34 + $0x20] sm:$0xff] (%p1654_p4) }
 0xa35   : > { %v5338_v25 = vpop.eup %5337 }
 0xa36   : > { %v1844_v26 = vsel %vm1741_vm9, %v5338_v25, 0.0 }
 0xa37   : > { %1845 = vadd.xlane.f32.xlu1 %v1844_v26 }
 0xa39   : > { %v5340_v27 = vpop.eup %5339 }
 0xa3a   : > { %v5342_v28 = vpop.eup %5341  ;;  %v2044_v29 = vsel %vm1741_vm9, %v5340_v27, 0.0 }
 0xa3b   : > { %2045 = vadd.xlane.f32.xlu1 %v2044_v29  ;;  %v1944_v31 = vsel %vm1741_vm9, %v5342_v28, 0.0  ;;  %v2182_v29 = vpop.f32.mrf.mxu0 (%p1654_p4) }
 0xa3c   : > { %1945 = vadd.xlane.f32.xlu0 %v1944_v31  ;;  %v2212_v31 = vstv (%p1654_p4), %s2206_s21 }
 0xa3d   : > { %v5344_v32 = vpop.eup %5343 }
 0xa3e   : > { %v1748_v33 = vsel %vm1741_vm9, %v5344_v32, 0.0 }
 0xa40   : > { %1749 = vadd.xlane.f32.xlu0 %v1748_v33 }
 0xac0   : > { %v1846_v34 = vpop.xlane.xlu1 %1845 }
 0xac1   : > { %5345 = vrcp.f32 %v1846_v34 }
 0xac4   : > { %v2046_v35 = vpop.xlane.xlu1 %2045 }
 0xac5   : > { %v1946_v36 = vpop.xlane.xlu0 %1945  ;;  %5347 = vrcp.f32 %v2046_v35  ;;  %v4732_v35 = vpop.f32.mrf.mxu0 (%p1654_p4) }
 0xac6   : > { %5349 = vrcp.f32 %v1946_v36 }
 0xac9   : > { %v1750_v37 = vpop.xlane.xlu0 %1749 }
 0xaca   : > { %5351 = vrcp.f32 %v1750_v37 }
 0xace   : > { %v5346_v38 = vpop.eup %5345 }
 0xacf   : > { %v1848_v39 = vmul.f32 %v5346_v38, %v5338_v25 }
 0xad1   : > { %1850 = vrot.lane.b32.xlu1 %v1848_v39, %s6113_s19 }
 0xad2   : > { %v5348_v40 = vpop.eup %5347 }
 0xad3   : > { %v5350_v41 = vpop.eup %5349  ;;  %v2048_v42 = vmul.f32 %v5348_v40, %v5340_v27 }
 0xad4   : > { %v1948_v43 = vmul.f32 %v5350_v41, %v5342_v28 }
 0xad5   : > { %2050 = vrot.lane.b32.xlu1 %v2048_v42, %s6114_s0 }
 0xad6   : > { %1950 = vrot.lane.b32.xlu0 %v1948_v43, %s6115_s23 }
 0xad7   : > { %v5352_v44 = vpop.eup %5351 }
 0xad8   : > { %v1752_v45 = vmul.f32 %v5352_v44, %v5344_v32  ;;  %v2197_v32 = vpop.f32.mrf.mxu1 (%p1654_p4) }
 0xad9   :  { %2087 = vperm.xlu1 (%p1654_p4), %5354, %v2072_v61  }
 0xada   : > { %1754 = vst.msk [vmem:[%s1753_s26] sm:$0xff] %vm1741_vm9, %v1752_v45  ;;  %2077 = vperm.xlu0 (%p1654_p4), %5353, %v2070_v60   ;;  %v4741_v36 = vpop.f32.mrf.mxu1 (%p1654_p4) }
 0xadc   :  { %v2202_v41 = vpop.f32.mrf.mxu1 (%p1654_p4) }
 0xadd   :  { %2092 = vperm.xlu1 (%p1654_p4), %5354, %v2073_v1  }
 0xade   :  { %2082 = vperm.xlu0 (%p1654_p4), %5353, %v2071_v0   ;;  %v4744_v58 = vpop.f32.mrf.mxu1 (%p1654_p4) }
 0xae2   :  { %2097 = vperm.xlu0 (%p1654_p4), %5353, %v2074_v5  }
 0xae5   :  { %v2187_v40 = vpop.f32.mrf.mxu0 (%p1654_p4) }
 0xb43   : > { %v1851_v46 = vpop.permute.xlu1 %1850 }
 0xb44   : > { %1854 = vst.msk [vmem:[%s1753_s26] sm:$0xff] %vm1853_vm10, %v1851_v46 }
 0xb46   :  { %1656 = sbr.rel (!%p1654_p4) target bundleno = 2140 (0x85c), region = 339 }
 0xb47   : > { %v2051_v47 = vpop.permute.xlu1 %2050 }
 0xb48   : > { %v1951_v48 = vpop.permute.xlu0 %1950 }
 0xb49   : > { %1954 = vst.msk [vmem:[%s1753_s26] sm:$0xff] %vm1953_vm11, %v1951_v48  ;;  %v4735_v48 = vpop.f32.mrf.mxu0 (%p1654_p4) }
 0xb4a   : > { %2054 = vst.msk [vmem:[%s1753_s26] sm:$0xff] %vm2053_vm12, %v2051_v47 }
 0xb4b   :  { %v2192_v61 = vpop.f32.mrf.mxu0 }
 0xb4d   :  { %v4738_v5 = vpop.f32.mrf.mxu0 }
 0xb51   :  { %v6643_v49 = vld [vmem:[#allocation7] sm:$0xff]   ;;  %v6645_v50 = vld [vmem:[#allocation7 + $0x8] sm:$0xff]   ;;  %v6647_v51 = vld [vmem:[#allocation7 + $0x10] sm:$0xff]  }
 0xb52   :  { %v6651_v17 = vld [vmem:[#allocation7 + $0x18] sm:$0xff]   ;;  %v6653_v52 = vld [vmem:[#allocation7 + $0x20] sm:$0xff]  }
 0xb54   :  { %v2088_v26 = vpop.permute.xlu1 %2087 }
 0xb55   :  { %v2078_v25 = vpop.permute.xlu0 %2077  ;;  %v2193_v0 = vadd.f32 %v2192_v61, %v2088_v26  ;;  %v7432_v26 = vmov %v6645_v50 }
 0xb56   :  { %v2183_v33 = vadd.f32 %v2182_v29, %v2078_v25  ;;  %v7429_v29 = vmov %v6653_v52 }
 0xb57   :  { %vm2209_vm3 = vcmp.ge.f32.partialorder %v2193_v0, 0.0  ;;  %v2215_v25 = vmul.f32 %v2212_v31, %v2193_v0 }
 0xb58   :  { %v2093_v28 = vpop.permute.xlu1 %2092  ;;  %vm2207_vm14 = vcmp.ge.f32.partialorder %v2183_v33, 0.0  ;;  %v2213_v38 = vmul.f32 %v2212_v31, %v2183_v33 }
 0xb59   :  { %v2083_v27 = vpop.permute.xlu0 %2082  ;;  %v2198_v34 = vadd.f32 %v2197_v32, %v2093_v28  ;;  %v7430_v32 = vmov %v6651_v17 }
 0xb5a   :  { %v2218_v42 = vsel %vm2207_vm14, %v2183_v33, %v2213_v38  ;;  %v2188_v44 = vadd.f32 %v2187_v40, %v2083_v27  ;;  %v2220_v27 = vsel %vm2209_vm3, %v2193_v0, %v2215_v25  ;;  %v7431_v33 = vmov %v6647_v51 }
 0xb5b   :  { %vm2210_vm15 = vcmp.ge.f32.partialorder %v2198_v34, 0.0  ;;  %v2216_v39 = vmul.f32 %v2212_v31, %v2198_v34  ;;  %v2223_v46 = vadd.f32 %v2218_v42, %v6679_v57   ;;  %v2225_v28 = vadd.f32 %v2220_v27, %v6667_v55  }
 0xb5c   :  { %vm2208_vm1 = vcmp.ge.f32.partialorder %v2188_v44, 0.0  ;;  %v2214_v59 = vmul.f32 %v2212_v31, %v2188_v44 }
 0xb5d   :  { %v2098_v37 = vpop.permute.xlu0 %2097  ;;  %v2221_v43 = vsel %vm2210_vm15, %v2198_v34, %v2216_v39  ;;  %v7433_v34 = vmov %v6643_v49 }
 0xb5e   :  { %v2203_v45 = vadd.f32 %v2202_v41, %v2098_v37  ;;  %v2226_v47 = vadd.f32 %v2221_v43, %v6663_v54   ;;  %v2219_v62 = vsel %vm2208_vm1, %v2188_v44, %v2214_v59 }
 0xb5f   :  { %v2224_v1 = vadd.f32 %v2219_v62, %v6673_v56  }
 0xb60   :  { %vm2211_vm2 = vcmp.ge.f32.partialorder %v2203_v45, 0.0  ;;  %v2217_v60 = vmul.f32 %v2212_v31, %v2203_v45 }
 0xb62   :  { %v2222_v63 = vsel %vm2211_vm2, %v2203_v45, %v2217_v60 }
 0xb63   :  { %v2227_v4 = vadd.f32 %v2222_v63, %v6655_v53  }
 0xb64 LB: > { %s7434_s20 = sld [smem:[#allocation71_spill]]  ;;  %v7380_v31 = vmov 0.0   ;;  %s4240_s11 = smul.u32 72, %s6031_s12  ;;  %vm6117_vm4 = vmmov 0   ;;  %vm2397_vm5 = vcmask 1043456   ;;  %vm2381_vm6 = vcmask 162816   ;;  %s6031_s12 = sphi %s6775_s12, %s7469_s12   ;;  %v6027_v46 = vphi %v2223_v46, %v7468_v46   ;;  %v6023_v1 = vphi %v2224_v1, %v7467_v1   ;;  %v6019_v28 = vphi %v2225_v28, %v7466_v28   ;;  %v6015_v47 = vphi %v2226_v47, %v7465_v47   ;;  %v6011_v4 = vphi %v2227_v4, %v7464_v4   ;;  %v6007_v34 = vphi %v7433_v34, %v7463_v34   ;;  %v6003_v26 = vphi %v7432_v26, %v7462_v26   ;;  %v5999_v33 = vphi %v7431_v33, %v7461_v33   ;;  %v5995_v32 = vphi %v7430_v32, %v7460_v32   ;;  %v5991_v29 = vphi %v7429_v29, %v7459_v29  }
 0xb65   : > { %4745 = vmatprep.subr.mxu0 %v7380_v31  ;;  %4770 = vmatprep.subr.mxu1 %v7380_v31  ;;  %v7435_v8 = vld [vmem:[#allocation75_spill] sm:$0xff]  ;;  %v7436_v2 = vld [vmem:[#allocation76_spill] sm:$0xff]  ;;  %v7437_v6 = vld [vmem:[#allocation77_spill] sm:$0xff]  ;;  %s7440_s18 = sld [smem:[#allocation72_spill]]  ;;  %s2823_s25 = smul.u32 24, %s6031_s12  ;;  %vm3074_vm7 = vcmask 261120  }
 0xb66   : > { %4746 = vmatpush3.msra.mxu0 %v6011_v4  ;;  %4755 = vmatprep.mubr.msk.f32.mxu0 %vm6117_vm4, %v7380_v31  ;;  %v7438_v7 = vld [vmem:[#allocation78_spill] sm:$0xff]  ;;  %v7439_v9 = vld [vmem:[#allocation79_spill] sm:$0xff]  ;;  %v7441_v11 = vld [vmem:[#allocation80_spill] sm:$0xff]  ;;  %s4284_s6 = smul.u32 96, %s6031_s12  ;;  %s4315_s2 = sshll.u32 %s6031_s12, 5 }
 0xb67   : > { %4747 = vmatprep.subr.mxu0 %v7380_v31  ;;  %4776 = vmatprep.mubr.msk.f32.mxu1 %vm6117_vm4, %v7380_v31  ;;  %v7442_v12 = vld [vmem:[#allocation81_spill] sm:$0xff]  ;;  %v7443_v13 = vld [vmem:[#allocation82_spill] sm:$0xff]  ;;  %v7444_v14 = vld [vmem:[#allocation83_spill] sm:$0xff]  ;;  %s3507_s5 = scalar_lea.vmem [#allocation38], %s4315_s2  ;;  %s7139_s27 = sadd.s32 1, %s6031_s12  }
 0xb68   : > { %4748 = vmatpush3.msra.mxu0 %v6015_v47  ;;  %v7445_v15 = vld [vmem:[#allocation84_spill] sm:$0xff]  ;;  %s6929_s1 = scalar_lea.vmem [#allocation37], %s4284_s6  ;;  %v7446_v20 = vld [vmem:[#allocation89_spill] sm:$0xff]  ;;  %v7447_v21 = vld [vmem:[#allocation90_spill] sm:$0xff]  ;;  %s2935_s7 = sld [smem:[#allocation44 + %s7139_s27]] }
 0xb69   : > { %4749 = vmatprep.subr.mxu0 %v7380_v31  ;;  %v4289_v44 = vld [vmem:[%s6929_s1 + $0x38] sm:$0xff]  ;;  %v4288_v45 = vld [vmem:[%s6929_s1 + $0x30] sm:$0xff]  ;;  %v4287_v48 = vld [vmem:[%s6929_s1 + $0x28] sm:$0xff]  ;;  %s2828_s10 = scalar_lea.vmem [#allocation35], %s6031_s12  ;;  %s3615_s4 = sadd.s32 8, %s6031_s12 }
 0xb6a   : > { %s6819_s13 = scalar_lea.vmem %s7434_s20, %s4240_s11  ;;  %4750 = vmatpush3.msra.mxu0 %v6019_v28  ;;  %v4286_v58 = vld [vmem:[%s6929_s1 + $0x20] sm:$0xff]  ;;  %v7448_v22 = vld [vmem:[#allocation91_spill] sm:$0xff]  ;;  %v7450_v18 = vld [vmem:[#allocation86_spill] sm:$0xff]  ;;  %s3616_s15 = sld [smem:[#allocation44 + %s3615_s4]] }
 0xb6b   : > { %v4244_v35 = vld [vmem:[%s6819_s13 + $0x28] sm:$0xf]  ;;  %v4243_v36 = vld [vmem:[%s6819_s13 + $0x20] sm:$0xff]  ;;  %4751 = vmatprep.subr.mxu0 %v7380_v31  ;;  %v4242_v37 = vld [vmem:[%s6819_s13 + $0x18] sm:$0xff]  ;;  %s2824_s28 = scalar_lea.vmem %s7440_s18, %s2823_s25  ;;  %s3512_s29 = scalar_lea.vmem [#allocation40], %s6031_s12 }
 0xb6c   : > { %4771 = vmatpush3.msk.msra.mxu1 %vm2397_vm5, %v4244_v35  ;;  %4752 = vmatpush3.msra.mxu0 %v6023_v1  ;;  %v2374_v38 = vld [vmem:[%s6819_s13 + $0x10] sm:$0xf]  ;;  %v2373_v39 = vld [vmem:[%s6819_s13 + $0x8] sm:$0xff]  ;;  %v2372_v40 = vld [vmem:[%s6819_s13] sm:$0xff]  ;;  %p2250_p5 = scmp.ge.s32.totalorder %s7139_s27, 7   ;;  %s7469_s12 = smov %s7139_s27 }
 0xb6d   : > { %4772 = vmatprep.subr.mxu1 %v7380_v31  ;;  %4753 = vmatprep.subr.mxu0 %v7380_v31  ;;  %v2827_v41 = vld [vmem:[%s2824_s28 + $0x10] sm:$0xf]  ;;  %v2826_v42 = vld [vmem:[%s2824_s28 + $0x8] sm:$0xff]  ;;  %v2825_v43 = vld [vmem:[%s2824_s28] sm:$0xff]  ;;  %s7471_s8 = sld [smem:[#allocation62_spill]] (%p2250_p5) }
 0xb6e   : > { %4773 = vmatpush3.msra.mxu1 %v4243_v36  ;;  %4754 = vmatpush3.msra.mxu0 %v6027_v46  ;;  %v4265_v59 = vld [vmem:[%s6819_s13 + $0x40] sm:$0xf]  ;;  %v4264_v61 = vld [vmem:[%s6819_s13 + $0x38] sm:$0xff]  ;;  %v4263_v0 = vld [vmem:[%s6819_s13 + $0x30] sm:$0xff]  ;;  %s7472_s3 = sld [smem:[#allocation63_spill]] (%p2250_p5) }
 0xb6f   : > { %4774 = vmatprep.subr.mxu1 %v7380_v31  ;;  %4756 = vmatmul.mubr.msk.f32.vlgmr.msra.gmra.mxu0 %vm2100_vm13, %v7435_v8  ;;  %v7449_v16 = vld [vmem:[#allocation85_spill] sm:$0xff]  ;;  %v7451_v10 = vld [vmem:[#allocation87_spill] sm:$0xff]  ;;  %v7452_v19 = vld [vmem:[#allocation88_spill] sm:$0xff] }
 0xb70   : > { %4775 = vmatpush3.msra.mxu1 %v4242_v37  ;;  %4812 = vmatprep.subr.mxu0 %v7380_v31 }
 0xb71   : > { %4813 = vmatpush3.msra.mxu0 %v6011_v4  ;;  %4758 = vmatprep.mubr.msk.f32.mxu0 %vm6117_vm4, %v7380_v31 }
 0xb72   : > { %4814 = vmatprep.subr.mxu0 %v7380_v31  ;;  %4777 = vmatmul.mubr.msk.f32.vlgmr.msra.gmra.mxu1 %vm2381_vm6, %v6027_v46 }
 0xb73   : > { %4815 = vmatpush3.msra.mxu0 %v6015_v47  ;;  %4791 = vmatprep.subr.mxu1 %v7380_v31 }
 0xb74   : > { %4759 = vmatmul.mubr.msk.f32.gmra.mxu0 %vm2100_vm13, %v7436_v2  ;;  %4816 = vmatprep.subr.mxu0 %v7380_v31 }
 0xb75   : > { %4761 = vmatprep.mubr.msk.f32.mxu0 %vm6117_vm4, %v7380_v31  ;;  %4817 = vmatpush3.msra.mxu0 %v6019_v28 }
 0xb76   : > { %4818 = vmatprep.subr.mxu0 %v7380_v31  ;;  %4792 = vmatpush3.msk.msra.mxu1 %vm2397_vm5, %v2374_v38 }
 0xb77   : > { %4819 = vmatpush3.msra.mxu0 %v6023_v1  ;;  %4779 = vmatprep.mubr.msk.f32.mxu1 %vm6117_vm4, %v7380_v31 }
 0xb78   : > { %4762 = vmatmul.mubr.msk.f32.gmra.mxu0 %vm2100_vm13, %v7437_v6  ;;  %4820 = vmatprep.subr.mxu0 %v7380_v31 }
 0xb79   : > { %4764 = vmatprep.mubr.msk.f32.mxu0 %vm6117_vm4, %v7380_v31  ;;  %4821 = vmatpush3.msra.mxu0 %v6027_v46 }
 0xb7a   : > { %4780 = vmatmul.mubr.msk.f32.gmra.mxu1 %vm2381_vm6, %v6023_v1  ;;  %4793 = vmatprep.subr.mxu1 %v7380_v31 }
 0xb7b   : > { %4782 = vmatprep.mubr.msk.f32.mxu1 %vm6117_vm4, %v7380_v31  ;;  %4794 = vmatpush3.msra.mxu1 %v2373_v39 }
 0xb7c   : > { %4765 = vmatmul.mubr.msk.f32.gmra.mxu0 %vm2100_vm13, %v7438_v7  ;;  %4795 = vmatprep.subr.mxu1 %v7380_v31 }
 0xb7d   : > { %4767 = vmatprep.mubr.msk.f32.mxu0 %vm6117_vm4, %v7380_v31  ;;  %4796 = vmatpush3.msra.mxu1 %v2372_v40 }
 0xb7e   : > { %4783 = vmatmul.mubr.msk.f32.gmra.mxu1 %vm2381_vm6, %v6019_v28  ;;  %4837 = vmatprep.subr.mxu1 %v7380_v31 }
 0xb7f   : > { %4785 = vmatprep.mubr.msk.f32.mxu1 %vm6117_vm4, %v7380_v31  ;;  %4858 = vmatprep.subr.mxu0 %v7380_v31 }
 0xb80   : > { %4768 = vmatmul.mubr.msk.f32.gmra.mxu0 %vm2100_vm13, %v7439_v9 }
 0xb81   : > { %4822 = vmatprep.mubr.msk.f32.mxu0 %vm6117_vm4, %v7380_v31 }
 0xb82   : > { %4786 = vmatmul.mubr.msk.f32.gmra.mxu1 %vm2381_vm6, %v6015_v47 }
 0xb83   : > { %4788 = vmatprep.mubr.msk.f32.mxu1 %vm6117_vm4, %v7380_v31 }
 0xb84   : > { %4823 = vmatmul.mubr.msk.f32.vlgmr.msra.gmra.mxu0 %vm2100_vm13, %v7441_v11 }
 0xb85   : > { %4825 = vmatprep.mubr.msk.f32.mxu0 %vm6117_vm4, %v7380_v31  ;;  %4859 = vmatpush3.msk.msra.mxu0 %vm2397_vm5, %v2827_v41 }
 0xb86   : > { %4789 = vmatmul.mubr.msk.f32.gmra.mxu1 %vm2381_vm6, %v6011_v4  ;;  %4860 = vmatprep.subr.mxu0 %v7380_v31 }
 0xb87   : > { %4797 = vmatprep.mubr.msk.f32.mxu1 %vm6117_vm4, %v7380_v31  ;;  %4861 = vmatpush3.msra.mxu0 %v2826_v42 }
 0xb88   : > { %4826 = vmatmul.mubr.msk.f32.gmra.mxu0 %vm2100_vm13, %v7442_v12  ;;  %4862 = vmatprep.subr.mxu0 %v7380_v31 }
 0xb89   : > { %4828 = vmatprep.mubr.msk.f32.mxu0 %vm6117_vm4, %v7380_v31  ;;  %4863 = vmatpush3.msra.mxu0 %v2825_v43 }
 0xb8a   : > { %4904 = vmatprep.subr.mxu0 %v7380_v31 }
 0xb8c   : > { %4829 = vmatmul.mubr.msk.f32.gmra.mxu0 %vm2100_vm13, %v7443_v13 }
 0xb8d   : > { %4831 = vmatprep.mubr.msk.f32.mxu0 %vm6117_vm4, %v7380_v31 }
 0xb90   : > { %4832 = vmatmul.mubr.msk.f32.gmra.mxu0 %vm2100_vm13, %v7444_v14 }
 0xb91   : > { %4834 = vmatprep.mubr.msk.f32.mxu0 %vm6117_vm4, %v7380_v31 }
 0xb94   : > { %4835 = vmatmul.mubr.msk.f32.gmra.mxu0 %vm2100_vm13, %v7445_v15  ;;  %v2941_v15 = vstv %s2935_s7 }
 0xb95   : > { %4864 = vmatprep.mubr.msk.f32.mxu0 %vm6117_vm4, %v7380_v31 }
 0xb98   : > { %4865 = vmatmul.mubr.msk.f32.vlgmr.msra.gmra.mxu0 %vm2381_vm6, %v6027_v46 }
 0xb99   : > { %4867 = vmatprep.mubr.msk.f32.mxu0 %vm6117_vm4, %v7380_v31  ;;  %4905 = vmatpush3.msra.mxu0 %v4289_v44 }
 0xb9a   : > { %4906 = vmatprep.subr.mxu0 %v7380_v31 }
 0xb9b   : > { %4907 = vmatpush3.msra.mxu0 %v4288_v45 }
 0xb9c   : > { %4868 = vmatmul.mubr.msk.f32.gmra.mxu0 %vm2381_vm6, %v6023_v1  ;;  %4908 = vmatprep.subr.mxu0 %v7380_v31 }
 0xb9d   : > { %4870 = vmatprep.mubr.msk.f32.mxu0 %vm6117_vm4, %v7380_v31  ;;  %4909 = vmatpush3.msra.mxu0 %v4287_v48 }
 0xb9e   : > { %4910 = vmatprep.subr.mxu0 %v7380_v31 }
 0xb9f   : > { %4911 = vmatpush3.msra.mxu0 %v4286_v58 }
 0xba0   : > { %4871 = vmatmul.mubr.msk.f32.gmra.mxu0 %vm2381_vm6, %v6019_v28  ;;  %4950 = vmatprep.subr.mxu0 %v7380_v31 }
 0xba1   : > { %4873 = vmatprep.mubr.msk.f32.mxu0 %vm6117_vm4, %v7380_v31 }
 0xba4   : > { %4874 = vmatmul.mubr.msk.f32.gmra.mxu0 %vm2381_vm6, %v6015_v47 }
 0xba5   : > { %4876 = vmatprep.mubr.msk.f32.mxu0 %vm6117_vm4, %v7380_v31 }
 0xba8   : > { %4877 = vmatmul.mubr.msk.f32.gmra.mxu0 %vm2381_vm6, %v6011_v4 }
 0xba9   : > { %4912 = vmatprep.mubr.msk.f32.mxu0 %vm6117_vm4, %v7380_v31 }
 0xbac   : > { %4913 = vmatmul.mubr.msk.f32.vlgmr.msra.gmra.mxu0 %vm3074_vm7, %v6007_v34 }
 0xbad   : > { %4951 = vmatpush3.msra.mxu0 %v5991_v29  ;;  %4915 = vmatprep.mubr.msk.f32.mxu0 %vm6117_vm4, %v7380_v31 }
 0xbae   : > { %4952 = vmatprep.subr.mxu0 %v7380_v31 }
 0xbaf   : > { %4953 = vmatpush3.msra.mxu0 %v5995_v32 }
 0xbb0   : > { %4916 = vmatmul.mubr.msk.f32.gmra.mxu0 %vm3074_vm7, %v6003_v26  ;;  %4954 = vmatprep.subr.mxu0 %v7380_v31 }
 0xbb1   : > { %4918 = vmatprep.mubr.msk.f32.mxu0 %vm6117_vm4, %v7380_v31  ;;  %4955 = vmatpush3.msra.mxu0 %v5999_v33 }
 0xbb2   : > { %4956 = vmatprep.subr.mxu0 %v7380_v31 }
 0xbb3   : > { %4957 = vmatpush3.msra.mxu0 %v6003_v26 }
 0xbb4   : > { %4919 = vmatmul.mubr.msk.f32.gmra.mxu0 %vm3074_vm7, %v5999_v33  ;;  %4958 = vmatprep.subr.mxu0 %v7380_v31 }
 0xbb5   : > { %4921 = vmatprep.mubr.msk.f32.mxu0 %vm6117_vm4, %v7380_v31  ;;  %4959 = vmatpush3.msra.mxu0 %v6007_v34 }
 0xbb6   : > { %4998 = vmatprep.subr.mxu0 %v7380_v31 }
 0xbb8   : > { %4922 = vmatmul.mubr.msk.f32.gmra.mxu0 %vm3074_vm7, %v5995_v32 }
 0xbb9   : > { %4924 = vmatprep.mubr.msk.f32.mxu0 %vm6117_vm4, %v7380_v31 }
 0xbbc   : > { %4925 = vmatmul.mubr.msk.f32.gmra.mxu0 %vm3074_vm7, %v5991_v29 }
 0xbbd   : > { %4960 = vmatprep.mubr.msk.f32.mxu0 %vm6117_vm4, %v7380_v31 }
 0xbc0   : > { %4961 = vmatmul.mubr.msk.f32.vlgmr.msra.gmra.mxu0 %vm2100_vm13, %v7446_v20 }
 0xbc1   : > { %4963 = vmatprep.mubr.msk.f32.mxu0 %vm6117_vm4, %v7380_v31 }
 0xbc4   : > { %4964 = vmatmul.mubr.msk.f32.gmra.mxu0 %vm2100_vm13, %v7447_v21 }
 0xbc5   : > { %4966 = vmatprep.mubr.msk.f32.mxu0 %vm6117_vm4, %v7380_v31 }
 0xbc8   : > { %4967 = vmatmul.mubr.msk.f32.gmra.mxu0 %vm2100_vm13, %v7448_v22 }
 0xbc9   : > { %4969 = vmatprep.mubr.msk.f32.mxu0 %vm6117_vm4, %v7380_v31 }
 0xbcc   : > { %4970 = vmatmul.mubr.msk.f32.gmra.mxu0 %vm2100_vm13, %v6741_v23 }
 0xbcd   : > { %4972 = vmatprep.mubr.msk.f32.mxu0 %vm6117_vm4, %v7380_v31 }
 0xbd0   : > { %4973 = vmatmul.mubr.msk.f32.gmra.mxu0 %vm2100_vm13, %v6743_v24 }
 0xbd1   : > { %5006 = vmatprep.mubr.msk.f32.mxu0 %vm6117_vm4, %v7380_v31 }
 0xc2f   : > { %v2345_v60 = vpop.f32.mrf.mxu0 }
 0xc30   : > { %4798 = vmatmul.mubr.msk.f32.vlgmr.msra.gmra.mxu1 %vm2381_vm6, %v2345_v60 }
 0xc31   : > { %v4757_v62 = vpop.f32.mrf.mxu0  ;;  %4838 = vmatpush3.msk.msra.mxu1 %vm2397_vm5, %v4265_v59  ;;  %4800 = vmatprep.mubr.msk.f32.mxu1 %vm6117_vm4, %v7380_v31 }
 0xc32   : > { %v7007_v63 = vpop.f32.mrf.mxu1  ;;  %4839 = vmatprep.subr.mxu1 %v7380_v31 }
 0xc33   : > { %4840 = vmatpush3.msra.mxu1 %v4264_v61 }
 0xc34   : > { %v2350_v5 = vpop.f32.mrf.mxu0  ;;  %v4778_v25 = vpop.f32.mrf.mxu1  ;;  %4841 = vmatprep.subr.mxu1 %v7380_v31 }
 0xc35   : > { %4801 = vmatmul.mubr.msk.f32.gmra.mxu1 %vm2381_vm6, %v2350_v5 }
 0xc36   : > { %v4760_v27 = vpop.f32.mrf.mxu0  ;;  %4803 = vmatprep.mubr.msk.f32.mxu1 %vm6117_vm4, %v7380_v31  ;;  %4842 = vmatpush3.msra.mxu1 %v4263_v0 }
 0xc37   : > { %4879 = vmatprep.subr.mxu1 %v7380_v31 }
 0xc38   : > { %v2355_v35 = vpop.f32.mrf.mxu0 }
 0xc39   : > { %4804 = vmatmul.mubr.msk.f32.gmra.mxu1 %vm2381_vm6, %v2355_v35 }
 0xc3a   : > { %v4763_v36 = vpop.f32.mrf.mxu0  ;;  %4806 = vmatprep.mubr.msk.f32.mxu1 %vm6117_vm4, %v7380_v31  ;;  %v7019_v37 = vpop.f32.mrf.mxu1 }
 0xc3c   : > { %v2360_v38 = vpop.f32.mrf.mxu0  ;;  %v4781_v39 = vpop.f32.mrf.mxu1 }
 0xc3d   : > { %4807 = vmatmul.mubr.msk.f32.gmra.mxu1 %vm2381_vm6, %v2360_v38 }
 0xc3e   : > { %v4766_v40 = vpop.f32.mrf.mxu0  ;;  %4809 = vmatprep.mubr.msk.f32.mxu1 %vm6117_vm4, %v7380_v31  ;;  %v7024_v41 = vpop.f32.mrf.mxu1 }
 0xc40   : > { %v2365_v42 = vpop.f32.mrf.mxu0  ;;  %v4784_v43 = vpop.f32.mrf.mxu1 }
 0xc41   : > { %4810 = vmatmul.mubr.msk.f32.gmra.mxu1 %vm2381_vm6, %v2365_v42 }
 0xc42   : > { %v4769_v44 = vpop.f32.mrf.mxu0  ;;  %4843 = vmatprep.mubr.msk.f32.mxu1 %vm6117_vm4, %v7380_v31  ;;  %v7029_v45 = vpop.f32.mrf.mxu1 }
 0xc44   : > { %v2680_v48 = vpop.f32.mrf.mxu0  ;;  %v4787_v58 = vpop.f32.mrf.mxu1 }
 0xc45   : > { %4844 = vmatmul.mubr.msk.f32.vlgmr.msra.gmra.mxu1 %vm2381_vm6, %v2680_v48  ;;  %v3067_v48 = vld [vmem:[%s6929_s1 + $0x18] sm:$0xff] }
 0xc46   : > { %v4824_v59 = vpop.f32.mrf.mxu0  ;;  %4880 = vmatpush3.msra.mxu1 %v5991_v29  ;;  %4846 = vmatprep.mubr.msk.f32.mxu1 %vm6117_vm4, %v7380_v31  ;;  %v7035_v60 = vpop.f32.mrf.mxu1 }
 0xc47   : > { %4881 = vmatprep.subr.mxu1 %v7380_v31 }
 0xc48   : > { %v2685_v61 = vpop.f32.mrf.mxu0  ;;  %4882 = vmatpush3.msra.mxu1 %v5995_v32  ;;  %v4790_v62 = vpop.f32.mrf.mxu1 }
 0xc49   : > { %4847 = vmatmul.mubr.msk.f32.gmra.mxu1 %vm2381_vm6, %v2685_v61  ;;  %4883 = vmatprep.subr.mxu1 %v7380_v31  ;;  %v3066_v61 = vld [vmem:[%s6929_s1 + $0x10] sm:$0xff] }
 0xc4a   : > { %v4827_v0 = vpop.f32.mrf.mxu0  ;;  %4849 = vmatprep.mubr.msk.f32.mxu1 %vm6117_vm4, %v7380_v31  ;;  %4884 = vmatpush3.msra.mxu1 %v5999_v33 }
 0xc4b   : > { %4885 = vmatprep.subr.mxu1 %v7380_v31 }
 0xc4c   : > { %v2690_v5 = vpop.f32.mrf.mxu0  ;;  %4886 = vmatpush3.msra.mxu1 %v6003_v26 }
 0xc4d   : > { %4850 = vmatmul.mubr.msk.f32.gmra.mxu1 %vm2381_vm6, %v2690_v5  ;;  %4887 = vmatprep.subr.mxu1 %v7380_v31 }
 0xc4e   : > { %v4830_v25 = vpop.f32.mrf.mxu0  ;;  %4852 = vmatprep.mubr.msk.f32.mxu1 %vm6117_vm4, %v7380_v31  ;;  %4888 = vmatpush3.msra.mxu1 %v6007_v34 }
 0xc4f   : > { %4927 = vmatprep.subr.mxu1 %v7380_v31  ;;  %v3065_v25 = vld [vmem:[%s6929_s1 + $0x8] sm:$0xff] }
 0xc50   : > { %v2695_v27 = vpop.f32.mrf.mxu0 }
 0xc51   : > { %4853 = vmatmul.mubr.msk.f32.gmra.mxu1 %vm2381_vm6, %v2695_v27 }
 0xc52   : > { %v4833_v35 = vpop.f32.mrf.mxu0  ;;  %4855 = vmatprep.mubr.msk.f32.mxu1 %vm6117_vm4, %v7380_v31 }
 0xc53   : > { %v3064_v35 = vld [vmem:[%s6929_s1] sm:$0xff] }
 0xc54   : > { %v2700_v36 = vpop.f32.mrf.mxu0 }
 0xc55   : > { %4856 = vmatmul.mubr.msk.f32.gmra.mxu1 %vm2381_vm6, %v2700_v36 }
 0xc56   : > { %v4836_v38 = vpop.f32.mrf.mxu0  ;;  %4889 = vmatprep.mubr.msk.f32.mxu1 %vm6117_vm4, %v7380_v31 }
 0xc58   : > { %v7078_v39 = vpop.f32.mrf.mxu0 }
 0xc59   : > { %4890 = vmatmul.mubr.msk.f32.vlgmr.msra.gmra.mxu1 %vm2100_vm13, %v7449_v16 }
 0xc5a   : > { %4892 = vmatprep.mubr.msk.f32.mxu1 %vm6117_vm4, %v7380_v31  ;;  %v4866_v40 = vpop.f32.mrf.mxu0  ;;  %4928 = vmatpush3.msra.mxu1 %v3067_v48 }
 0xc5b   : > { %4929 = vmatprep.subr.mxu1 %v7380_v31 }
 0xc5c   : > { %v7080_v42 = vpop.f32.mrf.mxu0  ;;  %4930 = vmatpush3.msra.mxu1 %v3066_v61 }
 0xc5d   : > { %4893 = vmatmul.mubr.msk.f32.gmra.mxu1 %vm2100_vm13, %v7450_v18  ;;  %4931 = vmatprep.subr.mxu1 %v7380_v31 }
 0xc5e   : > { %4895 = vmatprep.mubr.msk.f32.mxu1 %vm6117_vm4, %v7380_v31  ;;  %v4869_v43 = vpop.f32.mrf.mxu0  ;;  %4932 = vmatpush3.msra.mxu1 %v3065_v25 }
 0xc5f   : > { %4933 = vmatprep.subr.mxu1 %v7380_v31  ;;  %v3511_v43 = vld [vmem:[%s3507_s5 + $0x18] sm:$0xff] }
 0xc60   : > { %v7082_v44 = vpop.f32.mrf.mxu0  ;;  %4934 = vmatpush3.msra.mxu1 %v3064_v35  ;;  %4999 = vmatpush3.msra.mxu0 %v3511_v43 }
 0xc61   : > { %4896 = vmatmul.mubr.msk.f32.gmra.mxu1 %vm2100_vm13, %v7451_v10  ;;  %4975 = vmatprep.subr.mxu1 %v7380_v31 }
 0xc62   : > { %4898 = vmatprep.mubr.msk.f32.mxu1 %vm6117_vm4, %v7380_v31  ;;  %v4872_v58 = vpop.f32.mrf.mxu0  ;;  %5000 = vmatprep.subr.mxu0 %v7380_v31 }
 0xc63   : > { %v3510_v58 = vld [vmem:[%s3507_s5 + $0x10] sm:$0xff] }
 0xc64   : > { %v7086_v59 = vpop.f32.mrf.mxu0  ;;  %5001 = vmatpush3.msra.mxu0 %v3510_v58 }
 0xc65   : > { %4899 = vmatmul.mubr.msk.f32.gmra.mxu1 %vm2100_vm13, %v7452_v19  ;;  %5002 = vmatprep.subr.mxu0 %v7380_v31 }
 0xc66   : > { %4901 = vmatprep.mubr.msk.f32.mxu1 %vm6117_vm4, %v7380_v31  ;;  %v4875_v62 = vpop.f32.mrf.mxu0 }
 0xc68   : > { %v7090_v0 = vpop.f32.mrf.mxu0 }
 0xc69   : > { %4902 = vmatmul.mubr.msk.f32.gmra.mxu1 %vm2100_vm13, %v6733_v30 }
 0xc6a   : > { %4935 = vmatprep.mubr.msk.f32.mxu1 %vm6117_vm4, %v7380_v31  ;;  %v4878_v5 = vpop.f32.mrf.mxu0 }
 0xc6b   : > { %v3509_v5 = vld [vmem:[%s3507_s5 + $0x8] sm:$0xff] }
 0xc6c   : > { %v7093_v27 = vpop.f32.mrf.mxu0  ;;  %5003 = vmatpush3.msra.mxu0 %v3509_v5 }
 0xc6d   : > { %5004 = vmatprep.subr.mxu0 %v7380_v31 }
 0xc6e   : > { %v4914_v36 = vpop.f32.mrf.mxu0 }
 0xc70   : > { %v7098_v38 = vpop.f32.mrf.mxu0 }
 0xc72   : > { %v4917_v40 = vpop.f32.mrf.mxu0 }
 0xc73   : > { %v3508_v40 = vld [vmem:[%s3507_s5] sm:$0xff] }
 0xc74   : > { %v7101_v48 = vpop.f32.mrf.mxu0  ;;  %5005 = vmatpush3.msra.mxu0 %v3508_v40 }
 0xc75   : > { %5007 = vmatmul.mubr.msk.f32.vlgmr.msra.gmra.mxu0 %vm3074_vm7, %v6007_v34 }
 0xc76   : > { %v4920_v61 = vpop.f32.mrf.mxu0  ;;  %5009 = vmatprep.mubr.msk.f32.mxu0 %vm6117_vm4, %v7380_v31 }
 0xc78   : > { %v7104_v62 = vpop.f32.mrf.mxu0 }
 0xc79   : > { %5010 = vmatmul.mubr.msk.f32.gmra.mxu0 %vm3074_vm7, %v6003_v26 }
 0xc7a   : > { %v4923_v25 = vpop.f32.mrf.mxu0  ;;  %5012 = vmatprep.mubr.msk.f32.mxu0 %vm6117_vm4, %v7380_v31 }
 0xc7c   : > { %v7107_v35 = vpop.f32.mrf.mxu0 }
 0xc7d   : > { %5013 = vmatmul.mubr.msk.f32.gmra.mxu0 %vm3074_vm7, %v5999_v33 }
 0xc7e   : > { %v4926_v36 = vpop.f32.mrf.mxu0  ;;  %5015 = vmatprep.mubr.msk.f32.mxu0 %vm6117_vm4, %v7380_v31 }
 0xc80   : > { %v7110_v3 = vpop.f32.mrf.mxu0 }
 0xc81   : > { %5016 = vmatmul.mubr.msk.f32.gmra.mxu0 %vm3074_vm7, %v5995_v32 }
 0xc82   : > { %v4962_v43 = vpop.f32.mrf.mxu0  ;;  %5018 = vmatprep.mubr.msk.f32.mxu0 %vm6117_vm4, %v7380_v31  ;;  %v4272_v31 = vld [vmem:[%s2828_s10] ss:$0 sm:$0xff] }
 0xc83   : > { %v2911_v18 = vadd.f32 %v4272_v31, %v7080_v42 }
 0xc84   : > { %v7116_v58 = vpop.f32.mrf.mxu0 }
 0xc85   : > { %5019 = vmatmul.mubr.msk.f32.gmra.mxu0 %vm3074_vm7, %v5991_v29 }
 0xc86   : > { %v4965_v61 = vpop.f32.mrf.mxu0 }
 0xc88   : > { %v7122_v5 = vpop.f32.mrf.mxu0 }
 0xc8a   : > { %v4968_v25 = vpop.f32.mrf.mxu0 }
 0xc8c   : > { %v7128_v36 = vpop.f32.mrf.mxu0 }
 0xc8e   : > { %v4971_v40 = vpop.f32.mrf.mxu0 }
 0xc90   : > { %v7134_v43 = vpop.f32.mrf.mxu0 }
 0xc92   : > { %v4974_v61 = vpop.f32.mrf.mxu0 }
 0xc93   : > { %v2906_v61 = vadd.f32 %v4272_v31, %v7078_v39  ;;  %v2916_v39 = vadd.f32 %v4272_v31, %v7082_v44 }
 0xcf0   : > { %v2575_v25 = vpop.f32.mrf.mxu1 }
 0xcf1   : > { %v2576_v13 = vadd.f32 %v2575_v25, %v7007_v63 }
 0xcf2   : > { %v4799_v2 = vpop.f32.mrf.mxu1 }
 0xcf5   : > { %v2580_v6 = vpop.f32.mrf.mxu1 }
 0xcf7   : > { %v4802_v7 = vpop.f32.mrf.mxu1 }
 0xcf9   : > { %v2585_v8 = vpop.f32.mrf.mxu1 }
 0xcfb   : > { %v4805_v9 = vpop.f32.mrf.mxu1 }
 0xcfc   : > { %v2581_v9 = vadd.f32 %v2580_v6, %v7019_v37 }
 0xcfd   : > { %v2590_v40 = vpop.f32.mrf.mxu1 }
 0xcfe   : > { %v2591_v42 = vadd.f32 %v2590_v40, %v7029_v45  ;;  %v2926_v45 = vadd.f32 %v4272_v31, %v7090_v0  ;;  %v7457_v0 = vmov 0.0  }
 0xcff   : > { %v4808_v10 = vpop.f32.mrf.mxu1 }
 0xd01   : > { %v2595_v11 = vpop.f32.mrf.mxu1 }
 0xd03   : > { %v4811_v12 = vpop.f32.mrf.mxu1 }
 0xd04   : > { %v2586_v12 = vadd.f32 %v2585_v8, %v7024_v41 }
 0xd05   : > { %v2794_v14 = vpop.f32.mrf.mxu1 }
 0xd06   : > { %v2818_v2 = vadd.f32 %v2794_v14, %v2576_v13 }
 0xd07   : > { %v4845_v7 = vpop.f32.mrf.mxu1 }
 0xd08   : > { %v2929_v16 = vadd.f32 %v2906_v61, %v2818_v2 }
 0xd09   : > { %v2799_v19 = vpop.f32.mrf.mxu1 }
 0xd0a   : > { %vm2936_vm8 = vcmp.ge.f32.partialorder %v2929_v16, 0.0  ;;  %v2942_v10 = vmul.f32 %v2941_v15, %v2929_v16  ;;  %v2819_v20 = vadd.f32 %v2799_v19, %v2581_v9  ;;  %v2921_v19 = vadd.f32 %v4272_v31, %v7086_v59  ;;  %v4308_v31 = vld [vmem:[%s6929_s1 + $0x50] sm:$0xff] }
 0xd0b   : > { %v4848_v21 = vpop.f32.mrf.mxu1 }
 0xd0c   : > { %v2947_v22 = vsel %vm2936_vm8, %v2929_v16, %v2942_v10  ;;  %v2930_v63 = vadd.f32 %v2911_v18, %v2819_v20 }
 0xd0d   : > { %v7150_v46 = vadd.f32 %v6027_v46, %v2947_v22   ;;  %v2804_v14 = vpop.f32.mrf.mxu1  ;;  %v2596_v22 = vadd.f32 %v2595_v11, %v7035_v60 }
 0xd0e   : > { %vm2937_vm9 = vcmp.ge.f32.partialorder %v2930_v63, 0.0  ;;  %v2943_v6 = vmul.f32 %v2941_v15, %v2930_v63  ;;  %v2820_v37 = vadd.f32 %v2804_v14, %v2586_v12  ;;  %v4309_v12 = vld [vmem:[%s6929_s1 + $0x58] sm:$0xff]  ;;  %v4307_v14 = vld [vmem:[%s6929_s1 + $0x48] sm:$0xff] }
 0xd0f   : > { %v7453_v13 = vmov %v7150_v46  ;;  %v4851_v25 = vpop.f32.mrf.mxu1 }
 0xd10   : > { %v2948_v61 = vsel %vm2937_vm9, %v2930_v63, %v2943_v6  ;;  %v2931_v2 = vadd.f32 %v2916_v39, %v2820_v37 }
 0xd11   : > { %v7155_v1 = vadd.f32 %v6023_v1, %v2948_v61   ;;  %v2809_v16 = vpop.f32.mrf.mxu1 }
 0xd12   : > { %vm2938_vm10 = vcmp.ge.f32.partialorder %v2931_v2, 0.0  ;;  %v2944_v18 = vmul.f32 %v2941_v15, %v2931_v2  ;;  %v2821_v20 = vadd.f32 %v2809_v16, %v2591_v42 }
 0xd13   : > { %v7454_v8 = vmov %v7155_v1  ;;  %v4854_v21 = vpop.f32.mrf.mxu1 }
 0xd14   : > { %v2949_v46 = vsel %vm2938_vm10, %v2931_v2, %v2944_v18  ;;  %v2932_v41 = vadd.f32 %v2921_v19, %v2821_v20  ;;  %v4323_v30 = vmul.f32 (%p2250_p5), -1.442695, %v7454_v8 }
 0xd15   : > { %v7160_v28 = vadd.f32 %v6019_v28, %v2949_v46   ;;  %v2814_v59 = vpop.f32.mrf.mxu1 }
 0xd16   : > { %vm2939_vm11 = vcmp.ge.f32.partialorder %v2932_v41, 0.0  ;;  %v2945_v40 = vmul.f32 %v2941_v15, %v2932_v41  ;;  %v2822_v1 = vadd.f32 %v2814_v59, %v2596_v22 }
 0xd17   : > { %v7455_v44 = vmov %v7160_v28  ;;  %v4857_v7 = vpop.f32.mrf.mxu1 }
 0xd18   : > { %v2950_v9 = vsel %vm2939_vm11, %v2932_v41, %v2945_v40  ;;  %v2933_v10 = vadd.f32 %v2926_v45, %v2822_v1  ;;  %v4324_v24 = vmul.f32 (%p2250_p5), -1.442695, %v7455_v44 }
 0xd19   : > { %v7164_v47 = vadd.f32 %v6015_v47, %v2950_v9   ;;  %v3038_v60 = vpop.f32.mrf.mxu1 }
 0xd1a   : > { %vm2940_vm12 = vcmp.ge.f32.partialorder %v2933_v10, 0.0  ;;  %v2946_v63 = vmul.f32 %v2941_v15, %v2933_v10  ;;  %4936 = vmatmul.mubr.msk.f32.vlgmr.msra.gmra.mxu1 %vm3074_vm7, %v3038_v60  ;;  %v4306_v15 = vld [vmem:[%s6929_s1 + $0x40] sm:$0xff] }
 0xd1b   : > { %v7456_v11 = vmov %v7164_v47  ;;  %v4891_v28 = vpop.f32.mrf.mxu1  ;;  %4976 = vmatpush3.msra.mxu1 %v4309_v12  ;;  %4938 = vmatprep.mubr.msk.f32.mxu1 %vm6117_vm4, %v7457_v0  ;;  %v4316_v12 = vld [vmem:[%s3512_s29] ss:$0 sm:$0xff] }
 0xd1c   : > { %v2951_v39 = vsel %vm2940_vm12, %v2933_v10, %v2946_v63  ;;  %4977 = vmatprep.subr.mxu1 %v7457_v0 }
 0xd1d   : > { %v7173_v4 = vadd.f32 %v6011_v4, %v2951_v39   ;;  %v3043_v47 = vpop.f32.mrf.mxu1  ;;  %4978 = vmatpush3.msra.mxu1 %v4308_v31  ;;  %v3622_v39 = vstv %s3616_s15 }
 0xd1e   : > { %4939 = vmatmul.mubr.msk.f32.gmra.mxu1 %vm3074_vm7, %v3043_v47  ;;  %4979 = vmatprep.subr.mxu1 %v7457_v0 }
 0xd1f   : > { %v7458_v6 = vmov %v7173_v4  ;;  %v4894_v37 = vpop.f32.mrf.mxu1  ;;  %4941 = vmatprep.mubr.msk.f32.mxu1 %vm6117_vm4, %v7457_v0  ;;  %4980 = vmatpush3.msra.mxu1 %v4307_v14 }
 0xd20   : > { %4981 = vmatprep.subr.mxu1 %v7457_v0 }
 0xd21   : > { %v3048_v25 = vpop.f32.mrf.mxu1  ;;  %4982 = vmatpush3.msra.mxu1 %v4306_v15 }
 0xd22   : > { %4942 = vmatmul.mubr.msk.f32.gmra.mxu1 %vm3074_vm7, %v3048_v25 }
 0xd23   : > { %v4897_v42 = vpop.f32.mrf.mxu1  ;;  %4944 = vmatprep.mubr.msk.f32.mxu1 %vm6117_vm4, %v7457_v0 }
 0xd25   : > { %v3053_v4 = vpop.f32.mrf.mxu1 }
 0xd26   : > { %4945 = vmatmul.mubr.msk.f32.gmra.mxu1 %vm3074_vm7, %v3053_v4 }
 0xd27   : > { %v4900_v61 = vpop.f32.mrf.mxu1  ;;  %4947 = vmatprep.mubr.msk.f32.mxu1 %vm6117_vm4, %v7457_v0 }
 0xd29   : > { %v3058_v2 = vpop.f32.mrf.mxu1 }
 0xd2a   : > { %4948 = vmatmul.mubr.msk.f32.gmra.mxu1 %vm3074_vm7, %v3058_v2 }
 0xd2b   : > { %v4903_v19 = vpop.f32.mrf.mxu1  ;;  %4983 = vmatprep.mubr.msk.f32.mxu1 %vm6117_vm4, %v7457_v0 }
 0xd2e   : > { %4984 = vmatmul.mubr.msk.f32.vlgmr.msra.gmra.mxu1 %vm3074_vm7, %v7110_v3 }
 0xd2f   : > { %4986 = vmatprep.mubr.msk.f32.mxu1 %vm6117_vm4, %v7457_v0 }
 0xd32   : > { %4987 = vmatmul.mubr.msk.f32.gmra.mxu1 %vm3074_vm7, %v7116_v58 }
 0xd33   : > { %4989 = vmatprep.mubr.msk.f32.mxu1 %vm6117_vm4, %v7457_v0 }
 0xd35   : > { %v3586_v3 = vpop.f32.mrf.mxu0 }
 0xd36   : > { %4990 = vmatmul.mubr.msk.f32.gmra.mxu1 %vm3074_vm7, %v7122_v5  ;;  %v3587_v31 = vadd.f32 %v4316_v12, %v3586_v3 }
 0xd37   : > { %4992 = vmatprep.mubr.msk.f32.mxu1 %vm6117_vm4, %v7457_v0  ;;  %v5008_v58 = vpop.f32.mrf.mxu0 }
 0xd39   : > { %v3591_v16 = vpop.f32.mrf.mxu0 }
 0xd3a   : > { %4993 = vmatmul.mubr.msk.f32.gmra.mxu1 %vm3074_vm7, %v7128_v36  ;;  %v3592_v37 = vadd.f32 %v4316_v12, %v3591_v16 }
 0xd3b   : > { %4995 = vmatprep.mubr.msk.f32.mxu1 %vm6117_vm4, %v7457_v0  ;;  %v5011_v18 = vpop.f32.mrf.mxu0 }
 0xd3d   : > { %v3596_v20 = vpop.f32.mrf.mxu0 }
 0xd3e   : > { %4996 = vmatmul.mubr.msk.f32.gmra.mxu1 %vm3074_vm7, %v7134_v43  ;;  %v3597_v18 = vadd.f32 %v4316_v12, %v3596_v20 }
 0xd3f   : > { %v5014_v21 = vpop.f32.mrf.mxu0 }
 0xd41   : > { %v3601_v5 = vpop.f32.mrf.mxu0 }
 0xd43   : > { %v5017_v22 = vpop.f32.mrf.mxu0 }
 0xd45   : > { %v3606_v46 = vpop.f32.mrf.mxu0 }
 0xd47   : > { %v5020_v41 = vpop.f32.mrf.mxu0 }
 0xdda   : > { %v3261_v45 = vpop.f32.mrf.mxu1 }
 0xddb   : > { %v3262_v63 = vadd.f32 %v3261_v45, %v7093_v27 }
 0xddc   : > { %v4937_v36 = vpop.f32.mrf.mxu1 }
 0xddd   : > { %v3602_v36 = vadd.f32 %v4316_v12, %v3601_v5 }
 0xdde   : > { %v3266_v59 = vpop.f32.mrf.mxu1 }
 0xddf   : > { %v3267_v47 = vadd.f32 %v3266_v59, %v7098_v38 }
 0xde0   : > { %v4940_v40 = vpop.f32.mrf.mxu1 }
 0xde2   : > { %v3271_v1 = vpop.f32.mrf.mxu1 }
 0xde3   : > { %v3272_v2 = vadd.f32 %v3271_v1, %v7101_v48 }
 0xde4   : > { %v4943_v7 = vpop.f32.mrf.mxu1 }
 0xde6   : > { %v3276_v43 = vpop.f32.mrf.mxu1 }
 0xde7   : > { %v3277_v38 = vadd.f32 %v3276_v43, %v7104_v62 }
 0xde8   : > { %v4946_v9 = vpop.f32.mrf.mxu1 }
 0xdea   : > { %v3281_v10 = vpop.f32.mrf.mxu1 }
 0xdeb   : > { %v3282_v20 = vadd.f32 %v3281_v10, %v7107_v35  ;;  %v7470_v35 = vmov (%p2250_p5), 0.0   ;;  %v3765_v10 = vld [vmem:[#allocation41 + $0x10] sm:$0xf] (%p2250_p5) }
 0xdec   : > { %v4949_v60 = vpop.f32.mrf.mxu1  ;;  %5042 = vmatprep.subr.mxu1 (%p2250_p5), %v7470_v35  ;;  %5021 = vmatprep.subr.mxu0 (%p2250_p5), %v7470_v35 }
 0xded   : > { %v3607_v60 = vadd.f32 %v4316_v12, %v3606_v46  ;;  %v7468_v46 = vmov %v7453_v13  ;;  %v3918_v12 = vld [vmem:[#allocation43 + $0x10] sm:$0xff] (%p2250_p5)  ;;  %5022 = vmatpush3.msk.msra.mxu0 (%p2250_p5), %vm2397_vm5, %v3765_v10  ;;  %5027 = vmatprep.mubr.msk.f32.mxu0 (%p2250_p5), %vm6098_vm0, %v7470_v35 }
 0xdee   : > { %v3477_v28 = vpop.f32.mrf.mxu1  ;;  %v3919_v46 = vld [vmem:[#allocation43 + $0x18] sm:$0xff] (%p2250_p5)  ;;  %5023 = vmatprep.subr.mxu0 (%p2250_p5), %v7470_v35  ;;  %5050 = vmatprep.mubr.msk.f32.mxu1 (%p2250_p5), %vm6098_vm0, %v7470_v35 }
 0xdef   : > { %v3501_v0 = vadd.f32 %v3477_v28, %v3262_v63  ;;  %5043 = vmatpush3.msra.mxu1 (%p2250_p5), %v3919_v46 }
 0xdf0   : > { %v4985_v14 = vpop.f32.mrf.mxu1  ;;  %5044 = vmatprep.subr.mxu1 (%p2250_p5), %v7470_v35 }
 0xdf1   : > { %v3610_v15 = vadd.f32 %v3587_v31, %v3501_v0  ;;  %5045 = vmatpush3.msra.mxu1 (%p2250_p5), %v3918_v12 }
 0xdf2   : > { %v3482_v25 = vpop.f32.mrf.mxu1  ;;  %5046 = vmatprep.subr.mxu1 (%p2250_p5), %v7470_v35 }
 0xdf3   : > { %vm3617_vm14 = vcmp.ge.f32.partialorder %v3610_v15, 0.0  ;;  %v3623_v42 = vmul.f32 %v3622_v39, %v3610_v15  ;;  %v3502_v4 = vadd.f32 %v3482_v25, %v3267_v47 }
 0xdf4   : > { %v4988_v61 = vpop.f32.mrf.mxu1 }
 0xdf5   : > { %v3628_v19 = vsel %vm3617_vm14, %v3610_v15, %v3623_v42  ;;  %v3611_v58 = vadd.f32 %v3592_v37, %v3502_v4  ;;  %v7464_v4 = vmov %v7458_v6  ;;  %v3764_v37 = vld [vmem:[#allocation41 + $0x8] sm:$0xff] (%p2250_p5)  ;;  %v3917_v42 = vld [vmem:[#allocation43 + $0x8] sm:$0xff] (%p2250_p5) }
 0xdf6   : > { %v3633_v27 = vadd.f32 %v6007_v34, %v3628_v19   ;;  %v3487_v3 = vpop.f32.mrf.mxu1  ;;  %v3763_v61 = vld [vmem:[#allocation41] sm:$0xff] (%p2250_p5)  ;;  %5024 = vmatpush3.msra.mxu0 (%p2250_p5), %v3764_v37  ;;  %5047 = vmatpush3.msra.mxu1 (%p2250_p5), %v3917_v42 }
 0xdf7   : > { %vm3618_vm15 = vcmp.ge.f32.partialorder %v3611_v58, 0.0  ;;  %v3624_v21 = vmul.f32 %v3622_v39, %v3611_v58  ;;  %v3503_v22 = vadd.f32 %v3487_v3, %v3272_v2  ;;  %5025 = vmatprep.subr.mxu0 (%p2250_p5), %v7470_v35  ;;  %5048 = vmatprep.subr.mxu1 (%p2250_p5), %v7470_v35 }
 0xdf8   : > { %v4991_v41 = vpop.f32.mrf.mxu1  ;;  %v4327_v25 = vmul.f32 (%p2250_p5), -1.442695, %v3633_v27  ;;  %5026 = vmatpush3.msra.mxu0 (%p2250_p5), %v3763_v61 }
 0xdf9   : > { %v3629_v16 = vsel %vm3618_vm15, %v3611_v58, %v3624_v21  ;;  %v3612_v45 = vadd.f32 %v3597_v18, %v3503_v22 }
 0xdfa   : > { %v3634_v59 = vadd.f32 %v6003_v26, %v3629_v16   ;;  %v3492_v40 = vpop.f32.mrf.mxu1 }
 0xdfb   : > { %vm3619_vm1 = vcmp.ge.f32.partialorder %v3612_v45, 0.0  ;;  %v3625_v48 = vmul.f32 %v3622_v39, %v3612_v45  ;;  %v3504_v1 = vadd.f32 %v3492_v40, %v3277_v38 }
 0xdfc   : > { %v4994_v7 = vpop.f32.mrf.mxu1  ;;  %v4328_v23 = vmul.f32 (%p2250_p5), -1.442695, %v3634_v59 }
 0xdfd   : > { %v3630_v34 = vsel %vm3619_vm1, %v3612_v45, %v3625_v48  ;;  %v3613_v9 = vadd.f32 %v3602_v36, %v3504_v1  ;;  %v7467_v1 = vmov %v7454_v8  ;;  %v4326_v8 = vmul.f32 (%p2250_p5), -1.442695, %v7458_v6 }
 0xdfe   : > { %v3635_v63 = vadd.f32 %v5999_v33, %v3630_v34   ;;  %v3497_v31 = vpop.f32.mrf.mxu1  ;;  %v7463_v34 = vmov %v3633_v27 }
 0xdff   : > { %vm3620_vm2 = vcmp.ge.f32.partialorder %v3613_v9, 0.0  ;;  %v3626_v62 = vmul.f32 %v3622_v39, %v3613_v9  ;;  %v3505_v43 = vadd.f32 %v3497_v31, %v3282_v20  ;;  %v3678_v20 = vld [vmem:[%s7471_s8] sm:$0xff] (%p2250_p5)  ;;  %v3679_v31 = vld [vmem:[%s7471_s8 + $0x8] sm:$0xff] (%p2250_p5) }
 0xe00   : > { %v4997_v28 = vpop.f32.mrf.mxu1  ;;  %v7461_v33 = vmov %v3635_v63 }
 0xe01   : > { %v3631_v5 = vsel %vm3620_vm2, %v3613_v9, %v3626_v62  ;;  %v3614_v0 = vadd.f32 %v3607_v60, %v3505_v43  ;;  %v7466_v28 = vmov %v7455_v44  ;;  %v4325_v33 = vmul.f32 (%p2250_p5), -1.442695, %v7456_v11  ;;  %v3728_v9 = vld [vmem:[%s7472_s3] sm:$0xff] (%p2250_p5) }
 0xe02   : > { %v3636_v14 = vadd.f32 %v5995_v32, %v3631_v5   ;;  %v3729_v5 = vld [vmem:[%s7472_s3 + $0x8] sm:$0xff] (%p2250_p5) }
 0xe03   : > { %vm3621_vm3 = vcmp.ge.f32.partialorder %v3614_v0, 0.0  ;;  %v3627_v26 = vmul.f32 %v3622_v39, %v3614_v0  ;;  %v4322_v39 = vmul.f32 (%p2250_p5), -1.442695, %v7453_v13 }
 0xe04   : > { %v7460_v32 = vmov %v3636_v14  ;;  %2252 = sbr.rel (!%p2250_p5) target bundleno = 2916 (0xb64), region = 350  ;;  %v4330_v13 = vmul.f32 (%p2250_p5), -1.442695, %v3636_v14 }
 0xe05   : > { %v3632_v47 = vsel %vm3621_vm3, %v3614_v0, %v3627_v26  ;;  %v7462_v26 = vmov %v3634_v59  ;;  %5355 = vpow2.f32 (%p2250_p5), %v4322_v39  ;;  %v4329_v32 = vmul.f32 (%p2250_p5), -1.442695, %v3635_v63  ;;  %v3730_v39 = vld [vmem:[%s7472_s3 + $0x10] sm:$0xff] (%p2250_p5) }
 0xe06   : > { %v3637_v15 = vadd.f32 %v5991_v29, %v3632_v47   ;;  %v7465_v47 = vmov %v7456_v11  ;;  %5357 = vpow2.f32 (%p2250_p5), %v4327_v25 }
 0xe07   :  { %5359 = vpow2.f32 (%p2250_p5), %v4323_v30  ;;  %v3680_v47 = vld [vmem:[%s7471_s8 + $0x10] sm:$0xff] (%p2250_p5) }
 0xe08   : > { %v7459_v29 = vmov %v3637_v15  ;;  %5361 = vpow2.f32 (%p2250_p5), %v4328_v23  ;;  %v4331_v44 = vmul.f32 (%p2250_p5), -1.442695, %v3637_v15 }
 0xe09   :  { %v3916_v29 = vld [vmem:[#allocation43] sm:$0xff]  ;;  %5363 = vpow2.f32 %v4324_v24 }
 0xe0a   :  { %5049 = vmatpush3.msra.mxu1 %v3916_v29  ;;  %5365 = vpow2.f32 %v4329_v32 }
 0xe0b   :  { %5367 = vpow2.f32 %v4325_v33  ;;  %v3681_v33 = vld [vmem:[%s7471_s8 + $0x18] sm:$0xff] }
 0xe0c   :  { %5369 = vpow2.f32 %v4330_v13 }
 0xe0d   :  { %5371 = vpow2.f32 %v4326_v8 }
 0xe0e   :  { %5373 = vpow2.f32 %v4331_v44 }
 0xe12   :  { %v5356_v11 = vpop.eup %5355 }
 0xe13   :  { %v5358_v4 = vpop.eup %5357  ;;  %v3653_v2 = vadd.f32 1.0, %v5356_v11 }
 0xe14   :  { %v5360_v19 = vpop.eup %5359  ;;  %v3703_v58 = vadd.f32 1.0, %v5358_v4 }
 0xe15   :  { %v5362_v18 = vpop.eup %5361  ;;  %5375 = vrcp.f32 %v3653_v2  ;;  %v3654_v27 = vadd.f32 1.0, %v5360_v19 }
 0xe16   :  { %v5364_v3 = vpop.eup %5363  ;;  %5377 = vrcp.f32 %v3703_v58  ;;  %v3704_v6 = vadd.f32 1.0, %v5362_v18  ;;  %v3731_v18 = vld [vmem:[%s7472_s3 + $0x18] sm:$0xff] }
 0xe17   :  { %v5366_v21 = vpop.eup %5365  ;;  %5379 = vrcp.f32 %v3654_v27  ;;  %v3655_v22 = vadd.f32 1.0, %v5364_v3 }
 0xe18   :  { %v5368_v41 = vpop.eup %5367  ;;  %5381 = vrcp.f32 %v3704_v6  ;;  %v3705_v38 = vadd.f32 1.0, %v5366_v21 }
 0xe19   :  { %v5370_v16 = vpop.eup %5369  ;;  %5383 = vrcp.f32 %v3655_v22  ;;  %v3656_v45 = vadd.f32 1.0, %v5368_v41 }
 0xe1a   :  { %v5372_v36 = vpop.eup %5371  ;;  %5385 = vrcp.f32 %v3705_v38  ;;  %v3706_v59 = vadd.f32 1.0, %v5370_v16 }
 0xe1b   :  { %v5374_v40 = vpop.eup %5373  ;;  %5387 = vrcp.f32 %v3656_v45  ;;  %v3657_v48 = vadd.f32 1.0, %v5372_v36 }
 0xe1c   :  { %5389 = vrcp.f32 %v3706_v59  ;;  %v3707_v1 = vadd.f32 1.0, %v5374_v40 }
 0xe1d   :  { %5391 = vrcp.f32 %v3657_v48 }
 0xe1e   :  { %5393 = vrcp.f32 %v3707_v1 }
 0xe22   :  { %v5376_v7 = vpop.eup %5375 }
 0xe23   :  { %v5378_v34 = vpop.eup %5377  ;;  %vm3668_vm13 = vcmp.gt.f32.partialorder %v5376_v7, 0.5 }
 0xe24   :  { %v5380_v60 = vpop.eup %5379  ;;  %v3673_v63 = vsel %vm3668_vm13, %v5376_v7, 0.0  ;;  %vm3718_vm4 = vcmp.gt.f32.partialorder %v5378_v34, 0.5 }
 0xe25   :  { %v5382_v62 = vpop.eup %5381  ;;  %v3683_v43 = vadd.f32 %v3678_v20, %v3673_v63  ;;  %v3723_v28 = vsel %vm3718_vm4, %v5378_v34, 0.0  ;;  %vm3669_vm5 = vcmp.gt.f32.partialorder %v5380_v60, 0.5 }
 0xe26   :  { %v5384_v0 = vpop.eup %5383  ;;  %v3733_v14 = vadd.f32 %v3728_v9, %v3723_v28  ;;  %v3674_v26 = vsel %vm3669_vm5, %v5380_v60, 0.0  ;;  %vm3719_vm8 = vcmp.gt.f32.partialorder %v5382_v62, 0.5 }
 0xe27   :  { %v5386_v15 = vpop.eup %5385  ;;  %v3738_v46 = vmul.f32 %v3683_v43, %v6679_v57  ;;  %v3684_v10 = vadd.f32 %v3679_v31, %v3674_v26  ;;  %v3724_v12 = vsel %vm3719_vm8, %v5382_v62, 0.0  ;;  %vm3670_vm9 = vcmp.gt.f32.partialorder %v5384_v0, 0.5 }
 0xe28   :  { %v5388_v37 = vpop.eup %5387  ;;  %v3891_v25 = vmul.f32 %v3733_v14, %v6643_v49  ;;  %v3734_v42 = vadd.f32 %v3729_v5, %v3724_v12  ;;  %v3675_v61 = vsel %vm3670_vm9, %v5384_v0, 0.0  ;;  %vm3720_vm10 = vcmp.gt.f32.partialorder %v5386_v15, 0.5 }
 0xe29   :  { %v5390_v30 = vpop.eup %5389  ;;  %v3743_v23 = vmul.f32 1.442695, %v3738_v46  ;;  %v3739_v24 = vmul.f32 %v3684_v10, %v6673_v56  ;;  %v3685_v29 = vadd.f32 %v3680_v47, %v3675_v61  ;;  %v3725_v32 = vsel %vm3720_vm10, %v5386_v15, 0.0 }
 0xe2a   :  { %v5392_v13 = vpop.eup %5391  ;;  %v3896_v57 = vmul.f32 1.442695, %v3891_v25  ;;  %v3892_v8 = vmul.f32 %v3734_v42, %v6645_v50  ;;  %v3735_v44 = vadd.f32 %v3730_v39, %v3725_v32  ;;  %vm3671_vm11 = vcmp.gt.f32.partialorder %v5388_v37, 0.5  ;;  %v3682_v50 = vld [vmem:[%s7471_s8 + $0x20] sm:$0xff] }
 0xe2b   :  { %5395 = vpow2.f32 %v3743_v23  ;;  %v3745_v49 = vmul.f32 1.442695, %v3739_v24  ;;  %v3740_v11 = vmul.f32 %v3685_v29, %v6667_v55  ;;  %v3676_v4 = vsel %vm3671_vm11, %v5388_v37, 0.0  ;;  %v5394_v2 = vpop.eup %5393  ;;  %v3732_v55 = vld [vmem:[%s7472_s3 + $0x20] sm:$0xff] }
 0xe2c   :  { %5397 = vpow2.f32 %v3896_v57  ;;  %v3898_v56 = vmul.f32 1.442695, %v3892_v8  ;;  %v3893_v19 = vmul.f32 %v3735_v44, %v6647_v51  ;;  %v3686_v58 = vadd.f32 %v3681_v33, %v3676_v4 }
 0xe2d   :  { %5399 = vpow2.f32 %v3745_v49  ;;  %v3747_v27 = vmul.f32 1.442695, %v3740_v11  ;;  %vm3721_vm12 = vcmp.gt.f32.partialorder %v5390_v30, 0.5  ;;  %vm3672_vm14 = vcmp.gt.f32.partialorder %v5392_v13, 0.5 }
 0xe2e   :  { %5401 = vpow2.f32 %v3898_v56  ;;  %v3900_v3 = vmul.f32 1.442695, %v3893_v19  ;;  %v3741_v6 = vmul.f32 %v3686_v58, %v6663_v54  ;;  %v3726_v21 = vsel %vm3721_vm12, %v5390_v30, 0.0 }
 0xe2f   :  { %5403 = vpow2.f32 %v3747_v27  ;;  %v3736_v22 = vadd.f32 %v3731_v18, %v3726_v21  ;;  %v3677_v41 = vsel %vm3672_vm14, %v5392_v13, 0.0  ;;  %vm3722_vm15 = vcmp.gt.f32.partialorder %v5394_v2, 0.5 }
 0xe30   :  { %5405 = vpow2.f32 %v3900_v3  ;;  %v3749_v38 = vmul.f32 1.442695, %v3741_v6  ;;  %v3687_v51 = vadd.f32 %v3682_v50, %v3677_v41  ;;  %v3727_v16 = vsel %vm3722_vm15, %v5394_v2, 0.0 }
 0xe31   :  { %v3894_v45 = vmul.f32 %v3736_v22, %v6651_v17  ;;  %v3737_v36 = vadd.f32 %v3732_v55, %v3727_v16 }
 0xe32   :  { %5407 = vpow2.f32 %v3749_v38  ;;  %v3742_v59 = vmul.f32 %v3687_v51, %v6655_v53 }
 0xe33   :  { %v3902_v40 = vmul.f32 1.442695, %v3894_v45  ;;  %v3895_v48 = vmul.f32 %v3737_v36, %v6653_v52 }
 0xe34   :  { %v3751_v54 = vmul.f32 1.442695, %v3742_v59 }
 0xe35   :  { %5409 = vpow2.f32 %v3902_v40  ;;  %v3904_v1 = vmul.f32 1.442695, %v3895_v48 }
 0xe36   :  { %5411 = vpow2.f32 %v3751_v54 }
 0xe37   :  { %5413 = vpow2.f32 %v3904_v1 }
 0xe38   :  { %v5396_v7 = vpop.eup %5395 }
 0xe39   :  { %v5398_v20 = vpop.eup %5397  ;;  %v4332_v34 = vadd.f32 -1.0, %v5396_v7 }
 0xe3a   :  { %v5400_v9 = vpop.eup %5399  ;;  %v4343_v60 = vadd.f32 -1.0, %v5398_v20 }
 0xe3b   :  { %v5402_v63 = vpop.eup %5401  ;;  %v7286_v31 = vmul.f32 %v4332_v34, %v4332_v34  ;;  %v4333_v17 = vadd.f32 -1.0, %v5400_v9 }
 0xe3c   :  { %v5404_v62 = vpop.eup %5403  ;;  %v7288_v43 = vmul.f32 %v4343_v60, %v4343_v60  ;;  %v4344_v53 = vadd.f32 -1.0, %v5402_v63 }
 0xe3d   :  { %v5406_v28 = vpop.eup %5405  ;;  %5028 = vmatmul.mubr.msk.f32.vlgmr.msra.gmra.mxu0 %vm2381_vm6, %v7286_v31  ;;  %v7292_v52 = vmul.f32 %v4333_v17, %v4333_v17  ;;  %v4334_v5 = vadd.f32 -1.0, %v5404_v62 }
 0xe3e   :  { %5051 = vmatmul.mubr.msk.f32.vlgmr.msra.gmra.mxu1 %vm3074_vm7, %v7288_v43  ;;  %5030 = vmatprep.mubr.msk.f32.mxu0 %vm6098_vm0, %v7470_v35  ;;  %v7298_v0 = vmul.f32 %v4344_v53, %v4344_v53  ;;  %v4345_v14 = vadd.f32 -1.0, %v5406_v28 }
 0xe3f   :  { %v5408_v26 = vpop.eup %5407  ;;  %5053 = vmatprep.mubr.msk.f32.mxu1 %vm6098_vm0, %v7470_v35  ;;  %v7304_v47 = vmul.f32 %v4334_v5, %v4334_v5 }
 0xe40   :  { %v4335_v15 = vadd.f32 -1.0, %v5408_v26  ;;  %v7310_v10 = vmul.f32 %v4345_v14, %v4345_v14 }
 0xe41   :  { %5031 = vmatmul.mubr.msk.f32.gmra.mxu0 %vm2381_vm6, %v7292_v52 }
 0xe42   :  { %v5410_v46 = vpop.eup %5409  ;;  %5054 = vmatmul.mubr.msk.f32.gmra.mxu1 %vm3074_vm7, %v7298_v0  ;;  %5033 = vmatprep.mubr.msk.f32.mxu0 %vm6098_vm0, %v7470_v35  ;;  %v7316_v25 = vmul.f32 %v4335_v15, %v4335_v15 }
 0xe43   :  { %v5412_v12 = vpop.eup %5411  ;;  %5056 = vmatprep.mubr.msk.f32.mxu1 %vm6098_vm0, %v7470_v35  ;;  %v4346_v39 = vadd.f32 -1.0, %v5410_v46 }
 0xe44   :  { %v5414_v37 = vpop.eup %5413  ;;  %v4336_v42 = vadd.f32 -1.0, %v5412_v12 }
 0xe45   :  { %5034 = vmatmul.mubr.msk.f32.gmra.mxu0 %vm2381_vm6, %v7304_v47  ;;  %v7322_v61 = vmul.f32 %v4346_v39, %v4346_v39  ;;  %v4347_v30 = vadd.f32 -1.0, %v5414_v37 }
 0xe46   :  { %5057 = vmatmul.mubr.msk.f32.gmra.mxu1 %vm3074_vm7, %v7310_v10  ;;  %5036 = vmatprep.mubr.msk.f32.mxu0 %vm6098_vm0, %v7470_v35  ;;  %v7328_v23 = vmul.f32 %v4336_v42, %v4336_v42 }
 0xe47   :  { %5059 = vmatprep.mubr.msk.f32.mxu1 %vm6098_vm0, %v7470_v35  ;;  %v7334_v24 = vmul.f32 %v4347_v30, %v4347_v30 }
 0xe49   :  { %5037 = vmatmul.mubr.msk.f32.gmra.mxu0 %vm2381_vm6, %v7316_v25 }
 0xe4a   :  { %5060 = vmatmul.mubr.msk.f32.gmra.mxu1 %vm3074_vm7, %v7322_v61  ;;  %5039 = vmatprep.mubr.msk.f32.mxu0 %vm6098_vm0, %v7470_v35 }
 0xe4b   :  { %5062 = vmatprep.mubr.msk.f32.mxu1 %vm6098_vm0, %v7470_v35 }
 0xe4d   :  { %5040 = vmatmul.mubr.msk.f32.gmra.mxu0 %vm2381_vm6, %v7328_v23 }
 0xe4e   :  { %5063 = vmatmul.mubr.msk.f32.gmra.mxu1 %vm3074_vm7, %v7334_v24 }
 0xefd   :  { %v3852_v29 = vpop.f32.mrf.mxu0 }
 0xefe   :  { %v3853_v32 = vadd.f32 1e-05, %v3852_v29  ;;  %v4002_v33 = vpop.f32.mrf.mxu1 }
 0xeff   :  { %v4003_v13 = vadd.f32 1e-05, %v4002_v33  ;;  %v5029_v57 = vpop.f32.mrf.mxu0 }
 0xf00   :  { %5415 = vrcp.f32 %v3853_v32  ;;  %v5052_v8 = vpop.f32.mrf.mxu1 }
 0xf01   :  { %5417 = vrcp.f32 %v4003_v13  ;;  %v3857_v44 = vpop.f32.mrf.mxu0 }
 0xf02   :  { %v3858_v49 = vadd.f32 1e-05, %v3857_v44  ;;  %v4007_v11 = vpop.f32.mrf.mxu1 }
 0xf03   :  { %v4008_v4 = vadd.f32 1e-05, %v4007_v11  ;;  %v5032_v2 = vpop.f32.mrf.mxu0 }
 0xf04   :  { %5419 = vrcp.f32 %v3858_v49  ;;  %v5055_v35 = vpop.f32.mrf.mxu1 }
 0xf05   :  { %5421 = vrcp.f32 %v4008_v4  ;;  %v3862_v56 = vpop.f32.mrf.mxu0 }
 0xf06   :  { %v3863_v19 = vadd.f32 1e-05, %v3862_v56  ;;  %v4012_v58 = vpop.f32.mrf.mxu1 }
 0xf07   :  { %v4013_v18 = vadd.f32 1e-05, %v4012_v58  ;;  %v5035_v27 = vpop.f32.mrf.mxu0 }
 0xf08   :  { %5423 = vrcp.f32 %v3863_v19  ;;  %v5058_v50 = vpop.f32.mrf.mxu1 }
 0xf09   :  { %5425 = vrcp.f32 %v4013_v18  ;;  %v3867_v3 = vpop.f32.mrf.mxu0 }
 0xf0a   :  { %v3868_v6 = vadd.f32 1e-05, %v3867_v3  ;;  %v4017_v21 = vpop.f32.mrf.mxu1 }
 0xf0b   :  { %v4018_v55 = vadd.f32 1e-05, %v4017_v21  ;;  %v5038_v22 = vpop.f32.mrf.mxu0 }
 0xf0c   :  { %5427 = vrcp.f32 %v3868_v6  ;;  %v5061_v41 = vpop.f32.mrf.mxu1 }
 0xf0d   :  { %v5416_v38 = vpop.eup %5415  ;;  %5429 = vrcp.f32 %v4018_v55  ;;  %v3872_v51 = vpop.f32.mrf.mxu0 }
 0xf0e   :  { %v5418_v16 = vpop.eup %5417  ;;  %v3877_v45 = vmul.f32 %v5416_v38, %v7286_v31  ;;  %v3873_v36 = vadd.f32 1e-05, %v3872_v51  ;;  %v4022_v59 = vpop.f32.mrf.mxu1 }
 0xf0f   :  { %v4027_v40 = vmul.f32 %v5418_v16, %v7288_v43  ;;  %v4023_v48 = vadd.f32 1e-05, %v4022_v59  ;;  %v5041_v54 = vpop.f32.mrf.mxu0 }
 0xf10   :  { %3886 = vst.msk [vmem:[%s6291_s17] sm:$0xff] %vm2381_vm6, %v3877_v45  ;;  %5431 = vrcp.f32 %v3873_v36  ;;  %v5064_v1 = vpop.f32.mrf.mxu1 }
 0xf11   :  { %v5420_v7 = vpop.eup %5419  ;;  %4036 = vst.msk [vmem:[%s6296_s30] sm:$0xff] %vm3074_vm7, %v4027_v40  ;;  %5433 = vrcp.f32 %v4023_v48 }
 0xf12   :  { %v5422_v20 = vpop.eup %5421  ;;  %v3879_v34 = vmul.f32 %v5420_v7, %v7292_v52 }
 0xf13   :  { %v4029_v9 = vmul.f32 %v5422_v20, %v7298_v0 }
 0xf14   :  { %3887 = vst.msk [vmem:[%s6291_s17 + $0x8] sm:$0xff] %vm2381_vm6, %v3879_v34 }
 0xf15   :  { %v5424_v60 = vpop.eup %5423  ;;  %4037 = vst.msk [vmem:[%s6296_s30 + $0x8] sm:$0xff] %vm3074_vm7, %v4029_v9 }
 0xf16   :  { %v5426_v63 = vpop.eup %5425  ;;  %v3881_v31 = vmul.f32 %v5424_v60, %v7304_v47 }
 0xf17   :  { %v4031_v17 = vmul.f32 %v5426_v63, %v7310_v10 }
 0xf18   :  { %3888 = vst.msk [vmem:[%s6291_s17 + $0x10] sm:$0xff] %vm2381_vm6, %v3881_v31 }
 0xf19   :  { %v5428_v62 = vpop.eup %5427  ;;  %4038 = vst.msk [vmem:[%s6296_s30 + $0x10] sm:$0xff] %vm3074_vm7, %v4031_v17 }
 0xf1a   :  { %v5430_v43 = vpop.eup %5429  ;;  %v3883_v53 = vmul.f32 %v5428_v62, %v7316_v25 }
 0xf1b   :  { %v4033_v28 = vmul.f32 %v5430_v43, %v7322_v61 }
 0xf1c   :  { %3889 = vst.msk [vmem:[%s6291_s17 + $0x18] sm:$0xff] %vm2381_vm6, %v3883_v53 }
 0xf1d   :  { %v5432_v52 = vpop.eup %5431  ;;  %4039 = vst.msk [vmem:[%s6296_s30 + $0x18] sm:$0xff] %vm3074_vm7, %v4033_v28 }
 0xf1e   :  { %v5434_v5 = vpop.eup %5433  ;;  %v3885_v0 = vmul.f32 %v5432_v52, %v7328_v23 }
 0xf1f   :  { %v4035_v14 = vmul.f32 %v5434_v5, %v7334_v24 }
 0xf20   :  { %3890 = vst.msk [vmem:[%s6291_s17 + $0x20] sm:$0xff] %vm2381_vm6, %v3885_v0 }
 0xf21   :  { %4040 = vst.msk [vmem:[%s6296_s30 + $0x20] sm:$0xff] %vm3074_vm7, %v4035_v14 }
 0xf22   :  { %4049 = vsyncpa [#allocation9], 1 }
 0xf23   :  { %4050 = vsyncpa [#allocation12], 1 }
 0xf24   :  { %4051 = vsyncpa [#allocation15], 1 }
 0xf25   :  { %4052 = vsyncpa [#allocation18], 1 }
 0xf26   :  { %4053 = vsyncpa [#allocation21], 1 }
 0xf27   :  { %4054 = vsyncpa [#allocation24], 1 }
 0xf28   :  { %4055 = vsyncpa [#allocation27], 1 }
 0xf29   :  { %4056 = vsyncpa [#allocation30], 1 }
 0xf2a   :  { %4057 = vsyncpa [#allocation33], 1 }
 0xf2b   :  { %4058 = vsyncpa [#allocation36], 1 }
 0xf2c   :  { %4059 = vsyncpa [#allocation39], 1 }
 0xf2d   :  { %4060 = vsyncpa [#allocation42], 1 }
 0xf2e   :  { %4061 = vsyncpa [#allocation10], 1 }

// kernel: trajectory_model_forward.4
= control target key start
LH: loop header
LB: loop body
LE: loop exit
PB: predicated region body
PF: predicated region fallthrough
CT: control target
= control target key end

     0   :  { %17 = vsyncpa [#allocation6], 0  ;;  %s5604_s0 = inlined_call_operand.vmem [shape: f32[40,2], index: 0, kind: input, shape index: {}]   ;;  %s5605_s1 = inlined_call_operand.vmem [shape: f32[40,2], index: 1, kind: input, shape index: {}]   ;;  %s5606_s2 = inlined_call_operand.vmem [shape: f32[40,20], index: 2, kind: input, shape index: {}]   ;;  %s5607_s3 = inlined_call_operand.vmem [shape: f32[40,32], index: 3, kind: input, shape index: {}]   ;;  %s5608_s4 = inlined_call_operand.vmem [shape: f32[5,8,40], index: 4, kind: input, shape index: {}]   ;;  %s5609_s5 = inlined_call_operand.vmem [shape: f32[8,5,40], index: 5, kind: input, shape index: {}]   ;;  %s5610_s6 = inlined_call_operand.vmem [shape: f32[2,16], index: 6, kind: input, shape index: {}]   ;;  %s5611_s7 = inlined_call_operand.vmem [shape: f32[16,16], index: 7, kind: input, shape index: {}]   ;;  %s5612_s8 = inlined_call_operand.vmem [shape: f32[2,16], index: 8, kind: input, shape index: {}]   ;;  %s5613_s9 = inlined_call_operand.vmem [shape: f32[16,16], index: 9, kind: input, shape index: {}]   ;;  %s5614_s10 = inlined_call_operand.vmem [shape: f32[4], index: 10, kind: input, shape index: {}]   ;;  %s5615_s11 = inlined_call_operand.vmem [shape: f32[4,4], index: 11, kind: input, shape index: {}]   ;;  %s5616_s12 = inlined_call_operand.vmem [shape: f32[40,64], index: 12, kind: output, shape index: {}]  }
   0x1   :  { %s45_s23 = sshll.u32 %s5614_s10, 4  ;;  %s46_s23 = int_to_ptr.vmem [resolvable:$true] %s45_s23 }
   0x2   :  { %18 = vsyncpa [#allocation8], 0  ;;  %s55_s26 = sshll.u32 %s5615_s11, 4  ;;  %s4728_s27 = scalar_lea.vmem %s46_s23, 16  ;;  %s56_s26 = int_to_ptr.vmem [resolvable:$true] %s55_s26 }
   0x3   :  { %p4729_p0 = scmp.ne.s32.totalorder %s46_s23, %s4728_s27  ;;  %p4733_p1 = scmp.lt.s32.totalorder %s46_s23, %s46_s23 }
   0x4   :  { %p4734_p2 = scmp.lt.s32.totalorder %s4728_s27, %s4728_s27 }
   0x6   :  { %p4735_p3 = por %p4734_p2, %p4733_p1 }
   0x8   :  { %p4736_p4 = pnand %p4735_p3, %p4729_p0 }
   0xa   :  { %4739 = shalt.err (!%p4736_p4)
}
   0xb   :  { %s4788_s28 = smov [#allocation5]   ;;  %s4740_s29 = scalar_lea.vmem %s56_s26, 64 }
   0xc   :  { %48 = dma.vmem_to_smem %s46_s23, 16, %s4788_s28, [#allocation6]  }
   0xd   :  { %p4741_p5 = scmp.ne.s32.totalorder %s56_s26, %s4740_s29  ;;  %p4745_p6 = scmp.lt.s32.totalorder %s56_s26, %s56_s26 }
   0xe   :  { %p4746_p7 = scmp.lt.s32.totalorder %s4740_s29, %s4740_s29 }
  0x10   :  { %p4747_p8 = por %p4746_p7, %p4745_p6 }
  0x12   :  { %p4748_p9 = pnand %p4747_p8, %p4741_p5 }
  0x14   :  { %4751 = shalt.err (!%p4748_p9)
}
  0x15   :  { %s4789_s10 = smov [#allocation7]  }
  0x16   :  { %58 = dma.vmem_to_smem %s56_s26, 64, %s4789_s10, [#allocation8]  }
  0x17   :  { %4768 = dma.done.wait [#allocation6], 16  }
  0x18   :  { %4769 = vsyncadd [#allocation6], 4294967280 }
  0x19   :  { %4770 = dma.done.wait [#allocation8], 64  }
  0x1a   :  { %4771 = vsyncadd [#allocation8], 4294967232 }
  0x1b   :  { %65 = sfence }
  0x1c   :  { %v66_v0 = vlaneseq  ;;  %s4909_s11 = sld [smem:[#allocation5]]  ;;  %v4914_v1 = vld [vmem:[%s5610_s6] sm:$0x3]  ;;  %v4926_v3 = vld [vmem:[%s5611_s7 + $0x8] sm:$0xff]  ;;  %v4790_v9 = vmov 0.0  }
  0x1d   :  { %v4919_v2 = vld [vmem:[%s5611_s7] sm:$0xff]  ;;  %s4921_s16 = sld [smem:[#allocation5 + $0x1]]  ;;  %v4945_v8 = vld [vmem:[%s5613_s9 + $0x8] sm:$0xff] }
  0x1e   :  { %v4931_v4 = vld [vmem:[%s5612_s8] sm:$0x3]  ;;  %v4938_v6 = vshrl.u32 %v66_v0, 7  ;;  %v69_v7 = vand.u32 127, %v66_v0  ;;  %s4940_s22 = sld [smem:[#allocation5 + $0x2]]  ;;  %s4952_s8 = smov 0  }
  0x1f   :  { %v4936_v5 = vld [vmem:[%s5613_s9] sm:$0xff]  ;;  %s4947_s7 = sld [smem:[#allocation5 + $0x3]] }
  0x20   :  { %vm70_vm0 = vcmp.eq.s32.totalorder %v4938_v6, %v69_v7 }
  0x21   :  { %v4950_v10 = vsel %vm70_vm0, 1.0, %v4790_v9 }
  0x22 LB: > { %v4791_v11 = vmov 0.0   ;;  %vm4792_vm1 = vmmov 0   ;;  %s4959_s9 = sshll.u32 %s4774_s8, 3  ;;  %vm94_vm2 = vcmask 64512   ;;  %s4793_s30 = smov 120   ;;  %v4796_v14 = vmov 1   ;;  %s4774_s8 = sphi %s4952_s8, %s88_s8  }
  0x23   : > { %4300 = vmatprep.subr.mxu0 %v4791_v11  ;;  %4302 = vmatprep.mubr.msk.f32.mxu0 %vm4792_vm1, %v4791_v11  ;;  %s92_s27 = scalar_lea.vmem %s5607_s3, %s4959_s9  ;;  %s90_s10 = scalar_lea.vmem %s5605_s1, %s4959_s9  ;;  %v4797_v15 = vmov 0   ;;  %v184_v27 = vsub.s32 1, %v4938_v6  ;;  %v175_v28 = vsub.s32 0, %v4938_v6  ;;  %vm193_vm7 = vcmask 130048  }
  0x24   : > { %4305 = vmatprep.subr.mxu1 %v4791_v11  ;;  %4307 = vmatprep.mubr.msk.f32.mxu1 %vm4792_vm1, %v4791_v11  ;;  %v195_v12 = vld [vmem:[%s92_s27] sm:$0xff]  ;;  %s4794_s13 = smov 104   ;;  %s4795_s14 = smov 112   ;;  %v189_v35 = vstv %s4940_s22  ;;  %vm290_vm8 = vcmask 261248   ;;  %vm387_vm9 = vcmask 392448   ;;  %vm484_vm10 = vcmask 523648  }
  0x25   : > { %v91_v13 = vld [vmem:[%s90_s10] sm:$0xff]  ;;  %197 = vrot.lane.b32.xlu0 %v195_v12, %s4793_s30  ;;  %391 = vrot.lane.b32.xlu1 %v195_v12, %s4794_s13  ;;  %v185_v29 = vrot.slane %v4931_v4, %v184_v27  ;;  %v176_v30 = vrot.slane %v4931_v4, %v175_v28  ;;  %s4798_s15 = smov 16   ;;  %s4799_s17 = smov 32  }
  0x26   : > { %4301 = vmatpush3.msra.mxu0 %v91_v13  ;;  %4306 = vmatpush3.msra.mxu1 %v91_v13  ;;  %s4800_s18 = smov 48   ;;  %s192_s19 = scalar_lea.vmem [#allocation3], %s4959_s9 }
  0x27   : > { %4303 = vmatmul.mubr.msk.f32.vlgmr.msra.gmra.mxu0 %vm94_vm2, %v195_v12  ;;  %4310 = vmatprep.subr.mxu0 %v4791_v11  ;;  %s88_s8 = sadd.s32 1, %s4774_s8  }
  0x28   : > { %4311 = vmatpush3.msra.mxu0 %v91_v13  ;;  %4312 = vmatprep.mubr.msk.f32.mxu0 %vm4792_vm1, %v4791_v11  ;;  %p85_p10 = scmp.ge.s32.totalorder %s88_s8, 5  }
  0x29   : > { %294 = vrot.lane.b32.xlu0 %v195_v12, %s4795_s14  ;;  %4315 = vmatprep.subr.mxu1 %v4791_v11  ;;  %s4993_s20 = smov (%p85_p10), 0  }
  0x2a   : > { %4715 = vset.pattern.permute.xlu0 %v4796_v14  ;;  %4714 = vset.pattern.permute.xlu1 %v4797_v15 }
  0x97   : > { %v198_v16 = vpop.permute.xlu0 %197  ;;  %v392_v17 = vpop.permute.xlu1 %391 }
  0x98   : > { %4308 = vmatmul.mubr.msk.f32.vlgmr.msra.gmra.mxu1 %vm94_vm2, %v198_v16 }
  0x99   : > { %4316 = vmatpush3.msra.mxu1 %v91_v13  ;;  %4317 = vmatprep.mubr.msk.f32.mxu1 %vm4792_vm1, %v4791_v11 }
  0x9b   : > { %v295_v18 = vpop.permute.xlu0 %294 }
  0x9c   : > { %4313 = vmatmul.mubr.msk.f32.vlgmr.msra.gmra.mxu0 %vm94_vm2, %v295_v18  ;;  %4318 = vmatmul.mubr.msk.f32.vlgmr.msra.gmra.mxu1 %vm94_vm2, %v392_v17 }
  0xe7   : > { %v164_v19 = vpop.f32.mrf.mxu0 }
  0xe9   : > { %v4304_v20 = vpop.f32.mrf.mxu0 }
 0x158   : > { %v267_v21 = vpop.f32.mrf.mxu1 }
 0x159   : > { %278 = vperm.xlu0 %4715, %v267_v21   ;;  %273 = vperm.xlu1 %4714, %v267_v21  }
 0x15a   : > { %v4309_v22 = vpop.f32.mrf.mxu1 }
 0x15c   : > { %v364_v23 = vpop.f32.mrf.mxu0  ;;  %v461_v24 = vpop.f32.mrf.mxu1 }
 0x15d   : > { %4717 = vset.pattern.permute.xlu0 %v4797_v15  ;;  %370 = vperm.xlu1 %4714, %v364_v23  }
 0x15e   : > { %467 = vperm.xlu0 %4717, %v461_v24   ;;  %v4314_v25 = vpop.f32.mrf.mxu0  ;;  %v4319_v26 = vpop.f32.mrf.mxu1 }
 0x161   : > { %4716 = vset.pattern.permute.xlu1 %v4796_v14 }
 0x162   : > { %4719 = vset.pattern.permute.xlu0 %v4796_v14  ;;  %375 = vperm.xlu1 %4716, %v364_v23  }
 0x163   : > { %179 = vperm.xlu0 %4719, %v164_v19  }
 0x166   : > { %472 = vperm.xlu1 %4716, %v461_v24  }
 0x16a   : > { %4718 = vset.pattern.permute.xlu1 %v4797_v15 }
 0x16b   : > { %170 = vperm.xlu1 %4718, %v164_v19  }
 0x1d4   : > { %v279_v31 = vpop.permute.xlu0 %278  ;;  %v274_v32 = vpop.permute.xlu1 %273 }
 0x1d5   : > { %v281_v33 = vmul.f32 %v279_v31, %v185_v29  ;;  %v276_v34 = vmul.f32 %v274_v32, %v176_v30 }
 0x1d7   : > { %v282_v36 = vadd.f32 %v281_v33, %v276_v34 }
 0x1d8   : > { %v371_v37 = vpop.permute.xlu1 %370 }
 0x1d9   : > { %vm283_vm3 = vcmp.ge.f32.partialorder %v282_v36, 0.0  ;;  %v284_v38 = vmul.f32 %v282_v36, %v189_v35  ;;  %v373_v41 = vmul.f32 %v371_v37, %v176_v30  ;;  %v468_v42 = vpop.permute.xlu0 %467 }
 0x1da   : > { %v470_v44 = vmul.f32 %v468_v42, %v176_v30 }
 0x1db   : > { %v285_v39 = vsel %vm283_vm3, %v282_v36, %v284_v38 }
 0x1dc   : > { %287 = vrot.lane.b32.xlu1 %v285_v39, %s4798_s15 }
 0x1dd   : > { %v376_v40 = vpop.permute.xlu1 %375 }
 0x1de   : > { %v378_v43 = vmul.f32 %v376_v40, %v185_v29  ;;  %v180_v49 = vpop.permute.xlu0 %179 }
 0x1df   : > { %v186_v54 = vmul.f32 %v185_v29, %v180_v49 }
 0x1e0   : > { %v379_v45 = vadd.f32 %v378_v43, %v373_v41 }
 0x1e1   : > { %v473_v46 = vpop.permute.xlu1 %472 }
 0x1e2   : > { %v475_v47 = vmul.f32 %v473_v46, %v185_v29  ;;  %vm380_vm4 = vcmp.ge.f32.partialorder %v379_v45, 0.0  ;;  %v381_v48 = vmul.f32 %v379_v45, %v189_v35 }
 0x1e4   : > { %v476_v50 = vadd.f32 %v475_v47, %v470_v44  ;;  %v382_v51 = vsel %vm380_vm4, %v379_v45, %v381_v48 }
 0x1e5   : > { %384 = vrot.lane.b32.xlu1 %v382_v51, %s4799_s17 }
 0x1e6   : > { %v171_v52 = vpop.permute.xlu1 %170  ;;  %vm477_vm5 = vcmp.ge.f32.partialorder %v476_v50, 0.0  ;;  %v478_v53 = vmul.f32 %v476_v50, %v189_v35 }
 0x1e7   : > { %v177_v55 = vmul.f32 %v176_v30, %v171_v52 }
 0x1e8   : > { %v479_v56 = vsel %vm477_vm5, %v476_v50, %v478_v53 }
 0x1e9   : > { %v187_v57 = vadd.f32 %v186_v54, %v177_v55  ;;  %481 = vrot.lane.b32.xlu0 %v479_v56, %s4800_s18 }
 0x1eb   : > { %vm188_vm6 = vcmp.ge.f32.partialorder %v187_v57, 0.0  ;;  %v190_v58 = vmul.f32 %v189_v35, %v187_v57 }
 0x1ed   : > { %v191_v59 = vsel %vm188_vm6, %v187_v57, %v190_v58 }
 0x1ee   : > { %194 = vst.msk [vmem:[%s192_s19] sm:$0xff] %vm193_vm7, %v191_v59 }
 0x24e   : > { %v288_v60 = vpop.permute.xlu1 %287 }
 0x24f   : > { %291 = vst.msk [vmem:[%s192_s19] sm:$0xff] %vm290_vm8, %v288_v60 }
 0x257   : > { %v385_v61 = vpop.permute.xlu1 %384 }
 0x258   : > { %388 = vst.msk [vmem:[%s192_s19] sm:$0xff] %vm387_vm9, %v385_v61  ;;  %87 = sbr.rel (!%p85_p10) target bundleno = 34 (0x22), region = 116 }
 0x25b   : > { %v482_v62 = vpop.permute.xlu0 %481 }
 0x25c   : > { %485 = vst.msk [vmem:[%s192_s19] sm:$0xff] %vm484_vm10, %v482_v62 }
 0x25d LB: > { %v4801_v0 = vmov 0.0   ;;  %vm4802_vm11 = vmmov 0   ;;  %s4083_s1 = sshll.u32 %s4778_s20, 3  ;;  %vm500_vm12 = vcmask 326656   ;;  %s4803_s23 = smov 112   ;;  %vm5617_vm13 = vcmask 36864   ;;  %s4778_s20 = sphi %s4993_s20, %s491_s20  }
 0x25e   : > { %4320 = vmatprep.subr.mxu0 %v4801_v0  ;;  %4330 = vmatprep.mubr.msk.f32.mxu0 %vm4802_vm11, %v4801_v0  ;;  %s493_s22 = scalar_lea.vmem %s5609_s5, %s4083_s1  ;;  %s574_s24 = smul.u32 5, %s4778_s20  ;;  %vm581_vm14 = vcmask 1044480   ;;  %vm577_vm15 = vcmask 39936   ;;  %v5075_v25 = vstv %s4947_s7  ;;  %vm820_vm4 = vcmask 126976  }
 0x25f   : > { %4333 = vmatprep.subr.mxu1 %v4801_v0  ;;  %4335 = vmatprep.mubr.msk.f32.mxu1 %vm4802_vm11, %v4801_v0  ;;  %v5025_v12 = vld [vmem:[%s493_s22] sm:$0x1f]  ;;  %s4804_s26 = smov 123   ;;  %s4805_s27 = smov 96  }
 0x260   : > { %s5045_s25 = scalar_lea.vmem %s5606_s2, %s574_s24  ;;  %s4806_s28 = smov 5  }
 0x261   : > { %v576_v13 = vld [vmem:[%s5045_s25] sm:$0x1f]  ;;  %s4807_s29 = smov 118   ;;  %s4808_s10 = smov 80  }
 0x262   : > { %v662_v14 = vmul.f32 %v4950_v10, %v576_v13  ;;  %v917_v23 = vld [vmem:[%s5045_s25] sm:$0x1f]  ;;  %s4809_s30 = smov 10   ;;  %s5130_s13 = scalar_lea.vmem [#allocation4], %s574_s24 }
 0x263   : > { %v4998_v63 = vld [vmem:[#allocation3 + $0x20] sm:$0xff]  ;;  %v5001_v7 = vld [vmem:[#allocation3 + $0x18] sm:$0xff]  ;;  %v5009_v4 = vld [vmem:[#allocation3 + $0x10] sm:$0xff]  ;;  %s4810_s14 = smov 113   ;;  %s4811_s15 = smov 15  }
 0x264   : > { %4321 = vmatpush3.msra.mxu0 %v4998_v63  ;;  %v5015_v9 = vld [vmem:[#allocation3 + $0x8] sm:$0xff]  ;;  %v5022_v11 = vld [vmem:[#allocation3] sm:$0xff]  ;;  %836 = vrot.lane.b32.xlu1 %v5009_v4, %s4803_s23  ;;  %v664_v15 = vsel %vm5617_vm13, %v662_v14, 0.0  ;;  %v1266_v51 = vld [vmem:[%s5045_s25] sm:$0x1f]  ;;  %s4812_s17 = smov 16  }
 0x265   : > { %4322 = vmatprep.subr.mxu0 %v4801_v0  ;;  %840 = vrot.lane.b32.xlu0 %v4998_v63, %s4803_s23  ;;  %s4813_s18 = smov 32   ;;  %s4814_s19 = smov 48  }
 0x266   : > { %4323 = vmatpush3.msra.mxu0 %v5001_v7  ;;  %s491_s20 = sadd.s32 1, %s4778_s20  }
 0x267   : > { %4324 = vmatprep.subr.mxu0 %v4801_v0  ;;  %p488_p11 = scmp.ge.s32.totalorder %s491_s20, 8  }
 0x268   : > { %4325 = vmatpush3.msra.mxu0 %v5009_v4  ;;  %834 = vrot.lane.b32.xlu1 %v5015_v9, %s4803_s23  ;;  %s5222_s1 = smov (%p488_p11), 0  }
 0x269   : > { %4326 = vmatprep.subr.mxu0 %v4801_v0  ;;  %838 = vrot.lane.b32.xlu0 %v5001_v7, %s4803_s23 }
 0x26a   : > { %4327 = vmatpush3.msra.mxu0 %v5015_v9 }
 0x26b   : > { %4328 = vmatprep.subr.mxu0 %v4801_v0 }
 0x26c   : > { %4329 = vmatpush3.msra.mxu0 %v5022_v11 }
 0x26d   : > { %4331 = vmatmul.mubr.msk.f32.vlgmr.msra.gmra.mxu0 %vm500_vm12, %v5025_v12  ;;  %4350 = vmatprep.subr.mxu0 %v4801_v0 }
 0x26e   : > { %4360 = vmatprep.mubr.msk.f32.mxu0 %vm4802_vm11, %v4801_v0  ;;  %832 = vrot.lane.b32.xlu0 %v5022_v11, %s4803_s23 }
 0x272   : > { %919 = vrot.lane.b32.xlu0 %v917_v23, %s4804_s26 }
 0x276   : > { %1189 = vrot.lane.b32.xlu0 %v4998_v63, %s4805_s27 }
 0x27a   : > { %1187 = vrot.lane.b32.xlu0 %v5001_v7, %s4805_s27 }
 0x27e   : > { %1185 = vrot.lane.b32.xlu0 %v5009_v4, %s4805_s27 }
 0x282   : > { %1183 = vrot.lane.b32.xlu0 %v5015_v9, %s4805_s27 }
 0x286   : > { %1181 = vrot.lane.b32.xlu0 %v5022_v11, %s4805_s27 }
 0x28a   : > { %1003 = vrot.lane.b32.xlu0 %v4950_v10, %s4806_s28 }
 0x28c   : > { %665 = vadd.xlane.f32.xlu1 %v664_v15 }
 0x29d   : > { %1268 = vrot.lane.b32.xlu1 %v1266_v51, %s4807_s29 }
 0x2a1   : > { %1537 = vrot.lane.b32.xlu1 %v4998_v63, %s4808_s10 }
 0x2a5   : > { %1535 = vrot.lane.b32.xlu1 %v5001_v7, %s4808_s10 }
 0x2a9   : > { %1533 = vrot.lane.b32.xlu1 %v5009_v4, %s4808_s10 }
 0x2ad   : > { %1531 = vrot.lane.b32.xlu1 %v5015_v9, %s4808_s10 }
 0x2b1   : > { %1351 = vrot.lane.b32.xlu1 %v4950_v10, %s4809_s30 }
 0x2d6   : > { %v837_v18 = vpop.permute.xlu1 %836 }
 0x2d7   : > { %v841_v16 = vpop.permute.xlu0 %840 }
 0x2d8   : > { %4351 = vmatpush3.msra.mxu0 %v841_v16 }
 0x2d9   : > { %4352 = vmatprep.subr.mxu0 %v4801_v0 }
 0x2da   : > { %v835_v21 = vpop.permute.xlu1 %834 }
 0x2db   : > { %v839_v17 = vpop.permute.xlu0 %838 }
 0x2dc   : > { %4353 = vmatpush3.msra.mxu0 %v839_v17 }
 0x2dd   : > { %4354 = vmatprep.subr.mxu0 %v4801_v0 }
 0x2de   : > { %4355 = vmatpush3.msra.mxu0 %v837_v18 }
 0x2df   : > { %4356 = vmatprep.subr.mxu0 %v4801_v0 }
 0x2e0   : > { %4357 = vmatpush3.msra.mxu0 %v835_v21  ;;  %v833_v22 = vpop.permute.xlu0 %832 }
 0x2e1   : > { %4358 = vmatprep.subr.mxu0 %v4801_v0 }
 0x2e2   : > { %4359 = vmatpush3.msra.mxu0 %v833_v22 }
 0x2e3   : > { %4361 = vmatmul.mubr.msk.f32.vlgmr.msra.gmra.mxu0 %vm500_vm12, %v5025_v12  ;;  %4380 = vmatprep.subr.mxu0 %v4801_v0 }
 0x2e4   : > { %4390 = vmatprep.mubr.msk.f32.mxu0 %vm4802_vm11, %v4801_v0  ;;  %v5072_v24 = vpop.permute.xlu0 %919 }
 0x2e8   : > { %v1190_v26 = vpop.permute.xlu0 %1189 }
 0x2e9   : > { %4381 = vmatpush3.msra.mxu0 %v1190_v26 }
 0x2ea   : > { %4382 = vmatprep.subr.mxu0 %v4801_v0 }
 0x2ec   : > { %v1188_v32 = vpop.permute.xlu0 %1187 }
 0x2ed   : > { %4383 = vmatpush3.msra.mxu0 %v1188_v32 }
 0x2ee   : > { %4384 = vmatprep.subr.mxu0 %v4801_v0 }
 0x2f0   : > { %v1186_v37 = vpop.permute.xlu0 %1185 }
 0x2f1   : > { %4385 = vmatpush3.msra.mxu0 %v1186_v37 }
 0x2f2   : > { %4386 = vmatprep.subr.mxu0 %v4801_v0 }
 0x2f4   : > { %v1184_v38 = vpop.permute.xlu0 %1183 }
 0x2f5   : > { %4387 = vmatpush3.msra.mxu0 %v1184_v38 }
 0x2f6   : > { %4388 = vmatprep.subr.mxu0 %v4801_v0 }
 0x2f8   : > { %v1182_v39 = vpop.permute.xlu0 %1181 }
 0x2f9   : > { %4389 = vmatpush3.msra.mxu0 %v1182_v39 }
 0x2fa   : > { %4391 = vmatmul.mubr.msk.f32.vlgmr.msra.gmra.mxu0 %vm500_vm12, %v5025_v12  ;;  %4403 = vmatprep.subr.mxu0 %v4801_v0 }
 0x2fb   : > { %4404 = vmatpush3.msra.mxu0 %v4945_v8  ;;  %4407 = vmatprep.mubr.msk.f32.mxu0 %vm4802_vm11, %v4801_v0 }
 0x2fc   : > { %v1004_v40 = vpop.permute.xlu0 %1003  ;;  %4405 = vmatprep.subr.mxu0 %v4801_v0 }
 0x2fd   : > { %v1006_v41 = vmul.f32 %v1004_v40, %v917_v23  ;;  %4406 = vmatpush3.msra.mxu0 %v4936_v5 }
 0x2fe   : > { %4423 = vmatprep.subr.mxu0 %v4801_v0 }
 0x2ff   : > { %1008 = vrot.lane.b32.xlu0 %v1006_v41, %s4804_s26 }
 0x315   : > { %v666_v46 = vpop.xlane.xlu1 %665 }
 0x319   : > { %v5123_v52 = vpop.permute.xlu1 %1268 }
 0x31d   : > { %v5126_v55 = vpop.permute.xlu1 %1537 }
 0x321   : > { %v5135_v60 = vpop.permute.xlu1 %1535 }
 0x325   : > { %v1534_v63 = vpop.permute.xlu1 %1533 }
 0x329   : > { %v1532_v7 = vpop.permute.xlu1 %1531 }
 0x32d   : > { %v570_v19 = vpop.f32.mrf.mxu0  ;;  %v1352_v4 = vpop.permute.xlu1 %1351 }
 0x32e   : > { %4334 = vmatpush3.msk.msra.mxu1 %vm581_vm14, %v570_v19  ;;  %v660_v29 = vmul.f32 %v5075_v25, %v570_v19  ;;  %vm659_vm0 = vcmp.ge.f32.partialorder %v570_v19, 0.0  ;;  %v1354_v9 = vmul.f32 %v1352_v4, %v1266_v51 }
 0x32f   : > { %v4332_v20 = vpop.f32.mrf.mxu0  ;;  %4336 = vmatmul.mubr.msk.f32.vlgmr.msra.gmra.mxu1 %vm577_vm15, %v576_v13  ;;  %4338 = vmatprep.subr.mxu1 %v4801_v0 }
 0x330   : > { %4340 = vmatprep.mubr.msk.f32.mxu1 %vm4802_vm11, %v4801_v0  ;;  %v661_v35 = vsel %vm659_vm0, %v570_v19, %v660_v29  ;;  %1356 = vrot.lane.b32.xlu1 %v1354_v9, %s4807_s29 }
 0x371   : > { %v1009_v44 = vpop.permute.xlu0 %1008 }
 0x372   : > { %v1011_v45 = vsel %vm5617_vm13, %v1009_v44, 0.0 }
 0x373   : > { %1012 = vadd.xlane.f32.xlu0 %v1011_v45 }
 0x389   : > { %1529 = vrot.lane.b32.xlu0 %v5022_v11, %s4808_s10 }
 0x3a2   : > { %v1357_v14 = vpop.permute.xlu1 %1356 }
 0x3a3   : > { %v5102_v42 = vpop.f32.mrf.mxu0  ;;  %v1359_v15 = vsel %vm5617_vm13, %v1357_v14, 0.0 }
 0x3a4   : > { %1360 = vadd.xlane.f32.xlu1 %v1359_v15  ;;  %v1000_v16 = vmul.f32 %v5102_v42, %v5075_v25  ;;  %vm999_vm6 = vcmp.ge.f32.partialorder %v5102_v42, 0.0 }
 0x3a5   : > { %v4362_v43 = vpop.f32.mrf.mxu0 }
 0x3a6   : > { %v1001_v17 = vsel %vm999_vm6, %v5102_v42, %v1000_v16 }
 0x3ba   : > { %v5148_v11 = vpop.f32.mrf.mxu0 }
 0x3ef   : > { %v651_v30 = vpop.f32.mrf.mxu1 }
 0x3f0   : > { %vm655_vm1 = vcmp.ge.f32.partialorder %v651_v30, 0.0  ;;  %v657_v31 = vmul.f32 %v5075_v25, %v651_v30 }
 0x3f1   : > { %v4337_v33 = vpop.f32.mrf.mxu1 }
 0x3f2   : > { %v658_v34 = vsel %vm655_vm1, %v651_v30, %v657_v31 }
 0x3f3   : > { %4339 = vmatpush3.msk.msra.mxu1 %vm581_vm14, %v658_v34  ;;  %v667_v36 = vsub.f32 %v661_v35, %v658_v34 }
 0x3f4   : > { %4341 = vmatmul.mubr.msk.f32.vlgmr.msra.gmra.mxu1 %vm577_vm15, %v576_v13  ;;  %4343 = vmatprep.subr.mxu1 %v4801_v0  ;;  %v4392_v13 = vpop.f32.mrf.mxu0 }
 0x3f5   : > { %4344 = vmatpush3.msra.mxu1 %v4945_v8  ;;  %4347 = vmatprep.mubr.msk.f32.mxu1 %vm4802_vm11, %v4801_v0  ;;  %v668_v47 = vmul.f32 %v667_v36, %v666_v46 }
 0x3f6   : > { %4345 = vmatprep.subr.mxu1 %v4801_v0 }
 0x3f7   : > { %4346 = vmatpush3.msra.mxu1 %v4936_v5 }
 0x3f8   : > { %4363 = vmatprep.subr.mxu1 %v4801_v0 }
 0x3fc   : > { %v1013_v19 = vpop.xlane.xlu0 %1012 }
 0x400   : > { %v1530_v31 = vpop.permute.xlu0 %1529 }
 0x42d   : > { %v1361_v40 = vpop.xlane.xlu1 %1360 }
 0x4b4   : > { %v738_v48 = vpop.f32.mrf.mxu1 }
 0x4b5   : > { %v739_v49 = vadd.f32 %v738_v48, %v668_v47 }
 0x4b6   : > { %v4342_v50 = vpop.f32.mrf.mxu1 }
 0x4b7   : > { %4348 = vmatmul.mubr.msk.f32.vlgmr.msra.gmra.mxu1 %vm193_vm7, %v739_v49 }
 0x4b8   : > { %4364 = vmatpush3.msk.msra.mxu1 %vm581_vm14, %v5102_v42  ;;  %4365 = vmatprep.mubr.msk.f32.mxu1 %vm4802_vm11, %v4801_v0 }
 0x4b9   : > { %4368 = vmatprep.subr.mxu1 %v4801_v0 }
 0x4bb   : > { %4366 = vmatmul.mubr.msk.f32.vlgmr.msra.gmra.mxu1 %vm577_vm15, %v5072_v24 }
 0x4bc   : > { %4370 = vmatprep.mubr.msk.f32.mxu1 %vm4802_vm11, %v4801_v0 }
 0x577   : > { %v812_v53 = vpop.f32.mrf.mxu1 }
 0x578   : > { %vm816_vm3 = vcmp.ge.f32.partialorder %v812_v53, 0.0  ;;  %v817_v54 = vmul.f32 %v812_v53, %v5075_v25 }
 0x579   : > { %v4349_v56 = vpop.f32.mrf.mxu1 }
 0x57a   : > { %v818_v57 = vsel %vm816_vm3, %v812_v53, %v817_v54  ;;  %vm1169_vm3 = vcmask 258176  }
 0x57b   : > { %821 = vst.msk [vmem:[%s5130_s13] sm:$0x1f] %vm820_vm4, %v818_v57  ;;  %v992_v58 = vpop.f32.mrf.mxu1 }
 0x57c   : > { %vm996_vm5 = vcmp.ge.f32.partialorder %v992_v58, 0.0  ;;  %v997_v59 = vmul.f32 %v992_v58, %v5075_v25 }
 0x57d   : > { %v4367_v61 = vpop.f32.mrf.mxu1 }
 0x57e   : > { %v998_v62 = vsel %vm996_vm5, %v992_v58, %v997_v59  ;;  %vm1348_vm5 = vcmp.ge.f32.partialorder %v5148_v11, 0.0 }
 0x57f   : > { %4369 = vmatpush3.msk.msra.mxu1 %vm581_vm14, %v998_v62  ;;  %v1014_v18 = vsub.f32 %v1001_v17, %v998_v62 }
 0x580   : > { %4371 = vmatmul.mubr.msk.f32.vlgmr.msra.gmra.mxu1 %vm577_vm15, %v5072_v24  ;;  %4373 = vmatprep.subr.mxu1 %v4801_v0  ;;  %v1614_v24 = vld [vmem:[%s5045_s25] sm:$0x1f] }
 0x581   : > { %4374 = vmatpush3.msra.mxu1 %v4945_v8  ;;  %4377 = vmatprep.mubr.msk.f32.mxu1 %vm4802_vm11, %v4801_v0  ;;  %v1015_v20 = vmul.f32 %v1014_v18, %v1013_v19 }
 0x582   : > { %4375 = vmatprep.subr.mxu1 %v4801_v0  ;;  %1616 = vrot.lane.b32.xlu0 %v1614_v24, %s4810_s14 }
 0x583   : > { %4376 = vmatpush3.msra.mxu1 %v4936_v5 }
 0x584   : > { %4393 = vmatprep.subr.mxu1 %v4801_v0 }
 0x586   : > { %1699 = vrot.lane.b32.xlu0 %v4950_v10, %s4811_s15 }
 0x5f4   : > { %v5169_v36 = vpop.permute.xlu0 %1616 }
 0x5f8   : > { %v1700_v38 = vpop.permute.xlu0 %1699 }
 0x5f9   : > { %v1702_v39 = vmul.f32 %v1700_v38, %v1614_v24 }
 0x5fb   : > { %1704 = vrot.lane.b32.xlu0 %v1702_v39, %s4810_s14 }
 0x640   : > { %v1085_v21 = vpop.f32.mrf.mxu1 }
 0x641   : > { %v1086_v22 = vadd.f32 %v1085_v21, %v1015_v20 }
 0x642   : > { %v4372_v23 = vpop.f32.mrf.mxu1 }
 0x643   : > { %4378 = vmatmul.mubr.msk.f32.vlgmr.msra.gmra.mxu1 %vm193_vm7, %v1086_v22 }
 0x644   : > { %4394 = vmatpush3.msk.msra.mxu1 %vm581_vm14, %v5148_v11  ;;  %4395 = vmatprep.mubr.msk.f32.mxu1 %vm4802_vm11, %v4801_v0 }
 0x645   : > { %4398 = vmatprep.subr.mxu1 %v4801_v0 }
 0x647   : > { %4396 = vmatmul.mubr.msk.f32.vlgmr.msra.gmra.mxu1 %vm577_vm15, %v5123_v52 }
 0x648   : > { %4400 = vmatprep.mubr.msk.f32.mxu1 %vm4802_vm11, %v4801_v0 }
 0x66d   : > { %v1705_v42 = vpop.permute.xlu0 %1704 }
 0x66e   : > { %v1707_v43 = vsel %vm5617_vm13, %v1705_v42, 0.0 }
 0x66f   : > { %1708 = vadd.xlane.f32.xlu0 %v1707_v43 }
 0x703   : > { %v1158_v26 = vpop.f32.mrf.mxu1 }
 0x704   : > { %vm1162_vm0 = vcmp.ge.f32.partialorder %v1158_v26, 0.0  ;;  %v1163_v29 = vmul.f32 %v1158_v26, %v5075_v25 }
 0x705   : > { %v4379_v30 = vpop.f32.mrf.mxu1 }
 0x706   : > { %v1164_v32 = vsel %vm1162_vm0, %v1158_v26, %v1163_v29 }
 0x707   : > { %1166 = vrot.lane.b32.xlu1 %v1164_v32, %s4812_s17  ;;  %v1341_v33 = vpop.f32.mrf.mxu1 }
 0x708   : > { %vm1345_vm1 = vcmp.ge.f32.partialorder %v1341_v33, 0.0  ;;  %v1346_v34 = vmul.f32 %v1341_v33, %v5075_v25 }
 0x709   : > { %v4397_v35 = vpop.f32.mrf.mxu1 }
 0x70a   : > { %v1347_v37 = vsel %vm1345_vm1, %v1341_v33, %v1346_v34 }
 0x70b   : > { %4399 = vmatpush3.msk.msra.mxu1 %vm581_vm14, %v1347_v37 }
 0x70c   : > { %4401 = vmatmul.mubr.msk.f32.vlgmr.msra.gmra.mxu1 %vm577_vm15, %v5123_v52  ;;  %4410 = vmatprep.subr.mxu1 %v4801_v0 }
 0x70d   : > { %4411 = vmatpush3.msra.mxu1 %v5126_v55  ;;  %4420 = vmatprep.mubr.msk.f32.mxu1 %vm4802_vm11, %v4801_v0 }
 0x70e   : > { %4412 = vmatprep.subr.mxu1 %v4801_v0 }
 0x70f   : > { %4413 = vmatpush3.msra.mxu1 %v5135_v60 }
 0x710   : > { %4414 = vmatprep.subr.mxu1 %v4801_v0 }
 0x711   : > { %4415 = vmatpush3.msra.mxu1 %v1534_v63  ;;  %v1709_v63 = vpop.xlane.xlu0 %1708 }
 0x712   : > { %4416 = vmatprep.subr.mxu1 %v4801_v0 }
 0x713   : > { %4417 = vmatpush3.msra.mxu1 %v1532_v7 }
 0x714   : > { %4418 = vmatprep.subr.mxu1 %v4801_v0 }
 0x715   : > { %4419 = vmatpush3.msra.mxu1 %v1530_v31 }
 0x716   : > { %4421 = vmatmul.mubr.msk.f32.vlgmr.msra.gmra.mxu1 %vm500_vm12, %v5025_v12  ;;  %4433 = vmatprep.subr.mxu1 %v4801_v0  ;;  %v1349_v12 = vmul.f32 %v5148_v11, %v5075_v25 }
 0x717   : > { %4434 = vmatpush3.msra.mxu1 %v4945_v8  ;;  %4437 = vmatprep.mubr.msk.f32.mxu1 %vm4802_vm11, %v4801_v0 }
 0x718   : > { %4435 = vmatprep.subr.mxu1 %v4801_v0  ;;  %v1350_v44 = vsel %vm1348_vm5, %v5148_v11, %v1349_v12 }
 0x719   : > { %4436 = vmatpush3.msra.mxu1 %v4936_v5  ;;  %v1362_v45 = vsub.f32 %v1350_v44, %v1347_v37 }
 0x71b   : > { %v1363_v46 = vmul.f32 %v1362_v45, %v1361_v40 }
 0x779   : > { %v1167_v41 = vpop.permute.xlu1 %1166 }
 0x77a   : > { %1170 = vst.msk [vmem:[%s5130_s13] sm:$0x1f] %vm1169_vm3, %v1167_v41 }
 0x7cc   : > { %v1433_v47 = vpop.f32.mrf.mxu1 }
 0x7cd   : > { %v1434_v48 = vadd.f32 %v1433_v47, %v1363_v46 }
 0x7ce   : > { %v4402_v49 = vpop.f32.mrf.mxu1 }
 0x7cf   : > { %4408 = vmatmul.mubr.msk.f32.vlgmr.msra.gmra.mxu0 %vm193_vm7, %v1434_v48 }
 0x7d0   : > { %4425 = vmatprep.mubr.msk.f32.mxu0 %vm4802_vm11, %v4801_v0 }
 0x7d6   : > { %v1610_v50 = vpop.f32.mrf.mxu1 }
 0x7d7   : > { %4424 = vmatpush3.msk.msra.mxu0 %vm581_vm14, %v1610_v50  ;;  %v1697_v56 = vmul.f32 %v1610_v50, %v5075_v25  ;;  %vm1696_vm0 = vcmp.ge.f32.partialorder %v1610_v50, 0.0 }
 0x7d8   : > { %v4422_v51 = vpop.f32.mrf.mxu1  ;;  %4426 = vmatmul.mubr.msk.f32.vlgmr.msra.gmra.mxu0 %vm577_vm15, %v5169_v36  ;;  %4428 = vmatprep.subr.mxu0 %v4801_v0 }
 0x7d9   : > { %4430 = vmatprep.mubr.msk.f32.mxu0 %vm4802_vm11, %v4801_v0  ;;  %v1698_v61 = vsel %vm1696_vm0, %v1610_v50, %v1697_v56  ;;  %vm1517_vm11 = vcmask 389376  }
 0x88f   : > { %v1506_v52 = vpop.f32.mrf.mxu0 }
 0x890   : > { %vm1510_vm6 = vcmp.ge.f32.partialorder %v1506_v52, 0.0  ;;  %v1511_v53 = vmul.f32 %v1506_v52, %v5075_v25 }
 0x891   : > { %v4409_v54 = vpop.f32.mrf.mxu0 }
 0x892   : > { %v1512_v55 = vsel %vm1510_vm6, %v1506_v52, %v1511_v53  ;;  %vm1865_vm6 = vcmask 520576  }
 0x893   : > { %1514 = vrot.lane.b32.xlu1 %v1512_v55, %s4813_s18 }
 0x898   : > { %v1689_v57 = vpop.f32.mrf.mxu0 }
 0x899   : > { %vm1693_vm1 = vcmp.ge.f32.partialorder %v1689_v57, 0.0  ;;  %v1694_v58 = vmul.f32 %v1689_v57, %v5075_v25 }
 0x89a   : > { %v4427_v59 = vpop.f32.mrf.mxu0 }
 0x89b   : > { %v1695_v60 = vsel %vm1693_vm1, %v1689_v57, %v1694_v58 }
 0x89c   : > { %4429 = vmatpush3.msk.msra.mxu0 %vm581_vm14, %v1695_v60  ;;  %v1710_v0 = vsub.f32 %v1698_v61, %v1695_v60 }
 0x89d   : > { %4431 = vmatmul.mubr.msk.f32.vlgmr.msra.gmra.mxu0 %vm577_vm15, %v5169_v36 }
 0x89e   : > { %v1711_v7 = vmul.f32 %v1710_v0, %v1709_v63 }
 0x905   : > { %v1515_v62 = vpop.permute.xlu1 %1514 }
 0x906   : > { %1518 = vst.msk [vmem:[%s5130_s13] sm:$0x1f] %vm1517_vm11, %v1515_v62 }
 0x95d   : > { %v1781_v4 = vpop.f32.mrf.mxu0 }
 0x95e   : > { %v1782_v9 = vadd.f32 %v1781_v4, %v1711_v7 }
 0x95f   : > { %v4432_v11 = vpop.f32.mrf.mxu0 }
 0x960   : > { %4438 = vmatmul.mubr.msk.f32.vlgmr.msra.gmra.mxu1 %vm193_vm7, %v1782_v9 }
 0xa20   : > { %v1854_v13 = vpop.f32.mrf.mxu1 }
 0xa21   : > { %vm1858_vm5 = vcmp.ge.f32.partialorder %v1854_v13, 0.0  ;;  %v1859_v14 = vmul.f32 %v1854_v13, %v5075_v25 }
 0xa22   : > { %v4439_v15 = vpop.f32.mrf.mxu1 }
 0xa23   : > { %v1860_v16 = vsel %vm1858_vm5, %v1854_v13, %v1859_v14 }
 0xa24   : > { %1862 = vrot.lane.b32.xlu0 %v1860_v16, %s4814_s19 }
 0xa93   :  { %490 = sbr.rel (!%p488_p11) target bundleno = 605 (0x25d), region = 127 }
 0xa96   : > { %v1863_v17 = vpop.permute.xlu0 %1862 }
 0xa97   : > { %1866 = vst.msk [vmem:[%s5130_s13] sm:$0x1f] %vm1865_vm6, %v1863_v17 }
 0xa98 LB: > { %v4815_v25 = vmov 0.0   ;;  %vm4816_vm0 = vmmov 0   ;;  %s5231_s21 = smul.u32 5, %s4782_s1  ;;  %s4817_s24 = smov 113   ;;  %v5276_v33 = vstv %s4909_s11  ;;  %vm5618_vm13 = vcmask 36864   ;;  %s4782_s1 = sphi %s5222_s1, %s1872_s1  }
 0xa99   : > { %4440 = vmatprep.subr.mxu0 %v4815_v25  ;;  %4442 = vmatprep.mubr.msk.f32.mxu0 %vm4816_vm0, %v4815_v25  ;;  %s4818_s8 = smov 123   ;;  %s4819_s9 = smov 5   ;;  %v4823_v45 = vmov 0   ;;  %v4824_v13 = vmov 1  }
 0xa9a   : > { %4445 = vmatprep.subr.mxu1 %v4815_v25  ;;  %4447 = vmatprep.mubr.msk.f32.mxu1 %vm4816_vm0, %v4815_v25  ;;  %s1880_s20 = scalar_lea.vmem %s5606_s2, %s5231_s21  ;;  %s1874_s23 = scalar_lea.vmem %s5604_s0, %s5231_s21 }
 0xa9b   : > { %v2442_v5 = vld [vmem:[%s1880_s20] sm:$0x1f]  ;;  %s4820_s25 = smov 118   ;;  %s4821_s26 = smov 10   ;;  %4720 = vset.pattern.permute.xlu0 %v4823_v45  ;;  %4721 = vset.pattern.permute.xlu1 %v4823_v45 }
 0xa9c   : > { %v2069_v8 = vld [vmem:[%s1880_s20] sm:$0x1f]  ;;  %2444 = vrot.lane.b32.xlu1 %v2442_v5, %s4817_s24  ;;  %s4822_s27 = smov 15   ;;  %s4825_s28 = smov 16  }
 0xa9d   : > { %v5244_v18 = vld [vmem:[%s1874_s23] sm:$0x1f]  ;;  %2071 = vrot.lane.b32.xlu0 %v2069_v8, %s4818_s8  ;;  %s4826_s29 = smov 32   ;;  %s4827_s10 = smov 48  }
 0xa9e   : > { %v1881_v19 = vld [vmem:[%s1880_s20] sm:$0x1f]  ;;  %4441 = vmatpush3.msk.msra.mxu0 %vm581_vm14, %v5244_v18  ;;  %v1878_v58 = vmul.f32 %v5276_v33, %v5244_v18  ;;  %s2066_s30 = scalar_lea.vmem [#allocation2], %s5231_s21  ;;  %s1872_s1 = sadd.s32 1, %s4782_s1  }
 0xa9f   : > { %v2256_v20 = vld [vmem:[%s1880_s20] sm:$0x1f]  ;;  %4443 = vmatmul.mubr.msk.f32.vlgmr.msra.gmra.mxu0 %vm577_vm15, %v1881_v19  ;;  %4450 = vmatprep.subr.mxu0 %v4815_v25  ;;  %v1963_v38 = vmul.f32 %v4950_v10, %v1881_v19  ;;  %p1869_p12 = scmp.ge.s32.totalorder %s1872_s1, 8  }
 0xaa0   : > { %4451 = vmatpush3.msk.msra.mxu0 %vm581_vm14, %v5244_v18  ;;  %4452 = vmatprep.mubr.msk.f32.mxu0 %vm4816_vm0, %v4815_v25  ;;  %s5331_s13 = smov (%p1869_p12), 0  }
 0xaa1   : > { %2149 = vrot.lane.b32.xlu1 %v4950_v10, %s4819_s9  ;;  %2258 = vrot.lane.b32.xlu0 %v2256_v20, %s4820_s25  ;;  %v1965_v41 = vsel %vm5618_vm13, %v1963_v38, 0.0 }
 0xaa2   : > { %4460 = vmatprep.subr.mxu0 %v4815_v25 }
 0xaa5   : > { %2335 = vrot.lane.b32.xlu0 %v4950_v10, %s4821_s26  ;;  %2521 = vrot.lane.b32.xlu1 %v4950_v10, %s4822_s27 }
 0xb0e   : > { %v5259_v21 = vpop.permute.xlu1 %2444 }
 0xb0f   : > { %v2072_v22 = vpop.permute.xlu0 %2071 }
 0xb10   : > { %4453 = vmatmul.mubr.msk.f32.vlgmr.msra.gmra.mxu0 %vm577_vm15, %v2072_v22 }
 0xb11   : > { %4461 = vmatpush3.msk.msra.mxu0 %vm581_vm14, %v5244_v18  ;;  %4462 = vmatprep.mubr.msk.f32.mxu0 %vm4816_vm0, %v4815_v25 }
 0xb12   : > { %4470 = vmatprep.subr.mxu0 %v4815_v25 }
 0xb13   : > { %v2150_v23 = vpop.permute.xlu1 %2149  ;;  %v2259_v24 = vpop.permute.xlu0 %2258 }
 0xb14   : > { %v2152_v26 = vmul.f32 %v2150_v23, %v2069_v8  ;;  %4463 = vmatmul.mubr.msk.f32.vlgmr.msra.gmra.mxu0 %vm577_vm15, %v2259_v24 }
 0xb15   : > { %4471 = vmatpush3.msk.msra.mxu0 %vm581_vm14, %v5244_v18  ;;  %4472 = vmatprep.mubr.msk.f32.mxu0 %vm4816_vm0, %v4815_v25 }
 0xb16   : > { %2154 = vrot.lane.b32.xlu0 %v2152_v26, %s4818_s8 }
 0xb17   : > { %v2336_v29 = vpop.permute.xlu0 %2335  ;;  %v2522_v30 = vpop.permute.xlu1 %2521 }
 0xb18   : > { %v2338_v31 = vmul.f32 %v2336_v29, %v2256_v20  ;;  %4473 = vmatmul.mubr.msk.f32.vlgmr.msra.gmra.mxu0 %vm577_vm15, %v5259_v21  ;;  %v2524_v32 = vmul.f32 %v2522_v30, %v2442_v5  ;;  %v2060_v30 = vrot.slane %v4914_v1, %v184_v27 }
 0xb1a   : > { %2340 = vrot.lane.b32.xlu1 %v2338_v31, %s4820_s25  ;;  %2526 = vrot.lane.b32.xlu0 %v2524_v32, %s4817_s24  ;;  %v2051_v31 = vrot.slane %v4914_v1, %v175_v28 }
 0xb5f   : > { %v1956_v34 = vpop.f32.mrf.mxu0 }
 0xb60   : > { %v1961_v35 = vmul.f32 %v1956_v34, %v5276_v33  ;;  %vm1960_vm1 = vcmp.ge.f32.partialorder %v1956_v34, 0.0 }
 0xb61   : > { %v4444_v36 = vpop.f32.mrf.mxu0 }
 0xb62   : > { %v1962_v37 = vsel %vm1960_vm1, %v1956_v34, %v1961_v35 }
 0xb63   : > { %4446 = vmatpush3.msk.msra.mxu1 %vm581_vm14, %v1962_v37 }
 0xb64   : > { %4448 = vmatmul.mubr.msk.f32.vlgmr.msra.gmra.mxu1 %vm577_vm15, %v1881_v19  ;;  %4455 = vmatprep.subr.mxu1 %v4815_v25 }
 0xb65   : > { %4457 = vmatprep.mubr.msk.f32.mxu1 %vm4816_vm0, %v4815_v25 }
 0xb88   : > { %v2155_v39 = vpop.permute.xlu0 %2154 }
 0xb89   : > { %v2157_v40 = vsel %vm5618_vm13, %v2155_v39, 0.0 }
 0xb8a   : > { %2158 = vadd.xlane.f32.xlu1 %v2157_v40 }
 0xb8c   : > { %v2341_v42 = vpop.permute.xlu1 %2340  ;;  %v2527_v43 = vpop.permute.xlu0 %2526 }
 0xb8d   : > { %v2343_v12 = vsel %vm5618_vm13, %v2341_v42, 0.0  ;;  %v2529_v44 = vsel %vm5618_vm13, %v2527_v43, 0.0 }
 0xb8e   : > { %2344 = vadd.xlane.f32.xlu0 %v2343_v12  ;;  %1966 = vadd.xlane.f32.xlu1 %v1965_v41 }
 0xb92   : > { %2530 = vadd.xlane.f32.xlu0 %v2529_v44 }
 0xbd0   : > { %v2141_v46 = vpop.f32.mrf.mxu0 }
 0xbd1   : > { %vm2145_vm5 = vcmp.ge.f32.partialorder %v2141_v46, 0.0  ;;  %v2146_v47 = vmul.f32 %v2141_v46, %v5276_v33 }
 0xbd2   : > { %v4454_v48 = vpop.f32.mrf.mxu0 }
 0xbd3   : > { %v2147_v49 = vsel %vm2145_vm5, %v2141_v46, %v2146_v47  ;;  %vm1876_vm5 = vcmp.ge.f32.partialorder %v5244_v18, 0.0 }
 0xbd4   : > { %4456 = vmatpush3.msk.msra.mxu1 %vm581_vm14, %v2147_v49  ;;  %v2328_v50 = vpop.f32.mrf.mxu0  ;;  %v1879_v59 = vsel %vm1876_vm5, %v5244_v18, %v1878_v58 }
 0xbd5   : > { %vm2332_vm1 = vcmp.ge.f32.partialorder %v2328_v50, 0.0  ;;  %v2333_v51 = vmul.f32 %v2328_v50, %v5276_v33  ;;  %4458 = vmatmul.mubr.msk.f32.vlgmr.msra.gmra.mxu1 %vm577_vm15, %v2072_v22  ;;  %4465 = vmatprep.subr.mxu1 %v4815_v25  ;;  %v2160_v60 = vsub.f32 %v1879_v59, %v2147_v49  ;;  %v1968_v63 = vsub.f32 %v1879_v59, %v1962_v37 }
 0xbd6   : > { %v4464_v52 = vpop.f32.mrf.mxu0  ;;  %4467 = vmatprep.mubr.msk.f32.mxu1 %vm4816_vm0, %v4815_v25 }
 0xbd7   : > { %v2334_v53 = vsel %vm2332_vm1, %v2328_v50, %v2333_v51 }
 0xbd8   : > { %4466 = vmatpush3.msk.msra.mxu1 %vm581_vm14, %v2334_v53  ;;  %v2514_v54 = vpop.f32.mrf.mxu0  ;;  %v2346_v8 = vsub.f32 %v1879_v59, %v2334_v53 }
 0xbd9   : > { %vm2518_vm13 = vcmp.ge.f32.partialorder %v2514_v54, 0.0  ;;  %v2519_v55 = vmul.f32 %v2514_v54, %v5276_v33  ;;  %4468 = vmatmul.mubr.msk.f32.vlgmr.msra.gmra.mxu1 %vm577_vm15, %v2259_v24  ;;  %4475 = vmatprep.subr.mxu1 %v4815_v25 }
 0xbda   : > { %4477 = vmatprep.mubr.msk.f32.mxu1 %vm4816_vm0, %v4815_v25  ;;  %v4474_v56 = vpop.f32.mrf.mxu0 }
 0xbdb   : > { %v2520_v57 = vsel %vm2518_vm13, %v2514_v54, %v2519_v55 }
 0xbdc   : > { %4476 = vmatpush3.msk.msra.mxu1 %vm581_vm14, %v2520_v57  ;;  %v2532_v23 = vsub.f32 %v1879_v59, %v2520_v57 }
 0xbdd   : > { %4478 = vmatmul.mubr.msk.f32.vlgmr.msra.gmra.mxu1 %vm577_vm15, %v5259_v21 }
 0xc13   : > { %v2159_v61 = vpop.xlane.xlu1 %2158 }
 0xc14   : > { %v2161_v0 = vmul.f32 %v2160_v60, %v2159_v61 }
 0xc17   : > { %v1967_v62 = vpop.xlane.xlu1 %1966  ;;  %v2345_v25 = vpop.xlane.xlu0 %2344 }
 0xc18   : > { %v1969_v7 = vmul.f32 %v1968_v63, %v1967_v62  ;;  %v2347_v19 = vmul.f32 %v2346_v8, %v2345_v25 }
 0xc1b   : > { %v2531_v22 = vpop.xlane.xlu0 %2530 }
 0xc1c   : > { %v2533_v24 = vmul.f32 %v2532_v23, %v2531_v22 }
 0xc24   : > { %v2039_v4 = vpop.f32.mrf.mxu1 }
 0xc25   : > { %v2040_v9 = vadd.f32 %v2039_v4, %v1969_v7 }
 0xc26   : > { %v4449_v11 = vpop.f32.mrf.mxu1 }
 0xc27   : > { %2045 = vperm.xlu0 %4720, %v2040_v9  }
 0xc2b   : > { %4727 = vset.pattern.permute.xlu0 %v4824_v13 }
 0xc95   : > { %v2231_v14 = vpop.f32.mrf.mxu1 }
 0xc96   : > { %v2232_v15 = vadd.f32 %v2231_v14, %v2161_v0 }
 0xc97   : > { %v4459_v16 = vpop.f32.mrf.mxu1 }
 0xc98   : > { %2237 = vperm.xlu1 %4721, %v2232_v15  }
 0xc99   : > { %v2417_v17 = vpop.f32.mrf.mxu1 }
 0xc9a   : > { %v2418_v21 = vadd.f32 %v2417_v17, %v2347_v19 }
 0xc9b   : > { %v4469_v5 = vpop.f32.mrf.mxu1 }
 0xc9c   : > { %4722 = vset.pattern.permute.xlu1 %v4824_v13 }
 0xc9d   : > { %v2603_v18 = vpop.f32.mrf.mxu1  ;;  %2242 = vperm.xlu1 %4722, %v2232_v15  }
 0xc9e   : > { %v2604_v26 = vadd.f32 %v2603_v18, %v2533_v24 }
 0xc9f   : > { %v4479_v20 = vpop.f32.mrf.mxu1 }
 0xca1   : > { %4723 = vset.pattern.permute.xlu1 %v4823_v45 }
 0xca2   : > { %2423 = vperm.xlu1 %4723, %v2418_v21   ;;  %v2046_v49 = vpop.permute.xlu0 %2045 }
 0xca3   : > { %v2052_v52 = vmul.f32 %v2051_v31, %v2046_v49 }
 0xca6   : > { %4724 = vset.pattern.permute.xlu1 %v4824_v13 }
 0xca7   : > { %2428 = vperm.xlu1 %4724, %v2418_v21  }
 0xcab   : > { %4725 = vset.pattern.permute.xlu1 %v4823_v45 }
 0xcac   : > { %2609 = vperm.xlu1 %4725, %v2604_v26  }
 0xcb0   : > { %4726 = vset.pattern.permute.xlu1 %v4824_v13 }
 0xcb1   : > { %2614 = vperm.xlu1 %4726, %v2604_v26  }
 0xcb5   : > { %2054 = vperm.xlu1 %4726, %v2040_v9  }
 0xd13   : > { %v2238_v29 = vpop.permute.xlu1 %2237 }
 0xd14   : > { %v2240_v34 = vmul.f32 %v2238_v29, %v2051_v31 }
 0xd18   : > { %v2243_v32 = vpop.permute.xlu1 %2242 }
 0xd19   : > { %v2245_v35 = vmul.f32 %v2243_v32, %v2060_v30 }
 0xd1b   : > { %v2246_v36 = vadd.f32 %v2245_v35, %v2240_v34 }
 0xd1d   : > { %v2424_v37 = vpop.permute.xlu1 %2423  ;;  %vm2247_vm13 = vcmp.ge.f32.partialorder %v2246_v36, 0.0  ;;  %v2248_v38 = vmul.f32 %v2246_v36, %v5276_v33 }
 0xd1e   : > { %v2426_v41 = vmul.f32 %v2424_v37, %v2051_v31 }
 0xd1f   : > { %v2249_v39 = vsel %vm2247_vm13, %v2246_v36, %v2248_v38 }
 0xd20   : > { %2251 = vrot.lane.b32.xlu1 %v2249_v39, %s4825_s28 }
 0xd22   : > { %v2429_v40 = vpop.permute.xlu1 %2428 }
 0xd23   : > { %v2431_v42 = vmul.f32 %v2429_v40, %v2060_v30 }
 0xd25   : > { %v2432_v43 = vadd.f32 %v2431_v42, %v2426_v41 }
 0xd27   : > { %v2610_v12 = vpop.permute.xlu1 %2609  ;;  %vm2433_vm0 = vcmp.ge.f32.partialorder %v2432_v43, 0.0  ;;  %v2434_v44 = vmul.f32 %v2432_v43, %v5276_v33 }
 0xd28   : > { %v2612_v47 = vmul.f32 %v2610_v12, %v2051_v31 }
 0xd29   : > { %v2435_v45 = vsel %vm2433_vm0, %v2432_v43, %v2434_v44 }
 0xd2a   : > { %2437 = vrot.lane.b32.xlu0 %v2435_v45, %s4826_s29 }
 0xd2c   : > { %v2615_v46 = vpop.permute.xlu1 %2614 }
 0xd2d   : > { %v2617_v48 = vmul.f32 %v2615_v46, %v2060_v30 }
 0xd2f   : > { %v2618_v50 = vadd.f32 %v2617_v48, %v2612_v47 }
 0xd30   : > { %v2055_v51 = vpop.permute.xlu1 %2054 }
 0xd31   : > { %v2061_v53 = vmul.f32 %v2060_v30, %v2055_v51  ;;  %vm2619_vm1 = vcmp.ge.f32.partialorder %v2618_v50, 0.0  ;;  %v2620_v54 = vmul.f32 %v2618_v50, %v5276_v33 }
 0xd33   : > { %v2062_v55 = vadd.f32 %v2061_v53, %v2052_v52  ;;  %v2621_v56 = vsel %vm2619_vm1, %v2618_v50, %v2620_v54 }
 0xd34   : > { %2623 = vrot.lane.b32.xlu1 %v2621_v56, %s4827_s10 }
 0xd35   : > { %vm2063_vm5 = vcmp.ge.f32.partialorder %v2062_v55, 0.0  ;;  %v2064_v57 = vmul.f32 %v2062_v55, %v5276_v33 }
 0xd37   : > { %v2065_v58 = vsel %vm2063_vm5, %v2062_v55, %v2064_v57 }
 0xd38   : > { %2068 = vst.msk [vmem:[%s2066_s30] sm:$0x1f] %vm820_vm4, %v2065_v58 }
 0xd92   : > { %v2252_v59 = vpop.permute.xlu1 %2251 }
 0xd93   : > { %2255 = vst.msk [vmem:[%s2066_s30] sm:$0x1f] %vm1169_vm3, %v2252_v59 }
 0xd9c   : > { %v2438_v60 = vpop.permute.xlu0 %2437 }
 0xd9d   : > { %2441 = vst.msk [vmem:[%s2066_s30] sm:$0x1f] %vm1517_vm11, %v2438_v60 }
 0xda3   :  { %1871 = sbr.rel (!%p1869_p12) target bundleno = 2712 (0xa98), region = 138 }
 0xda6   : > { %v2624_v61 = vpop.permute.xlu1 %2623 }
 0xda7   : > { %2627 = vst.msk [vmem:[%s2066_s30] sm:$0x1f] %vm1865_vm6, %v2624_v61 }
 0xda8 LB: > { %v4828_v0 = vmov 0.0   ;;  %vm4829_vm13 = vmmov 0   ;;  %s5345_s0 = sshll.u32 %s4786_s13, 3  ;;  %s4830_s15 = smov 112   ;;  %v5465_v32 = vstv %s4921_s16  ;;  %s4786_s13 = sphi %s5331_s13, %s2633_s13  }
 0xda9   : > { %4480 = vmatprep.subr.mxu0 %v4828_v0  ;;  %4490 = vmatprep.mubr.msk.f32.mxu0 %vm4829_vm13, %v4828_v0  ;;  %s2635_s14 = scalar_lea.vmem %s5608_s4, %s5345_s0  ;;  %s2716_s19 = scalar_lea.vmem %s5607_s3, %s5345_s0 }
 0xdaa   : > { %4493 = vmatprep.subr.mxu1 %v4828_v0  ;;  %4495 = vmatprep.mubr.msk.f32.mxu1 %vm4829_vm13, %v4828_v0  ;;  %v5366_v27 = vld [vmem:[%s2635_s14] sm:$0xff]  ;;  %s4831_s1 = smov 96   ;;  %s4832_s21 = smov 120  }
 0xdab   : > { %v5389_v28 = vld [vmem:[%s2716_s19] sm:$0xff]  ;;  %s4833_s5 = smov 80   ;;  %s4834_s7 = smov 104  }
 0xdac   : > { %s3580_s20 = sld [smem:[#allocation7]]  ;;  %s3671_s17 = scalar_lea.vmem %s5616_s12, %s5345_s0 }
 0xdad   : > { %s4141_s6 = sld [smem:[#allocation7 + $0x80]]  ;;  %s4835_s18 = smov 16  }
 0xdae   : > { %v5336_v33 = vld [vmem:[#allocation2 + $0x20] sm:$0xff]  ;;  %v5339_v62 = vld [vmem:[#allocation2 + $0x18] sm:$0xff]  ;;  %v5349_v1 = vld [vmem:[#allocation2 + $0x10] sm:$0xff]  ;;  %s4151_s22 = sld [smem:[#allocation7 + $0x180]]  ;;  %s4836_s19 = smov 48  }
 0xdaf   : > { %4481 = vmatpush3.msra.mxu0 %v5336_v33  ;;  %v5355_v6 = vld [vmem:[#allocation2 + $0x8] sm:$0xff]  ;;  %v5363_v10 = vld [vmem:[#allocation2] sm:$0xff]  ;;  %2883 = vrot.lane.b32.xlu0 %v5336_v33, %s4830_s15  ;;  %s4137_s23 = sld [smem:[#allocation7 + $0x1]]  ;;  %s2633_s13 = sadd.s32 1, %s4786_s13  }
 0xdb0   : > { %4482 = vmatprep.subr.mxu0 %v4828_v0  ;;  %2879 = vrot.lane.b32.xlu1 %v5349_v1, %s4830_s15  ;;  %s4142_s24 = sld [smem:[#allocation7 + $0x81]]  ;;  %p2630_p13 = scmp.ge.s32.totalorder %s2633_s13, 5  }
 0xdb1   : > { %4483 = vmatpush3.msra.mxu0 %v5339_v62  ;;  %s4147_s8 = sld [smem:[#allocation7 + $0x101]] }
 0xdb2   : > { %4484 = vmatprep.subr.mxu0 %v4828_v0  ;;  %s4152_s9 = sld [smem:[#allocation7 + $0x181]]  ;;  %v3581_v35 = vstv %s3580_s20 }
 0xdb3   : > { %4485 = vmatpush3.msra.mxu0 %v5349_v1  ;;  %2881 = vrot.lane.b32.xlu0 %v5339_v62, %s4830_s15  ;;  %s4146_s25 = sld [smem:[#allocation7 + $0x100]]  ;;  %v3674_v36 = vstv %s4141_s6 }
 0xdb4   : > { %4486 = vmatprep.subr.mxu0 %v4828_v0  ;;  %2877 = vrot.lane.b32.xlu1 %v5355_v6, %s4830_s15  ;;  %v3908_v39 = vstv %s4151_s22  ;;  %s4143_s26 = sld [smem:[#allocation7 + $0x82]] }
 0xdb5   : > { %4487 = vmatpush3.msra.mxu0 %v5355_v6  ;;  %v3584_v41 = vstv %s4137_s23  ;;  %s4153_s27 = sld [smem:[#allocation7 + $0x182]] }
 0xdb6   : > { %4488 = vmatprep.subr.mxu0 %v4828_v0  ;;  %v3677_v42 = vstv %s4142_s24  ;;  %s4138_s28 = sld [smem:[#allocation7 + $0x2]] }
 0xdb7   : > { %4489 = vmatpush3.msra.mxu0 %v5363_v10  ;;  %2875 = vrot.lane.b32.xlu0 %v5363_v10, %s4830_s15  ;;  %v3794_v12 = vstv %s4147_s8  ;;  %s4148_s29 = sld [smem:[#allocation7 + $0x102]] }
 0xdb8   : > { %4491 = vmatmul.mubr.msk.f32.vlgmr.msra.gmra.mxu0 %vm500_vm12, %v5366_v27  ;;  %4518 = vmatprep.subr.mxu0 %v4828_v0  ;;  %v3911_v44 = vstv %s4152_s9  ;;  %s4144_s10 = sld [smem:[#allocation7 + $0x83]] }
 0xdb9   : > { %4520 = vmatprep.mubr.msk.f32.mxu0 %vm4829_vm13, %v4828_v0  ;;  %3118 = vrot.lane.b32.xlu1 %v5336_v33, %s4831_s1  ;;  %v3791_v45 = vstv %s4146_s25  ;;  %s4154_s30 = sld [smem:[#allocation7 + $0x183]] }
 0xdba   : > { %s4139_s2 = sld [smem:[#allocation7 + $0x3]] }
 0xdbb   : > { %3116 = vrot.lane.b32.xlu0 %v5339_v62, %s4831_s1  ;;  %s4149_s11 = sld [smem:[#allocation7 + $0x103]] }
 0xdbd   : > { %3114 = vrot.lane.b32.xlu1 %v5349_v1, %s4831_s1 }
 0xdbf   : > { %2960 = vrot.lane.b32.xlu0 %v5389_v28, %s4832_s21 }
 0xdc1   : > { %3112 = vrot.lane.b32.xlu1 %v5355_v6, %s4831_s1 }
 0xdc3   : > { %3110 = vrot.lane.b32.xlu0 %v5363_v10, %s4831_s1 }
 0xdc5   : > { %3195 = vrot.lane.b32.xlu1 %v5389_v28, %s4830_s15 }
 0xdc7   : > { %3353 = vrot.lane.b32.xlu0 %v5336_v33, %s4833_s5 }
 0xdc9   : > { %3351 = vrot.lane.b32.xlu1 %v5339_v62, %s4833_s5 }
 0xdcb   : > { %3349 = vrot.lane.b32.xlu0 %v5349_v1, %s4833_s5 }
 0xdcd   : > { %3347 = vrot.lane.b32.xlu1 %v5355_v6, %s4833_s5 }
 0xdcf   : > { %3345 = vrot.lane.b32.xlu0 %v5363_v10, %s4833_s5  ;;  %v5489_v10 = vld [vmem:[#allocation4 + $0x20] sm:$0xff] }
 0xdd1   : > { %3430 = vrot.lane.b32.xlu1 %v5389_v28, %s4834_s7 }
 0xdd3   : > { %3706 = vrot.lane.b32.xlu0 %v5489_v10, %s4830_s15 }
 0xe21   : > { %v2884_v4 = vpop.permute.xlu0 %2883 }
 0xe22   : > { %v2880_v9 = vpop.permute.xlu1 %2879 }
 0xe25   : > { %v2882_v13 = vpop.permute.xlu0 %2881 }
 0xe26   : > { %v2878_v15 = vpop.permute.xlu1 %2877 }
 0xe29   : > { %v2876_v16 = vpop.permute.xlu0 %2875 }
 0xe2b   : > { %v3119_v17 = vpop.permute.xlu1 %3118 }
 0xe2d   : > { %v3117_v25 = vpop.permute.xlu0 %3116 }
 0xe2f   : > { %v3115_v5 = vpop.permute.xlu1 %3114 }
 0xe31   : > { %v2961_v8 = vpop.permute.xlu0 %2960 }
 0xe33   : > { %v3113_v18 = vpop.permute.xlu1 %3112 }
 0xe35   : > { %v3111_v19 = vpop.permute.xlu0 %3110 }
 0xe37   : > { %v3196_v31 = vpop.permute.xlu1 %3195 }
 0xe39   : > { %v3354_v37 = vpop.permute.xlu0 %3353 }
 0xe3b   : > { %v3352_v51 = vpop.permute.xlu1 %3351 }
 0xe3d   : > { %v3350_v58 = vpop.permute.xlu0 %3349 }
 0xe3f   : > { %v3348_v1 = vpop.permute.xlu1 %3347 }
 0xe41   : > { %v3346_v6 = vpop.permute.xlu0 %3345 }
 0xe78   : > { %v2712_v63 = vpop.f32.mrf.mxu0 }
 0xe79   : > { %4494 = vmatpush3.msra.mxu1 %v2712_v63  ;;  %v5495_v63 = vld [vmem:[#allocation4 + $0x10] sm:$0xff] }
 0xe7a   : > { %v4492_v7 = vpop.f32.mrf.mxu0  ;;  %4496 = vmatmul.mubr.msk.f32.vlgmr.msra.gmra.mxu1 %vm94_vm2, %v5389_v28  ;;  %4498 = vmatprep.subr.mxu1 %v4828_v0  ;;  %v5493_v28 = vld [vmem:[#allocation4 + $0x18] sm:$0xff] }
 0xe7b   : > { %4499 = vmatpush3.msra.mxu1 %v4926_v3  ;;  %4502 = vmatprep.mubr.msk.f32.mxu1 %vm4829_vm13, %v4828_v0  ;;  %v5499_v7 = vld [vmem:[#allocation4 + $0x8] sm:$0xff] }
 0xe7c   : > { %4500 = vmatprep.subr.mxu1 %v4828_v0  ;;  %3704 = vrot.lane.b32.xlu1 %v5493_v28, %s4830_s15 }
 0xe7d   : > { %4501 = vmatpush3.msra.mxu1 %v4919_v2  ;;  %3702 = vrot.lane.b32.xlu0 %v5495_v63, %s4830_s15 }
 0xe7e   : > { %4505 = vmatprep.subr.mxu1 %v4828_v0 }
 0xe80   : > { %3700 = vrot.lane.b32.xlu1 %v5499_v7, %s4830_s15 }
 0xe84   : > { %3823 = vrot.lane.b32.xlu1 %v5489_v10, %s4831_s1 }
 0xe88   : > { %3821 = vrot.lane.b32.xlu1 %v5493_v28, %s4831_s1 }
 0xe8c   : > { %3819 = vrot.lane.b32.xlu1 %v5495_v63, %s4831_s1 }
 0xe90   : > { %3817 = vrot.lane.b32.xlu1 %v5499_v7, %s4831_s1 }
 0xf3a   : > { %v2788_v11 = vpop.f32.mrf.mxu1 }
 0xf3b   : > { %4503 = vmatmul.mubr.msk.f32.vlgmr.msra.gmra.mxu1 %vm193_vm7, %v2788_v11  ;;  %v3707_v11 = vpop.permute.xlu0 %3706 }
 0xf3c   : > { %4506 = vmatpush3.msra.mxu1 %v2884_v4  ;;  %v4497_v14 = vpop.f32.mrf.mxu1  ;;  %4515 = vmatprep.mubr.msk.f32.mxu1 %vm4829_vm13, %v4828_v0  ;;  %v5503_v4 = vld [vmem:[#allocation4] sm:$0xff] }
 0xf3d   : > { %4507 = vmatprep.subr.mxu1 %v4828_v0  ;;  %3698 = vrot.lane.b32.xlu0 %v5503_v4, %s4830_s15 }
 0xf3e   : > { %4508 = vmatpush3.msra.mxu1 %v2882_v13  ;;  %3815 = vrot.lane.b32.xlu1 %v5503_v4, %s4831_s1  ;;  %s4837_s1 = smov 32  }
 0xf3f   : > { %4509 = vmatprep.subr.mxu1 %v4828_v0 }
 0xf40   : > { %4510 = vmatpush3.msra.mxu1 %v2880_v9  ;;  %v3431_v9 = vpop.permute.xlu1 %3430 }
 0xf41   : > { %4511 = vmatprep.subr.mxu1 %v4828_v0  ;;  %3940 = vrot.lane.b32.xlu0 %v5489_v10, %s4833_s5 }
 0xf42   : > { %4512 = vmatpush3.msra.mxu1 %v2878_v15  ;;  %v3681_v15 = vstv %s4143_s26 }
 0xf43   : > { %4513 = vmatprep.subr.mxu1 %v4828_v0 }
 0xf44   : > { %4514 = vmatpush3.msra.mxu1 %v2876_v16  ;;  %v3705_v14 = vpop.permute.xlu1 %3704  ;;  %v3915_v16 = vstv %s4153_s27 }
 0xf45   : > { %4516 = vmatmul.mubr.msk.f32.vlgmr.msra.gmra.mxu1 %vm500_vm12, %v5366_v27  ;;  %4530 = vmatprep.subr.mxu1 %v4828_v0 }
 0xf46   : > { %4531 = vmatpush3.msra.mxu1 %v3119_v17  ;;  %4540 = vmatprep.mubr.msk.f32.mxu1 %vm4829_vm13, %v4828_v0 }
 0xf47   : > { %4532 = vmatprep.subr.mxu1 %v4828_v0  ;;  %3938 = vrot.lane.b32.xlu0 %v5493_v28, %s4833_s5 }
 0xf48   : > { %4533 = vmatpush3.msra.mxu1 %v3117_v25  ;;  %v3588_v25 = vstv %s4138_s28 }
 0xf49   : > { %4534 = vmatprep.subr.mxu1 %v4828_v0 }
 0xf4a   : > { %4535 = vmatpush3.msra.mxu1 %v3115_v5  ;;  %v3798_v5 = vstv %s4148_s29 }
 0xf4b   : > { %4536 = vmatprep.subr.mxu1 %v4828_v0  ;;  %3936 = vrot.lane.b32.xlu0 %v5495_v63, %s4833_s5 }
 0xf4c   : > { %4537 = vmatpush3.msra.mxu1 %v3113_v18 }
 0xf4d   : > { %4538 = vmatprep.subr.mxu1 %v4828_v0 }
 0xf4e   : > { %4539 = vmatpush3.msra.mxu1 %v3111_v19  ;;  %v3703_v19 = vpop.permute.xlu0 %3702 }
 0xf4f   : > { %4541 = vmatmul.mubr.msk.f32.vlgmr.msra.gmra.mxu1 %vm500_vm12, %v5366_v27  ;;  %4568 = vmatprep.subr.mxu1 %v4828_v0 }
 0xf50   : > { %4570 = vmatprep.mubr.msk.f32.mxu1 %vm4829_vm13, %v4828_v0  ;;  %3934 = vrot.lane.b32.xlu0 %v5499_v7, %s4833_s5 }
 0xf54   : > { %3932 = vrot.lane.b32.xlu0 %v5503_v4, %s4833_s5 }
 0xffb   : > { %v2862_v20 = vpop.f32.mrf.mxu1 }
 0xffc   : > { %v2868_v34 = vmul.f32 %v5465_v32, %v2862_v20  ;;  %vm2866_vm14 = vcmp.ge.f32.partialorder %v2862_v20, 0.0 }
 0xffd   : > { %v4504_v21 = vpop.f32.mrf.mxu1 }
 0xffe   : > { %v2869_v38 = vsel %vm2866_vm14, %v2862_v20, %v2868_v34  ;;  %v3701_v20 = vpop.permute.xlu1 %3700  ;;  %v3699_v34 = vpop.permute.xlu0 %3698 }
 0xfff   : > { %v3582_v47 = vmul.f32 %v3581_v35, %v2869_v38  ;;  %v3675_v48 = vmul.f32 %v3674_v36, %v2869_v38  ;;  %v3909_v49 = vmul.f32 %v3908_v39, %v2869_v38  ;;  %v3792_v57 = vmul.f32 %v3791_v45, %v2869_v38 }
0x1002   : > { %v3941_v36 = vpop.permute.xlu0 %3940 }
0x1005   : > { %v2956_v22 = vpop.f32.mrf.mxu1 }
0x1006   : > { %4519 = vmatpush3.msra.mxu0 %v2956_v22  ;;  %v3939_v38 = vpop.permute.xlu0 %3938 }
0x1007   : > { %v4517_v23 = vpop.f32.mrf.mxu1  ;;  %4521 = vmatmul.mubr.msk.f32.vlgmr.msra.gmra.mxu0 %vm94_vm2, %v2961_v8  ;;  %4523 = vmatprep.subr.mxu0 %v4828_v0 }
0x1008   : > { %4524 = vmatpush3.msra.mxu0 %v4926_v3  ;;  %4527 = vmatprep.mubr.msk.f32.mxu0 %vm4829_vm13, %v4828_v0 }
0x1009   : > { %4525 = vmatprep.subr.mxu0 %v4828_v0 }
0x100a   : > { %4526 = vmatpush3.msra.mxu0 %v4919_v2  ;;  %v3937_v39 = vpop.permute.xlu0 %3936 }
0x100b   : > { %4543 = vmatprep.subr.mxu0 %v4828_v0 }
0x100f   : > { %v3191_v24 = vpop.f32.mrf.mxu1 }
0x1011   : > { %v4542_v26 = vpop.f32.mrf.mxu1 }
0x10c7   : > { %v3030_v29 = vpop.f32.mrf.mxu0 }
0x10c8   : > { %4528 = vmatmul.mubr.msk.f32.vlgmr.msra.gmra.mxu0 %vm193_vm7, %v3030_v29 }
0x10c9   : > { %v4522_v30 = vpop.f32.mrf.mxu0  ;;  %4544 = vmatpush3.msra.mxu0 %v3191_v24  ;;  %4545 = vmatprep.mubr.msk.f32.mxu0 %vm4829_vm13, %v4828_v0 }
0x10ca   : > { %4548 = vmatprep.subr.mxu0 %v4828_v0 }
0x10cc   : > { %4546 = vmatmul.mubr.msk.f32.vlgmr.msra.gmra.mxu0 %vm94_vm2, %v3196_v31 }
0x10cd   : > { %4549 = vmatpush3.msra.mxu0 %v4926_v3  ;;  %4552 = vmatprep.mubr.msk.f32.mxu0 %vm4829_vm13, %v4828_v0 }
0x10ce   : > { %4550 = vmatprep.subr.mxu0 %v4828_v0 }
0x10cf   : > { %4551 = vmatpush3.msra.mxu0 %v4919_v2 }
0x10d0   : > { %4555 = vmatprep.subr.mxu0 %v4828_v0 }
0x1188   : > { %v3103_v40 = vpop.f32.mrf.mxu0 }
0x1189   : > { %vm3107_vm15 = vcmp.ge.f32.partialorder %v3103_v40, 0.0  ;;  %v3108_v43 = vmul.f32 %v3103_v40, %v5465_v32 }
0x118a   : > { %v4529_v46 = vpop.f32.mrf.mxu0 }
0x118b   : > { %v3109_v50 = vsel %vm3107_vm15, %v3103_v40, %v3108_v43  ;;  %v3935_v40 = vpop.permute.xlu0 %3934 }
0x118c   : > { %v3585_v52 = vmul.f32 %v3584_v41, %v3109_v50  ;;  %v3678_v53 = vmul.f32 %v3677_v42, %v3109_v50  ;;  %v3795_v54 = vmul.f32 %v3794_v12, %v3109_v50  ;;  %v3912_v55 = vmul.f32 %v3911_v44, %v3109_v50  ;;  %v3265_v56 = vpop.f32.mrf.mxu0  ;;  %v3824_v42 = vpop.permute.xlu1 %3823 }
0x118d   : > { %4553 = vmatmul.mubr.msk.f32.vlgmr.msra.gmra.mxu0 %vm193_vm7, %v3265_v56 }
0x118e   : > { %4556 = vmatpush3.msra.mxu0 %v3354_v37  ;;  %v4547_v59 = vpop.f32.mrf.mxu0  ;;  %4565 = vmatprep.mubr.msk.f32.mxu0 %vm4829_vm13, %v4828_v0  ;;  %v5472_v60 = vadd.f32 %v3678_v53, %v3675_v48  ;;  %v5474_v61 = vadd.f32 %v3912_v55, %v3909_v49  ;;  %v5476_v33 = vadd.f32 %v3585_v52, %v3582_v47  ;;  %v3919_v55 = vstv %s4154_s30 }
0x118f   : > { %4557 = vmatprep.subr.mxu0 %v4828_v0  ;;  %v5479_v62 = vadd.f32 %v3795_v54, %v3792_v57  ;;  %v3933_v41 = vpop.permute.xlu0 %3932  ;;  %v3685_v54 = vstv %s4144_s10 }
0x1190   : > { %4558 = vmatpush3.msra.mxu0 %v3352_v51  ;;  %v3822_v43 = vpop.permute.xlu1 %3821 }
0x1191   : > { %4559 = vmatprep.subr.mxu0 %v4828_v0 }
0x1192   : > { %4560 = vmatpush3.msra.mxu0 %v3350_v58 }
0x1193   : > { %4561 = vmatprep.subr.mxu0 %v4828_v0 }
0x1194   : > { %4562 = vmatpush3.msra.mxu0 %v3348_v1  ;;  %v3820_v45 = vpop.permute.xlu1 %3819 }
0x1195   : > { %4563 = vmatprep.subr.mxu0 %v4828_v0 }
0x1196   : > { %4564 = vmatpush3.msra.mxu0 %v3346_v6 }
0x1197   : > { %4566 = vmatmul.mubr.msk.f32.vlgmr.msra.gmra.mxu0 %vm500_vm12, %v5366_v27  ;;  %4593 = vmatprep.subr.mxu0 %v4828_v0 }
0x1198   : > { %4603 = vmatprep.mubr.msk.f32.mxu0 %vm4829_vm13, %v4828_v0  ;;  %4594 = vmatpush3.msra.mxu0 %v3707_v11  ;;  %v3818_v46 = vpop.permute.xlu1 %3817 }
0x1199   : > { %4595 = vmatprep.subr.mxu0 %v4828_v0 }
0x119a   : > { %4596 = vmatpush3.msra.mxu0 %v3705_v14 }
0x119b   : > { %4597 = vmatprep.subr.mxu0 %v4828_v0 }
0x119c   : > { %4598 = vmatpush3.msra.mxu0 %v3703_v19  ;;  %v3816_v47 = vpop.permute.xlu1 %3815 }
0x119d   : > { %4599 = vmatprep.subr.mxu0 %v4828_v0 }
0x119e   : > { %4600 = vmatpush3.msra.mxu0 %v3701_v20 }
0x119f   : > { %4601 = vmatprep.subr.mxu0 %v4828_v0 }
0x11a0   : > { %4602 = vmatpush3.msra.mxu0 %v3699_v34 }
0x11a1   : > { %4619 = vmatprep.subr.mxu0 %v4828_v0  ;;  %4604 = vmatmul.mubr.msk.f32.vlgmr.msra.gmra.mxu0 %vm500_vm12, %v5366_v27 }
0x11a2   : > { %4629 = vmatprep.mubr.msk.f32.mxu0 %vm4829_vm13, %v4828_v0  ;;  %4620 = vmatpush3.msra.mxu0 %v3941_v36 }
0x11a3   : > { %4621 = vmatprep.subr.mxu0 %v4828_v0 }
0x11a4   : > { %4622 = vmatpush3.msra.mxu0 %v3939_v38 }
0x11a5   : > { %4623 = vmatprep.subr.mxu0 %v4828_v0 }
0x11a6   : > { %4624 = vmatpush3.msra.mxu0 %v3937_v39 }
0x11a7   : > { %4625 = vmatprep.subr.mxu0 %v4828_v0 }
0x11a8   : > { %4626 = vmatpush3.msra.mxu0 %v3935_v40 }
0x11a9   : > { %4627 = vmatprep.subr.mxu0 %v4828_v0 }
0x11aa   : > { %4628 = vmatpush3.msra.mxu0 %v3933_v41 }
0x11ab   : > { %4630 = vmatmul.mubr.msk.f32.vlgmr.msra.gmra.mxu0 %vm500_vm12, %v5366_v27 }
0x124d   : > { %v3338_v13 = vpop.f32.mrf.mxu0 }
0x124e   : > { %vm3342_vm4 = vcmp.ge.f32.partialorder %v3338_v13, 0.0  ;;  %v3343_v17 = vmul.f32 %v3338_v13, %v5465_v32 }
0x124f   : > { %v4554_v8 = vpop.f32.mrf.mxu0 }
0x1250   : > { %v3344_v18 = vsel %vm3342_vm4, %v3338_v13, %v3343_v17 }
0x1251   : > { %v3682_v21 = vmul.f32 %v3681_v15, %v3344_v18  ;;  %v3916_v22 = vmul.f32 %v3915_v16, %v3344_v18  ;;  %v3589_v23 = vmul.f32 %v3588_v25, %v3344_v18  ;;  %v3799_v24 = vmul.f32 %v3798_v5, %v3344_v18 }
0x1253   : > { %v5534_v26 = vadd.f32 %v3682_v21, %v5472_v60  ;;  %v5537_v29 = vadd.f32 %v3916_v22, %v5474_v61  ;;  %v5540_v30 = vadd.f32 %v3589_v23, %v5476_v33  ;;  %v5543_v31 = vadd.f32 %v3799_v24, %v5479_v62 }
0x1257   : > { %v3426_v35 = vpop.f32.mrf.mxu0 }
0x1258   : > { %4569 = vmatpush3.msra.mxu1 %v3426_v35 }
0x1259   : > { %v4567_v37 = vpop.f32.mrf.mxu0  ;;  %4571 = vmatmul.mubr.msk.f32.vlgmr.msra.gmra.mxu1 %vm94_vm2, %v3431_v9  ;;  %4573 = vmatprep.subr.mxu1 %v4828_v0 }
0x125a   : > { %4574 = vmatpush3.msra.mxu1 %v4926_v3  ;;  %4577 = vmatprep.mubr.msk.f32.mxu1 %vm4829_vm13, %v4828_v0 }
0x125b   : > { %4575 = vmatprep.subr.mxu1 %v4828_v0 }
0x125c   : > { %4576 = vmatpush3.msra.mxu1 %v4919_v2 }
0x125d   : > { %4580 = vmatprep.subr.mxu1 %v4828_v0 }
0x1261   : > { %v3779_v48 = vpop.f32.mrf.mxu0 }
0x1263   : > { %v4605_v49 = vpop.f32.mrf.mxu0 }
0x126b   : > { %v4013_v50 = vpop.f32.mrf.mxu0 }
0x126d   : > { %v4631_v51 = vpop.f32.mrf.mxu0 }
0x1319   : > { %v3500_v12 = vpop.f32.mrf.mxu1 }
0x131a   : > { %4578 = vmatmul.mubr.msk.f32.vlgmr.msra.gmra.mxu1 %vm193_vm7, %v3500_v12 }
0x131b   : > { %4581 = vmatpush3.msra.mxu1 %v5489_v10  ;;  %v4572_v44 = vpop.f32.mrf.mxu1  ;;  %4590 = vmatprep.mubr.msk.f32.mxu1 %vm4829_vm13, %v4828_v0 }
0x131c   : > { %4582 = vmatprep.subr.mxu1 %v4828_v0 }
0x131d   : > { %4583 = vmatpush3.msra.mxu1 %v5493_v28  ;;  %v3802_v28 = vstv %s4149_s11 }
0x131e   : > { %4584 = vmatprep.subr.mxu1 %v4828_v0 }
0x131f   : > { %4585 = vmatpush3.msra.mxu1 %v5495_v63 }
0x1320   : > { %4586 = vmatprep.subr.mxu1 %v4828_v0 }
0x1321   : > { %4587 = vmatpush3.msra.mxu1 %v5499_v7 }
0x1322   : > { %4588 = vmatprep.subr.mxu1 %v4828_v0 }
0x1323   : > { %4589 = vmatpush3.msra.mxu1 %v5503_v4 }
0x1324   : > { %4591 = vmatmul.mubr.msk.f32.vlgmr.msra.gmra.mxu1 %vm500_vm12, %v5366_v27  ;;  %4606 = vmatprep.subr.mxu1 %v4828_v0 }
0x1325   : > { %4607 = vmatpush3.msra.mxu1 %v3824_v42  ;;  %4616 = vmatprep.mubr.msk.f32.mxu1 %vm4829_vm13, %v4828_v0 }
0x1326   : > { %4608 = vmatprep.subr.mxu1 %v4828_v0 }
0x1327   : > { %4609 = vmatpush3.msra.mxu1 %v3822_v43 }
0x1328   : > { %4610 = vmatprep.subr.mxu1 %v4828_v0 }
0x1329   : > { %4611 = vmatpush3.msra.mxu1 %v3820_v45 }
0x132a   : > { %4612 = vmatprep.subr.mxu1 %v4828_v0 }
0x132b   : > { %4613 = vmatpush3.msra.mxu1 %v3818_v46 }
0x132c   : > { %4614 = vmatprep.subr.mxu1 %v4828_v0  ;;  %v3592_v0 = vstv %s4139_s2 }
0x132d   : > { %4615 = vmatpush3.msra.mxu1 %v3816_v47 }
0x132e   : > { %4617 = vmatmul.mubr.msk.f32.vlgmr.msra.gmra.mxu1 %vm500_vm12, %v5366_v27 }
0x13da   : > { %v3573_v52 = vpop.f32.mrf.mxu1 }
0x13db   : > { %vm3577_vm3 = vcmp.ge.f32.partialorder %v3573_v52, 0.0  ;;  %v3578_v53 = vmul.f32 %v3573_v52, %v5465_v32 }
0x13dc   : > { %v4579_v56 = vpop.f32.mrf.mxu1 }
0x13dd   : > { %v3579_v57 = vsel %vm3577_vm3, %v3573_v52, %v3578_v53 }
0x13de   : > { %v3686_v58 = vmul.f32 %v3685_v54, %v3579_v57  ;;  %v3920_v59 = vmul.f32 %v3919_v55, %v3579_v57  ;;  %v3593_v27 = vmul.f32 %v3592_v0, %v3579_v57  ;;  %v3803_v63 = vmul.f32 %v3802_v28, %v3579_v57 }
0x13e0   : > { %v3687_v60 = vadd.f32 %v3686_v58, %v5534_v26  ;;  %v3921_v33 = vadd.f32 %v3920_v59, %v5537_v29  ;;  %v3594_v62 = vadd.f32 %v3593_v27, %v5540_v30  ;;  %v3804_v7 = vadd.f32 %v3803_v63, %v5543_v31 }
0x13e2   : > { %v3783_v61 = vadd.f32 %v3779_v48, %v3687_v60  ;;  %v4017_v6 = vadd.f32 %v4013_v50, %v3921_v33 }
0x13e4   : > { %v3666_v1 = vpop.f32.mrf.mxu1  ;;  %3785 = vrot.lane.b32.xlu1 %v3783_v61, %s4835_s18 }
0x13e5   : > { %v3670_v32 = vadd.f32 %v3666_v1, %v3594_v62 }
0x13e6   : > { %v4592_v10 = vpop.f32.mrf.mxu1 }
0x13e7   : > { %3672 = vst.msk [vmem:[%s3671_s17] sm:$0xff] %vm193_vm7, %v3670_v32 }
0x13e8   : > { %4019 = vrot.lane.b32.xlu1 %v4017_v6, %s4836_s19 }
0x13ee   : > { %v3896_v4 = vpop.f32.mrf.mxu1 }
0x13ef   : > { %v3900_v9 = vadd.f32 %v3896_v4, %v3804_v7 }
0x13f0   : > { %v4618_v11 = vpop.f32.mrf.mxu1 }
0x13f1   : > { %3902 = vrot.lane.b32.xlu0 %v3900_v9, %s4837_s1 }
0x1456   : > { %v3786_v13 = vpop.permute.xlu1 %3785 }
0x1457   : > { %3789 = vst.msk [vmem:[%s3671_s17] sm:$0xff] %vm290_vm8, %v3786_v13 }
0x145a   : > { %v4020_v15 = vpop.permute.xlu1 %4019 }
0x1461   :  { %2632 = sbr.rel (!%p2630_p13) target bundleno = 3496 (0xda8), region = 149 }
0x1463   : > { %v3903_v14 = vpop.permute.xlu0 %3902 }
0x1464   : > { %3906 = vst.msk [vmem:[%s3671_s17] sm:$0xff] %vm387_vm9, %v3903_v14 }
0x1465   : > { %4023 = vst.msk [vmem:[%s3671_s17] sm:$0xff] %vm484_vm10, %v4020_v15 }
0x1466   :  { %4028 = vsyncpa [#allocation6], 1 }
0x1467   :  { %4029 = vsyncpa [#allocation8], 1 }

</bundles_post_ra>
